<compile_context>
chip_gen: v7x
topology: tpu7x:2x2x1
jax: 0.10.0
libtpu: 0.0.40
codegen_flags: <defaults>
</compile_context>

<pallas_src>
import functools

import numpy as np
import jax
import jax.numpy as jnp
from jax.experimental import pallas as pl
from jax.experimental.pallas import tpu as pltpu


# --------------------------------------------------------------------------
# Fused SQVAE forward kernel (one image per grid step)
# --------------------------------------------------------------------------
def _sqvae_fused_kernel(
    wq_ref,                       # SMEM (1,) f32 : 0.5 * precision_q
    x_ref,                        # (1, H, W*C) f32  one image, channels fastest
    bw1_ref, b1_ref,              # (3, W*C,   W*HID) bf16, (1, W*HID) f32
    bw2_ref, b2_ref,              # (3, W*HID, W*D  ) bf16, (1, W*D  ) f32
    cbT_ref, cb_ref, c2_ref,      # (D, K) f32, (K, D) f32, (1, K) f32
    bw3_ref, b3_ref,              # (3, W*D,   W*HID) bf16, (1, W*HID) f32
    bw4_ref, b4_ref,              # (3, W*HID, W*C  ) bf16, (1, W*C  ) f32
    z_ref, zq_ref, xr_ref,        # (1, H, W*D), (1, H, W*D), (1, H, W*C) f32
    part_ref,                     # (1, 1, PART) f32 : [counts(K), sse, kldd, kldc, 0..]
    pad_ref,                      # VMEM (H+2, W*CMAX) bf16 : shared vertical-halo scratch
    *, H, W, C, HID, D, K, CMAX, PART,
):
    HW = H * W

    # Zero only the two halo border rows; interiors are always overwritten below.
    zrow = jnp.zeros((1, W * CMAX), jnp.bfloat16)
    pad_ref[0:1, :] = zrow
    pad_ref[H + 1:H + 2, :] = zrow

    def conv3x3(act, bw_ref, brow_ref, cin, relu):
        # act: (H, W*cin) f32, channels fastest per pixel.  One lane-dense bf16 store
        # into the vertical-halo scratch (the horizontal taps + horizontal padding are
        # folded into the banded weights), then 3 row-shifted MXU matmuls in f32.
        wcin = W * cin
        a1 = act.astype(jnp.bfloat16)               # interior rows, kept in registers
        pad_ref[1:H + 1, 0:wcin] = a1
        a0 = pad_ref[0:H, 0:wcin]                   # rows shifted up   (top zero row)
        a2 = pad_ref[2:H + 2, 0:wcin]               # rows shifted down (bottom zero row)
        out = jnp.dot(a0, bw_ref[0], preferred_element_type=jnp.float32)
        out = out + jnp.dot(a1, bw_ref[1], preferred_element_type=jnp.float32)
        out = out + jnp.dot(a2, bw_ref[2], preferred_element_type=jnp.float32)
        out = out + brow_ref[...]
        if relu:
            out = jnp.maximum(out, 0.0)
        return out                                   # (H, W*cout) f32

    def img_to_pix(a, cdim):
        # (H, W*cdim) -> (H*W, cdim) with pixel order p = w*H + h.  Order-independent
        # for the per-pixel quantizer math; undone by pix_to_img.  (Static slices +
        # concatenate: avoids relying on general minor-dim reshape support.)
        return jnp.concatenate(
            [a[:, w * cdim:(w + 1) * cdim] for w in range(W)], axis=0)

    def pix_to_img(a, cdim):
        # (H*W, cdim) in p = w*H + h order -> (H, W*cdim)
        return jnp.concatenate(
            [a[w * H:(w + 1) * H, :] for w in range(W)], axis=1)

    # ------------------------------ encoder ------------------------------
    x = x_ref[0]                                                  # (H, W*C) f32
    h1 = conv3x3(x, bw1_ref, b1_ref, C, relu=True)                # (H, W*HID)
    z = conv3x3(h1, bw2_ref, b2_ref, HID, relu=False)             # (H, W*D)

    # -------- Gaussian vector quantizer (deterministic path, f32) --------
    wq = wq_ref[0]                                                # 0.5 * precision_q
    zp = img_to_pix(z, D)                                         # (HW, D)

    z2 = jnp.sum(zp * zp, axis=1, keepdims=True)                  # (HW, 1)
    cross = jnp.dot(zp, cbT_ref[...], preferred_element_type=jnp.float32)   # (HW, K)
    logits = -(wq * (z2 + c2_ref[...] - 2.0 * cross))

    m = jnp.max(logits, axis=1, keepdims=True)
    e = jnp.exp(logits - m)
    s = jnp.sum(e, axis=1, keepdims=True)
    probs = e * pl.reciprocal(s, approx=True)                     # EUP reciprocal
    logprobs = (logits - m) - jnp.log(s)

    # argmax -> one-hot (first-occurrence tie break, matches torch.argmax)
    col = jax.lax.broadcasted_iota(jnp.int32, (HW, K), 1)
    idx = jnp.min(jnp.where(logits == m, col, K), axis=1, keepdims=True)
    onehot = (col == idx).astype(jnp.float32)

    zq = jnp.dot(onehot, cb_ref[...], preferred_element_type=jnp.float32)   # (HW, D)
    counts = jnp.sum(onehot, axis=0, keepdims=True)               # (1, K)
    kldd = jnp.sum(probs * logprobs)                              # per-image partials
    kldc = wq * jnp.sum((zp - zq) ** 2)

    zq_img = pix_to_img(zq, D)                                    # (H, W*D)

    # ------------------------------ decoder ------------------------------
    h2 = conv3x3(zq_img, bw3_ref, b3_ref, D, relu=True)           # (H, W*HID)
    xr = conv3x3(h2, bw4_ref, b4_ref, HID, relu=False)            # (H, W*C)

    # per-image reconstruction SSE (fused epilogue)
    diff = xr - x
    sse = jnp.sum(diff * diff)

    # --------------------------- lane-dense outputs ---------------------------
    z_ref[0] = z
    zq_ref[0] = zq_img
    xr_ref[0] = xr

    extras = jnp.concatenate(
        [jnp.reshape(sse, (1, 1)), jnp.reshape(kldd, (1, 1)),
         jnp.reshape(kldc, (1, 1))], axis=1)                      # (1, 3)
    pieces = [counts, extras]
    if PART - K - 3 > 0:
        pieces.append(jnp.zeros((1, PART - K - 3), jnp.float32))
    part_ref[0] = jnp.concatenate(pieces, axis=1)                 # (1, PART)


def _sqvae_pallas(wq, x_rows, bw1, b1r, bw2, b2r, cbT, cb, c2, bw3, b3r, bw4, b4r,
                  *, B, H, W, C, HID, D, K):
    CMAX = max(C, HID, D)
    PART = ((K + 3 + 127) // 128) * 128

    def const_spec(shape):
        zeros = (0,) * len(shape)
        return pl.BlockSpec(shape, lambda b, zeros=zeros: zeros)

    def batch_spec(shape):
        n = len(shape) - 1
        return pl.BlockSpec(shape, lambda b, n=n: (b,) + (0,) * n)

    kern = functools.partial(
        _sqvae_fused_kernel,
        H=H, W=W, C=C, HID=HID, D=D, K=K, CMAX=CMAX, PART=PART)

    return pl.pallas_call(
        kern,
        out_shape=(
            jax.ShapeDtypeStruct((B, H, W * D), jnp.float32),   # z_from_encoder
            jax.ShapeDtypeStruct((B, H, W * D), jnp.float32),   # z_quantized
            jax.ShapeDtypeStruct((B, H, W * C), jnp.float32),   # x_reconst
            jax.ShapeDtypeStruct((B, 1, PART), jnp.float32),    # per-image partial sums
        ),
        grid=(B,),
        in_specs=[
            pl.BlockSpec(memory_space=pltpu.SMEM),              # 0.5 * precision_q
            batch_spec((1, H, W * C)),                          # x (one image per step)
            const_spec((3, W * C, W * HID)), const_spec((1, W * HID)),   # enc conv1
            const_spec((3, W * HID, W * D)), const_spec((1, W * D)),     # enc conv2
            const_spec((D, K)), const_spec((K, D)), const_spec((1, K)),  # codebook
            const_spec((3, W * D, W * HID)), const_spec((1, W * HID)),   # dec conv1
            const_spec((3, W * HID, W * C)), const_spec((1, W * C)),     # dec conv2
        ],
        out_specs=(
            batch_spec((1, H, W * D)),
            batch_spec((1, H, W * D)),
            batch_spec((1, H, W * C)),
            batch_spec((1, 1, PART)),
        ),
        scratch_shapes=[
            pltpu.VMEM((H + 2, W * CMAX), jnp.bfloat16),        # shared vertical halo
        ],
        compiler_params=pltpu.CompilerParams(
            dimension_semantics=("parallel",)),                 # 2-way split on v7x
    )(wq, x_rows, bw1, b1r, bw2, b2r, cbT, cb, c2, bw3, b3r, bw4, b4r)


# --------------------------------------------------------------------------
# Wrapper-side weight preparation (banded conv weights, bias rows)
# --------------------------------------------------------------------------
def _band_select(W_):
    # S[w_in, w_out, dx] = 1 iff w_in == w_out + dx - 1 (implicit zero padding at edges)
    S = np.zeros((W_, W_, 3), np.float32)
    for o in range(W_):
        for dx in range(3):
            i = o + dx - 1
            if 0 <= i < W_:
                S[i, o, dx] = 1.0
    return S


def _banded_conv_weight(k_hwio, W_):
    # k_hwio: (3, 3, Cin, Cout) -> (3, W*Cin, W*Cout) bf16, one block-banded matrix per
    # vertical tap dy, horizontal taps (and left/right zero padding) folded in.
    S = _band_select(W_)
    _, _, cin, cout = k_hwio.shape
    bw = jnp.einsum("iox,dxab->diaob", S, k_hwio.astype(jnp.float32))
    return bw.reshape(3, W_ * cin, W_ * cout).astype(jnp.bfloat16)


def _bias_row(b, W_):
    # (Cout,) -> (1, W*Cout) per-pixel bias row (channels fastest)
    return jnp.tile(b.astype(jnp.float32), (W_,)).reshape(1, -1)


# --------------------------------------------------------------------------
# Parameters (deterministic, mirrors weights_init: conv ~ N(0, 0.02), codebook ~ N(0,1))
# --------------------------------------------------------------------------
def init_params(key, C, hidden, dim_dict, size_dict, log_param_q_init=0.0):
    ks = jax.random.split(key, 5)
    return {
        "enc_w1": 0.02 * jax.random.normal(ks[0], (3, 3, C, hidden), jnp.float32),
        "enc_b1": jnp.zeros((hidden,), jnp.float32),
        "enc_w2": 0.02 * jax.random.normal(ks[1], (3, 3, hidden, dim_dict), jnp.float32),
        "enc_b2": jnp.zeros((dim_dict,), jnp.float32),
        "dec_w1": 0.02 * jax.random.normal(ks[2], (3, 3, dim_dict, hidden), jnp.float32),
        "dec_b1": jnp.zeros((hidden,), jnp.float32),
        "dec_w2": 0.02 * jax.random.normal(ks[3], (3, 3, hidden, C), jnp.float32),
        "dec_b2": jnp.zeros((C,), jnp.float32),
        "codebook": jax.random.normal(ks[4], (size_dict, dim_dict), jnp.float32),
        "log_param_q_scalar": jnp.float32(log_param_q_init),
    }


# --------------------------------------------------------------------------
# SQVAE.forward (flg_train=False, flg_quant_det=True, param_var_q='gaussian_1')
# --------------------------------------------------------------------------
def sqvae_forward(x_nchw, params):
    x = jnp.transpose(x_nchw, (0, 2, 3, 1)).astype(jnp.float32)   # NCHW -> NHWC
    B, H, W, C = x.shape
    HID = params["enc_w1"].shape[-1]
    D = params["enc_w2"].shape[-1]
    K = params["codebook"].shape[0]

    # gaussian_1: log_var_q = 0 ;  param_q = exp(0) + exp(log_param_q_scalar)
    param_q = jnp.exp(jnp.float32(0.0)) + jnp.exp(params["log_param_q_scalar"])
    precision_q = 1.0 / jnp.maximum(param_q, 1e-10)
    wq = (0.5 * precision_q).reshape(1).astype(jnp.float32)

    x_rows = x.reshape(B, H, W * C)                               # lane-dense image rows

    bw1 = _banded_conv_weight(params["enc_w1"], W)
    bw2 = _banded_conv_weight(params["enc_w2"], W)
    bw3 = _banded_conv_weight(params["dec_w1"], W)
    bw4 = _banded_conv_weight(params["dec_w2"], W)
    b1r = _bias_row(params["enc_b1"], W)
    b2r = _bias_row(params["enc_b2"], W)
    b3r = _bias_row(params["dec_b1"], W)
    b4r = _bias_row(params["dec_b2"], W)

    cb = params["codebook"].astype(jnp.float32)
    cbT = cb.T                                                    # (D, K) pre-transposed
    c2 = jnp.sum(cb * cb, axis=1).reshape(1, K)                   # ||c||^2 precomputed

    z_rows, zq_rows, xr_rows, parts = _sqvae_pallas(
        wq, x_rows, bw1, b1r, bw2, b2r, cbT, cb, c2, bw3, b3r, bw4, b4r,
        B=B, H=H, W=W, C=C, HID=HID, D=D, K=K)

    # ------- finalize the tiny global reductions (per-image partials) -------
    counts = parts[:, 0, :K]                                      # (B, K)
    sse_b = parts[:, 0, K]
    kldd_b = parts[:, 0, K + 1]
    kldc_b = parts[:, 0, K + 2]

    n_pix = B * H * W
    avg_probs = jnp.sum(counts, axis=0) / n_pix
    perplexity = jnp.exp(-jnp.sum(avg_probs * jnp.log(avg_probs + 1e-7)))
    mse = jnp.sum(sse_b) / B                                      # F.mse_loss(sum) / bs
    loss_latent = (jnp.sum(kldd_b) + jnp.sum(kldc_b)) / B
    loss_reconst = (C * H * W) * jnp.log(mse) / 2.0
    loss_all = loss_reconst + loss_latent

    x_reconst = jnp.transpose(xr_rows.reshape(B, H, W, C), (0, 3, 1, 2))   # -> NCHW
    latents = dict(
        z_from_encoder=jnp.transpose(z_rows.reshape(B, H, W, D), (0, 3, 1, 2)),
        z_to_decoder=jnp.transpose(zq_rows.reshape(B, H, W, D), (0, 3, 1, 2)),
    )
    loss = dict(all=loss_all, mse=mse, perplexity=perplexity)
    return x_reconst, latents, loss


if __name__ == "__main__":
    B, C, H, W = 2, 4, 16, 16
    hidden, dim_dict, size_dict = 32, 16, 32

    key = jax.random.PRNGKey(0)
    kx, kp = jax.random.split(key)
    x = jax.random.normal(kx, (B, C, H, W), jnp.float32)
    params = init_params(kp, C, hidden, dim_dict, size_dict, log_param_q_init=0.0)

    fwd = jax.jit(sqvae_forward)
    x_reconst, latents, loss = fwd(x, params)
    jax.block_until_ready((x_reconst, latents, loss))

    assert x_reconst.shape == (B, C, H, W)
    assert latents["z_from_encoder"].shape == (B, dim_dict, H, W)
    assert latents["z_to_decoder"].shape == (B, dim_dict, H, W)
    assert bool(jnp.isfinite(loss["all"])) and bool(jnp.isfinite(loss["mse"]))
    assert bool(jnp.isfinite(loss["perplexity"]))
    print("KERNEL_OK")
</pallas_src>

<mosaic_0001>
module attributes {stable_mosaic.version = 11 : i64} {
  func.func @_sqvae_fused_kernel(%arg0: i32, %arg1: memref<1xf32, #tpu.memory_space<smem>>, %arg2: memref<1x16x64xf32, #tpu.memory_space<vmem>>, %arg3: memref<3x64x512xbf16, #tpu.memory_space<vmem>>, %arg4: memref<1x512xf32, #tpu.memory_space<vmem>>, %arg5: memref<3x512x256xbf16, #tpu.memory_space<vmem>>, %arg6: memref<1x256xf32, #tpu.memory_space<vmem>>, %arg7: memref<16x32xf32, #tpu.memory_space<vmem>>, %arg8: memref<32x16xf32, #tpu.memory_space<vmem>>, %arg9: memref<1x32xf32, #tpu.memory_space<vmem>>, %arg10: memref<3x256x512xbf16, #tpu.memory_space<vmem>>, %arg11: memref<1x512xf32, #tpu.memory_space<vmem>>, %arg12: memref<3x512x64xbf16, #tpu.memory_space<vmem>>, %arg13: memref<1x64xf32, #tpu.memory_space<vmem>>, %arg14: memref<1x16x256xf32, #tpu.memory_space<vmem>>, %arg15: memref<1x16x256xf32, #tpu.memory_space<vmem>>, %arg16: memref<1x16x64xf32, #tpu.memory_space<vmem>>, %arg17: memref<1x1x128xf32, #tpu.memory_space<vmem>>, %arg18: memref<18x512xbf16, #tpu.memory_space<vmem>>) attributes {dimension_semantics = [#tpu.dimension_semantics<parallel>], iteration_bounds = array<i64: 2>, scalar_prefetch = 0 : i64, scratch_operands = 1 : i64, tpu.core_type = #tpu.core_type<tc>, window_params = [{transform_indices = @transform_0, window_bounds = array<i64: 1>}, {transform_indices = @transform_1, window_bounds = array<i64: 1, 16, 64>}, {pipeline_mode = #tpu.pipeline_mode<synchronous>, transform_indices = @transform_2, window_bounds = array<i64: 3, 64, 512>}, {pipeline_mode = #tpu.pipeline_mode<synchronous>, transform_indices = @transform_3, window_bounds = array<i64: 1, 512>}, {pipeline_mode = #tpu.pipeline_mode<synchronous>, transform_indices = @transform_4, window_bounds = array<i64: 3, 512, 256>}, {pipeline_mode = #tpu.pipeline_mode<synchronous>, transform_indices = @transform_5, window_bounds = array<i64: 1, 256>}, {pipeline_mode = #tpu.pipeline_mode<synchronous>, transform_indices = @transform_6, window_bounds = array<i64: 16, 32>}, {pipeline_mode = #tpu.pipeline_mode<synchronous>, transform_indices = @transform_7, window_bounds = array<i64: 32, 16>}, {pipeline_mode = #tpu.pipeline_mode<synchronous>, transform_indices = @transform_8, window_bounds = array<i64: 1, 32>}, {pipeline_mode = #tpu.pipeline_mode<synchronous>, transform_indices = @transform_9, window_bounds = array<i64: 3, 256, 512>}, {pipeline_mode = #tpu.pipeline_mode<synchronous>, transform_indices = @transform_10, window_bounds = array<i64: 1, 512>}, {pipeline_mode = #tpu.pipeline_mode<synchronous>, transform_indices = @transform_11, window_bounds = array<i64: 3, 512, 64>}, {pipeline_mode = #tpu.pipeline_mode<synchronous>, transform_indices = @transform_12, window_bounds = array<i64: 1, 64>}, {transform_indices = @transform_13, window_bounds = array<i64: 1, 16, 256>}, {transform_indices = @transform_14, window_bounds = array<i64: 1, 16, 256>}, {transform_indices = @transform_15, window_bounds = array<i64: 1, 16, 64>}, {transform_indices = @transform_16, window_bounds = array<i64: 1, 1, 128>}]} {
    %cst = arith.constant 0.000000e+00 : bf16
    %0 = vector.broadcast %cst : bf16 to vector<1x512xbf16>
    %c0 = arith.constant 0 : index
    %c0_0 = arith.constant 0 : index
    %1 = vector.load %arg18[%c0, %c0_0] : memref<18x512xbf16, #tpu.memory_space<vmem>>, vector<1x512xbf16>
    tpu.vector_store %arg18[%c0, %c0_0], %0 {strides = array<i32>} : memref<18x512xbf16, #tpu.memory_space<vmem>>, vector<1x512xbf16>,
    %c17 = arith.constant 17 : index
    %c0_1 = arith.constant 0 : index
    %2 = vector.load %arg18[%c17, %c0_1] : memref<18x512xbf16, #tpu.memory_space<vmem>>, vector<1x512xbf16>
    tpu.vector_store %arg18[%c17, %c0_1], %0 {strides = array<i32>} : memref<18x512xbf16, #tpu.memory_space<vmem>>, vector<1x512xbf16>,
    %c0_2 = arith.constant 0 : index
    %c0_3 = arith.constant 0 : index
    %c0_4 = arith.constant 0 : index
    %3 = vector.load %arg2[%c0_2, %c0_3, %c0_4] : memref<1x16x64xf32, #tpu.memory_space<vmem>>, vector<1x16x64xf32>
    %4 = vector.shape_cast %3 : vector<1x16x64xf32> to vector<16x64xf32>
    %5 = arith.truncf %4 : vector<16x64xf32> to vector<16x64xbf16>
    %c1 = arith.constant 1 : index
    %c0_5 = arith.constant 0 : index
    %6 = vector.load %arg18[%c1, %c0_5] : memref<18x512xbf16, #tpu.memory_space<vmem>>, vector<16x64xbf16>
    tpu.vector_store %arg18[%c1, %c0_5], %5 {strides = array<i32>} : memref<18x512xbf16, #tpu.memory_space<vmem>>, vector<16x64xbf16>,
    %c0_6 = arith.constant 0 : index
    %c0_7 = arith.constant 0 : index
    %7 = vector.load %arg18[%c0_6, %c0_7] : memref<18x512xbf16, #tpu.memory_space<vmem>>, vector<16x64xbf16>
    %c2 = arith.constant 2 : index
    %c0_8 = arith.constant 0 : index
    %8 = vector.load %arg18[%c2, %c0_8] : memref<18x512xbf16, #tpu.memory_space<vmem>>, vector<16x64xbf16>
    %c0_9 = arith.constant 0 : index
    %c0_10 = arith.constant 0 : index
    %c0_11 = arith.constant 0 : index
    %9 = vector.load %arg3[%c0_9, %c0_10, %c0_11] : memref<3x64x512xbf16, #tpu.memory_space<vmem>>, vector<1x64x512xbf16>
    %10 = vector.shape_cast %9 : vector<1x64x512xbf16> to vector<64x512xbf16>
    %cst_12 = arith.constant dense<0.000000e+00> : vector<16x512xf32>
    %11 = tpu.matmul %7, %10, %cst_12 {dimension_numbers = #tpu.dot_dimension_numbers<[1], [0], [0], [1], [0, 0, 1, 1], [], []>} : vector<16x64xbf16>, vector<64x512xbf16>, vector<16x512xf32> -> vector<16x512xf32>
    %c1_13 = arith.constant 1 : index
    %c0_14 = arith.constant 0 : index
    %c0_15 = arith.constant 0 : index
    %12 = vector.load %arg3[%c1_13, %c0_14, %c0_15] : memref<3x64x512xbf16, #tpu.memory_space<vmem>>, vector<1x64x512xbf16>
    %13 = vector.shape_cast %12 : vector<1x64x512xbf16> to vector<64x512xbf16>
    %cst_16 = arith.constant dense<0.000000e+00> : vector<16x512xf32>
    %14 = tpu.matmul %5, %13, %cst_16 {dimension_numbers = #tpu.dot_dimension_numbers<[1], [0], [0], [1], [0, 0, 1, 1], [], []>} : vector<16x64xbf16>, vector<64x512xbf16>, vector<16x512xf32> -> vector<16x512xf32>
    %15 = arith.addf %11, %14 : vector<16x512xf32>
    %c2_17 = arith.constant 2 : index
    %c0_18 = arith.constant 0 : index
    %c0_19 = arith.constant 0 : index
    %16 = vector.load %arg3[%c2_17, %c0_18, %c0_19] : memref<3x64x512xbf16, #tpu.memory_space<vmem>>, vector<1x64x512xbf16>
    %17 = vector.shape_cast %16 : vector<1x64x512xbf16> to vector<64x512xbf16>
    %cst_20 = arith.constant dense<0.000000e+00> : vector<16x512xf32>
    %18 = tpu.matmul %8, %17, %cst_20 {dimension_numbers = #tpu.dot_dimension_numbers<[1], [0], [0], [1], [0, 0, 1, 1], [], []>} : vector<16x64xbf16>, vector<64x512xbf16>, vector<16x512xf32> -> vector<16x512xf32>
    %19 = arith.addf %15, %18 : vector<16x512xf32>
    %c0_21 = arith.constant 0 : index
    %c0_22 = arith.constant 0 : index
    %20 = vector.load %arg4[%c0_21, %c0_22] : memref<1x512xf32, #tpu.memory_space<vmem>>, vector<1x512xf32>
    %21 = vector.broadcast %20 : vector<1x512xf32> to vector<16x512xf32>
    %22 = arith.addf %19, %21 : vector<16x512xf32>
    %cst_23 = arith.constant 0.000000e+00 : f32
    %23 = vector.broadcast %cst_23 : f32 to vector<16x512xf32>
    %24 = arith.maximumf %22, %23 : vector<16x512xf32>
    %25 = arith.truncf %24 : vector<16x512xf32> to vector<16x512xbf16>
    %c1_24 = arith.constant 1 : index
    %c0_25 = arith.constant 0 : index
    %26 = vector.load %arg18[%c1_24, %c0_25] : memref<18x512xbf16, #tpu.memory_space<vmem>>, vector<16x512xbf16>
    tpu.vector_store %arg18[%c1_24, %c0_25], %25 {strides = array<i32>} : memref<18x512xbf16, #tpu.memory_space<vmem>>, vector<16x512xbf16>,
    %c0_26 = arith.constant 0 : index
    %c0_27 = arith.constant 0 : index
    %27 = vector.load %arg18[%c0_26, %c0_27] : memref<18x512xbf16, #tpu.memory_space<vmem>>, vector<16x512xbf16>
    %c2_28 = arith.constant 2 : index
    %c0_29 = arith.constant 0 : index
    %28 = vector.load %arg18[%c2_28, %c0_29] : memref<18x512xbf16, #tpu.memory_space<vmem>>, vector<16x512xbf16>
    %c0_30 = arith.constant 0 : index
    %c0_31 = arith.constant 0 : index
    %c0_32 = arith.constant 0 : index
    %29 = vector.load %arg5[%c0_30, %c0_31, %c0_32] : memref<3x512x256xbf16, #tpu.memory_space<vmem>>, vector<1x512x256xbf16>
    %30 = vector.shape_cast %29 : vector<1x512x256xbf16> to vector<512x256xbf16>
    %cst_33 = arith.constant dense<0.000000e+00> : vector<16x256xf32>
    %31 = tpu.matmul %27, %30, %cst_33 {dimension_numbers = #tpu.dot_dimension_numbers<[1], [0], [0], [1], [0, 0, 1, 1], [], []>} : vector<16x512xbf16>, vector<512x256xbf16>, vector<16x256xf32> -> vector<16x256xf32>
    %c1_34 = arith.constant 1 : index
    %c0_35 = arith.constant 0 : index
    %c0_36 = arith.constant 0 : index
    %32 = vector.load %arg5[%c1_34, %c0_35, %c0_36] : memref<3x512x256xbf16, #tpu.memory_space<vmem>>, vector<1x512x256xbf16>
    %33 = vector.shape_cast %32 : vector<1x512x256xbf16> to vector<512x256xbf16>
    %cst_37 = arith.constant dense<0.000000e+00> : vector<16x256xf32>
    %34 = tpu.matmul %25, %33, %cst_37 {dimension_numbers = #tpu.dot_dimension_numbers<[1], [0], [0], [1], [0, 0, 1, 1], [], []>} : vector<16x512xbf16>, vector<512x256xbf16>, vector<16x256xf32> -> vector<16x256xf32>
    %35 = arith.addf %31, %34 : vector<16x256xf32>
    %c2_38 = arith.constant 2 : index
    %c0_39 = arith.constant 0 : index
    %c0_40 = arith.constant 0 : index
    %36 = vector.load %arg5[%c2_38, %c0_39, %c0_40] : memref<3x512x256xbf16, #tpu.memory_space<vmem>>, vector<1x512x256xbf16>
    %37 = vector.shape_cast %36 : vector<1x512x256xbf16> to vector<512x256xbf16>
    %cst_41 = arith.constant dense<0.000000e+00> : vector<16x256xf32>
    %38 = tpu.matmul %28, %37, %cst_41 {dimension_numbers = #tpu.dot_dimension_numbers<[1], [0], [0], [1], [0, 0, 1, 1], [], []>} : vector<16x512xbf16>, vector<512x256xbf16>, vector<16x256xf32> -> vector<16x256xf32>
    %39 = arith.addf %35, %38 : vector<16x256xf32>
    %c0_42 = arith.constant 0 : index
    %c0_43 = arith.constant 0 : index
    %40 = vector.load %arg6[%c0_42, %c0_43] : memref<1x256xf32, #tpu.memory_space<vmem>>, vector<1x256xf32>
    %41 = vector.broadcast %40 : vector<1x256xf32> to vector<16x256xf32>
    %42 = arith.addf %39, %41 : vector<16x256xf32>
    %c0_44 = arith.constant 0 : index
    %43 = memref.load %arg1[%c0_44] : memref<1xf32, #tpu.memory_space<smem>>
    %44 = vector.extract_strided_slice %42 {offsets = [0, 0], sizes = [16, 16], strides = [1, 1]} : vector<16x256xf32> to vector<16x16xf32>
    %45 = vector.extract_strided_slice %42 {offsets = [0, 16], sizes = [16, 16], strides = [1, 1]} : vector<16x256xf32> to vector<16x16xf32>
    %46 = vector.extract_strided_slice %42 {offsets = [0, 32], sizes = [16, 16], strides = [1, 1]} : vector<16x256xf32> to vector<16x16xf32>
    %47 = vector.extract_strided_slice %42 {offsets = [0, 48], sizes = [16, 16], strides = [1, 1]} : vector<16x256xf32> to vector<16x16xf32>
    %48 = vector.extract_strided_slice %42 {offsets = [0, 64], sizes = [16, 16], strides = [1, 1]} : vector<16x256xf32> to vector<16x16xf32>
    %49 = vector.extract_strided_slice %42 {offsets = [0, 80], sizes = [16, 16], strides = [1, 1]} : vector<16x256xf32> to vector<16x16xf32>
    %50 = vector.extract_strided_slice %42 {offsets = [0, 96], sizes = [16, 16], strides = [1, 1]} : vector<16x256xf32> to vector<16x16xf32>
    %51 = vector.extract_strided_slice %42 {offsets = [0, 112], sizes = [16, 16], strides = [1, 1]} : vector<16x256xf32> to vector<16x16xf32>
    %52 = vector.extract_strided_slice %42 {offsets = [0, 128], sizes = [16, 16], strides = [1, 1]} : vector<16x256xf32> to vector<16x16xf32>
    %53 = vector.extract_strided_slice %42 {offsets = [0, 144], sizes = [16, 16], strides = [1, 1]} : vector<16x256xf32> to vector<16x16xf32>
    %54 = vector.extract_strided_slice %42 {offsets = [0, 160], sizes = [16, 16], strides = [1, 1]} : vector<16x256xf32> to vector<16x16xf32>
    %55 = vector.extract_strided_slice %42 {offsets = [0, 176], sizes = [16, 16], strides = [1, 1]} : vector<16x256xf32> to vector<16x16xf32>
    %56 = vector.extract_strided_slice %42 {offsets = [0, 192], sizes = [16, 16], strides = [1, 1]} : vector<16x256xf32> to vector<16x16xf32>
    %57 = vector.extract_strided_slice %42 {offsets = [0, 208], sizes = [16, 16], strides = [1, 1]} : vector<16x256xf32> to vector<16x16xf32>
    %58 = vector.extract_strided_slice %42 {offsets = [0, 224], sizes = [16, 16], strides = [1, 1]} : vector<16x256xf32> to vector<16x16xf32>
    %59 = vector.extract_strided_slice %42 {offsets = [0, 240], sizes = [16, 16], strides = [1, 1]} : vector<16x256xf32> to vector<16x16xf32>
    %60 = tpu.concatenate %44, %45, %46, %47, %48, %49, %50, %51, %52, %53, %54, %55, %56, %57, %58, %59 in 0 : vector<16x16xf32>, vector<16x16xf32>, vector<16x16xf32>, vector<16x16xf32>, vector<16x16xf32>, vector<16x16xf32>, vector<16x16xf32>, vector<16x16xf32>, vector<16x16xf32>, vector<16x16xf32>, vector<16x16xf32>, vector<16x16xf32>, vector<16x16xf32>, vector<16x16xf32>, vector<16x16xf32>, vector<16x16xf32> -> vector<256x16xf32>
    %61 = arith.mulf %60, %60 : vector<256x16xf32>
    %cst_45 = arith.constant dense<0.000000e+00> : vector<256xf32>
    %62 = vector.multi_reduction <add>, %61, %cst_45 [1] : vector<256x16xf32> to vector<256xf32>
    %63 = vector.shape_cast %62 : vector<256xf32> to vector<256x1xf32>
    %c0_46 = arith.constant 0 : index
    %c0_47 = arith.constant 0 : index
    %64 = vector.load %arg7[%c0_46, %c0_47] : memref<16x32xf32, #tpu.memory_space<vmem>>, vector<16x32xf32>
    %cst_48 = arith.constant dense<0.000000e+00> : vector<256x32xf32>
    %65 = tpu.matmul %60, %64, %cst_48 {dimension_numbers = #tpu.dot_dimension_numbers<[1], [0], [0], [1], [0, 0, 1, 1], [], []>} : vector<256x16xf32>, vector<16x32xf32>, vector<256x32xf32> -> vector<256x32xf32>
    %c0_49 = arith.constant 0 : index
    %c0_50 = arith.constant 0 : index
    %66 = vector.load %arg9[%c0_49, %c0_50] : memref<1x32xf32, #tpu.memory_space<vmem>>, vector<1x32xf32>
    %67 = vector.broadcast %63 : vector<256x1xf32> to vector<256x32xf32>
    %68 = vector.broadcast %66 : vector<1x32xf32> to vector<256x32xf32>
    %69 = arith.addf %67, %68 : vector<256x32xf32>
    %cst_51 = arith.constant 2.000000e+00 : f32
    %70 = vector.broadcast %cst_51 : f32 to vector<256x32xf32>
    %71 = arith.mulf %70, %65 : vector<256x32xf32>
    %72 = arith.subf %69, %71 : vector<256x32xf32>
    %73 = vector.broadcast %43 : f32 to vector<256x32xf32>
    %74 = arith.mulf %73, %72 : vector<256x32xf32>
    %cst_52 = arith.constant 0.000000e+00 : f32
    %75 = vector.broadcast %cst_52 : f32 to vector<256x32xf32>
    %76 = arith.subf %75, %74 : vector<256x32xf32>
    %cst_53 = arith.constant dense<0xFF800000> : vector<256xf32>
    %77 = vector.multi_reduction <maximumf>, %76, %cst_53 [1] : vector<256x32xf32> to vector<256xf32>
    %78 = vector.shape_cast %77 : vector<256xf32> to vector<256x1xf32>
    %79 = vector.broadcast %78 : vector<256x1xf32> to vector<256x32xf32>
    %80 = arith.subf %76, %79 : vector<256x32xf32>
    %81 = math.exp %80 : vector<256x32xf32>
    %cst_54 = arith.constant dense<0.000000e+00> : vector<256xf32>
    %82 = vector.multi_reduction <add>, %81, %cst_54 [1] : vector<256x32xf32> to vector<256xf32>
    %83 = vector.shape_cast %82 : vector<256xf32> to vector<256x1xf32>
    %84 = tpu.reciprocal %83 {approx = true} : vector<256x1xf32> -> vector<256x1xf32>
    %85 = vector.broadcast %84 : vector<256x1xf32> to vector<256x32xf32>
    %86 = arith.mulf %81, %85 : vector<256x32xf32>
    %87 = vector.broadcast %78 : vector<256x1xf32> to vector<256x32xf32>
    %88 = arith.subf %76, %87 : vector<256x32xf32>
    %89 = math.log %83 : vector<256x1xf32>
    %90 = vector.broadcast %89 : vector<256x1xf32> to vector<256x32xf32>
    %91 = arith.subf %88, %90 : vector<256x32xf32>
    %92 = tpu.iota {dimensions = array<i32: 1>} : vector<256x32xi32>
    %93 = vector.broadcast %78 : vector<256x1xf32> to vector<256x32xf32>
    %94 = arith.cmpf oeq, %76, %93 : vector<256x32xf32>
    %c32_i32 = arith.constant 32 : i32
    %95 = vector.broadcast %c32_i32 : i32 to vector<256x32xi32>
    %96 = arith.select %94, %92, %95 : vector<256x32xi1>, vector<256x32xi32>
    %cst_55 = arith.constant dense<2147483647> : vector<256xi32>
    %97 = vector.multi_reduction <minsi>, %96, %cst_55 [1] : vector<256x32xi32> to vector<256xi32>
    %98 = vector.shape_cast %97 : vector<256xi32> to vector<256x1xi32>
    %99 = vector.broadcast %98 : vector<256x1xi32> to vector<256x32xi32>
    %100 = arith.cmpi eq, %92, %99 : vector<256x32xi32>
    %101 = arith.extui %100 : vector<256x32xi1> to vector<256x32xi32>
    %102 = arith.sitofp %101 : vector<256x32xi32> to vector<256x32xf32>
    %c0_56 = arith.constant 0 : index
    %c0_57 = arith.constant 0 : index
    %103 = vector.load %arg8[%c0_56, %c0_57] : memref<32x16xf32, #tpu.memory_space<vmem>>, vector<32x16xf32>
    %cst_58 = arith.constant dense<0.000000e+00> : vector<256x16xf32>
    %104 = tpu.matmul %102, %103, %cst_58 {dimension_numbers = #tpu.dot_dimension_numbers<[1], [0], [0], [1], [0, 0, 1, 1], [], []>} : vector<256x32xf32>, vector<32x16xf32>, vector<256x16xf32> -> vector<256x16xf32>
    %cst_59 = arith.constant dense<0.000000e+00> : vector<32xf32>
    %105 = vector.multi_reduction <add>, %102, %cst_59 [0] : vector<256x32xf32> to vector<32xf32>
    %106 = vector.shape_cast %105 : vector<32xf32> to vector<1x32xf32>
    %107 = arith.mulf %86, %91 : vector<256x32xf32>
    %108 = vector.shape_cast %107 : vector<256x32xf32> to vector<1x256x32xf32>
    %cst_60 = arith.constant dense<0.000000e+00> : vector<1xf32>
    %109 = vector.multi_reduction <add>, %108, %cst_60 [1, 2] : vector<1x256x32xf32> to vector<1xf32>
    %110 = vector.shape_cast %109 : vector<1xf32> to vector<1x1x1xf32>
    %111 = vector.extract %110[0, 0, 0] : f32 from vector<1x1x1xf32>
    %112 = arith.subf %60, %104 : vector<256x16xf32>
    %113 = arith.mulf %112, %112 : vector<256x16xf32>
    %114 = vector.shape_cast %113 : vector<256x16xf32> to vector<1x256x16xf32>
    %cst_61 = arith.constant dense<0.000000e+00> : vector<1xf32>
    %115 = vector.multi_reduction <add>, %114, %cst_61 [1, 2] : vector<1x256x16xf32> to vector<1xf32>
    %116 = vector.shape_cast %115 : vector<1xf32> to vector<1x1x1xf32>
    %117 = vector.extract %116[0, 0, 0] : f32 from vector<1x1x1xf32>
    %118 = arith.mulf %43, %117 : f32
    %119 = vector.extract_strided_slice %104 {offsets = [0, 0], sizes = [16, 16], strides = [1, 1]} : vector<256x16xf32> to vector<16x16xf32>
    %120 = vector.extract_strided_slice %104 {offsets = [16, 0], sizes = [16, 16], strides = [1, 1]} : vector<256x16xf32> to vector<16x16xf32>
    %121 = vector.extract_strided_slice %104 {offsets = [32, 0], sizes = [16, 16], strides = [1, 1]} : vector<256x16xf32> to vector<16x16xf32>
    %122 = vector.extract_strided_slice %104 {offsets = [48, 0], sizes = [16, 16], strides = [1, 1]} : vector<256x16xf32> to vector<16x16xf32>
    %123 = vector.extract_strided_slice %104 {offsets = [64, 0], sizes = [16, 16], strides = [1, 1]} : vector<256x16xf32> to vector<16x16xf32>
    %124 = vector.extract_strided_slice %104 {offsets = [80, 0], sizes = [16, 16], strides = [1, 1]} : vector<256x16xf32> to vector<16x16xf32>
    %125 = vector.extract_strided_slice %104 {offsets = [96, 0], sizes = [16, 16], strides = [1, 1]} : vector<256x16xf32> to vector<16x16xf32>
    %126 = vector.extract_strided_slice %104 {offsets = [112, 0], sizes = [16, 16], strides = [1, 1]} : vector<256x16xf32> to vector<16x16xf32>
    %127 = vector.extract_strided_slice %104 {offsets = [128, 0], sizes = [16, 16], strides = [1, 1]} : vector<256x16xf32> to vector<16x16xf32>
    %128 = vector.extract_strided_slice %104 {offsets = [144, 0], sizes = [16, 16], strides = [1, 1]} : vector<256x16xf32> to vector<16x16xf32>
    %129 = vector.extract_strided_slice %104 {offsets = [160, 0], sizes = [16, 16], strides = [1, 1]} : vector<256x16xf32> to vector<16x16xf32>
    %130 = vector.extract_strided_slice %104 {offsets = [176, 0], sizes = [16, 16], strides = [1, 1]} : vector<256x16xf32> to vector<16x16xf32>
    %131 = vector.extract_strided_slice %104 {offsets = [192, 0], sizes = [16, 16], strides = [1, 1]} : vector<256x16xf32> to vector<16x16xf32>
    %132 = vector.extract_strided_slice %104 {offsets = [208, 0], sizes = [16, 16], strides = [1, 1]} : vector<256x16xf32> to vector<16x16xf32>
    %133 = vector.extract_strided_slice %104 {offsets = [224, 0], sizes = [16, 16], strides = [1, 1]} : vector<256x16xf32> to vector<16x16xf32>
    %134 = vector.extract_strided_slice %104 {offsets = [240, 0], sizes = [16, 16], strides = [1, 1]} : vector<256x16xf32> to vector<16x16xf32>
    %135 = tpu.concatenate %119, %120, %121, %122, %123, %124, %125, %126, %127, %128, %129, %130, %131, %132, %133, %134 in 1 : vector<16x16xf32>, vector<16x16xf32>, vector<16x16xf32>, vector<16x16xf32>, vector<16x16xf32>, vector<16x16xf32>, vector<16x16xf32>, vector<16x16xf32>, vector<16x16xf32>, vector<16x16xf32>, vector<16x16xf32>, vector<16x16xf32>, vector<16x16xf32>, vector<16x16xf32>, vector<16x16xf32>, vector<16x16xf32> -> vector<16x256xf32>
    %136 = arith.truncf %135 : vector<16x256xf32> to vector<16x256xbf16>
    %c1_62 = arith.constant 1 : index
    %c0_63 = arith.constant 0 : index
    %137 = vector.load %arg18[%c1_62, %c0_63] : memref<18x512xbf16, #tpu.memory_space<vmem>>, vector<16x256xbf16>
    tpu.vector_store %arg18[%c1_62, %c0_63], %136 {strides = array<i32>} : memref<18x512xbf16, #tpu.memory_space<vmem>>, vector<16x256xbf16>,
    %c0_64 = arith.constant 0 : index
    %c0_65 = arith.constant 0 : index
    %138 = vector.load %arg18[%c0_64, %c0_65] : memref<18x512xbf16, #tpu.memory_space<vmem>>, vector<16x256xbf16>
    %c2_66 = arith.constant 2 : index
    %c0_67 = arith.constant 0 : index
    %139 = vector.load %arg18[%c2_66, %c0_67] : memref<18x512xbf16, #tpu.memory_space<vmem>>, vector<16x256xbf16>
    %c0_68 = arith.constant 0 : index
    %c0_69 = arith.constant 0 : index
    %c0_70 = arith.constant 0 : index
    %140 = vector.load %arg10[%c0_68, %c0_69, %c0_70] : memref<3x256x512xbf16, #tpu.memory_space<vmem>>, vector<1x256x512xbf16>
    %141 = vector.shape_cast %140 : vector<1x256x512xbf16> to vector<256x512xbf16>
    %cst_71 = arith.constant dense<0.000000e+00> : vector<16x512xf32>
    %142 = tpu.matmul %138, %141, %cst_71 {dimension_numbers = #tpu.dot_dimension_numbers<[1], [0], [0], [1], [0, 0, 1, 1], [], []>} : vector<16x256xbf16>, vector<256x512xbf16>, vector<16x512xf32> -> vector<16x512xf32>
    %c1_72 = arith.constant 1 : index
    %c0_73 = arith.constant 0 : index
    %c0_74 = arith.constant 0 : index
    %143 = vector.load %arg10[%c1_72, %c0_73, %c0_74] : memref<3x256x512xbf16, #tpu.memory_space<vmem>>, vector<1x256x512xbf16>
    %144 = vector.shape_cast %143 : vector<1x256x512xbf16> to vector<256x512xbf16>
    %cst_75 = arith.constant dense<0.000000e+00> : vector<16x512xf32>
    %145 = tpu.matmul %136, %144, %cst_75 {dimension_numbers = #tpu.dot_dimension_numbers<[1], [0], [0], [1], [0, 0, 1, 1], [], []>} : vector<16x256xbf16>, vector<256x512xbf16>, vector<16x512xf32> -> vector<16x512xf32>
    %146 = arith.addf %142, %145 : vector<16x512xf32>
    %c2_76 = arith.constant 2 : index
    %c0_77 = arith.constant 0 : index
    %c0_78 = arith.constant 0 : index
    %147 = vector.load %arg10[%c2_76, %c0_77, %c0_78] : memref<3x256x512xbf16, #tpu.memory_space<vmem>>, vector<1x256x512xbf16>
    %148 = vector.shape_cast %147 : vector<1x256x512xbf16> to vector<256x512xbf16>
    %cst_79 = arith.constant dense<0.000000e+00> : vector<16x512xf32>
    %149 = tpu.matmul %139, %148, %cst_79 {dimension_numbers = #tpu.dot_dimension_numbers<[1], [0], [0], [1], [0, 0, 1, 1], [], []>} : vector<16x256xbf16>, vector<256x512xbf16>, vector<16x512xf32> -> vector<16x512xf32>
    %150 = arith.addf %146, %149 : vector<16x512xf32>
    %c0_80 = arith.constant 0 : index
    %c0_81 = arith.constant 0 : index
    %151 = vector.load %arg11[%c0_80, %c0_81] : memref<1x512xf32, #tpu.memory_space<vmem>>, vector<1x512xf32>
    %152 = vector.broadcast %151 : vector<1x512xf32> to vector<16x512xf32>
    %153 = arith.addf %150, %152 : vector<16x512xf32>
    %cst_82 = arith.constant 0.000000e+00 : f32
    %154 = vector.broadcast %cst_82 : f32 to vector<16x512xf32>
    %155 = arith.maximumf %153, %154 : vector<16x512xf32>
    %156 = arith.truncf %155 : vector<16x512xf32> to vector<16x512xbf16>
    %c1_83 = arith.constant 1 : index
    %c0_84 = arith.constant 0 : index
    %157 = vector.load %arg18[%c1_83, %c0_84] : memref<18x512xbf16, #tpu.memory_space<vmem>>, vector<16x512xbf16>
    tpu.vector_store %arg18[%c1_83, %c0_84], %156 {strides = array<i32>} : memref<18x512xbf16, #tpu.memory_space<vmem>>, vector<16x512xbf16>,
    %c0_85 = arith.constant 0 : index
    %c0_86 = arith.constant 0 : index
    %158 = vector.load %arg18[%c0_85, %c0_86] : memref<18x512xbf16, #tpu.memory_space<vmem>>, vector<16x512xbf16>
    %c2_87 = arith.constant 2 : index
    %c0_88 = arith.constant 0 : index
    %159 = vector.load %arg18[%c2_87, %c0_88] : memref<18x512xbf16, #tpu.memory_space<vmem>>, vector<16x512xbf16>
    %c0_89 = arith.constant 0 : index
    %c0_90 = arith.constant 0 : index
    %c0_91 = arith.constant 0 : index
    %160 = vector.load %arg12[%c0_89, %c0_90, %c0_91] : memref<3x512x64xbf16, #tpu.memory_space<vmem>>, vector<1x512x64xbf16>
    %161 = vector.shape_cast %160 : vector<1x512x64xbf16> to vector<512x64xbf16>
    %cst_92 = arith.constant dense<0.000000e+00> : vector<16x64xf32>
    %162 = tpu.matmul %158, %161, %cst_92 {dimension_numbers = #tpu.dot_dimension_numbers<[1], [0], [0], [1], [0, 0, 1, 1], [], []>} : vector<16x512xbf16>, vector<512x64xbf16>, vector<16x64xf32> -> vector<16x64xf32>
    %c1_93 = arith.constant 1 : index
    %c0_94 = arith.constant 0 : index
    %c0_95 = arith.constant 0 : index
    %163 = vector.load %arg12[%c1_93, %c0_94, %c0_95] : memref<3x512x64xbf16, #tpu.memory_space<vmem>>, vector<1x512x64xbf16>
    %164 = vector.shape_cast %163 : vector<1x512x64xbf16> to vector<512x64xbf16>
    %cst_96 = arith.constant dense<0.000000e+00> : vector<16x64xf32>
    %165 = tpu.matmul %156, %164, %cst_96 {dimension_numbers = #tpu.dot_dimension_numbers<[1], [0], [0], [1], [0, 0, 1, 1], [], []>} : vector<16x512xbf16>, vector<512x64xbf16>, vector<16x64xf32> -> vector<16x64xf32>
    %166 = arith.addf %162, %165 : vector<16x64xf32>
    %c2_97 = arith.constant 2 : index
    %c0_98 = arith.constant 0 : index
    %c0_99 = arith.constant 0 : index
    %167 = vector.load %arg12[%c2_97, %c0_98, %c0_99] : memref<3x512x64xbf16, #tpu.memory_space<vmem>>, vector<1x512x64xbf16>
    %168 = vector.shape_cast %167 : vector<1x512x64xbf16> to vector<512x64xbf16>
    %cst_100 = arith.constant dense<0.000000e+00> : vector<16x64xf32>
    %169 = tpu.matmul %159, %168, %cst_100 {dimension_numbers = #tpu.dot_dimension_numbers<[1], [0], [0], [1], [0, 0, 1, 1], [], []>} : vector<16x512xbf16>, vector<512x64xbf16>, vector<16x64xf32> -> vector<16x64xf32>
    %170 = arith.addf %166, %169 : vector<16x64xf32>
    %c0_101 = arith.constant 0 : index
    %c0_102 = arith.constant 0 : index
    %171 = vector.load %arg13[%c0_101, %c0_102] : memref<1x64xf32, #tpu.memory_space<vmem>>, vector<1x64xf32>
    %172 = vector.broadcast %171 : vector<1x64xf32> to vector<16x64xf32>
    %173 = arith.addf %170, %172 : vector<16x64xf32>
    %174 = arith.subf %173, %4 : vector<16x64xf32>
    %175 = arith.mulf %174, %174 : vector<16x64xf32>
    %176 = vector.shape_cast %175 : vector<16x64xf32> to vector<1x16x64xf32>
    %cst_103 = arith.constant dense<0.000000e+00> : vector<1xf32>
    %177 = vector.multi_reduction <add>, %176, %cst_103 [1, 2] : vector<1x16x64xf32> to vector<1xf32>
    %178 = vector.shape_cast %177 : vector<1xf32> to vector<1x1x1xf32>
    %179 = vector.extract %178[0, 0, 0] : f32 from vector<1x1x1xf32>
    %c0_104 = arith.constant 0 : index
    %c0_105 = arith.constant 0 : index
    %c0_106 = arith.constant 0 : index
    %180 = vector.load %arg14[%c0_104, %c0_105, %c0_106] : memref<1x16x256xf32, #tpu.memory_space<vmem>>, vector<1x16x256xf32>
    %181 = vector.shape_cast %180 : vector<1x16x256xf32> to vector<16x256xf32>
    %182 = vector.shape_cast %42 : vector<16x256xf32> to vector<1x16x256xf32>
    tpu.vector_store %arg14[%c0_104, %c0_105, %c0_106], %182 {strides = array<i32>} : memref<1x16x256xf32, #tpu.memory_space<vmem>>, vector<1x16x256xf32>,
    %c0_107 = arith.constant 0 : index
    %c0_108 = arith.constant 0 : index
    %c0_109 = arith.constant 0 : index
    %183 = vector.load %arg15[%c0_107, %c0_108, %c0_109] : memref<1x16x256xf32, #tpu.memory_space<vmem>>, vector<1x16x256xf32>
    %184 = vector.shape_cast %183 : vector<1x16x256xf32> to vector<16x256xf32>
    %185 = vector.shape_cast %135 : vector<16x256xf32> to vector<1x16x256xf32>
    tpu.vector_store %arg15[%c0_107, %c0_108, %c0_109], %185 {strides = array<i32>} : memref<1x16x256xf32, #tpu.memory_space<vmem>>, vector<1x16x256xf32>,
    %c0_110 = arith.constant 0 : index
    %c0_111 = arith.constant 0 : index
    %c0_112 = arith.constant 0 : index
    %186 = vector.load %arg16[%c0_110, %c0_111, %c0_112] : memref<1x16x64xf32, #tpu.memory_space<vmem>>, vector<1x16x64xf32>
    %187 = vector.shape_cast %186 : vector<1x16x64xf32> to vector<16x64xf32>
    %188 = vector.shape_cast %173 : vector<16x64xf32> to vector<1x16x64xf32>
    tpu.vector_store %arg16[%c0_110, %c0_111, %c0_112], %188 {strides = array<i32>} : memref<1x16x64xf32, #tpu.memory_space<vmem>>, vector<1x16x64xf32>,
    %189 = vector.broadcast %179 : f32 to vector<1x1xf32>
    %190 = vector.broadcast %111 : f32 to vector<1x1xf32>
    %191 = vector.broadcast %118 : f32 to vector<1x1xf32>
    %192 = tpu.concatenate %189, %190, %191 in 1 : vector<1x1xf32>, vector<1x1xf32>, vector<1x1xf32> -> vector<1x3xf32>
    %cst_113 = arith.constant 0.000000e+00 : f32
    %193 = vector.broadcast %cst_113 : f32 to vector<1x93xf32>
    %194 = tpu.concatenate %106, %192, %193 in 1 : vector<1x32xf32>, vector<1x3xf32>, vector<1x93xf32> -> vector<1x128xf32>
    %c0_114 = arith.constant 0 : index
    %c0_115 = arith.constant 0 : index
    %c0_116 = arith.constant 0 : index
    %195 = vector.load %arg17[%c0_114, %c0_115, %c0_116] : memref<1x1x128xf32, #tpu.memory_space<vmem>>, vector<1x1x128xf32>
    %196 = vector.shape_cast %195 : vector<1x1x128xf32> to vector<1x128xf32>
    %197 = vector.shape_cast %194 : vector<1x128xf32> to vector<1x1x128xf32>
    tpu.vector_store %arg17[%c0_114, %c0_115, %c0_116], %197 {strides = array<i32>} : memref<1x1x128xf32, #tpu.memory_space<vmem>>, vector<1x1x128xf32>,
    return
  }
  func.func @transform_0(%arg0: i32) -> i32 {
    %c0_i32 = arith.constant 0 : i32
    %c0_i32_0 = arith.constant 0 : i32
    return %c0_i32 : i32
  }
  func.func @transform_1(%arg0: i32) -> (i32, i32, i32) {
    %c0_i32 = arith.constant 0 : i32
    %c0_i32_0 = arith.constant 0 : i32
    %c0_i32_1 = arith.constant 0 : i32
    return %arg0, %c0_i32, %c0_i32_0 : i32, i32, i32
  }
  func.func @transform_2(%arg0: i32) -> (i32, i32, i32) {
    %c0_i32 = arith.constant 0 : i32
    %c0_i32_0 = arith.constant 0 : i32
    %c0_i32_1 = arith.constant 0 : i32
    %c0_i32_2 = arith.constant 0 : i32
    return %c0_i32, %c0_i32_0, %c0_i32_1 : i32, i32, i32
  }
  func.func @transform_3(%arg0: i32) -> (i32, i32) {
    %c0_i32 = arith.constant 0 : i32
    %c0_i32_0 = arith.constant 0 : i32
    %c0_i32_1 = arith.constant 0 : i32
    return %c0_i32, %c0_i32_0 : i32, i32
  }
  func.func @transform_4(%arg0: i32) -> (i32, i32, i32) {
    %c0_i32 = arith.constant 0 : i32
    %c0_i32_0 = arith.constant 0 : i32
    %c0_i32_1 = arith.constant 0 : i32
    %c0_i32_2 = arith.constant 0 : i32
    return %c0_i32, %c0_i32_0, %c0_i32_1 : i32, i32, i32
  }
  func.func @transform_5(%arg0: i32) -> (i32, i32) {
    %c0_i32 = arith.constant 0 : i32
    %c0_i32_0 = arith.constant 0 : i32
    %c0_i32_1 = arith.constant 0 : i32
    return %c0_i32, %c0_i32_0 : i32, i32
  }
  func.func @transform_6(%arg0: i32) -> (i32, i32) {
    %c0_i32 = arith.constant 0 : i32
    %c0_i32_0 = arith.constant 0 : i32
    %c0_i32_1 = arith.constant 0 : i32
    return %c0_i32, %c0_i32_0 : i32, i32
  }
  func.func @transform_7(%arg0: i32) -> (i32, i32) {
    %c0_i32 = arith.constant 0 : i32
    %c0_i32_0 = arith.constant 0 : i32
    %c0_i32_1 = arith.constant 0 : i32
    return %c0_i32, %c0_i32_0 : i32, i32
  }
  func.func @transform_8(%arg0: i32) -> (i32, i32) {
    %c0_i32 = arith.constant 0 : i32
    %c0_i32_0 = arith.constant 0 : i32
    %c0_i32_1 = arith.constant 0 : i32
    return %c0_i32, %c0_i32_0 : i32, i32
  }
  func.func @transform_9(%arg0: i32) -> (i32, i32, i32) {
    %c0_i32 = arith.constant 0 : i32
    %c0_i32_0 = arith.constant 0 : i32
    %c0_i32_1 = arith.constant 0 : i32
    %c0_i32_2 = arith.constant 0 : i32
    return %c0_i32, %c0_i32_0, %c0_i32_1 : i32, i32, i32
  }
  func.func @transform_10(%arg0: i32) -> (i32, i32) {
    %c0_i32 = arith.constant 0 : i32
    %c0_i32_0 = arith.constant 0 : i32
    %c0_i32_1 = arith.constant 0 : i32
    return %c0_i32, %c0_i32_0 : i32, i32
  }
  func.func @transform_11(%arg0: i32) -> (i32, i32, i32) {
    %c0_i32 = arith.constant 0 : i32
    %c0_i32_0 = arith.constant 0 : i32
    %c0_i32_1 = arith.constant 0 : i32
    %c0_i32_2 = arith.constant 0 : i32
    return %c0_i32, %c0_i32_0, %c0_i32_1 : i32, i32, i32
  }
  func.func @transform_12(%arg0: i32) -> (i32, i32) {
    %c0_i32 = arith.constant 0 : i32
    %c0_i32_0 = arith.constant 0 : i32
    %c0_i32_1 = arith.constant 0 : i32
    return %c0_i32, %c0_i32_0 : i32, i32
  }
  func.func @transform_13(%arg0: i32) -> (i32, i32, i32) {
    %c0_i32 = arith.constant 0 : i32
    %c0_i32_0 = arith.constant 0 : i32
    %c0_i32_1 = arith.constant 0 : i32
    return %arg0, %c0_i32, %c0_i32_0 : i32, i32, i32
  }
  func.func @transform_14(%arg0: i32) -> (i32, i32, i32) {
    %c0_i32 = arith.constant 0 : i32
    %c0_i32_0 = arith.constant 0 : i32
    %c0_i32_1 = arith.constant 0 : i32
    return %arg0, %c0_i32, %c0_i32_0 : i32, i32, i32
  }
  func.func @transform_15(%arg0: i32) -> (i32, i32, i32) {
    %c0_i32 = arith.constant 0 : i32
    %c0_i32_0 = arith.constant 0 : i32
    %c0_i32_1 = arith.constant 0 : i32
    return %arg0, %c0_i32, %c0_i32_0 : i32, i32, i32
  }
  func.func @transform_16(%arg0: i32) -> (i32, i32, i32) {
    %c0_i32 = arith.constant 0 : i32
    %c0_i32_0 = arith.constant 0 : i32
    %c0_i32_1 = arith.constant 0 : i32
    return %arg0, %c0_i32, %c0_i32_0 : i32, i32, i32
  }
}

</mosaic_0001>

<bundles_post_ra>
// kernel: tile.23
= control target key start
LH: loop header
LB: loop body
LE: loop exit
PB: predicated region body
PF: predicated region fallthrough
CT: control target
= control target key end

     0   :  { %s28_s0 = inlined_call_operand.vmem [shape: f32[32], index: 0, kind: input, shape index: {}]   ;;  %s29_s1 = inlined_call_operand.vmem [shape: f32[16,32], index: 1, kind: output, shape index: {}]  }
   0x1   :  { %v4_v0 = vld [vmem:[%s28_s0] ss:$0 sm:$0xff] }
   0x2   :  { %5 = vst [vmem:[%s29_s1] sm:$0xff] %v4_v0  ;;  %8 = vst [vmem:[%s29_s1 + $0x8] sm:$0xff] %v4_v0 }

// kernel: tile.24
= control target key start
LH: loop header
LB: loop body
LE: loop exit
PB: predicated region body
PF: predicated region fallthrough
CT: control target
= control target key end

     0   :  { %s57_s8 = smov 96   ;;  %vm3_vm0 = vcmask 261120   ;;  %s59_s15 = smov 64   ;;  %vm9_vm1 = vcmask 1048320   ;;  %vm15_vm2 = vcmask 785920   ;;  %vm21_vm3 = vcmask 523520   ;;  %s94_s0 = inlined_call_operand.vmem [shape: f32[16,32], index: 0, kind: input, shape index: {}]   ;;  %s95_s1 = inlined_call_operand.vmem [shape: f32[1,512], index: 1, kind: output, shape index: {}]  }
   0x1   :  { %v48_v0 = vld [vmem:[%s94_s0 + $0x3] ss:$4 sm:$0xf]   ;;  %v49_v1 = vld [vmem:[%s94_s0 + $0x2] ss:$4 sm:$0xf]  }
   0x2   :  { %7 = vrot.lane.b32.xlu0 %v48_v0, %s57_s8  ;;  %v50_v2 = vld [vmem:[%s94_s0 + $0x1] ss:$4 sm:$0xf]   ;;  %v2_v3 = vld [vmem:[%s94_s0] ss:$4 sm:$0xf]  }
   0x3   :  { %s58_s0 = smov 32   ;;  %4 = vst.msk [vmem:[#allocation0] ss:$8 sm:$0xf] %vm3_vm0, %v2_v3  }
   0x4   :  { %19 = vrot.lane.b32.xlu1 %v50_v2, %s58_s0 }
   0x6   :  { %13 = vrot.lane.b32.xlu0 %v49_v1, %s59_s15 }
  0x74   :  { %v8_v4 = vpop.permute.xlu0 %7  }
  0x75   :  { %10 = vst.msk [vmem:[#allocation0] ss:$8 sm:$0xf] %vm9_vm1, %v8_v4  }
  0x76   :  { %v20_v5 = vpop.permute.xlu1 %19  }
  0x78   :  { %v14_v6 = vpop.permute.xlu0 %13  }
  0x79   :  { %16 = vst.msk [vmem:[#allocation0] ss:$8 sm:$0xf] %vm15_vm2, %v14_v6  }
  0x7a   :  { %22 = vst.msk [vmem:[#allocation0] ss:$8 sm:$0xf] %vm21_vm3, %v20_v5  }
  0x81   :  { %v26_v7 = vld [vmem:[#allocation0] sm:$0x1]  ;;  %v30_v8 = vld [vmem:[#allocation0 + $0x8] sm:$0x1]  ;;  %v35_v9 = vld [vmem:[#allocation0 + $0x10] sm:$0x1] }
  0x82   :  { %28 = vst [vmem:[%s95_s1] sm:$0x1] %v26_v7  ;;  %51 = vst [vmem:[%s95_s1 + $0x1] sm:$0x1] %v30_v8  ;;  %v41_v10 = vld [vmem:[#allocation0 + $0x18] sm:$0x1] }
  0x83   :  { %52 = vst [vmem:[%s95_s1 + $0x2] sm:$0x1] %v35_v9  ;;  %53 = vst [vmem:[%s95_s1 + $0x3] sm:$0x1] %v41_v10 }

// kernel: tile.28
= control target key start
LH: loop header
LB: loop body
LE: loop exit
PB: predicated region body
PF: predicated region fallthrough
CT: control target
= control target key end

     0   :  { %s28_s0 = inlined_call_operand.vmem [shape: f32[16], index: 0, kind: input, shape index: {}]   ;;  %s29_s1 = inlined_call_operand.vmem [shape: f32[16,16], index: 1, kind: output, shape index: {}]  }
   0x1   :  { %v4_v0 = vld [vmem:[%s28_s0] ss:$0 sm:$0xff] }
   0x2   :  { %5 = vst [vmem:[%s29_s1] sm:$0xff] %v4_v0  ;;  %8 = vst [vmem:[%s29_s1 + $0x8] sm:$0xff] %v4_v0 }

// kernel: tile.29
= control target key start
LH: loop header
LB: loop body
LE: loop exit
PB: predicated region body
PF: predicated region fallthrough
CT: control target
= control target key end

     0   :  { %s7_s6 = smov 3  ;;  %s21_s9 = smov 3  ;;  %vm4_vm0 = vcmask 130048   ;;  %vm11_vm1 = vcmask 1048448   ;;  %vm18_vm2 = vcmask 917248   ;;  %vm25_vm3 = vcmask 786048   ;;  %s128_s0 = inlined_call_operand.vmem [shape: f32[16,16], index: 0, kind: input, shape index: {}]   ;;  %s129_s1 = inlined_call_operand.vmem [shape: f32[1,256], index: 1, kind: output, shape index: {}]  }
   0x1   :  { %v66_v0 = vld [vmem:[%s128_s0 + $0x7] ss:$8 sm:%s7_s6]   ;;  %s81_s10 = smov 112   ;;  %v68_v1 = vld [vmem:[%s128_s0 + $0x5] ss:$8 sm:%s21_s9]   ;;  %s14_s13 = smov 3 }
   0x2   :  { %9 = vrot.lane.b32.xlu0 %v66_v0, %s81_s10  ;;  %s82_s14 = smov 80   ;;  %v67_v2 = vld [vmem:[%s128_s0 + $0x6] ss:$8 sm:%s14_s13]   ;;  %s28_s17 = smov 3  ;;  %vm32_vm4 = vcmask 654848   ;;  %vm39_vm5 = vcmask 523648  }
   0x3   :  { %23 = vrot.lane.b32.xlu1 %v68_v1, %s82_s14  ;;  %v69_v3 = vld [vmem:[%s128_s0 + $0x4] ss:$8 sm:%s28_s17]   ;;  %s35_s20 = smov 3  ;;  %s42_s21 = smov 3  ;;  %vm46_vm6 = vcmask 392448   ;;  %vm53_vm7 = vcmask 261248  }
   0x4   :  { %s83_s22 = smov 96   ;;  %s84_s23 = smov 64   ;;  %v70_v4 = vld [vmem:[%s128_s0 + $0x3] ss:$8 sm:%s35_s20]   ;;  %v71_v5 = vld [vmem:[%s128_s0 + $0x2] ss:$8 sm:%s42_s21]  }
   0x5   :  { %s2_s26 = smov 3  ;;  %s49_s29 = smov 3 }
   0x6   :  { %16 = vrot.lane.b32.xlu0 %v67_v2, %s83_s22  ;;  %v3_v6 = vld [vmem:[%s128_s0] ss:$8 sm:%s2_s26]   ;;  %s85_s3 = smov 48   ;;  %s86_s4 = smov 32  }
   0x7   :  { %30 = vrot.lane.b32.xlu1 %v69_v3, %s84_s23  ;;  %5 = vst.msk [vmem:[#allocation0] ss:$8 sm:$0x3] %vm4_vm0, %v3_v6   ;;  %v72_v7 = vld [vmem:[%s128_s0 + $0x1] ss:$8 sm:%s49_s29]   ;;  %s87_s0 = smov 16  }
   0xa   :  { %37 = vrot.lane.b32.xlu0 %v70_v4, %s85_s3 }
   0xb   :  { %44 = vrot.lane.b32.xlu1 %v71_v5, %s86_s4 }
   0xe   :  { %51 = vrot.lane.b32.xlu0 %v72_v7, %s87_s0 }
  0x74   :  { %v10_v8 = vpop.permute.xlu0 %9  }
  0x75   :  { %12 = vst.msk [vmem:[#allocation0] ss:$8 sm:$0x3] %vm11_vm1, %v10_v8   ;;  %v24_v9 = vpop.permute.xlu1 %23  }
  0x78   :  { %v17_v10 = vpop.permute.xlu0 %16  }
  0x79   :  { %19 = vst.msk [vmem:[#allocation0] ss:$8 sm:$0x3] %vm18_vm2, %v17_v10   ;;  %v31_v11 = vpop.permute.xlu1 %30  }
  0x7a   :  { %26 = vst.msk [vmem:[#allocation0] ss:$8 sm:$0x3] %vm25_vm3, %v24_v9  }
  0x7b   :  { %33 = vst.msk [vmem:[#allocation0] ss:$8 sm:$0x3] %vm32_vm4, %v31_v11  }
  0x7c   :  { %v38_v12 = vpop.permute.xlu0 %37  }
  0x7d   :  { %40 = vst.msk [vmem:[#allocation0] ss:$8 sm:$0x3] %vm39_vm5, %v38_v12   ;;  %v45_v13 = vpop.permute.xlu1 %44  }
  0x7e   :  { %47 = vst.msk [vmem:[#allocation0] ss:$8 sm:$0x3] %vm46_vm6, %v45_v13  }
  0x80   :  { %v52_v14 = vpop.permute.xlu0 %51  }
  0x81   :  { %54 = vst.msk [vmem:[#allocation0] ss:$8 sm:$0x3] %vm53_vm7, %v52_v14  }
  0x88   :  { %v58_v15 = vld [vmem:[#allocation0] sm:$0x1]  ;;  %v62_v16 = vld [vmem:[#allocation0 + $0x8] sm:$0x1] }
  0x89   :  { %60 = vst [vmem:[%s129_s1] sm:$0x1] %v58_v15  ;;  %73 = vst [vmem:[%s129_s1 + $0x1] sm:$0x1] %v62_v16 }

// kernel: tile.38
= control target key start
LH: loop header
LB: loop body
LE: loop exit
PB: predicated region body
PF: predicated region fallthrough
CT: control target
= control target key end

     0   :  { %s28_s0 = inlined_call_operand.vmem [shape: f32[4], index: 0, kind: input, shape index: {}]   ;;  %s29_s1 = inlined_call_operand.vmem [shape: f32[16,4], index: 1, kind: output, shape index: {}]  }
   0x1   :  { %v4_v0 = vld [vmem:[%s28_s0] ss:$0 sm:$0xff] }
   0x2   :  { %5 = vst [vmem:[%s29_s1] sm:$0xff] %v4_v0  ;;  %8 = vst [vmem:[%s29_s1 + $0x8] sm:$0xff] %v4_v0 }

// kernel: tile.39
= control target key start
LH: loop header
LB: loop body
LE: loop exit
PB: predicated region body
PF: predicated region fallthrough
CT: control target
= control target key end

     0   :  { %s131_s10 = smov 60   ;;  %s132_s11 = smov 52   ;;  %vm3_vm0 = vcmask 31744   ;;  %vm9_vm1 = vcmask 523744   ;;  %vm15_vm2 = vcmask 490944   ;;  %vm21_vm3 = vcmask 458144   ;;  %s207_s0 = inlined_call_operand.vmem [shape: f32[16,4], index: 0, kind: input, shape index: {}]   ;;  %s208_s1 = inlined_call_operand.vmem [shape: f32[1,64], index: 1, kind: output, shape index: {}]  }
   0x1   :  { %v101_v0 = vld [vmem:[%s207_s0 + $0xf] sm:$0x1]   ;;  %v103_v1 = vld [vmem:[%s207_s0 + $0xd] sm:$0x1]   ;;  %v102_v2 = vld [vmem:[%s207_s0 + $0xe] sm:$0x1]  }
   0x2   :  { %7 = vrot.lane.b32.xlu0 %v101_v0, %s131_s10  ;;  %19 = vrot.lane.b32.xlu1 %v103_v1, %s132_s11  ;;  %v104_v3 = vld [vmem:[%s207_s0 + $0xc] sm:$0x1]   ;;  %s133_s16 = smov 56   ;;  %s134_s17 = smov 48   ;;  %v105_v4 = vld [vmem:[%s207_s0 + $0xb] sm:$0x1]  }
   0x3   :  { %v106_v5 = vld [vmem:[%s207_s0 + $0xa] sm:$0x1]   ;;  %v2_v6 = vld [vmem:[%s207_s0] sm:$0x1]   ;;  %s135_s24 = smov 44   ;;  %s136_s25 = smov 40  }
   0x4   :  { %4 = vst.msk [vmem:[#allocation0] sm:$0x1] %vm3_vm0, %v2_v6   ;;  %v107_v7 = vld [vmem:[%s207_s0 + $0x9] sm:$0x1]   ;;  %v108_v8 = vld [vmem:[%s207_s0 + $0x8] sm:$0x1]  }
   0x5   :  { %s137_s30 = smov 36   ;;  %s138_s2 = smov 32   ;;  %v109_v9 = vld [vmem:[%s207_s0 + $0x7] sm:$0x1]   ;;  %v110_v10 = vld [vmem:[%s207_s0 + $0x6] sm:$0x1]  }
   0x6   :  { %13 = vrot.lane.b32.xlu0 %v102_v2, %s133_s16  ;;  %25 = vrot.lane.b32.xlu1 %v104_v3, %s134_s17  ;;  %s139_s7 = smov 28   ;;  %s140_s8 = smov 24   ;;  %v111_v11 = vld [vmem:[%s207_s0 + $0x5] sm:$0x1]   ;;  %v112_v12 = vld [vmem:[%s207_s0 + $0x4] sm:$0x1]  }
   0x7   :  { %s141_s13 = smov 20   ;;  %s142_s14 = smov 16   ;;  %v113_v13 = vld [vmem:[%s207_s0 + $0x3] sm:$0x1]   ;;  %v114_v14 = vld [vmem:[%s207_s0 + $0x2] sm:$0x1]  }
   0x8   :  { %s143_s19 = smov 12   ;;  %s144_s20 = smov 8   ;;  %v115_v15 = vld [vmem:[%s207_s0 + $0x1] sm:$0x1]   ;;  %vm27_vm4 = vcmask 425344   ;;  %vm33_vm5 = vcmask 392544  }
   0x9   :  { %s145_s0 = smov 4   ;;  %vm39_vm6 = vcmask 359744   ;;  %vm45_vm7 = vcmask 326944   ;;  %vm51_vm8 = vcmask 294144   ;;  %vm57_vm9 = vcmask 261344  }
   0xa   :  { %31 = vrot.lane.b32.xlu0 %v105_v4, %s135_s24  ;;  %37 = vrot.lane.b32.xlu1 %v106_v5, %s136_s25  ;;  %vm63_vm10 = vcmask 228544   ;;  %vm69_vm11 = vcmask 195744   ;;  %vm75_vm12 = vcmask 162944   ;;  %vm81_vm13 = vcmask 130144  }
   0xb   :  { %vm87_vm14 = vcmask 97344   ;;  %vm93_vm15 = vcmask 64544  }
   0xe   :  { %43 = vrot.lane.b32.xlu0 %v107_v7, %s137_s30  ;;  %49 = vrot.lane.b32.xlu1 %v108_v8, %s138_s2 }
  0x12   :  { %55 = vrot.lane.b32.xlu0 %v109_v9, %s139_s7  ;;  %61 = vrot.lane.b32.xlu1 %v110_v10, %s140_s8 }
  0x16   :  { %67 = vrot.lane.b32.xlu0 %v111_v11, %s141_s13  ;;  %73 = vrot.lane.b32.xlu1 %v112_v12, %s142_s14 }
  0x1a   :  { %79 = vrot.lane.b32.xlu0 %v113_v13, %s143_s19  ;;  %85 = vrot.lane.b32.xlu1 %v114_v14, %s144_s20 }
  0x1e   :  { %91 = vrot.lane.b32.xlu0 %v115_v15, %s145_s0 }
  0x74   :  { %v8_v16 = vpop.permute.xlu0 %7   ;;  %v20_v17 = vpop.permute.xlu1 %19  }
  0x75   :  { %10 = vst.msk [vmem:[#allocation0] sm:$0x1] %vm9_vm1, %v8_v16  }
  0x78   :  { %v14_v18 = vpop.permute.xlu0 %13   ;;  %v26_v19 = vpop.permute.xlu1 %25  }
  0x79   :  { %16 = vst.msk [vmem:[#allocation0] sm:$0x1] %vm15_vm2, %v14_v18  }
  0x7a   :  { %22 = vst.msk [vmem:[#allocation0] sm:$0x1] %vm21_vm3, %v20_v17  }
  0x7b   :  { %28 = vst.msk [vmem:[#allocation0] sm:$0x1] %vm27_vm4, %v26_v19  }
  0x7c   :  { %v32_v20 = vpop.permute.xlu0 %31   ;;  %v38_v21 = vpop.permute.xlu1 %37  }
  0x7d   :  { %34 = vst.msk [vmem:[#allocation0] sm:$0x1] %vm33_vm5, %v32_v20  }
  0x7e   :  { %40 = vst.msk [vmem:[#allocation0] sm:$0x1] %vm39_vm6, %v38_v21  }
  0x80   :  { %v44_v22 = vpop.permute.xlu0 %43   ;;  %v50_v23 = vpop.permute.xlu1 %49  }
  0x81   :  { %46 = vst.msk [vmem:[#allocation0] sm:$0x1] %vm45_vm7, %v44_v22  }
  0x82   :  { %52 = vst.msk [vmem:[#allocation0] sm:$0x1] %vm51_vm8, %v50_v23  }
  0x84   :  { %v56_v24 = vpop.permute.xlu0 %55   ;;  %v62_v25 = vpop.permute.xlu1 %61  }
  0x85   :  { %58 = vst.msk [vmem:[#allocation0] sm:$0x1] %vm57_vm9, %v56_v24  }
  0x86   :  { %64 = vst.msk [vmem:[#allocation0] sm:$0x1] %vm63_vm10, %v62_v25  }
  0x88   :  { %v68_v26 = vpop.permute.xlu0 %67   ;;  %v74_v27 = vpop.permute.xlu1 %73  }
  0x89   :  { %70 = vst.msk [vmem:[#allocation0] sm:$0x1] %vm69_vm11, %v68_v26  }
  0x8a   :  { %76 = vst.msk [vmem:[#allocation0] sm:$0x1] %vm75_vm12, %v74_v27  }
  0x8c   :  { %v80_v28 = vpop.permute.xlu0 %79   ;;  %v86_v29 = vpop.permute.xlu1 %85  }
  0x8d   :  { %82 = vst.msk [vmem:[#allocation0] sm:$0x1] %vm81_vm13, %v80_v28  }
  0x8e   :  { %88 = vst.msk [vmem:[#allocation0] sm:$0x1] %vm87_vm14, %v86_v29  }
  0x90   :  { %v92_v30 = vpop.permute.xlu0 %91  }
  0x91   :  { %94 = vst.msk [vmem:[#allocation0] sm:$0x1] %vm93_vm15, %v92_v30  }
  0x98   :  { %v98_v31 = vld [vmem:[#allocation0] sm:$0x1] }
  0x99   :  { %100 = vst [vmem:[%s208_s1] sm:$0x1] %v98_v31 }

// kernel: sqvae_forward.1
= control target key start
LH: loop header
LB: loop body
LE: loop exit
PB: predicated region body
PF: predicated region fallthrough
CT: control target
= control target key end

     0   :  { %s10828_s24 = smov 0   ;;  %s14568_s0 = inlined_call_operand.<no memory space> [shape: f32[1], index: 0, kind: input, shape index: {}]   ;;  %s14569_s1 = inlined_call_operand.vmem [shape: f32[2,16,64], index: 1, kind: input, shape index: {}]   ;;  %s14570_s2 = inlined_call_operand.vmem [shape: bf16[3,64,512], index: 2, kind: input, shape index: {}]   ;;  %s14571_s3 = inlined_call_operand.vmem [shape: f32[1,512], index: 3, kind: input, shape index: {}]   ;;  %s14572_s4 = inlined_call_operand.vmem [shape: bf16[3,512,256], index: 4, kind: input, shape index: {}]   ;;  %s14573_s5 = inlined_call_operand.vmem [shape: f32[1,256], index: 5, kind: input, shape index: {}]   ;;  %s14574_s6 = inlined_call_operand.vmem [shape: f32[16,32], index: 6, kind: input, shape index: {}]   ;;  %s14575_s7 = inlined_call_operand.vmem [shape: f32[32,16], index: 7, kind: input, shape index: {}]   ;;  %s14576_s8 = inlined_call_operand.vmem [shape: f32[1,32], index: 8, kind: input, shape index: {}]   ;;  %s14577_s9 = inlined_call_operand.vmem [shape: bf16[3,256,512], index: 9, kind: input, shape index: {}]   ;;  %s14578_s10 = inlined_call_operand.vmem [shape: f32[1,512], index: 10, kind: input, shape index: {}]   ;;  %s14579_s11 = inlined_call_operand.vmem [shape: bf16[3,512,64], index: 11, kind: input, shape index: {}]   ;;  %s14580_s12 = inlined_call_operand.vmem [shape: f32[1,64], index: 12, kind: input, shape index: {}]   ;;  %s14581_s13 = inlined_call_operand.vmem [shape: f32[2,16,256], index: 13, kind: output, shape index: {0}]   ;;  %s14582_s14 = inlined_call_operand.vmem [shape: f32[2,16,256], index: 14, kind: output, shape index: {1}]   ;;  %s14583_s15 = inlined_call_operand.vmem [shape: f32[2,16,64], index: 15, kind: output, shape index: {2}]   ;;  %s14584_s16 = inlined_call_operand.vmem [shape: f32[2,1,128], index: 16, kind: output, shape index: {3}]  }
   0x1   :  { %14753 = sst [smem:[#allocation112_spill]] %s14568_s0 }
   0x2   :  { %s14754_s23 = sld [smem:[#allocation112_spill]] }
   0x8   :  { %22 = sst [smem:[#allocation3]] %s14754_s23 }
   0x9 LB: > { %s8247_s25 = sadd.s32 4294967295, %s10729_s24   ;;  %p8251_p0 = scmp.ge.s32.totalorder %s10729_s24, 1  ;;  %s10729_s24 = sphi %s10828_s24, %s28_s24  }
   0xa   : > { %p470_p1 = scmp.lt.s32.totalorder %s10729_s24, 3 }
   0xc   : > { %p471_p2 = pnand %p8251_p0, %p470_p1 }
   0xe   : > { %474 = sbr.rel (%p471_p2) target bundleno = 3164 (0xc5c), region = 72 }
  0x15   : > { %v9768_v0 = vld [vmem:[%s14570_s2 + $0x84] ss:$16 sps:$4 sm:$0xff]   ;;  %p533_p3 = scmp.lt.s32.totalorder %s8247_s25, 1  ;;  %v9770_v1 = vld [vmem:[%s14570_s2 + $0x80] ss:$16 sps:$4 sm:$0xff]   ;;  %v10731_v2 = vmov 0  }
  0x16   : > { %776 = vmatprep.mubr.bf16.mxu0 %v10731_v2  ;;  %819 = vmatprep.mubr.bf16.mxu1 %v10731_v2  ;;  %v9771_v3 = vld [vmem:[%s14570_s2 + $0xa4] ss:$16 sps:$4 sm:$0xff]   ;;  %v9773_v4 = vld [vmem:[%s14570_s2 + $0xa0] ss:$16 sps:$4 sm:$0xff]   ;;  %vm557_vm0 = vcmask 1040384   ;;  %vm560_vm1 = vcmask 1044484  }
  0x17   : > { %744 = vmatprep.subr.bf16.mxu0 %v9768_v0  ;;  %s15070_s25 = smov (!%p533_p3, %s8247_s25), 1  ;;  %v9774_v5 = vld [vmem:[%s14570_s2 + $0xc4] ss:$16 sps:$4 sm:$0xff]   ;;  %vm558_vm2 = vsmask.f32 256  ;;  %v14755_v9 = vmov 0 }
  0x18   : > { %745 = vmatpush1.bf16.msra.mxu0 %v9770_v1  ;;  %s14585_s21 = sshll.u32 %s15070_s25, 4  ;;  %v9776_v6 = vld [vmem:[%s14570_s2 + $0xc0] ss:$16 sps:$4 sm:$0xff]   ;;  %vm559_vm3 = vmand %vm557_vm0, %vm558_vm2  ;;  %vm561_vm4 = vsmask.f32 4352  ;;  %vm611_vm13 = vcmask 519168  }
  0x19   : > { %746 = vmatprep.subr.bf16.mxu0 %v9771_v3  ;;  %s10861_s26 = scalar_lea.vmem %s14569_s1, %s14585_s21  ;;  %v9777_v7 = vld [vmem:[%s14570_s2 + $0xe4] ss:$16 sps:$4 sm:$0xff]   ;;  %vm562_vm5 = vmand %vm560_vm1, %vm561_vm4  ;;  %vm572_vm6 = vsmask.f32 7954  ;;  %vm570_vm8 = vsmask.f32 7938 }
  0x1a   : > { %v564_v8 = vld [vmem:[#allocation2] sm:$0x11]  ;;  %vm10872_vm7 = vmor %vm562_vm5, %vm559_vm3  ;;  %v582_v14 = vld [vmem:[%s10861_s26 + $0x8] sm:$0xff]  ;;  %vm589_vm12 = vsmask.f32 4368  ;;  %v14762_v28 = vmov 0 }
  0x1b   : > { %v14756_v9 = vsel %vm10872_vm7, 4294967295, %v14755_v9  ;;  %v575_v10 = vld [vmem:[#allocation2 + $0x20] sm:$0x11]  ;;  %v565_v12 = vsel %vm10872_vm7, 0, %v564_v8  ;;  %vm10881_vm9 = vmand %vm557_vm0, %vm570_vm8  ;;  %v9360_v18 = vpack.c.bf16 %v582_v14, %v582_v14  ;;  %v9789_v30 = vld [vmem:[%s14570_s2 + $0x8c] ss:$16 sps:$4 sm:$0xff]  }
  0x1c   : > { %747 = vmatpush1.bf16.msra.mxu0 %v9773_v4  ;;  %14757 = vst [vmem:[#allocation4_spill] sm:$0xff] %v14756_v9  ;;  %v581_v11 = vld [vmem:[%s10861_s26] sm:$0xff]  ;;  %566 = vst [vmem:[#allocation2] sm:$0x11] %v565_v12  ;;  %vm618_vm0 = vcmask 516096   ;;  %787 = vmatprep.subr.bf16.mxu1 %v9789_v30  ;;  %vm1306_vm4 = vcmask 1043456  }
  0x1d   : > { %748 = vmatprep.subr.bf16.mxu0 %v9774_v5  ;;  %v9359_v15 = vpack.c.bf16 %v581_v11, %v581_v11  ;;  %v9779_v16 = vld [vmem:[%s14570_s2 + $0xe0] ss:$16 sps:$4 sm:$0xff]   ;;  %vm10891_vm10 = vmand %vm560_vm1, %vm572_vm6  ;;  %v9782_v21 = vld [vmem:[%s14570_s2 + $0x4] ss:$16 sps:$4 sm:$0xff]   ;;  %v600_v23 = vshrl.u32 %v9360_v18, 16  ;;  %v603_v24 = vshll.u32 %v9360_v18, 16  ;;  %v10910_v27 = vpack.c.bf16 %v582_v14, %v581_v11 }
  0x1e   : > { %vm574_vm11 = vmor %vm10891_vm10, %vm10881_vm9  ;;  %v9780_v25 = vld [vmem:[%s14570_s2] ss:$16 sps:$4 sm:$0xff]   ;;  %vm740_vm1 = vcmask 523264   ;;  %v9785_v35 = vld [vmem:[%s14570_s2 + $0x24] ss:$16 sps:$4 sm:$0xff]   ;;  %vm1308_vm5 = vcmask 1047556  }
  0x1f   : > { %v592_v19 = vshrl.u32 %v9359_v15, 16  ;;  %v595_v20 = vshll.u32 %v9359_v15, 16  ;;  %v576_v22 = vsel %vm574_vm11, 0, %v575_v10  ;;  %vm10913_vm14 = vmor %vm558_vm2, %vm589_vm12  ;;  %v602_v29 = vrot.slane %v600_v23, 7  ;;  %v9794_v36 = vld [vmem:[%s14570_s2 + $0x88] ss:$16 sps:$4 sm:$0xff]  }
  0x20   : > { %749 = vmatpush1.bf16.msra.mxu0 %v9776_v6  ;;  %577 = vst [vmem:[#allocation2 + $0x20] sm:$0x11] %v576_v22  ;;  %v14763_v28 = vsel %vm10913_vm14, 4294967295, %v14762_v28  ;;  %vm10922_vm15 = vmand %vm611_vm13, %vm570_vm8  ;;  %v9783_v39 = vld [vmem:[%s14570_s2 + $0x20] ss:$16 sps:$4 sm:$0xff]   ;;  %788 = vmatpush1.bf16.msra.mxu1 %v9794_v36  ;;  %s14700_s17 = sshll.u32 %s15070_s25, 5 }
  0x21   : > { %750 = vmatprep.subr.bf16.mxu0 %v9777_v7  ;;  %v594_v26 = vrot.slane %v592_v19, 7  ;;  %14764 = vst [vmem:[#allocation5_spill] sm:$0xff] %v14763_v28  ;;  %v605_v34 = vor.u32 %v603_v24, %v602_v29  ;;  %v607_v37 = vrot.slane %v602_v29, 4  ;;  %v9795_v40 = vld [vmem:[%s14570_s2 + $0xac] ss:$16 sps:$4 sm:$0xff]   ;;  %vm619_vm3 = vmand %vm618_vm0, %vm558_vm2  ;;  %vm1027_vm2 = vcmask 1046528   ;;  %s11761_s20 = scalar_lea.vmem %s14581_s13, %s14700_s17 }
  0x22   : > { %v9788_v43 = vld [vmem:[%s14570_s2 + $0x44] ss:$16 sps:$4 sm:$0xff]   ;;  %789 = vmatprep.subr.bf16.mxu1 %v9795_v40  ;;  %v9800_v44 = vld [vmem:[%s14570_s2 + $0xa8] ss:$16 sps:$4 sm:$0xff]   ;;  %v9802_v46 = vld [vmem:[%s14570_s2 + $0xcc] ss:$16 sps:$4 sm:$0xff]  }
  0x23   : > { %v597_v31 = vor.u32 %v595_v20, %v594_v26  ;;  %v598_v32 = vrot.slane %v594_v26, 4  ;;  %v613_v38 = vld [vmem:[#allocation2] sm:$0xf]  ;;  %v9807_v49 = vld [vmem:[%s14570_s2 + $0xc8] ss:$16 sps:$4 sm:$0xff]   ;;  %vm11177_vm9 = vmand %vm1306_vm4, %vm570_vm8  ;;  %vm2942_vm8 = vcmask 130048  }
  0x24   : > { %751 = vmatpush1.bf16.msra.mxu0 %v9779_v16  ;;  %v9786_v48 = vld [vmem:[%s14570_s2 + $0x40] ss:$16 sps:$4 sm:$0xff]   ;;  %790 = vmatpush1.bf16.msra.mxu1 %v9800_v44  ;;  %v9808_v50 = vld [vmem:[%s14570_s2 + $0xec] ss:$16 sps:$4 sm:$0xff]   ;;  %v9793_v51 = vld [vmem:[%s14570_s2 + $0x64] ss:$16 sps:$4 sm:$0xff]  }
  0x25   : > { %918 = vmatprep.subr.bf16.mxu0 %v9782_v21  ;;  %v606_v41 = vsel %vm10913_vm14, %v598_v32, %v605_v34  ;;  %v614_v42 = vsel %vm10922_vm15, %v597_v31, %v613_v38  ;;  %791 = vmatprep.subr.bf16.mxu1 %v9802_v46  ;;  %v9791_v52 = vld [vmem:[%s14570_s2 + $0x60] ss:$16 sps:$4 sm:$0xff]   ;;  %v9813_v55 = vld [vmem:[%s14570_s2 + $0xe8] ss:$16 sps:$4 sm:$0xff]   ;;  %v9816_v56 = vld [vmem:[%s14570_s2 + $0xc] ss:$16 sps:$4 sm:$0xff]  }
  0x26   : > { %615 = vst [vmem:[#allocation2] sm:$0xf] %v614_v42  ;;  %617 = vst.msk [vmem:[#allocation2 + $0x10] sm:$0xf] %vm611_vm13, %v606_v41  ;;  %v9799_v57 = vld [vmem:[%s14570_s2 + $0x104] ss:$16 sps:$4 sm:$0xff]  }
  0x27   : > { %8294 = vmatmul.mubr.msk.bf16.vlgmr.msra.gmra.mrb[0].mxu0 %vm740_vm1, %v10910_v27  ;;  %v620_v45 = vld [vmem:[#allocation2 + $0x20] sm:$0x1]  ;;  %v9814_v59 = vld [vmem:[%s14570_s2 + $0x8] ss:$16 sps:$4 sm:$0xff]   ;;  %v9806_v61 = vld [vmem:[%s14570_s2 + $0x124] ss:$16 sps:$4 sm:$0xff]  }
  0x28   : > { %919 = vmatpush1.bf16.msra.mxu0 %v9780_v25  ;;  %950 = vmatprep.mubr.bf16.mxu0 %v10731_v2  ;;  %v621_v47 = vsel %vm619_vm3, %v607_v37, %v620_v45  ;;  %v9797_v60 = vld [vmem:[%s14570_s2 + $0x100] ss:$16 sps:$4 sm:$0xff]   ;;  %v9822_v62 = vld [vmem:[%s14570_s2 + $0x2c] ss:$16 sps:$4 sm:$0xff]   ;;  %v9820_v0 = vld [vmem:[%s14570_s2 + $0x28] ss:$16 sps:$4 sm:$0xff]  }
  0x29   : > { %920 = vmatprep.subr.bf16.mxu0 %v9785_v35  ;;  %622 = vst [vmem:[#allocation2 + $0x20] sm:$0x1] %v621_v47  ;;  %792 = vmatpush1.bf16.msra.mxu1 %v9807_v49  ;;  %v9804_v63 = vld [vmem:[%s14570_s2 + $0x120] ss:$16 sps:$4 sm:$0xff]   ;;  %v9827_v1 = vld [vmem:[%s14570_s2 + $0x4c] ss:$16 sps:$4 sm:$0xff]   ;;  %vm1309_vm10 = vmand %vm1308_vm5, %vm572_vm6 }
  0x2a   : > { %793 = vmatprep.subr.bf16.mxu1 %v9808_v50  ;;  %v9812_v3 = vld [vmem:[%s14570_s2 + $0x144] ss:$16 sps:$4 sm:$0xff]   ;;  %v9810_v5 = vld [vmem:[%s14570_s2 + $0x140] ss:$16 sps:$4 sm:$0xff]   ;;  %v9825_v7 = vld [vmem:[%s14570_s2 + $0x48] ss:$16 sps:$4 sm:$0xff]  }
  0x2b   : > { %v9830_v10 = vld [vmem:[%s14570_s2 + $0x6c] ss:$16 sps:$4 sm:$0xff]   ;;  %v9819_v11 = vld [vmem:[%s14570_s2 + $0x164] ss:$16 sps:$4 sm:$0xff]   ;;  %v9817_v12 = vld [vmem:[%s14570_s2 + $0x160] ss:$16 sps:$4 sm:$0xff]  }
  0x2c   : > { %921 = vmatpush1.bf16.msra.mxu0 %v9783_v39  ;;  %v9828_v14 = vld [vmem:[%s14570_s2 + $0x68] ss:$16 sps:$4 sm:$0xff]   ;;  %v9833_v18 = vld [vmem:[%s14570_s2 + $0x10c] ss:$16 sps:$4 sm:$0xff]   ;;  %vm11192_vm6 = vmor %vm1309_vm10, %vm11177_vm9  ;;  %s14704_s22 = smov 96   ;;  %s14701_s23 = smov 112  }
  0x2d   : > { %922 = vmatprep.subr.bf16.mxu0 %v9788_v43  ;;  %v623_v53 = vld [vmem:[#allocation2] sm:$0xf]  ;;  %v624_v54 = vld [vmem:[#allocation2 + $0x10] sm:$0xf]  ;;  %794 = vmatpush1.bf16.msra.mxu1 %v9813_v55  ;;  %v9845_v19 = vld [vmem:[%s14572_s4 + $0x204] ss:$8 sps:$4 sm:$0xff]  }
  0x2e   : > { %v8296_v58 = vcombine.low %v623_v53, %v624_v54  ;;  %961 = vmatprep.subr.bf16.mxu1 %v9816_v56  ;;  %v625_v4 = vld [vmem:[#allocation2] sm:$0xe]  ;;  %v9831_v20 = vld [vmem:[%s14570_s2 + $0x108] ss:$16 sps:$4 sm:$0xff]   ;;  %v9836_v22 = vld [vmem:[%s14570_s2 + $0x12c] ss:$16 sps:$4 sm:$0xff]  }
  0x2f   : > { %v8331_v8 = vcombine.low %v625_v4, %v624_v54  ;;  %v9843_v23 = vld [vmem:[%s14572_s4 + $0x200] ss:$8 sps:$4 sm:$0xff]   ;;  %v9848_v24 = vld [vmem:[%s14572_s4 + $0x214] ss:$8 sps:$4 sm:$0xff]   ;;  %v9851_v29 = vld [vmem:[%s14572_s4 + $0x224] ss:$8 sps:$4 sm:$0xff]  }
  0x30   : > { %923 = vmatpush1.bf16.msra.mxu0 %v9786_v48  ;;  %8295 = vmatmul.mubr.msk.bf16.vlgmr.msra.gmra.mrb[0].mxu1 %vm740_vm1, %v10910_v27  ;;  %v9824_v6 = vld [vmem:[#allocation2 + $0x20] ss:$0 sps:$4 sm:$0x11]   ;;  %v9834_v25 = vld [vmem:[%s14570_s2 + $0x128] ss:$16 sps:$4 sm:$0xff]   ;;  %s14706_s27 = smov 80  }
  0x31   : > { %924 = vmatprep.subr.bf16.mxu0 %v9793_v51  ;;  %962 = vmatpush1.bf16.msra.mxu1 %v9814_v59  ;;  %v1028_v15 = vrot.slane %v8331_v8, 1  ;;  %v1029_v16 = vrot.slane %v9824_v6, 1  ;;  %v9839_v26 = vld [vmem:[%s14570_s2 + $0x14c] ss:$16 sps:$4 sm:$0xff]   ;;  %v9846_v27 = vld [vmem:[%s14572_s4 + $0x210] ss:$8 sps:$4 sm:$0xff]  }
  0x32   : > { %963 = vmatprep.subr.bf16.mxu1 %v9822_v62  ;;  %993 = vmatprep.mubr.bf16.mxu1 %v10731_v2  ;;  %v9837_v30 = vld [vmem:[%s14570_s2 + $0x148] ss:$16 sps:$4 sm:$0xff]   ;;  %v9854_v33 = vld [vmem:[%s14572_s4 + $0x234] ss:$8 sps:$4 sm:$0xff]   ;;  %v9857_v35 = vld [vmem:[%s14572_s4 + $0x244] ss:$8 sps:$4 sm:$0xff]  }
  0x33   : > { %v1030_v21 = vsel %vm1027_vm2, %v1028_v15, %v1029_v16  ;;  %v9849_v31 = vld [vmem:[%s14572_s4 + $0x220] ss:$8 sps:$4 sm:$0xff]   ;;  %v9852_v34 = vld [vmem:[%s14572_s4 + $0x230] ss:$8 sps:$4 sm:$0xff]   ;;  %v9860_v37 = vld [vmem:[%s14572_s4 + $0x254] ss:$8 sps:$4 sm:$0xff]  }
  0x34   : > { %925 = vmatpush1.bf16.msra.mxu0 %v9791_v52  ;;  %v9840_v32 = vld [vmem:[%s14570_s2 + $0x168] ss:$16 sps:$4 sm:$0xff]   ;;  %v9863_v39 = vld [vmem:[%s14572_s4 + $0x264] ss:$8 sps:$4 sm:$0xff]   ;;  %v9866_v41 = vld [vmem:[%s14572_s4 + $0x274] ss:$8 sps:$4 sm:$0xff]  }
  0x35   : > { %1114 = vmatprep.subr.bf16.mxu0 %v9799_v57  ;;  %964 = vmatpush1.bf16.msra.mxu1 %v9820_v0  ;;  %v9855_v36 = vld [vmem:[%s14572_s4 + $0x240] ss:$8 sps:$4 sm:$0xff]   ;;  %v9858_v38 = vld [vmem:[%s14572_s4 + $0x250] ss:$8 sps:$4 sm:$0xff]   ;;  %v9869_v43 = vld [vmem:[%s14572_s4 + $0x284] ss:$8 sps:$4 sm:$0xff]   ;;  %v14588_v0 = vlaneseq }
  0x36   : > { %965 = vmatprep.subr.bf16.mxu1 %v9827_v1  ;;  %v9861_v40 = vld [vmem:[%s14572_s4 + $0x260] ss:$8 sps:$4 sm:$0xff]   ;;  %v9864_v42 = vld [vmem:[%s14572_s4 + $0x270] ss:$8 sps:$4 sm:$0xff]   ;;  %v9872_v45 = vld [vmem:[%s14572_s4 + $0x294] ss:$8 sps:$4 sm:$0xff]  }
  0x37   : > { %8313 = vmatmul.mubr.msk.bf16.vlgmr.msra.gmra.mrb[0].mxu0 %vm740_vm1, %v8296_v58  ;;  %v9867_v44 = vld [vmem:[%s14572_s4 + $0x280] ss:$8 sps:$4 sm:$0xff]   ;;  %v9870_v46 = vld [vmem:[%s14572_s4 + $0x290] ss:$8 sps:$4 sm:$0xff]   ;;  %v9875_v47 = vld [vmem:[%s14572_s4 + $0x2a4] ss:$8 sps:$4 sm:$0xff]  }
  0x38   : > { %1115 = vmatpush1.bf16.msra.mxu0 %v9797_v60  ;;  %1146 = vmatprep.mubr.bf16.mxu0 %v10731_v2  ;;  %v9873_v48 = vld [vmem:[%s14572_s4 + $0x2a0] ss:$8 sps:$4 sm:$0xff]   ;;  %v9878_v49 = vld [vmem:[%s14572_s4 + $0x2b4] ss:$8 sps:$4 sm:$0xff]   ;;  %v9876_v50 = vld [vmem:[%s14572_s4 + $0x2b0] ss:$8 sps:$4 sm:$0xff]  }
  0x39   : > { %1116 = vmatprep.subr.bf16.mxu0 %v9806_v61  ;;  %966 = vmatpush1.bf16.msra.mxu1 %v9825_v7  ;;  %v9881_v51 = vld [vmem:[%s14572_s4 + $0x2c4] ss:$8 sps:$4 sm:$0xff]   ;;  %v9879_v52 = vld [vmem:[%s14572_s4 + $0x2c0] ss:$8 sps:$4 sm:$0xff]   ;;  %v9884_v53 = vld [vmem:[%s14572_s4 + $0x2d4] ss:$8 sps:$4 sm:$0xff]  }
  0x3a   : > { %967 = vmatprep.subr.bf16.mxu1 %v9830_v10  ;;  %v9882_v54 = vld [vmem:[%s14572_s4 + $0x2d0] ss:$8 sps:$4 sm:$0xff]   ;;  %v9887_v55 = vld [vmem:[%s14572_s4 + $0x2e4] ss:$8 sps:$4 sm:$0xff]   ;;  %v9885_v56 = vld [vmem:[%s14572_s4 + $0x2e0] ss:$8 sps:$4 sm:$0xff]  }
  0x3b   : > { %v9890_v57 = vld [vmem:[%s14572_s4 + $0x2f4] ss:$8 sps:$4 sm:$0xff]   ;;  %v9893_v59 = vld [vmem:[%s14572_s4 + $0x304] ss:$8 sps:$4 sm:$0xff]   ;;  %v11163_v1 = vshrl.u32 %v14588_v0, 7  ;;  %s14708_s28 = smov 64  }
  0x3c   : > { %1117 = vmatpush1.bf16.msra.mxu0 %v9804_v63  ;;  %v567_v60 = vld [vmem:[#allocation2 + $0x8] sm:$0x11]  ;;  %s14710_s29 = smov 48   ;;  %s14713_s30 = smov 32  }
  0x3d   : > { %1118 = vmatprep.subr.bf16.mxu0 %v9812_v3  ;;  %968 = vmatpush1.bf16.msra.mxu1 %v9828_v14  ;;  %v578_v61 = vld [vmem:[#allocation2 + $0x28] sm:$0x11]  ;;  %v568_v62 = vsel %vm10872_vm7, 0, %v567_v60  ;;  %14767 = vst [vmem:[#allocation6_spill] sm:$0xff] %v11163_v1  ;;  %v1208_v3 = vld [vmem:[%s14571_s3] sm:$0xf] }
  0x3e   : > { %1157 = vmatprep.subr.bf16.mxu1 %v9833_v18  ;;  %v579_v63 = vsel %vm574_vm11, 0, %v578_v61  ;;  %569 = vst [vmem:[#allocation2 + $0x8] sm:$0x11] %v568_v62  ;;  %v11169_v4 = vsub.s32 0, %v11163_v1  ;;  %s14715_s0 = smov 16   ;;  %s12025_s18 = sld [smem:[#allocation3]] }
  0x3f   : > { %580 = vst [vmem:[#allocation2 + $0x28] sm:$0x11] %v579_v63  ;;  %vm3498_vm11 = vcmask 261120   ;;  %s14902_s17 = smov 80   ;;  %s14905_s19 = smov 96  }
  0x40   : > { %1119 = vmatpush1.bf16.msra.mxu0 %v9810_v5  ;;  %8314 = vmatmul.mubr.msk.bf16.vlgmr.msra.gmra.mrb[0].mxu1 %vm740_vm1, %v8296_v58  ;;  %v9888_v58 = vld [vmem:[%s14572_s4 + $0x2f0] ss:$8 sps:$4 sm:$0xff]   ;;  %14768 = vst [vmem:[#allocation7_spill] sm:$0xff] %v11169_v4  ;;  %v11172_v5 = vsub.s32 1, %v11163_v1  ;;  %v1213_v13 = vrot.slane %v1208_v3, %v11169_v4 }
  0x41   : > { %1120 = vmatprep.subr.bf16.mxu0 %v9819_v11  ;;  %1158 = vmatpush1.bf16.msra.mxu1 %v9831_v20 }
  0x42   : > { %1159 = vmatprep.subr.bf16.mxu1 %v9836_v22  ;;  %1189 = vmatprep.mubr.bf16.mxu1 %v10731_v2  ;;  %v9842_v2 = vld [vmem:[%s14570_s2 + $0x16c] ss:$16 sps:$4 sm:$0xff]   ;;  %14769 = vst [vmem:[#allocation8_spill] sm:$0xff] %v11172_v5  ;;  %v1217_v17 = vrot.slane %v1208_v3, %v11172_v5 }
  0x44   : > { %1121 = vmatpush1.bf16.msra.mxu0 %v9817_v12 }
  0x45   : > { %1782 = vmatprep.subr.bf16.mxu0 %v9845_v19  ;;  %1160 = vmatpush1.bf16.msra.mxu1 %v9834_v25 }
  0x46   : > { %1161 = vmatprep.subr.bf16.mxu1 %v9839_v26 }
  0x47   : > { %8349 = vmatmul.mubr.msk.bf16.vlgmr.msra.gmra.mrb[0].mxu0 %vm740_vm1, %v1030_v21 }
  0x48   : > { %1783 = vmatpush1.bf16.msra.mxu0 %v9843_v23 }
  0x49   : > { %1784 = vmatprep.subr.bf16.mxu0 %v9848_v24  ;;  %1162 = vmatpush1.bf16.msra.mxu1 %v9837_v30  ;;  %v9896_v30 = vld [vmem:[%s14572_s4 + $0x314] ss:$8 sps:$4 sm:$0xff]  }
  0x4a   : > { %1163 = vmatprep.subr.bf16.mxu1 %v9842_v2  ;;  %v14586_v2 = vsub.s32 3, %v11163_v1 }
  0x4c   : > { %1785 = vmatpush1.bf16.msra.mxu0 %v9846_v27  ;;  %v9891_v27 = vld [vmem:[%s14572_s4 + $0x300] ss:$8 sps:$4 sm:$0xff]  }
  0x4d   : > { %1786 = vmatprep.subr.bf16.mxu0 %v9851_v29  ;;  %1164 = vmatpush1.bf16.msra.mxu1 %v9840_v32  ;;  %v14587_v29 = vsub.s32 2, %v11163_v1 }
  0x50   : > { %1787 = vmatpush1.bf16.msra.mxu0 %v9849_v31  ;;  %8350 = vmatmul.mubr.msk.bf16.vlgmr.msra.gmra.mrb[0].mxu1 %vm740_vm1, %v1030_v21  ;;  %v1314_v21 = vld [vmem:[#allocation2 + $0x8] sm:$0xff] }
  0x51   : > { %1788 = vmatprep.subr.bf16.mxu0 %v9854_v33 }
  0x54   : > { %1789 = vmatpush1.bf16.msra.mxu0 %v9852_v34  ;;  %v14772_v34 = vmov 0 }
  0x55   : > { %1790 = vmatprep.subr.bf16.mxu0 %v9857_v35  ;;  %v14773_v34 = vsel %vm11192_vm6, 4294967295, %v14772_v34  ;;  %v1311_v35 = vld [vmem:[#allocation2] sm:$0xff] }
  0x56   : > { %14774 = vst [vmem:[#allocation9_spill] sm:$0xff] %v14773_v34 }
  0x58   : > { %1791 = vmatpush1.bf16.msra.mxu0 %v9855_v36 }
  0x59   : > { %1792 = vmatprep.subr.bf16.mxu0 %v9860_v37 }
  0x5c   : > { %1793 = vmatpush1.bf16.msra.mxu0 %v9858_v38 }
  0x5d   : > { %1794 = vmatprep.subr.bf16.mxu0 %v9863_v39  ;;  %v9894_v39 = vld [vmem:[%s14572_s4 + $0x310] ss:$8 sps:$4 sm:$0xff]  }
  0x60   : > { %1795 = vmatpush1.bf16.msra.mxu0 %v9861_v40  ;;  %v1221_v40 = vrot.slane %v1208_v3, %v14587_v29 }
  0x61   : > { %1796 = vmatprep.subr.bf16.mxu0 %v9866_v41  ;;  %v1319_v41 = vld [vmem:[#allocation2 + $0x20] sm:$0x11] }
  0x64   : > { %1797 = vmatpush1.bf16.msra.mxu0 %v9864_v42  ;;  %v9899_v42 = vld [vmem:[%s14572_s4 + $0x324] ss:$8 sps:$4 sm:$0xff]  }
  0x65   : > { %1798 = vmatprep.subr.bf16.mxu0 %v9869_v43  ;;  %v1225_v43 = vrot.slane %v1208_v3, %v14586_v2  ;;  %v9900_v3 = vld [vmem:[%s14572_s4 + $0x330] ss:$8 sps:$4 sm:$0xff]  }
  0x68   : > { %1799 = vmatpush1.bf16.msra.mxu0 %v9867_v44 }
  0x69   : > { %1800 = vmatprep.subr.bf16.mxu0 %v9872_v45 }
  0x6c   : > { %1801 = vmatpush1.bf16.msra.mxu0 %v9870_v46 }
  0x6d   : > { %1802 = vmatprep.subr.bf16.mxu0 %v9875_v47 }
  0x70   : > { %1803 = vmatpush1.bf16.msra.mxu0 %v9873_v48 }
  0x71   : > { %1804 = vmatprep.subr.bf16.mxu0 %v9878_v49 }
  0x74   : > { %1805 = vmatpush1.bf16.msra.mxu0 %v9876_v50 }
  0x75   : > { %1806 = vmatprep.subr.bf16.mxu0 %v9881_v51  ;;  %v9897_v51 = vld [vmem:[%s14572_s4 + $0x320] ss:$8 sps:$4 sm:$0xff]  }
  0x78   : > { %1807 = vmatpush1.bf16.msra.mxu0 %v9879_v52 }
  0x79   : > { %1808 = vmatprep.subr.bf16.mxu0 %v9884_v53 }
  0x7c   : > { %1809 = vmatpush1.bf16.msra.mxu0 %v9882_v54  ;;  %v9902_v54 = vld [vmem:[%s14572_s4 + $0x334] ss:$8 sps:$4 sm:$0xff]  }
  0x7d   : > { %1810 = vmatprep.subr.bf16.mxu0 %v9887_v55 }
  0x80   : > { %1811 = vmatpush1.bf16.msra.mxu0 %v9885_v56 }
  0x81   : > { %1812 = vmatprep.subr.bf16.mxu0 %v9890_v57 }
  0x84   : > { %1813 = vmatpush1.bf16.msra.mxu0 %v9888_v58 }
  0x85   : > { %1825 = vmatprep.subr.bf16.mxu0 %v9893_v59 }
 0x11a   : > { %v1148_v6 = vpop.f32.mrb[0].mxu0 }
 0x11b   : > { %v1230_v7 = vadd.f32 %v1213_v13, %v1148_v6  ;;  %v1150_v8 = vpop.f32.mrb[1].mxu0 }
 0x11c   : > { %v1231_v10 = vadd.f32 %v1217_v17, %v1150_v8  ;;  %v1152_v11 = vpop.f32.mrb[2].mxu0 }
 0x11d   : > { %v1238_v12 = vmax.f32 %v1230_v7, 0.0  ;;  %v1234_v14 = vadd.f32 %v1213_v13, %v1152_v11  ;;  %v1154_v15 = vpop.f32.mrb[3].mxu0 }
 0x11e   : > { %v1239_v16 = vmax.f32 %v1231_v10, 0.0  ;;  %v1235_v18 = vadd.f32 %v1217_v17, %v1154_v15  ;;  %v9905_v17 = vld [vmem:[%s14572_s4 + $0x344] ss:$8 sps:$4 sm:$0xff]   ;;  %v9903_v15 = vld [vmem:[%s14572_s4 + $0x340] ss:$8 sps:$4 sm:$0xff]  }
 0x11f   : > { %v1242_v19 = vmax.f32 %v1234_v14, 0.0 }
 0x120   : > { %v9361_v20 = vpack.c.bf16 %v1239_v16, %v1238_v12  ;;  %v1243_v22 = vmax.f32 %v1235_v18, 0.0  ;;  %v9908_v18 = vld [vmem:[%s14572_s4 + $0x354] ss:$8 sps:$4 sm:$0xff]  }
 0x121   : > { %v1246_v23 = vpack.c.bf16 %v1242_v19, %v1238_v12 }
 0x122   : > { %v1267_v24 = vshrl.u32 %v9361_v20, 16  ;;  %v1247_v25 = vpack.c.bf16 %v1243_v22, %v1239_v16  ;;  %v9363_v26 = vpack.c.bf16 %v1243_v22, %v1242_v19  ;;  %v1270_v32 = vshll.u32 %v9361_v20, 16 }
 0x123   : > { %v1191_v48 = vpop.f32.mrb[0].mxu1 }
 0x124   : > { %v1269_v31 = vrot.slane %v1267_v24, 7  ;;  %v1282_v33 = vshrl.u32 %v9363_v26, 16  ;;  %1814 = vmatprep.mubr.bf16.mxu0 %v1247_v25  ;;  %v1285_v38 = vshll.u32 %v9363_v26, 16  ;;  %v1232_v52 = vadd.f32 %v1221_v40, %v1191_v48  ;;  %v1193_v53 = vpop.f32.mrb[1].mxu1  ;;  %v9906_v25 = vld [vmem:[%s14572_s4 + $0x350] ss:$8 sps:$4 sm:$0xff]  }
 0x125   : > { %1815 = vmatmul.mubr.bf16.vlgmr.msra.gmra.mrb[4].mxu0 %v1246_v23  ;;  %v1233_v55 = vadd.f32 %v1225_v43, %v1193_v53  ;;  %v1195_v56 = vpop.f32.mrb[2].mxu1  ;;  %v1322_v26 = vld [vmem:[#allocation2 + $0x28] sm:$0x11]  ;;  %v9926_v48 = vld [vmem:[%s14572_s4 + $0x3b4] ss:$8 sps:$4 sm:$0xff]  }
 0x126   : > { %v1272_v36 = vor.u32 %v1270_v32, %v1269_v31  ;;  %v1284_v37 = vrot.slane %v1282_v33, 7  ;;  %1826 = vmatpush1.bf16.msra.mxu0 %v9891_v27  ;;  %v1280_v44 = vrot.slane %v1269_v31, 4  ;;  %v1240_v59 = vmax.f32 %v1232_v52, 0.0  ;;  %v1197_v61 = vpop.f32.mrb[3].mxu1  ;;  %v9911_v32 = vld [vmem:[%s14572_s4 + $0x364] ss:$8 sps:$4 sm:$0xff]  }
 0x127   : > { %1827 = vmatprep.subr.bf16.mxu0 %v9896_v30  ;;  %v1236_v60 = vadd.f32 %v1221_v40, %v1195_v56  ;;  %v1241_v62 = vmax.f32 %v1233_v55, 0.0  ;;  %v1237_v63 = vadd.f32 %v1225_v43, %v1197_v61  ;;  %v9912_v40 = vld [vmem:[%s14572_s4 + $0x370] ss:$8 sps:$4 sm:$0xff]   ;;  %v9920_v43 = vld [vmem:[%s14572_s4 + $0x394] ss:$8 sps:$4 sm:$0xff]  }
 0x128   : > { %v11208_v45 = vsel %vm11192_vm6, %v1272_v36, %v1311_v35  ;;  %v1287_v46 = vor.u32 %v1285_v38, %v1284_v37  ;;  %v1298_v47 = vrot.slane %v1284_v37, 4  ;;  %v9909_v36 = vld [vmem:[%s14572_s4 + $0x360] ss:$8 sps:$4 sm:$0xff]   ;;  %v9932_v53 = vld [vmem:[%s14572_s4 + $0x3d4] ss:$8 sps:$4 sm:$0xff]  }
 0x129   : > { %1313 = vst [vmem:[#allocation2] sm:$0xff] %v11208_v45  ;;  %v1244_v13 = vmax.f32 %v1236_v60, 0.0  ;;  %v9362_v6 = vpack.c.bf16 %v1241_v62, %v1240_v59  ;;  %v1245_v7 = vmax.f32 %v1237_v63, 0.0  ;;  %v9927_v52 = vld [vmem:[%s14572_s4 + $0x3c0] ss:$8 sps:$4 sm:$0xff]  }
 0x12a   : > { %v11213_v49 = vsel %vm10913_vm14, %v1280_v44, %v1287_v46  ;;  %v1320_v50 = vsel %vm10872_vm7, %v1298_v47, %v1319_v41  ;;  %1828 = vmatpush1.bf16.msra.mxu0 %v9894_v39  ;;  %v9914_v39 = vld [vmem:[%s14572_s4 + $0x374] ss:$8 sps:$4 sm:$0xff]   ;;  %v9917_v41 = vld [vmem:[%s14572_s4 + $0x384] ss:$8 sps:$4 sm:$0xff]   ;;  %v9918_v44 = vld [vmem:[%s14572_s4 + $0x390] ss:$8 sps:$4 sm:$0xff]  }
 0x12b   : > { %1321 = vst [vmem:[#allocation2 + $0x20] sm:$0x11] %v1320_v50  ;;  %1829 = vmatprep.subr.bf16.mxu0 %v9899_v42  ;;  %v8484_v57 = vcombine.high %v11208_v45, %v11213_v49  ;;  %v8483_v58 = vcombine.low %v11208_v45, %v11213_v49  ;;  %v11233_v8 = vpack.c.bf16 %v1244_v13, %v1240_v59  ;;  %v1274_v10 = vshrl.u32 %v9362_v6, 16  ;;  %v9915_v42 = vld [vmem:[%s14572_s4 + $0x380] ss:$8 sps:$4 sm:$0xff]  }
 0x12c   : > { %v1277_v11 = vshll.u32 %v9362_v6, 16  ;;  %v1249_v12 = vpack.c.bf16 %v1245_v7, %v1241_v62  ;;  %v9364_v14 = vpack.c.bf16 %v1245_v7, %v1244_v13  ;;  %v9923_v46 = vld [vmem:[%s14572_s4 + $0x3a4] ss:$8 sps:$4 sm:$0xff]   ;;  %v9921_v47 = vld [vmem:[%s14572_s4 + $0x3a0] ss:$8 sps:$4 sm:$0xff]  }
 0x12d   : > { %v1276_v16 = vrot.slane %v1274_v10, 7  ;;  %v9924_v50 = vld [vmem:[%s14572_s4 + $0x3b0] ss:$8 sps:$4 sm:$0xff]   ;;  %v9935_v55 = vld [vmem:[%s14572_s4 + $0x3e4] ss:$8 sps:$4 sm:$0xff]  }
 0x12e   : > { %1830 = vmatpush1.bf16.msra.mxu0 %v9897_v51  ;;  %v1291_v19 = vshrl.u32 %v9364_v14, 16  ;;  %v1294_v20 = vshll.u32 %v9364_v14, 16  ;;  %1857 = vmatprep.mubr.bf16.mxu0 %v1249_v12  ;;  %v9929_v51 = vld [vmem:[%s14572_s4 + $0x3c4] ss:$8 sps:$4 sm:$0xff]   ;;  %v9933_v56 = vld [vmem:[%s14572_s4 + $0x3e0] ss:$8 sps:$4 sm:$0xff]  }
 0x12f   : > { %1831 = vmatprep.subr.bf16.mxu0 %v9902_v54  ;;  %v1279_v22 = vor.u32 %v1277_v11, %v1276_v16  ;;  %v1289_v23 = vrot.slane %v1276_v16, 4  ;;  %v9930_v54 = vld [vmem:[%s14572_s4 + $0x3d0] ss:$8 sps:$4 sm:$0xff]   ;;  %v9938_v59 = vld [vmem:[%s14572_s4 + $0x3f4] ss:$8 sps:$4 sm:$0xff]  }
 0x130   : > { %v1293_v24 = vrot.slane %v1291_v19, 7  ;;  %v9936_v60 = vld [vmem:[%s14572_s4 + $0x3f0] ss:$8 sps:$4 sm:$0xff]   ;;  %v9941_v61 = vld [vmem:[%s14572_s4 + $0x4] ss:$8 sps:$4 sm:$0xff]  }
 0x131   : > { %v11246_v27 = vsel %vm11192_vm6, %v1279_v22, %v1314_v21  ;;  %v9939_v62 = vld [vmem:[%s14572_s4] ss:$8 sps:$4 sm:$0xff]   ;;  %v9944_v63 = vld [vmem:[%s14572_s4 + $0x14] ss:$8 sps:$4 sm:$0xff]   ;;  %v9947_v13 = vld [vmem:[%s14572_s4 + $0x24] ss:$8 sps:$4 sm:$0xff]  }
 0x132   : > { %1832 = vmatpush1.bf16.msra.mxu0 %v9900_v3  ;;  %v1296_v30 = vor.u32 %v1294_v20, %v1293_v24  ;;  %v1299_v31 = vrot.slane %v1293_v24, 4  ;;  %1316 = vst [vmem:[#allocation2 + $0x8] sm:$0xff] %v11246_v27  ;;  %v9942_v3 = vld [vmem:[%s14572_s4 + $0x10] ss:$8 sps:$4 sm:$0xff]   ;;  %v9950_v6 = vld [vmem:[%s14572_s4 + $0x34] ss:$8 sps:$4 sm:$0xff]  }
 0x133   : > { %1833 = vmatprep.subr.bf16.mxu0 %v9905_v17  ;;  %v9945_v17 = vld [vmem:[%s14572_s4 + $0x20] ss:$8 sps:$4 sm:$0xff]   ;;  %v9953_v7 = vld [vmem:[%s14572_s4 + $0x44] ss:$8 sps:$4 sm:$0xff]   ;;  %v9956_v10 = vld [vmem:[%s14572_s4 + $0x54] ss:$8 sps:$4 sm:$0xff]  }
 0x134   : > { %v11254_v33 = vsel %vm10913_vm14, %v1289_v23, %v1296_v30  ;;  %v1323_v35 = vsel %vm10872_vm7, %v1299_v31, %v1322_v26  ;;  %v9954_v11 = vld [vmem:[%s14572_s4 + $0x50] ss:$8 sps:$4 sm:$0xff]   ;;  %v9959_v12 = vld [vmem:[%s14572_s4 + $0x64] ss:$8 sps:$4 sm:$0xff]   ;;  %v9957_v14 = vld [vmem:[%s14572_s4 + $0x60] ss:$8 sps:$4 sm:$0xff]  }
 0x135   : > { %1324 = vst [vmem:[#allocation2 + $0x28] sm:$0x11] %v1323_v35  ;;  %v8486_v37 = vcombine.high %v11246_v27, %v11254_v33  ;;  %v8485_v38 = vcombine.low %v11246_v27, %v11254_v33  ;;  %v9960_v16 = vld [vmem:[%s14572_s4 + $0x70] ss:$8 sps:$4 sm:$0xff]   ;;  %v9963_v19 = vld [vmem:[%s14572_s4 + $0x80] ss:$8 sps:$4 sm:$0xff]  }
 0x136   : > { %1834 = vmatpush1.bf16.msra.mxu0 %v9903_v15  ;;  %v9962_v15 = vld [vmem:[%s14572_s4 + $0x74] ss:$8 sps:$4 sm:$0xff]   ;;  %v9966_v21 = vld [vmem:[%s14572_s4 + $0x90] ss:$8 sps:$4 sm:$0xff]   ;;  %v9971_v22 = vld [vmem:[%s14572_s4 + $0xa4] ss:$8 sps:$4 sm:$0xff]  }
 0x137   : > { %1835 = vmatprep.subr.bf16.mxu0 %v9908_v18  ;;  %v9965_v18 = vld [vmem:[%s14572_s4 + $0x84] ss:$8 sps:$4 sm:$0xff]   ;;  %v9968_v20 = vld [vmem:[%s14572_s4 + $0x94] ss:$8 sps:$4 sm:$0xff]   ;;  %v9969_v23 = vld [vmem:[%s14572_s4 + $0xa0] ss:$8 sps:$4 sm:$0xff]  }
 0x138   : > { %v9974_v24 = vld [vmem:[%s14572_s4 + $0xb4] ss:$8 sps:$4 sm:$0xff]   ;;  %v9977_v26 = vld [vmem:[%s14572_s4 + $0xc4] ss:$8 sps:$4 sm:$0xff]   ;;  %v9975_v30 = vld [vmem:[%s14572_s4 + $0xc0] ss:$8 sps:$4 sm:$0xff]  }
 0x139   : > { %v9980_v31 = vld [vmem:[%s14572_s4 + $0xd4] ss:$8 sps:$4 sm:$0xff]   ;;  %v9983_v35 = vld [vmem:[%s14572_s4 + $0xe4] ss:$8 sps:$4 sm:$0xff]   ;;  %v9993_v45 = vld [vmem:[%s14572_s4 + $0x120] ss:$8 sps:$4 sm:$0xff]  }
 0x13a   : > { %1836 = vmatpush1.bf16.msra.mxu0 %v9906_v25  ;;  %v9972_v25 = vld [vmem:[%s14572_s4 + $0xb0] ss:$8 sps:$4 sm:$0xff]   ;;  %v10047_v27 = vld [vmem:[%s14572_s4 + $0x434] ss:$8 sps:$4 sm:$0xff]  }
 0x13b   : > { %1837 = vmatprep.subr.bf16.mxu0 %v9911_v32  ;;  %v9978_v32 = vld [vmem:[%s14572_s4 + $0xd0] ss:$8 sps:$4 sm:$0xff]  }
 0x13e   : > { %1838 = vmatpush1.bf16.msra.mxu0 %v9909_v36  ;;  %v9981_v36 = vld [vmem:[%s14572_s4 + $0xe0] ss:$8 sps:$4 sm:$0xff]  }
 0x13f   : > { %1839 = vmatprep.subr.bf16.mxu0 %v9914_v39  ;;  %v9986_v39 = vld [vmem:[%s14572_s4 + $0xf4] ss:$8 sps:$4 sm:$0xff]  }
 0x142   : > { %1840 = vmatpush1.bf16.msra.mxu0 %v9912_v40  ;;  %v9984_v40 = vld [vmem:[%s14572_s4 + $0xf0] ss:$8 sps:$4 sm:$0xff]  }
 0x143   : > { %1841 = vmatprep.subr.bf16.mxu0 %v9917_v41  ;;  %v9989_v41 = vld [vmem:[%s14572_s4 + $0x104] ss:$8 sps:$4 sm:$0xff]  }
 0x146   : > { %1842 = vmatpush1.bf16.msra.mxu0 %v9915_v42  ;;  %v9987_v42 = vld [vmem:[%s14572_s4 + $0x100] ss:$8 sps:$4 sm:$0xff]  }
 0x147   : > { %1843 = vmatprep.subr.bf16.mxu0 %v9920_v43  ;;  %v9992_v43 = vld [vmem:[%s14572_s4 + $0x114] ss:$8 sps:$4 sm:$0xff]  }
 0x14a   : > { %1844 = vmatpush1.bf16.msra.mxu0 %v9918_v44  ;;  %v9990_v44 = vld [vmem:[%s14572_s4 + $0x110] ss:$8 sps:$4 sm:$0xff]  }
 0x14b   : > { %1845 = vmatprep.subr.bf16.mxu0 %v9923_v46  ;;  %v9995_v46 = vld [vmem:[%s14572_s4 + $0x124] ss:$8 sps:$4 sm:$0xff]  }
 0x14e   : > { %1846 = vmatpush1.bf16.msra.mxu0 %v9921_v47  ;;  %v10001_v47 = vld [vmem:[%s14572_s4 + $0x144] ss:$8 sps:$4 sm:$0xff]  }
 0x14f   : > { %1847 = vmatprep.subr.bf16.mxu0 %v9926_v48  ;;  %v9999_v48 = vld [vmem:[%s14572_s4 + $0x140] ss:$8 sps:$4 sm:$0xff]  }
 0x152   : > { %1848 = vmatpush1.bf16.msra.mxu0 %v9924_v50  ;;  %v10004_v50 = vld [vmem:[%s14572_s4 + $0x154] ss:$8 sps:$4 sm:$0xff]  }
 0x153   : > { %1849 = vmatprep.subr.bf16.mxu0 %v9929_v51  ;;  %v10002_v51 = vld [vmem:[%s14572_s4 + $0x150] ss:$8 sps:$4 sm:$0xff]  }
 0x156   : > { %1850 = vmatpush1.bf16.msra.mxu0 %v9927_v52  ;;  %v10007_v52 = vld [vmem:[%s14572_s4 + $0x164] ss:$8 sps:$4 sm:$0xff]  }
 0x157   : > { %1851 = vmatprep.subr.bf16.mxu0 %v9932_v53  ;;  %v10005_v53 = vld [vmem:[%s14572_s4 + $0x160] ss:$8 sps:$4 sm:$0xff]  }
 0x15a   : > { %1852 = vmatpush1.bf16.msra.mxu0 %v9930_v54  ;;  %v10010_v54 = vld [vmem:[%s14572_s4 + $0x174] ss:$8 sps:$4 sm:$0xff]  }
 0x15b   : > { %1853 = vmatprep.subr.bf16.mxu0 %v9935_v55  ;;  %v10008_v55 = vld [vmem:[%s14572_s4 + $0x170] ss:$8 sps:$4 sm:$0xff]  }
 0x15e   : > { %1854 = vmatpush1.bf16.msra.mxu0 %v9933_v56  ;;  %v10013_v56 = vld [vmem:[%s14572_s4 + $0x184] ss:$8 sps:$4 sm:$0xff]  }
 0x15f   : > { %1855 = vmatprep.subr.bf16.mxu0 %v9938_v59  ;;  %v10011_v59 = vld [vmem:[%s14572_s4 + $0x180] ss:$8 sps:$4 sm:$0xff]  }
 0x162   : > { %1856 = vmatpush1.bf16.msra.mxu0 %v9936_v60  ;;  %v10016_v60 = vld [vmem:[%s14572_s4 + $0x194] ss:$8 sps:$4 sm:$0xff]  }
 0x163   : > { %2208 = vmatprep.subr.bf16.mxu0 %v9941_v61  ;;  %v10014_v61 = vld [vmem:[%s14572_s4 + $0x190] ss:$8 sps:$4 sm:$0xff]  }
 0x165   : > { %1858 = vmatmul.mubr.bf16.vlgmr.msra.gmra.mrb[4].mxu0 %v11233_v8  ;;  %v9951_v8 = vld [vmem:[%s14572_s4 + $0x40] ss:$8 sps:$4 sm:$0xff]  }
 0x166   : > { %2209 = vmatpush1.bf16.msra.mxu0 %v9939_v62  ;;  %2240 = vmatprep.mubr.bf16.mxu0 %v8484_v57  ;;  %v9948_v57 = vld [vmem:[%s14572_s4 + $0x30] ss:$8 sps:$4 sm:$0xff]   ;;  %v10019_v62 = vld [vmem:[%s14572_s4 + $0x1a4] ss:$8 sps:$4 sm:$0xff]  }
 0x167   : > { %2210 = vmatprep.subr.bf16.mxu0 %v9944_v63  ;;  %v10017_v63 = vld [vmem:[%s14572_s4 + $0x1a0] ss:$8 sps:$4 sm:$0xff]  }
 0x16a   : > { %2211 = vmatpush1.bf16.msra.mxu0 %v9942_v3  ;;  %v10022_v3 = vld [vmem:[%s14572_s4 + $0x1b4] ss:$8 sps:$4 sm:$0xff]  }
 0x16b   : > { %2212 = vmatprep.subr.bf16.mxu0 %v9947_v13  ;;  %v10020_v13 = vld [vmem:[%s14572_s4 + $0x1b0] ss:$8 sps:$4 sm:$0xff]  }
 0x16e   : > { %2213 = vmatpush1.bf16.msra.mxu0 %v9945_v17  ;;  %v10025_v17 = vld [vmem:[%s14572_s4 + $0x1c4] ss:$8 sps:$4 sm:$0xff]  }
 0x16f   : > { %2214 = vmatprep.subr.bf16.mxu0 %v9950_v6  ;;  %v10023_v6 = vld [vmem:[%s14572_s4 + $0x1c0] ss:$8 sps:$4 sm:$0xff]  }
 0x172   : > { %2215 = vmatpush1.bf16.msra.mxu0 %v9948_v57  ;;  %v10028_v57 = vld [vmem:[%s14572_s4 + $0x1d4] ss:$8 sps:$4 sm:$0xff]  }
 0x173   : > { %2216 = vmatprep.subr.bf16.mxu0 %v9953_v7  ;;  %v10026_v7 = vld [vmem:[%s14572_s4 + $0x1d0] ss:$8 sps:$4 sm:$0xff]  }
 0x176   : > { %2217 = vmatpush1.bf16.msra.mxu0 %v9951_v8  ;;  %v10031_v8 = vld [vmem:[%s14572_s4 + $0x1e4] ss:$8 sps:$4 sm:$0xff]  }
 0x177   : > { %2218 = vmatprep.subr.bf16.mxu0 %v9956_v10  ;;  %v10029_v10 = vld [vmem:[%s14572_s4 + $0x1e0] ss:$8 sps:$4 sm:$0xff]  }
 0x17a   : > { %2219 = vmatpush1.bf16.msra.mxu0 %v9954_v11  ;;  %v11515_v11 = vld [vmem:[#allocation2 + $0x20] sm:$0x11] }
 0x17b   : > { %2220 = vmatprep.subr.bf16.mxu0 %v9959_v12  ;;  %v10034_v12 = vld [vmem:[%s14572_s4 + $0x1f4] ss:$8 sps:$4 sm:$0xff]  }
 0x17e   : > { %2221 = vmatpush1.bf16.msra.mxu0 %v9957_v14  ;;  %v11520_v14 = vld [vmem:[#allocation2] sm:$0xee] }
 0x17f   : > { %2222 = vmatprep.subr.bf16.mxu0 %v9962_v15  ;;  %v8620_v15 = vcombine.high %v11515_v11, %v11515_v11 }
 0x182   : > { %2223 = vmatpush1.bf16.msra.mxu0 %v9960_v16  ;;  %v10032_v16 = vld [vmem:[%s14572_s4 + $0x1f0] ss:$8 sps:$4 sm:$0xff]  }
 0x183   : > { %2224 = vmatprep.subr.bf16.mxu0 %v9965_v18  ;;  %v10037_v18 = vld [vmem:[%s14572_s4 + $0x404] ss:$8 sps:$4 sm:$0xff]  }
 0x186   : > { %2225 = vmatpush1.bf16.msra.mxu0 %v9963_v19  ;;  %v8616_v19 = vcombine.high %v11520_v14, %v11213_v49 }
 0x187   : > { %2226 = vmatprep.subr.bf16.mxu0 %v9968_v20  ;;  %v2383_v20 = vrot.slane %v8620_v15, 1  ;;  %v10094_v15 = vld [vmem:[%s14572_s4 + $0x524] ss:$8 sps:$4 sm:$0xff]  }
 0x18a   : > { %2227 = vmatpush1.bf16.msra.mxu0 %v9966_v21  ;;  %v10035_v21 = vld [vmem:[%s14572_s4 + $0x400] ss:$8 sps:$4 sm:$0xff]  }
 0x18b   : > { %2228 = vmatprep.subr.bf16.mxu0 %v9971_v22  ;;  %v2382_v22 = vrot.slane %v8616_v19, 1  ;;  %v10095_v19 = vld [vmem:[%s14572_s4 + $0x530] ss:$8 sps:$4 sm:$0xff]  }
 0x18e   : > { %2229 = vmatpush1.bf16.msra.mxu0 %v9969_v23  ;;  %v10041_v23 = vld [vmem:[%s14572_s4 + $0x414] ss:$8 sps:$4 sm:$0xff]  }
 0x18f   : > { %2230 = vmatprep.subr.bf16.mxu0 %v9974_v24  ;;  %v2384_v24 = vsel %vm1027_vm2, %v2382_v22, %v2383_v20  ;;  %v10100_v20 = vld [vmem:[%s14572_s4 + $0x544] ss:$8 sps:$4 sm:$0xff]   ;;  %v10103_v22 = vld [vmem:[%s14572_s4 + $0x554] ss:$8 sps:$4 sm:$0xff]  }
 0x192   : > { %2231 = vmatpush1.bf16.msra.mxu0 %v9972_v25  ;;  %v10039_v25 = vld [vmem:[%s14572_s4 + $0x410] ss:$8 sps:$4 sm:$0xff]  }
 0x193   : > { %2232 = vmatprep.subr.bf16.mxu0 %v9977_v26  ;;  %v10044_v26 = vld [vmem:[%s14572_s4 + $0x424] ss:$8 sps:$4 sm:$0xff]  }
 0x196   : > { %2233 = vmatpush1.bf16.msra.mxu0 %v9975_v30  ;;  %v10042_v30 = vld [vmem:[%s14572_s4 + $0x420] ss:$8 sps:$4 sm:$0xff]  }
 0x197   : > { %2234 = vmatprep.subr.bf16.mxu0 %v9980_v31  ;;  %v10050_v31 = vld [vmem:[%s14572_s4 + $0x444] ss:$8 sps:$4 sm:$0xff]  }
 0x19a   : > { %2235 = vmatpush1.bf16.msra.mxu0 %v9978_v32  ;;  %v10048_v32 = vld [vmem:[%s14572_s4 + $0x440] ss:$8 sps:$4 sm:$0xff]  }
 0x19b   : > { %2236 = vmatprep.subr.bf16.mxu0 %v9983_v35  ;;  %v10053_v35 = vld [vmem:[%s14572_s4 + $0x454] ss:$8 sps:$4 sm:$0xff]  }
 0x19e   : > { %2237 = vmatpush1.bf16.msra.mxu0 %v9981_v36  ;;  %v10051_v36 = vld [vmem:[%s14572_s4 + $0x450] ss:$8 sps:$4 sm:$0xff]  }
 0x19f   : > { %2238 = vmatprep.subr.bf16.mxu0 %v9986_v39  ;;  %v10056_v39 = vld [vmem:[%s14572_s4 + $0x464] ss:$8 sps:$4 sm:$0xff]  }
 0x1a2   : > { %2239 = vmatpush1.bf16.msra.mxu0 %v9984_v40  ;;  %v10054_v40 = vld [vmem:[%s14572_s4 + $0x460] ss:$8 sps:$4 sm:$0xff]  }
 0x1a3   : > { %2251 = vmatprep.subr.bf16.mxu0 %v9989_v41  ;;  %v10059_v41 = vld [vmem:[%s14572_s4 + $0x474] ss:$8 sps:$4 sm:$0xff]  }
 0x1a5   : > { %2241 = vmatmul.mubr.bf16.vlgmr.msra.gmra.mrb[4].mxu0 %v8483_v58  ;;  %v9998_v58 = vld [vmem:[%s14572_s4 + $0x134] ss:$8 sps:$4 sm:$0xff]  }
 0x1a6   : > { %2252 = vmatpush1.bf16.msra.mxu0 %v9987_v42  ;;  %2283 = vmatprep.mubr.bf16.mxu0 %v8486_v37  ;;  %v9996_v37 = vld [vmem:[%s14572_s4 + $0x130] ss:$8 sps:$4 sm:$0xff]  }
 0x1a7   : > { %2253 = vmatprep.subr.bf16.mxu0 %v9992_v43  ;;  %v10057_v42 = vld [vmem:[%s14572_s4 + $0x470] ss:$8 sps:$4 sm:$0xff]   ;;  %v10062_v43 = vld [vmem:[%s14572_s4 + $0x484] ss:$8 sps:$4 sm:$0xff]  }
 0x1aa   : > { %2254 = vmatpush1.bf16.msra.mxu0 %v9990_v44  ;;  %v10060_v44 = vld [vmem:[%s14572_s4 + $0x480] ss:$8 sps:$4 sm:$0xff]  }
 0x1ab   : > { %2255 = vmatprep.subr.bf16.mxu0 %v9995_v46  ;;  %v10065_v46 = vld [vmem:[%s14572_s4 + $0x494] ss:$8 sps:$4 sm:$0xff]  }
 0x1ae   : > { %2256 = vmatpush1.bf16.msra.mxu0 %v9993_v45  ;;  %v10063_v45 = vld [vmem:[%s14572_s4 + $0x490] ss:$8 sps:$4 sm:$0xff]  }
 0x1af   : > { %2257 = vmatprep.subr.bf16.mxu0 %v9998_v58  ;;  %v10068_v58 = vld [vmem:[%s14572_s4 + $0x4a4] ss:$8 sps:$4 sm:$0xff]  }
 0x1b2   : > { %2258 = vmatpush1.bf16.msra.mxu0 %v9996_v37  ;;  %v10066_v37 = vld [vmem:[%s14572_s4 + $0x4a0] ss:$8 sps:$4 sm:$0xff]  }
 0x1b3   : > { %2259 = vmatprep.subr.bf16.mxu0 %v10001_v47  ;;  %v10071_v47 = vld [vmem:[%s14572_s4 + $0x4b4] ss:$8 sps:$4 sm:$0xff]  }
 0x1b6   : > { %2260 = vmatpush1.bf16.msra.mxu0 %v9999_v48  ;;  %v10069_v48 = vld [vmem:[%s14572_s4 + $0x4b0] ss:$8 sps:$4 sm:$0xff]  }
 0x1b7   : > { %2261 = vmatprep.subr.bf16.mxu0 %v10004_v50  ;;  %v10074_v50 = vld [vmem:[%s14572_s4 + $0x4c4] ss:$8 sps:$4 sm:$0xff]  }
 0x1ba   : > { %2262 = vmatpush1.bf16.msra.mxu0 %v10002_v51  ;;  %v10072_v51 = vld [vmem:[%s14572_s4 + $0x4c0] ss:$8 sps:$4 sm:$0xff]  }
 0x1bb   : > { %2263 = vmatprep.subr.bf16.mxu0 %v10007_v52  ;;  %v10077_v52 = vld [vmem:[%s14572_s4 + $0x4d4] ss:$8 sps:$4 sm:$0xff]  }
 0x1be   : > { %2264 = vmatpush1.bf16.msra.mxu0 %v10005_v53  ;;  %v10075_v53 = vld [vmem:[%s14572_s4 + $0x4d0] ss:$8 sps:$4 sm:$0xff]  }
 0x1bf   : > { %2265 = vmatprep.subr.bf16.mxu0 %v10010_v54  ;;  %v10080_v54 = vld [vmem:[%s14572_s4 + $0x4e4] ss:$8 sps:$4 sm:$0xff]  }
 0x1c2   : > { %2266 = vmatpush1.bf16.msra.mxu0 %v10008_v55  ;;  %v10078_v55 = vld [vmem:[%s14572_s4 + $0x4e0] ss:$8 sps:$4 sm:$0xff]  }
 0x1c3   : > { %2267 = vmatprep.subr.bf16.mxu0 %v10013_v56  ;;  %v11623_v56 = vld [vmem:[#allocation2 + $0x8] sm:$0xee] }
 0x1c6   : > { %2268 = vmatpush1.bf16.msra.mxu0 %v10011_v59  ;;  %v11625_v59 = vld [vmem:[#allocation2 + $0x28] sm:$0x11] }
 0x1c7   : > { %2269 = vmatprep.subr.bf16.mxu0 %v10016_v60  ;;  %v10083_v60 = vld [vmem:[%s14572_s4 + $0x4f4] ss:$8 sps:$4 sm:$0xff]  }
 0x1ca   : > { %2270 = vmatpush1.bf16.msra.mxu0 %v10014_v61  ;;  %v8619_v61 = vcombine.low %v11515_v11, %v11515_v11  ;;  %v10091_v11 = vld [vmem:[%s14572_s4 + $0x514] ss:$8 sps:$4 sm:$0xff]  }
 0x1cb   : > { %2271 = vmatprep.subr.bf16.mxu0 %v10019_v62  ;;  %v8618_v62 = vcombine.high %v11623_v56, %v11254_v33 }
 0x1ce   : > { %2272 = vmatpush1.bf16.msra.mxu0 %v10017_v63  ;;  %v8622_v63 = vcombine.high %v11625_v59, %v11625_v59 }
 0x1cf   : > { %2273 = vmatprep.subr.bf16.mxu0 %v10022_v3  ;;  %v10081_v3 = vld [vmem:[%s14572_s4 + $0x4f0] ss:$8 sps:$4 sm:$0xff]  }
 0x1d2   : > { %2274 = vmatpush1.bf16.msra.mxu0 %v10020_v13  ;;  %v8615_v13 = vcombine.low %v11520_v14, %v11213_v49  ;;  %v10089_v14 = vld [vmem:[%s14572_s4 + $0x510] ss:$8 sps:$4 sm:$0xff]  }
 0x1d3   : > { %2275 = vmatprep.subr.bf16.mxu0 %v10025_v17  ;;  %v10087_v17 = vld [vmem:[%s14572_s4 + $0x504] ss:$8 sps:$4 sm:$0xff]  }
 0x1d6   : > { %2276 = vmatpush1.bf16.msra.mxu0 %v10023_v6  ;;  %v2380_v6 = vrot.slane %v8619_v61, 1 }
 0x1d7   : > { %2277 = vmatprep.subr.bf16.mxu0 %v10028_v57  ;;  %v2388_v57 = vrot.slane %v8618_v62, 1 }
 0x1da   : > { %2278 = vmatpush1.bf16.msra.mxu0 %v10026_v7  ;;  %v2389_v7 = vrot.slane %v8622_v63, 1 }
 0x1db   : > { %2279 = vmatprep.subr.bf16.mxu0 %v10031_v8  ;;  %v2379_v8 = vrot.slane %v8615_v13, 1 }
 0x1dd   : > { %v2381_v49 = vsel %vm1027_vm2, %v2379_v8, %v2380_v6 }
 0x1de   : > { %2280 = vmatpush1.bf16.msra.mxu0 %v10029_v10  ;;  %v10085_v10 = vld [vmem:[%s14572_s4 + $0x500] ss:$8 sps:$4 sm:$0xff]  }
 0x1df   : > { %2281 = vmatprep.subr.bf16.mxu0 %v10034_v12  ;;  %v2390_v12 = vsel %vm1027_vm2, %v2388_v57, %v2389_v7 }
 0x1e2   : > { %2282 = vmatpush1.bf16.msra.mxu0 %v10032_v16  ;;  %v10092_v16 = vld [vmem:[%s14572_s4 + $0x520] ss:$8 sps:$4 sm:$0xff]  }
 0x1e3   : > { %2715 = vmatprep.subr.bf16.mxu0 %v10037_v18  ;;  %v10097_v18 = vld [vmem:[%s14572_s4 + $0x534] ss:$8 sps:$4 sm:$0xff]  }
 0x1e5   : > { %2284 = vmatmul.mubr.bf16.vlgmr.msra.gmra.mrb[4].mxu0 %v8485_v38  ;;  %v10045_v38 = vld [vmem:[%s14572_s4 + $0x430] ss:$8 sps:$4 sm:$0xff]  }
 0x1e6   : > { %2716 = vmatpush1.bf16.msra.mxu0 %v10035_v21  ;;  %2747 = vmatprep.mubr.bf16.mxu0 %v2384_v24  ;;  %v10098_v21 = vld [vmem:[%s14572_s4 + $0x540] ss:$8 sps:$4 sm:$0xff]   ;;  %v10106_v24 = vld [vmem:[%s14572_s4 + $0x564] ss:$8 sps:$4 sm:$0xff]  }
 0x1e7   : > { %2717 = vmatprep.subr.bf16.mxu0 %v10041_v23  ;;  %v10101_v23 = vld [vmem:[%s14572_s4 + $0x550] ss:$8 sps:$4 sm:$0xff]  }
 0x1ea   : > { %2718 = vmatpush1.bf16.msra.mxu0 %v10039_v25  ;;  %v10104_v25 = vld [vmem:[%s14572_s4 + $0x560] ss:$8 sps:$4 sm:$0xff]  }
 0x1eb   : > { %2719 = vmatprep.subr.bf16.mxu0 %v10044_v26  ;;  %v10109_v26 = vld [vmem:[%s14572_s4 + $0x574] ss:$8 sps:$4 sm:$0xff]  }
 0x1ee   : > { %2720 = vmatpush1.bf16.msra.mxu0 %v10042_v30  ;;  %v10107_v30 = vld [vmem:[%s14572_s4 + $0x570] ss:$8 sps:$4 sm:$0xff]  }
 0x1ef   : > { %2721 = vmatprep.subr.bf16.mxu0 %v10047_v27  ;;  %v10112_v27 = vld [vmem:[%s14572_s4 + $0x584] ss:$8 sps:$4 sm:$0xff]  }
 0x1f2   : > { %2722 = vmatpush1.bf16.msra.mxu0 %v10045_v38  ;;  %v10110_v38 = vld [vmem:[%s14572_s4 + $0x580] ss:$8 sps:$4 sm:$0xff]  }
 0x1f3   : > { %2723 = vmatprep.subr.bf16.mxu0 %v10050_v31  ;;  %v10115_v31 = vld [vmem:[%s14572_s4 + $0x594] ss:$8 sps:$4 sm:$0xff]  }
 0x1f6   : > { %2724 = vmatpush1.bf16.msra.mxu0 %v10048_v32  ;;  %v10113_v32 = vld [vmem:[%s14572_s4 + $0x590] ss:$8 sps:$4 sm:$0xff]  }
 0x1f7   : > { %2725 = vmatprep.subr.bf16.mxu0 %v10053_v35  ;;  %v10118_v35 = vld [vmem:[%s14572_s4 + $0x5a4] ss:$8 sps:$4 sm:$0xff]  }
 0x1fa   : > { %2726 = vmatpush1.bf16.msra.mxu0 %v10051_v36  ;;  %v10116_v36 = vld [vmem:[%s14572_s4 + $0x5a0] ss:$8 sps:$4 sm:$0xff]  }
 0x1fb   : > { %2727 = vmatprep.subr.bf16.mxu0 %v10056_v39  ;;  %v10121_v39 = vld [vmem:[%s14572_s4 + $0x5b4] ss:$8 sps:$4 sm:$0xff]  }
 0x1fe   : > { %2728 = vmatpush1.bf16.msra.mxu0 %v10054_v40  ;;  %v10119_v40 = vld [vmem:[%s14572_s4 + $0x5b0] ss:$8 sps:$4 sm:$0xff]  }
 0x1ff   : > { %2729 = vmatprep.subr.bf16.mxu0 %v10059_v41  ;;  %v10124_v41 = vld [vmem:[%s14572_s4 + $0x5c4] ss:$8 sps:$4 sm:$0xff]  }
 0x202   : > { %2730 = vmatpush1.bf16.msra.mxu0 %v10057_v42  ;;  %v10122_v42 = vld [vmem:[%s14572_s4 + $0x5c0] ss:$8 sps:$4 sm:$0xff]  }
 0x203   : > { %2731 = vmatprep.subr.bf16.mxu0 %v10062_v43  ;;  %v10127_v43 = vld [vmem:[%s14572_s4 + $0x5d4] ss:$8 sps:$4 sm:$0xff]  }
 0x206   : > { %2732 = vmatpush1.bf16.msra.mxu0 %v10060_v44  ;;  %v10125_v44 = vld [vmem:[%s14572_s4 + $0x5d0] ss:$8 sps:$4 sm:$0xff]  }
 0x207   : > { %2733 = vmatprep.subr.bf16.mxu0 %v10065_v46  ;;  %v10130_v46 = vld [vmem:[%s14572_s4 + $0x5e4] ss:$8 sps:$4 sm:$0xff]  }
 0x20a   : > { %2734 = vmatpush1.bf16.msra.mxu0 %v10063_v45  ;;  %v10128_v45 = vld [vmem:[%s14572_s4 + $0x5e0] ss:$8 sps:$4 sm:$0xff]  }
 0x20b   : > { %2735 = vmatprep.subr.bf16.mxu0 %v10068_v58  ;;  %v10133_v58 = vld [vmem:[%s14572_s4 + $0x5f4] ss:$8 sps:$4 sm:$0xff]  }
 0x20e   : > { %2736 = vmatpush1.bf16.msra.mxu0 %v10066_v37  ;;  %v8617_v37 = vcombine.low %v11623_v56, %v11254_v33  ;;  %v3039_v33 = vld [vmem:[%s14574_s6] sm:$0xff] }
 0x20f   : > { %2737 = vmatprep.subr.bf16.mxu0 %v10071_v47  ;;  %v8621_v47 = vcombine.low %v11625_v59, %v11625_v59 }
 0x212   : > { %2738 = vmatpush1.bf16.msra.mxu0 %v10069_v48  ;;  %v10131_v48 = vld [vmem:[%s14572_s4 + $0x5f0] ss:$8 sps:$4 sm:$0xff]  }
 0x213   : > { %2739 = vmatprep.subr.bf16.mxu0 %v10074_v50  ;;  %v2385_v50 = vrot.slane %v8617_v37, 1 }
 0x216   : > { %2740 = vmatpush1.bf16.msra.mxu0 %v10072_v51  ;;  %v2386_v51 = vrot.slane %v8621_v47, 1 }
 0x217   : > { %2741 = vmatprep.subr.bf16.mxu0 %v10077_v52 }
 0x218   : > { %v2387_v52 = vsel %vm1027_vm2, %v2385_v50, %v2386_v51 }
 0x21a   : > { %2742 = vmatpush1.bf16.msra.mxu0 %v10075_v53  ;;  %v3040_v53 = vld [vmem:[%s14574_s6 + $0x8] sm:$0xff] }
 0x21b   : > { %2743 = vmatprep.subr.bf16.mxu0 %v10080_v54  ;;  %v9681_v54 = vpack.c.bf16 %v3040_v53, %v3039_v33 }
 0x21d   : > { %9682 = vmatprep.subr.bf16.mxu1 %v9681_v54 }
 0x21e   : > { %2744 = vmatpush1.bf16.msra.mxu0 %v10078_v55  ;;  %9684 = vmatpush3.bf16.msra.mxu1 %v9681_v54  ;;  %v2805_v55 = vld [vmem:[%s14573_s5] sm:$0x3] }
 0x21f   : > { %2745 = vmatprep.subr.bf16.mxu0 %v10083_v60  ;;  %v2810_v56 = vrot.slane %v2805_v55, %v11169_v4  ;;  %v2814_v59 = vrot.slane %v2805_v55, %v11172_v5 }
 0x222   : > { %2746 = vmatpush1.bf16.msra.mxu0 %v10081_v3 }
 0x223   : > { %2758 = vmatprep.subr.bf16.mxu0 %v10087_v17 }
 0x225   : > { %2748 = vmatmul.mubr.bf16.vlgmr.msra.gmra.mrb[4].mxu0 %v2381_v49 }
 0x226   : > { %2759 = vmatpush1.bf16.msra.mxu0 %v10085_v10  ;;  %2790 = vmatprep.mubr.bf16.mxu0 %v2390_v12 }
 0x227   : > { %2760 = vmatprep.subr.bf16.mxu0 %v10091_v11 }
 0x22a   : > { %2761 = vmatpush1.bf16.msra.mxu0 %v10089_v14 }
 0x22b   : > { %2762 = vmatprep.subr.bf16.mxu0 %v10094_v15 }
 0x22e   : > { %2763 = vmatpush1.bf16.msra.mxu0 %v10092_v16 }
 0x22f   : > { %2764 = vmatprep.subr.bf16.mxu0 %v10097_v18 }
 0x232   : > { %2765 = vmatpush1.bf16.msra.mxu0 %v10095_v19 }
 0x233   : > { %2766 = vmatprep.subr.bf16.mxu0 %v10100_v20 }
 0x236   : > { %2767 = vmatpush1.bf16.msra.mxu0 %v10098_v21 }
 0x237   : > { %2768 = vmatprep.subr.bf16.mxu0 %v10103_v22 }
 0x23a   : > { %2769 = vmatpush1.bf16.msra.mxu0 %v10101_v23 }
 0x23b   : > { %2770 = vmatprep.subr.bf16.mxu0 %v10106_v24 }
 0x23e   : > { %2771 = vmatpush1.bf16.msra.mxu0 %v10104_v25 }
 0x23f   : > { %2772 = vmatprep.subr.bf16.mxu0 %v10109_v26 }
 0x242   : > { %2773 = vmatpush1.bf16.msra.mxu0 %v10107_v30 }
 0x243   : > { %2774 = vmatprep.subr.bf16.mxu0 %v10112_v27 }
 0x246   : > { %2775 = vmatpush1.bf16.msra.mxu0 %v10110_v38 }
 0x247   : > { %2776 = vmatprep.subr.bf16.mxu0 %v10115_v31 }
 0x24a   : > { %2777 = vmatpush1.bf16.msra.mxu0 %v10113_v32 }
 0x24b   : > { %2778 = vmatprep.subr.bf16.mxu0 %v10118_v35 }
 0x24e   : > { %2779 = vmatpush1.bf16.msra.mxu0 %v10116_v36 }
 0x24f   : > { %2780 = vmatprep.subr.bf16.mxu0 %v10121_v39 }
 0x252   : > { %2781 = vmatpush1.bf16.msra.mxu0 %v10119_v40 }
 0x253   : > { %2782 = vmatprep.subr.bf16.mxu0 %v10124_v41 }
 0x256   : > { %2783 = vmatpush1.bf16.msra.mxu0 %v10122_v42 }
 0x257   : > { %2784 = vmatprep.subr.bf16.mxu0 %v10127_v43 }
 0x25a   : > { %2785 = vmatpush1.bf16.msra.mxu0 %v10125_v44 }
 0x25b   : > { %2786 = vmatprep.subr.bf16.mxu0 %v10130_v46 }
 0x25e   : > { %2787 = vmatpush1.bf16.msra.mxu0 %v10128_v45 }
 0x25f   : > { %2788 = vmatprep.subr.bf16.mxu0 %v10133_v58 }
 0x262   : > { %2789 = vmatpush1.bf16.msra.mxu0 %v10131_v48 }
 0x265   : > { %2791 = vmatmul.mubr.bf16.vlgmr.msra.gmra.mrb[4].mxu0 %v2387_v52 }
 0x338   : > { %v2792_v60 = vpop.f32.mrb[4].mxu0 }
 0x339   : > { %v2817_v61 = vadd.f32 %v2810_v56, %v2792_v60  ;;  %v2794_v62 = vpop.f32.mrb[5].mxu0 }
 0x33a   : > { %v11763_v63 = vadd.f32 %v2814_v59, %v2794_v62  ;;  %v2796_v3 = vpop.f32.mrb[6].mxu0 }
 0x33b   : > { %v2819_v13 = vadd.f32 %v2810_v56, %v2796_v3  ;;  %2830 = vrot.lane.b32.xlu1 %v2817_v61, %s14704_s22  ;;  %2824 = vrot.lane.b32.xlu0 %v2817_v61, %s14701_s23  ;;  %v2798_v17 = vpop.f32.mrb[7].mxu0  ;;  %8076 = vst [vmem:[%s11761_s20] sm:$0xff] %v2817_v61  ;;  %v2910_v57 = vmul.f32 %v2817_v61, %v2817_v61 }
 0x33c   : > { %v11768_v6 = vadd.f32 %v2814_v59, %v2798_v17  ;;  %9577 = vmatprep.mubr.msk.f32.mxu1 %vm2942_vm8, %v2817_v61  ;;  %8077 = vst [vmem:[%s11761_s20 + $0x8] sm:$0xff] %v11763_v63  ;;  %v2926_v56 = vmul.f32 %v11763_v63, %v11763_v63 }
 0x33d   : > { %9578 = vmatmul.mubr.msk.f32.vlgmr.msra.gmra.mrb[4].mxu1 %vm2942_vm8, %v2819_v13  ;;  %8078 = vst [vmem:[%s11761_s20 + $0x10] sm:$0xff] %v2819_v13  ;;  %v2943_v7 = vsel %vm2942_vm8, %v2910_v57, 0.0  ;;  %v2911_v8 = vmul.f32 %v2819_v13, %v2819_v13 }
 0x33e   : > { %8079 = vst [vmem:[%s11761_s20 + $0x18] sm:$0xff] %v11768_v6  ;;  %v2991_v62 = vsel %vm2942_vm8, %v2926_v56, 0.0 }
 0x33f   : > { %2832 = vrot.lane.b32.xlu1 %v2819_v13, %s14704_s22  ;;  %2826 = vrot.lane.b32.xlu0 %v2819_v13, %s14701_s23  ;;  %v2946_v10 = vsel %vm2942_vm8, %v2911_v8, 0.0 }
 0x343   : > { %2838 = vrot.lane.b32.xlu1 %v2819_v13, %s14706_s27  ;;  %2836 = vrot.lane.b32.xlu0 %v2817_v61, %s14706_s27 }
 0x347   : > { %2844 = vrot.lane.b32.xlu1 %v2819_v13, %s14708_s28  ;;  %2842 = vrot.lane.b32.xlu0 %v2817_v61, %s14708_s28 }
 0x34b   : > { %2850 = vrot.lane.b32.xlu1 %v2819_v13, %s14710_s29  ;;  %2848 = vrot.lane.b32.xlu0 %v2817_v61, %s14710_s29 }
 0x34f   : > { %2856 = vrot.lane.b32.xlu1 %v2819_v13, %s14713_s30  ;;  %2854 = vrot.lane.b32.xlu0 %v2817_v61, %s14713_s30 }
 0x353   : > { %2862 = vrot.lane.b32.xlu1 %v2819_v13, %s14715_s0  ;;  %2860 = vrot.lane.b32.xlu0 %v2817_v61, %s14715_s0  ;;  %v2927_v13 = vmul.f32 %v11768_v6, %v11768_v6 }
 0x357   : > { %2868 = vrot.lane.b32.xlu0 %v11763_v63, %s14701_s23  ;;  %2870 = vrot.lane.b32.xlu1 %v11768_v6, %s14701_s23  ;;  %s14890_s23 = smov 16  }
 0x35b   : > { %2874 = vrot.lane.b32.xlu0 %v11763_v63, %s14704_s22  ;;  %2876 = vrot.lane.b32.xlu1 %v11768_v6, %s14704_s22  ;;  %s14894_s22 = smov 32  }
 0x35f   : > { %2880 = vrot.lane.b32.xlu0 %v11763_v63, %s14706_s27  ;;  %2882 = vrot.lane.b32.xlu1 %v11768_v6, %s14706_s27 }
 0x363   : > { %2886 = vrot.lane.b32.xlu0 %v11763_v63, %s14708_s28  ;;  %2888 = vrot.lane.b32.xlu1 %v11768_v6, %s14708_s28  ;;  %s14899_s28 = smov 64  }
 0x367   : > { %2892 = vrot.lane.b32.xlu0 %v11763_v63, %s14710_s29  ;;  %2894 = vrot.lane.b32.xlu1 %v11768_v6, %s14710_s29  ;;  %s14896_s29 = smov 48  }
 0x36b   : > { %2898 = vrot.lane.b32.xlu0 %v11763_v63, %s14713_s30  ;;  %2900 = vrot.lane.b32.xlu1 %v11768_v6, %s14713_s30 }
 0x36f   : > { %2904 = vrot.lane.b32.xlu0 %v11763_v63, %s14715_s0  ;;  %2906 = vrot.lane.b32.xlu1 %v11768_v6, %s14715_s0  ;;  %s15023_s0 = sshll.u32 %s15070_s25, 5 }
 0x38e   : > { %2944 = vadd.xlane.f32.xlu0 %v2943_v7  ;;  %v2994_v7 = vsel %vm2942_vm8, %v2927_v13, 0.0 }
 0x393   : > { %2947 = vadd.xlane.f32.xlu1 %v2946_v10 }
 0x3ad   : > { %v11819_v11 = vpop.permute.xlu1 %2830  ;;  %v11821_v49 = vpop.permute.xlu0 %2824 }
 0x3ae   : > { %14775 = vst [vmem:[#allocation10_spill] sm:$0xff] %v11819_v11  ;;  %14776 = vst [vmem:[#allocation11_spill] sm:$0xff] %v11821_v49  ;;  %9580 = vmatprep.mubr.msk.f32.mxu1 %vm2942_vm8, %v11821_v49  ;;  %v2912_v12 = vmul.f32 %v11821_v49, %v11821_v49  ;;  %v2914_v14 = vmul.f32 %v11819_v11, %v11819_v11 }
 0x3b0   : > { %v2949_v15 = vsel %vm2942_vm8, %v2912_v12, 0.0  ;;  %v2955_v16 = vsel %vm2942_vm8, %v2914_v14, 0.0 }
 0x3b1   : > { %v11831_v18 = vpop.permute.xlu1 %2832  ;;  %2950 = vadd.xlane.f32.xlu0 %v2949_v15  ;;  %v11833_v19 = vpop.permute.xlu0 %2826  ;;  %2956 = vadd.xlane.f32.xlu1 %v2955_v16 }
 0x3b2   : > { %14777 = vst [vmem:[#allocation12_spill] sm:$0xff] %v11831_v18  ;;  %14778 = vst [vmem:[#allocation13_spill] sm:$0xff] %v11833_v19  ;;  %9581 = vmatmul.mubr.msk.f32.gmra.mrb[6].mxu1 %vm2942_vm8, %v11833_v19  ;;  %v2913_v20 = vmul.f32 %v11833_v19, %v11833_v19  ;;  %v2915_v22 = vmul.f32 %v11831_v18, %v11831_v18 }
 0x3b3   : > { %9583 = vmatprep.mubr.msk.f32.mxu1 %vm2942_vm8, %v11819_v11 }
 0x3b4   : > { %v2952_v21 = vsel %vm2942_vm8, %v2913_v20, 0.0  ;;  %v2958_v26 = vsel %vm2942_vm8, %v2915_v22, 0.0 }
 0x3b5   : > { %v11844_v23 = vpop.permute.xlu1 %2838  ;;  %2953 = vadd.xlane.f32.xlu0 %v2952_v21  ;;  %v11846_v24 = vpop.permute.xlu0 %2836 }
 0x3b6   : > { %14779 = vst [vmem:[#allocation14_spill] sm:$0xff] %v11844_v23  ;;  %14780 = vst [vmem:[#allocation15_spill] sm:$0xff] %v11846_v24  ;;  %9584 = vmatmul.mubr.msk.f32.gmra.mrb[8].mxu1 %vm2942_vm8, %v11831_v18  ;;  %v2916_v25 = vmul.f32 %v11846_v24, %v11846_v24  ;;  %v2917_v27 = vmul.f32 %v11844_v23, %v11844_v23 }
 0x3b7   : > { %9586 = vmatprep.mubr.msk.f32.mxu1 %vm2942_vm8, %v11846_v24 }
 0x3b8   : > { %v2961_v30 = vsel %vm2942_vm8, %v2916_v25, 0.0  ;;  %v2964_v35 = vsel %vm2942_vm8, %v2917_v27, 0.0 }
 0x3b9   : > { %v11858_v38 = vpop.permute.xlu1 %2844  ;;  %2959 = vadd.xlane.f32.xlu0 %v2958_v26  ;;  %v11860_v31 = vpop.permute.xlu0 %2842  ;;  %2962 = vadd.xlane.f32.xlu1 %v2961_v30 }
 0x3ba   : > { %14781 = vst [vmem:[#allocation16_spill] sm:$0xff] %v11858_v38  ;;  %14782 = vst [vmem:[#allocation17_spill] sm:$0xff] %v11860_v31  ;;  %9587 = vmatmul.mubr.msk.f32.gmra.mrb[10].mxu1 %vm2942_vm8, %v11844_v23  ;;  %v2918_v32 = vmul.f32 %v11860_v31, %v11860_v31  ;;  %v2919_v39 = vmul.f32 %v11858_v38, %v11858_v38 }
 0x3bb   : > { %9589 = vmatprep.mubr.msk.f32.mxu1 %vm2942_vm8, %v11860_v31 }
 0x3bc   : > { %v2967_v36 = vsel %vm2942_vm8, %v2918_v32, 0.0  ;;  %v2970_v43 = vsel %vm2942_vm8, %v2919_v39, 0.0 }
 0x3bd   : > { %v11872_v40 = vpop.permute.xlu1 %2850  ;;  %2965 = vadd.xlane.f32.xlu0 %v2964_v35  ;;  %v11874_v41 = vpop.permute.xlu0 %2848  ;;  %2968 = vadd.xlane.f32.xlu1 %v2967_v36 }
 0x3be   : > { %14783 = vst [vmem:[#allocation18_spill] sm:$0xff] %v11872_v40  ;;  %14784 = vst [vmem:[#allocation19_spill] sm:$0xff] %v11874_v41  ;;  %9590 = vmatmul.mubr.msk.f32.gmra.mrb[12].mxu1 %vm2942_vm8, %v11858_v38  ;;  %v2920_v42 = vmul.f32 %v11874_v41, %v11874_v41  ;;  %v2921_v46 = vmul.f32 %v11872_v40, %v11872_v40 }
 0x3bf   : > { %9592 = vmatprep.mubr.msk.f32.mxu1 %vm2942_vm8, %v11874_v41 }
 0x3c0   : > { %v2973_v44 = vsel %vm2942_vm8, %v2920_v42, 0.0  ;;  %v2976_v47 = vsel %vm2942_vm8, %v2921_v46, 0.0 }
 0x3c1   : > { %v11886_v45 = vpop.permute.xlu1 %2856  ;;  %2971 = vadd.xlane.f32.xlu0 %v2970_v43  ;;  %v11888_v58 = vpop.permute.xlu0 %2854  ;;  %2974 = vadd.xlane.f32.xlu1 %v2973_v44 }
 0x3c2   : > { %14785 = vst [vmem:[#allocation20_spill] sm:$0xff] %v11886_v45  ;;  %14786 = vst [vmem:[#allocation21_spill] sm:$0xff] %v11888_v58  ;;  %9593 = vmatmul.mubr.msk.f32.gmra.mrb[14].mxu1 %vm2942_vm8, %v11872_v40  ;;  %v2922_v37 = vmul.f32 %v11888_v58, %v11888_v58  ;;  %v2923_v50 = vmul.f32 %v11886_v45, %v11886_v45 }
 0x3c3   : > { %9595 = vmatprep.mubr.msk.f32.mxu1 %vm2942_vm8, %v11888_v58 }
 0x3c4   : > { %v2979_v48 = vsel %vm2942_vm8, %v2922_v37, 0.0  ;;  %v2982_v53 = vsel %vm2942_vm8, %v2923_v50, 0.0 }
 0x3c5   : > { %v11900_v51 = vpop.permute.xlu1 %2862  ;;  %2977 = vadd.xlane.f32.xlu0 %v2976_v47  ;;  %v11902_v52 = vpop.permute.xlu0 %2860  ;;  %2980 = vadd.xlane.f32.xlu1 %v2979_v48 }
 0x3c6   : > { %14787 = vst [vmem:[#allocation22_spill] sm:$0xff] %v11900_v51  ;;  %14788 = vst [vmem:[#allocation23_spill] sm:$0xff] %v11902_v52  ;;  %9596 = vmatmul.mubr.msk.f32.gmra.mrb[16].mxu1 %vm2942_vm8, %v11886_v45  ;;  %v2924_v33 = vmul.f32 %v11902_v52, %v11902_v52  ;;  %v2925_v55 = vmul.f32 %v11900_v51, %v11900_v51 }
 0x3c7   : > { %9598 = vmatprep.mubr.msk.f32.mxu1 %vm2942_vm8, %v11902_v52 }
 0x3c8   : > { %v2985_v54 = vsel %vm2942_vm8, %v2924_v33, 0.0  ;;  %v2988_v61 = vsel %vm2942_vm8, %v2925_v55, 0.0 }
 0x3c9   : > { %2983 = vadd.xlane.f32.xlu0 %v2982_v53  ;;  %v11916_v59 = vpop.permute.xlu0 %2868  ;;  %2986 = vadd.xlane.f32.xlu1 %v2985_v54  ;;  %v11918_v60 = vpop.permute.xlu1 %2870 }
 0x3ca   : > { %14789 = vst [vmem:[#allocation24_spill] sm:$0xff] %v11916_v59  ;;  %14790 = vst [vmem:[#allocation25_spill] sm:$0xff] %v11918_v60  ;;  %9599 = vmatmul.mubr.msk.f32.gmra.mrb[18].mxu1 %vm2942_vm8, %v11900_v51  ;;  %v2928_v3 = vmul.f32 %v11916_v59, %v11916_v59  ;;  %v2929_v10 = vmul.f32 %v11918_v60, %v11918_v60 }
 0x3cb   : > { %9601 = vmatprep.mubr.msk.f32.mxu1 %vm2942_vm8, %v11763_v63 }
 0x3cc   : > { %v2997_v63 = vsel %vm2942_vm8, %v2928_v3, 0.0  ;;  %v3000_v15 = vsel %vm2942_vm8, %v2929_v10, 0.0  ;;  %v12030_v10 = vld [vmem:[%s14576_s8] ss:$0 sm:$0xff] }
 0x3cd   : > { %2989 = vadd.xlane.f32.xlu0 %v2988_v61  ;;  %v11930_v17 = vpop.permute.xlu0 %2874  ;;  %2992 = vadd.xlane.f32.xlu1 %v2991_v62  ;;  %v11932_v57 = vpop.permute.xlu1 %2876 }
 0x3ce   : > { %14791 = vst [vmem:[#allocation26_spill] sm:$0xff] %v11930_v17  ;;  %14792 = vst [vmem:[#allocation27_spill] sm:$0xff] %v11932_v57  ;;  %9602 = vmatmul.mubr.msk.f32.gmra.mrb[20].mxu1 %vm2942_vm8, %v11768_v6  ;;  %v2930_v8 = vmul.f32 %v11930_v17, %v11930_v17  ;;  %v2931_v20 = vmul.f32 %v11932_v57, %v11932_v57 }
 0x3cf   : > { %9604 = vmatprep.mubr.msk.f32.mxu1 %vm2942_vm8, %v11916_v59 }
 0x3d0   : > { %v3003_v6 = vsel %vm2942_vm8, %v2930_v8, 0.0  ;;  %v3006_v26 = vsel %vm2942_vm8, %v2931_v20, 0.0  ;;  %v12034_v20 = vstv %s12025_s18 }
 0x3d1   : > { %v11944_v12 = vpop.permute.xlu0 %2880  ;;  %2998 = vadd.xlane.f32.xlu1 %v2997_v63  ;;  %v11946_v14 = vpop.permute.xlu1 %2882  ;;  %2995 = vadd.xlane.f32.xlu0 %v2994_v7 }
 0x3d2   : > { %14793 = vst [vmem:[#allocation28_spill] sm:$0xff] %v11944_v12  ;;  %14794 = vst [vmem:[#allocation29_spill] sm:$0xff] %v11946_v14  ;;  %9605 = vmatmul.mubr.msk.f32.gmra.mrb[22].mxu1 %vm2942_vm8, %v11918_v60  ;;  %v2932_v16 = vmul.f32 %v11944_v12, %v11944_v12  ;;  %v2933_v27 = vmul.f32 %v11946_v14, %v11946_v14 }
 0x3d3   : > { %9607 = vmatprep.mubr.msk.f32.mxu1 %vm2942_vm8, %v11930_v17 }
 0x3d4   : > { %v3009_v25 = vsel %vm2942_vm8, %v2932_v16, 0.0  ;;  %v3012_v39 = vsel %vm2942_vm8, %v2933_v27, 0.0 }
 0x3d5   : > { %v11958_v21 = vpop.permute.xlu0 %2886  ;;  %3004 = vadd.xlane.f32.xlu1 %v3003_v6  ;;  %v11960_v22 = vpop.permute.xlu1 %2888  ;;  %3001 = vadd.xlane.f32.xlu0 %v3000_v15 }
 0x3d6   : > { %14795 = vst [vmem:[#allocation30_spill] sm:$0xff] %v11958_v21  ;;  %14796 = vst [vmem:[#allocation31_spill] sm:$0xff] %v11960_v22  ;;  %9608 = vmatmul.mubr.msk.f32.gmra.mrb[24].mxu1 %vm2942_vm8, %v11932_v57  ;;  %v2934_v30 = vmul.f32 %v11958_v21, %v11958_v21  ;;  %v2935_v43 = vmul.f32 %v11960_v22, %v11960_v22 }
 0x3d7   : > { %9610 = vmatprep.mubr.msk.f32.mxu1 %vm2942_vm8, %v11944_v12 }
 0x3d8   : > { %v3015_v36 = vsel %vm2942_vm8, %v2934_v30, 0.0  ;;  %v3018_v47 = vsel %vm2942_vm8, %v2935_v43, 0.0 }
 0x3d9   : > { %v11972_v32 = vpop.permute.xlu0 %2892  ;;  %3010 = vadd.xlane.f32.xlu1 %v3009_v25  ;;  %v11974_v35 = vpop.permute.xlu1 %2894  ;;  %3007 = vadd.xlane.f32.xlu0 %v3006_v26 }
 0x3da   : > { %14797 = vst [vmem:[#allocation32_spill] sm:$0xff] %v11972_v32  ;;  %14798 = vst [vmem:[#allocation33_spill] sm:$0xff] %v11974_v35  ;;  %9611 = vmatmul.mubr.msk.f32.gmra.mrb[26].mxu1 %vm2942_vm8, %v11946_v14  ;;  %v2936_v42 = vmul.f32 %v11972_v32, %v11972_v32  ;;  %v2937_v50 = vmul.f32 %v11974_v35, %v11974_v35 }
 0x3db   : > { %9613 = vmatprep.mubr.msk.f32.mxu1 %vm2942_vm8, %v11958_v21 }
 0x3dc   : > { %v3021_v37 = vsel %vm2942_vm8, %v2936_v42, 0.0  ;;  %v3024_v54 = vsel %vm2942_vm8, %v2937_v50, 0.0 }
 0x3dd   : > { %v11986_v44 = vpop.permute.xlu0 %2898  ;;  %3016 = vadd.xlane.f32.xlu1 %v3015_v36  ;;  %3013 = vadd.xlane.f32.xlu0 %v3012_v39  ;;  %v11990_v46 = vpop.permute.xlu1 %2900 }
 0x3de   : > { %14799 = vst [vmem:[#allocation34_spill] sm:$0xff] %v11986_v44  ;;  %9614 = vmatmul.mubr.msk.f32.gmra.mrb[28].mxu1 %vm2942_vm8, %v11960_v22  ;;  %14800 = vst [vmem:[#allocation35_spill] sm:$0xff] %v11990_v46  ;;  %v2938_v48 = vmul.f32 %v11986_v44, %v11986_v44  ;;  %v2939_v56 = vmul.f32 %v11990_v46, %v11990_v46 }
 0x3df   : > { %9616 = vmatprep.mubr.msk.f32.mxu1 %vm2942_vm8, %v11972_v32 }
 0x3e0   : > { %v3027_v53 = vsel %vm2942_vm8, %v2938_v48, 0.0  ;;  %v3030_v3 = vsel %vm2942_vm8, %v2939_v56, 0.0 }
 0x3e1   : > { %v12000_v33 = vpop.permute.xlu0 %2904  ;;  %3022 = vadd.xlane.f32.xlu1 %v3021_v37  ;;  %3019 = vadd.xlane.f32.xlu0 %v3018_v47  ;;  %v12012_v61 = vpop.permute.xlu1 %2906 }
 0x3e2   : > { %14801 = vst [vmem:[#allocation36_spill] sm:$0xff] %v12000_v33  ;;  %9617 = vmatmul.mubr.msk.f32.gmra.mrb[30].mxu1 %vm2942_vm8, %v11974_v35  ;;  %v2940_v55 = vmul.f32 %v12000_v33, %v12000_v33  ;;  %14802 = vst [vmem:[#allocation37_spill] sm:$0xff] %v12012_v61  ;;  %v2941_v13 = vmul.f32 %v12012_v61, %v12012_v61 }
 0x3e3   : > { %9619 = vmatprep.mubr.msk.f32.mxu1 %vm2942_vm8, %v11986_v44 }
 0x3e4   : > { %v3033_v62 = vsel %vm2942_vm8, %v2940_v55, 0.0  ;;  %v3036_v63 = vsel %vm2942_vm8, %v2941_v13, 0.0 }
 0x3e5   : > { %3028 = vadd.xlane.f32.xlu1 %v3027_v53  ;;  %3025 = vadd.xlane.f32.xlu0 %v3024_v54 }
 0x3e6   : > { %9620 = vmatmul.mubr.msk.f32.gmra.mrb[32].mxu1 %vm2942_vm8, %v11990_v46 }
 0x3e7   : > { %9622 = vmatprep.mubr.msk.f32.mxu1 %vm2942_vm8, %v12000_v33 }
 0x3e9   : > { %3034 = vadd.xlane.f32.xlu1 %v3033_v62  ;;  %3031 = vadd.xlane.f32.xlu0 %v3030_v3 }
 0x3ea   : > { %9623 = vmatmul.mubr.msk.f32.gmra.mrb[34].mxu1 %vm2942_vm8, %v12012_v61 }
 0x3ed   : > { %3037 = vadd.xlane.f32.xlu0 %v3036_v63 }
 0x410   : > { %v9579_v7 = vpop.f32.mrb[4].mxu1 }
 0x411   : > { %v3171_v8 = vpop.f32.mrb[5].mxu1  ;;  %v3370_v27 = vmul.f32 2.0, %v9579_v7 }
 0x412   : > { %v3369_v15 = vmul.f32 2.0, %v3171_v8 }
 0x41b   : > { %v2945_v6 = vpop.xlane.xlu0 %2944 }
 0x41c   : > { %v3337_v16 = vadd.f32 %v12030_v10, %v2945_v6 }
 0x41e   : > { %v3401_v25 = vsub.f32 %v3337_v16, %v3369_v15 }
 0x420   : > { %v2948_v26 = vpop.xlane.xlu1 %2947  ;;  %v3434_v30 = vmul.f32 %v12034_v20, %v3401_v25 }
 0x421   : > { %v3338_v36 = vadd.f32 %v12030_v10, %v2948_v26 }
 0x422   : > { %v12038_v39 = vsub.f32 0.0, %v3434_v30 }
 0x423   : > { %v3402_v42 = vsub.f32 %v3338_v36, %v3370_v27 }
 0x424   : > { %14803 = vst [vmem:[#allocation38_spill] sm:$0xff] %v12038_v39  ;;  %v3499_v43 = vsel %vm3498_vm11, %v12038_v39, -inf }
 0x425   : > { %3500 = vmax.xlane.f32.xlu1 %v3499_v43  ;;  %v3435_v37 = vmul.f32 %v12034_v20, %v3402_v42 }
 0x427   : > { %v12043_v47 = vsub.f32 0.0, %v3435_v37 }
 0x429   : > { %14804 = vst [vmem:[#allocation39_spill] sm:$0xff] %v12043_v47  ;;  %v3502_v48 = vsel %vm3498_vm11, %v12043_v47, -inf }
 0x42a   : > { %3503 = vmax.xlane.f32.xlu0 %v3502_v48 }
 0x43e   : > { %v2951_v50 = vpop.xlane.xlu0 %2950  ;;  %v2957_v55 = vpop.xlane.xlu1 %2956 }
 0x43f   : > { %v3339_v27 = vadd.f32 %v12030_v10, %v2951_v50  ;;  %v3341_v5 = vadd.f32 %v12030_v10, %v2957_v55 }
 0x442   : > { %v2954_v53 = vpop.xlane.xlu0 %2953 }
 0x443   : > { %v3340_v25 = vadd.f32 %v12030_v10, %v2954_v53 }
 0x446   : > { %v2960_v54 = vpop.xlane.xlu0 %2959  ;;  %v2963_v62 = vpop.xlane.xlu1 %2962 }
 0x447   : > { %v3342_v2 = vadd.f32 %v12030_v10, %v2960_v54 }
 0x44a   : > { %v2966_v56 = vpop.xlane.xlu0 %2965  ;;  %v2969_v13 = vpop.xlane.xlu1 %2968 }
 0x44b   : > { %v3344_v54 = vadd.f32 %v12030_v10, %v2966_v56 }
 0x44e   : > { %v2972_v3 = vpop.xlane.xlu0 %2971  ;;  %v12049_v7 = vpop.xlane.xlu1 %2974 }
 0x452   : > { %v12047_v63 = vpop.xlane.xlu0 %2977  ;;  %v12053_v6 = vpop.xlane.xlu1 %2980 }
 0x456   : > { %v12051_v8 = vpop.xlane.xlu0 %2983  ;;  %v12059_v36 = vpop.xlane.xlu1 %2986 }
 0x45a   : > { %v12055_v15 = vpop.xlane.xlu0 %2989 }
 0x45e   : > { %v12064_v4 = vpop.xlane.xlu0 %2995 }
 0x462   : > { %v12083_v56 = vpop.xlane.xlu0 %3001 }
 0x485   : > { %v9582_v16 = vpop.f32.mrb[6].mxu1 }
 0x486   : > { %v3372_v26 = vmul.f32 2.0, %v9582_v16  ;;  %v3181_v30 = vpop.f32.mrb[7].mxu1 }
 0x487   : > { %v3371_v42 = vmul.f32 2.0, %v3181_v30  ;;  %v12069_v30 = vpop.xlane.xlu1 %2992 }
 0x488   : > { %v3404_v43 = vsub.f32 %v3340_v25, %v3372_v26 }
 0x489   : > { %v3403_v37 = vsub.f32 %v3339_v27, %v3371_v42  ;;  %v9585_v48 = vpop.f32.mrb[8].mxu1 }
 0x48a   : > { %v3437_v29 = vmul.f32 %v12034_v20, %v3404_v43  ;;  %v3374_v0 = vmul.f32 2.0, %v9585_v48  ;;  %v3191_v1 = vpop.f32.mrb[9].mxu1 }
 0x48b   : > { %v3436_v53 = vmul.f32 %v12034_v20, %v3403_v37  ;;  %v3373_v16 = vmul.f32 2.0, %v3191_v1  ;;  %v3343_v1 = vadd.f32 %v12030_v10, %v2963_v62 }
 0x48c   : > { %v3406_v50 = vsub.f32 %v3342_v2, %v3374_v0  ;;  %v12067_v34 = vsub.f32 0.0, %v3437_v29 }
 0x48d   : > { %v3405_v25 = vsub.f32 %v3341_v5, %v3373_v16  ;;  %v9588_v26 = vpop.f32.mrb[10].mxu1  ;;  %v12071_v27 = vsub.f32 0.0, %v3436_v53 }
 0x48e   : > { %14805 = vst [vmem:[#allocation40_spill] sm:$0xff] %v12067_v34  ;;  %v3439_v42 = vmul.f32 %v12034_v20, %v3406_v50  ;;  %v3376_v43 = vmul.f32 2.0, %v9588_v26  ;;  %v3201_v55 = vpop.f32.mrb[11].mxu1  ;;  %v3508_v48 = vsel %vm3498_vm11, %v12067_v34, -inf  ;;  %v3346_v26 = vadd.f32 %v12030_v10, %v2972_v3 }
 0x48f   : > { %14806 = vst [vmem:[#allocation41_spill] sm:$0xff] %v12071_v27  ;;  %v3438_v0 = vmul.f32 %v12034_v20, %v3405_v25  ;;  %v3375_v29 = vmul.f32 2.0, %v3201_v55  ;;  %3509 = vmax.xlane.f32.xlu0 %v3508_v48  ;;  %v3505_v5 = vsel %vm3498_vm11, %v12071_v27, -inf }
 0x490   : > { %v3408_v2 = vsub.f32 %v3344_v54, %v3376_v43  ;;  %3506 = vmax.xlane.f32.xlu1 %v3505_v5  ;;  %v12081_v37 = vsub.f32 0.0, %v3439_v42  ;;  %v3345_v54 = vadd.f32 %v12030_v10, %v2969_v13  ;;  %v12092_v43 = vpop.xlane.xlu1 %2998  ;;  %v3348_v13 = vadd.f32 %v12030_v10, %v12047_v63 }
 0x491   : > { %v3407_v53 = vsub.f32 %v3343_v1, %v3375_v29  ;;  %v9591_v16 = vpop.f32.mrb[12].mxu1  ;;  %v12085_v50 = vsub.f32 0.0, %v3438_v0 }
 0x492   : > { %14807 = vst [vmem:[#allocation42_spill] sm:$0xff] %v12081_v37  ;;  %v3441_v62 = vmul.f32 %v12034_v20, %v3408_v2  ;;  %v3378_v25 = vmul.f32 2.0, %v9591_v16  ;;  %v3211_v55 = vpop.f32.mrb[13].mxu1  ;;  %v3514_v48 = vsel %vm3498_vm11, %v12081_v37, -inf }
 0x493   : > { %14808 = vst [vmem:[#allocation43_spill] sm:$0xff] %v12085_v50  ;;  %v3440_v42 = vmul.f32 %v12034_v20, %v3407_v53  ;;  %v3377_v5 = vmul.f32 2.0, %v3211_v55  ;;  %3515 = vmax.xlane.f32.xlu0 %v3514_v48  ;;  %v3511_v1 = vsel %vm3498_vm11, %v12085_v50, -inf }
 0x494   : > { %v3410_v0 = vsub.f32 %v3346_v26, %v3378_v25  ;;  %3512 = vmax.xlane.f32.xlu1 %v3511_v1  ;;  %v12097_v3 = vsub.f32 0.0, %v3441_v62  ;;  %v3347_v26 = vadd.f32 %v12030_v10, %v12049_v7  ;;  %v12108_v25 = vpop.xlane.xlu0 %3007  ;;  %v3350_v7 = vadd.f32 %v12030_v10, %v12051_v8 }
 0x495   : > { %v3409_v29 = vsub.f32 %v3345_v54, %v3377_v5  ;;  %v9594_v2 = vpop.f32.mrb[14].mxu1  ;;  %v12099_v16 = vsub.f32 0.0, %v3440_v42  ;;  %v12115_v5 = vpop.xlane.xlu1 %3004  ;;  %v3358_v35 = vadd.f32 %v12030_v10, %v12108_v25 }
 0x496   : > { %14809 = vst [vmem:[#allocation44_spill] sm:$0xff] %v12097_v3  ;;  %v3443_v28 = vmul.f32 %v12034_v20, %v3410_v0  ;;  %v3380_v9 = vmul.f32 2.0, %v9594_v2  ;;  %v3221_v53 = vpop.f32.mrb[15].mxu1  ;;  %v3520_v55 = vsel %vm3498_vm11, %v12097_v3, -inf }
 0x497   : > { %14810 = vst [vmem:[#allocation45_spill] sm:$0xff] %v12099_v16  ;;  %v3442_v62 = vmul.f32 %v12034_v20, %v3409_v29  ;;  %v3379_v48 = vmul.f32 2.0, %v3221_v53  ;;  %3521 = vmax.xlane.f32.xlu0 %v3520_v55  ;;  %v3517_v54 = vsel %vm3498_vm11, %v12099_v16, -inf }
 0x498   : > { %v3412_v63 = vsub.f32 %v3348_v13, %v3380_v9  ;;  %3518 = vmax.xlane.f32.xlu1 %v3517_v54  ;;  %v12113_v42 = vsub.f32 0.0, %v3443_v28  ;;  %v3349_v9 = vadd.f32 %v12030_v10, %v12053_v6  ;;  %v3352_v6 = vadd.f32 %v12030_v10, %v12055_v15 }
 0x499   : > { %v3411_v1 = vsub.f32 %v3347_v26, %v3379_v48  ;;  %v9597_v0 = vpop.f32.mrb[16].mxu1  ;;  %v12117_v2 = vsub.f32 0.0, %v3442_v62  ;;  %v12131_v48 = vpop.xlane.xlu0 %3013 }
 0x49a   : > { %14811 = vst [vmem:[#allocation46_spill] sm:$0xff] %v12113_v42  ;;  %v3445_v29 = vmul.f32 %v12034_v20, %v3412_v63  ;;  %v3382_v53 = vmul.f32 2.0, %v9597_v0  ;;  %v3231_v55 = vpop.f32.mrb[17].mxu1  ;;  %v3526_v33 = vsel %vm3498_vm11, %v12113_v42, -inf  ;;  %v3360_v21 = vadd.f32 %v12030_v10, %v12131_v48 }
 0x49b   : > { %14812 = vst [vmem:[#allocation47_spill] sm:$0xff] %v12117_v2  ;;  %v3444_v28 = vmul.f32 %v12034_v20, %v3411_v1  ;;  %v3381_v13 = vmul.f32 2.0, %v3231_v55  ;;  %3527 = vmax.xlane.f32.xlu0 %v3526_v33  ;;  %v3523_v26 = vsel %vm3498_vm11, %v12117_v2, -inf }
 0x49c   : > { %v3414_v62 = vsub.f32 %v3350_v7, %v3382_v53  ;;  %3524 = vmax.xlane.f32.xlu1 %v3523_v26  ;;  %v12129_v8 = vsub.f32 0.0, %v3445_v29  ;;  %v3351_v7 = vadd.f32 %v12030_v10, %v12059_v36  ;;  %v12142_v29 = vpop.xlane.xlu1 %3010  ;;  %v3354_v36 = vadd.f32 %v12030_v10, %v12064_v4 }
 0x49d   : > { %v3413_v54 = vsub.f32 %v3349_v9, %v3381_v13  ;;  %v9600_v63 = vpop.f32.mrb[18].mxu1  ;;  %v12133_v0 = vsub.f32 0.0, %v3444_v28 }
 0x49e   : > { %14813 = vst [vmem:[#allocation48_spill] sm:$0xff] %v12129_v8  ;;  %v3447_v1 = vmul.f32 %v12034_v20, %v3414_v62  ;;  %v3384_v55 = vmul.f32 2.0, %v9600_v63  ;;  %v3241_v33 = vpop.f32.mrb[19].mxu1  ;;  %v3532_v61 = vsel %vm3498_vm11, %v12129_v8, -inf }
 0x49f   : > { %14814 = vst [vmem:[#allocation49_spill] sm:$0xff] %v12133_v0  ;;  %v3446_v53 = vmul.f32 %v12034_v20, %v3413_v54  ;;  %v3383_v9 = vmul.f32 2.0, %v3241_v33  ;;  %3533 = vmax.xlane.f32.xlu0 %v3532_v61  ;;  %v3529_v28 = vsel %vm3498_vm11, %v12133_v0, -inf }
 0x4a0   : > { %v3416_v15 = vsub.f32 %v3352_v6, %v3384_v55  ;;  %3530 = vmax.xlane.f32.xlu1 %v3529_v28  ;;  %v12147_v13 = vsub.f32 0.0, %v3447_v1  ;;  %v3353_v6 = vadd.f32 %v12030_v10, %v12069_v30  ;;  %v12158_v55 = vpop.xlane.xlu0 %3019  ;;  %v3356_v30 = vadd.f32 %v12030_v10, %v12083_v56 }
 0x4a1   : > { %v3415_v26 = vsub.f32 %v3351_v7, %v3383_v9  ;;  %v9603_v62 = vpop.f32.mrb[20].mxu1  ;;  %v12149_v63 = vsub.f32 0.0, %v3446_v53  ;;  %v3017_v9 = vpop.xlane.xlu1 %3016 }
 0x4a2   : > { %14815 = vst [vmem:[#allocation50_spill] sm:$0xff] %v12147_v13  ;;  %v3449_v44 = vmul.f32 %v12034_v20, %v3416_v15  ;;  %v3386_v46 = vmul.f32 2.0, %v9603_v62  ;;  %v3251_v54 = vpop.f32.mrb[21].mxu1  ;;  %v3538_v61 = vsel %vm3498_vm11, %v12147_v13, -inf }
 0x4a3   : > { %14816 = vst [vmem:[#allocation51_spill] sm:$0xff] %v12149_v63  ;;  %v3448_v1 = vmul.f32 %v12034_v20, %v3415_v26  ;;  %v3385_v33 = vmul.f32 2.0, %v3251_v54  ;;  %3539 = vmax.xlane.f32.xlu0 %v3538_v61  ;;  %v3535_v7 = vsel %vm3498_vm11, %v12149_v63, -inf }
 0x4a4   : > { %v3418_v4 = vsub.f32 %v3354_v36, %v3386_v46  ;;  %3536 = vmax.xlane.f32.xlu1 %v3535_v7  ;;  %v12163_v53 = vsub.f32 0.0, %v3449_v44  ;;  %v3355_v46 = vadd.f32 %v12030_v10, %v12092_v43 }
 0x4a5   : > { %v3417_v28 = vsub.f32 %v3353_v6, %v3385_v33  ;;  %v9606_v15 = vpop.f32.mrb[22].mxu1  ;;  %v12165_v62 = vsub.f32 0.0, %v3448_v1  ;;  %v3026_v33 = vpop.xlane.xlu0 %3025 }
 0x4a6   : > { %14817 = vst [vmem:[#allocation52_spill] sm:$0xff] %v12163_v53  ;;  %v3451_v32 = vmul.f32 %v12034_v20, %v3418_v4  ;;  %v3388_v26 = vmul.f32 2.0, %v9606_v15  ;;  %v3261_v54 = vpop.f32.mrb[23].mxu1  ;;  %v3544_v61 = vsel %vm3498_vm11, %v12163_v53, -inf  ;;  %v3364_v14 = vadd.f32 %v12030_v10, %v3026_v33 }
 0x4a7   : > { %14818 = vst [vmem:[#allocation53_spill] sm:$0xff] %v12165_v62  ;;  %v3450_v44 = vmul.f32 %v12034_v20, %v3417_v28  ;;  %v3387_v36 = vmul.f32 2.0, %v3261_v54  ;;  %3545 = vmax.xlane.f32.xlu0 %v3544_v61  ;;  %v3541_v6 = vsel %vm3498_vm11, %v12165_v62, -inf }
 0x4a8   : > { %v3420_v1 = vsub.f32 %v3356_v30, %v3388_v26  ;;  %3542 = vmax.xlane.f32.xlu1 %v3541_v6  ;;  %v12177_v56 = vsub.f32 0.0, %v3451_v32  ;;  %v3357_v30 = vadd.f32 %v12030_v10, %v12115_v5  ;;  %v3023_v32 = vpop.xlane.xlu1 %3022 }
 0x4a9   : > { %v3419_v7 = vsub.f32 %v3355_v46, %v3387_v36  ;;  %v9609_v4 = vpop.f32.mrb[24].mxu1  ;;  %v12179_v15 = vsub.f32 0.0, %v3450_v44 }
 0x4aa   : > { %14819 = vst [vmem:[#allocation54_spill] sm:$0xff] %v12177_v56  ;;  %v3453_v43 = vmul.f32 %v12034_v20, %v3420_v1  ;;  %v3390_v28 = vmul.f32 2.0, %v9609_v4  ;;  %v3271_v54 = vpop.f32.mrb[25].mxu1  ;;  %v3550_v61 = vsel %vm3498_vm11, %v12177_v56, -inf }
 0x4ab   : > { %14820 = vst [vmem:[#allocation55_spill] sm:$0xff] %v12179_v15  ;;  %v3452_v26 = vmul.f32 %v12034_v20, %v3419_v7  ;;  %v3389_v46 = vmul.f32 2.0, %v3271_v54  ;;  %3551 = vmax.xlane.f32.xlu0 %v3550_v61  ;;  %v3547_v44 = vsel %vm3498_vm11, %v12179_v15, -inf }
 0x4ac   : > { %v3422_v36 = vsub.f32 %v3358_v35, %v3390_v28  ;;  %3548 = vmax.xlane.f32.xlu1 %v3547_v44  ;;  %v12191_v25 = vsub.f32 0.0, %v3453_v43  ;;  %v3359_v35 = vadd.f32 %v12030_v10, %v12142_v29  ;;  %v3032_v28 = vpop.xlane.xlu0 %3031  ;;  %v3362_v29 = vadd.f32 %v12030_v10, %v12158_v55 }
 0x4ad   : > { %v3421_v6 = vsub.f32 %v3357_v30, %v3389_v46  ;;  %v9612_v1 = vpop.f32.mrb[26].mxu1  ;;  %v12193_v4 = vsub.f32 0.0, %v3452_v26  ;;  %v3029_v46 = vpop.xlane.xlu1 %3028 }
 0x4ae   : > { %14821 = vst [vmem:[#allocation56_spill] sm:$0xff] %v12191_v25  ;;  %v3455_v5 = vmul.f32 %v12034_v20, %v3422_v36  ;;  %v3392_v22 = vmul.f32 2.0, %v9612_v1  ;;  %v3281_v7 = vpop.f32.mrb[27].mxu1  ;;  %v3556_v54 = vsel %vm3498_vm11, %v12191_v25, -inf }
 0x4af   : > { %14822 = vst [vmem:[#allocation57_spill] sm:$0xff] %v12193_v4  ;;  %v3454_v43 = vmul.f32 %v12034_v20, %v3421_v6  ;;  %v3391_v61 = vmul.f32 2.0, %v3281_v7  ;;  %3557 = vmax.xlane.f32.xlu0 %v3556_v54  ;;  %v3553_v30 = vsel %vm3498_vm11, %v12193_v4, -inf }
 0x4b0   : > { %v3424_v26 = vsub.f32 %v3360_v21, %v3392_v22  ;;  %3554 = vmax.xlane.f32.xlu1 %v3553_v30  ;;  %v12205_v48 = vsub.f32 0.0, %v3455_v5  ;;  %v3361_v21 = vadd.f32 %v12030_v10, %v3017_v9  ;;  %v3038_v55 = vpop.xlane.xlu0 %3037 }
 0x4b1   : > { %v3423_v44 = vsub.f32 %v3359_v35, %v3391_v61  ;;  %v9615_v36 = vpop.f32.mrb[28].mxu1  ;;  %v12207_v1 = vsub.f32 0.0, %v3454_v43 }
 0x4b2   : > { %14823 = vst [vmem:[#allocation58_spill] sm:$0xff] %v12205_v48  ;;  %v3457_v12 = vmul.f32 %v12034_v20, %v3424_v26  ;;  %v3394_v6 = vmul.f32 2.0, %v9615_v36  ;;  %v3291_v7 = vpop.f32.mrb[29].mxu1  ;;  %v3562_v54 = vsel %vm3498_vm11, %v12205_v48, -inf }
 0x4b3   : > { %14824 = vst [vmem:[#allocation59_spill] sm:$0xff] %v12207_v1  ;;  %v3456_v22 = vmul.f32 %v12034_v20, %v3423_v44  ;;  %v3393_v5 = vmul.f32 2.0, %v3291_v7  ;;  %3563 = vmax.xlane.f32.xlu0 %v3562_v54  ;;  %v3559_v43 = vsel %vm3498_vm11, %v12207_v1, -inf  ;;  %v3035_v7 = vpop.xlane.xlu1 %3034 }
 0x4b4   : > { %v3426_v35 = vsub.f32 %v3362_v29, %v3394_v6  ;;  %v12218_v61 = vsub.f32 0.0, %v3457_v12  ;;  %3560 = vmax.xlane.f32.xlu1 %v3559_v43  ;;  %v3363_v6 = vadd.f32 %v12030_v10, %v3023_v32  ;;  %v3366_v32 = vadd.f32 %v12030_v10, %v3032_v28 }
 0x4b5   : > { %v3425_v30 = vsub.f32 %v3361_v21, %v3393_v5  ;;  %v9618_v26 = vpop.f32.mrb[30].mxu1  ;;  %v12220_v36 = vsub.f32 0.0, %v3456_v22 }
 0x4b6   : > { %14825 = vst [vmem:[#allocation60_spill] sm:$0xff] %v12218_v61  ;;  %v3459_v9 = vmul.f32 %v12034_v20, %v3426_v35  ;;  %v3396_v17 = vmul.f32 2.0, %v9618_v26  ;;  %v3301_v44 = vpop.f32.mrb[31].mxu1  ;;  %v3568_v29 = vsel %vm3498_vm11, %v12218_v61, -inf }
 0x4b7   : > { %14826 = vst [vmem:[#allocation61_spill] sm:$0xff] %v12220_v36  ;;  %v3458_v12 = vmul.f32 %v12034_v20, %v3425_v30  ;;  %v3395_v54 = vmul.f32 2.0, %v3301_v44  ;;  %3569 = vmax.xlane.f32.xlu0 %v3568_v29  ;;  %v3565_v21 = vsel %vm3498_vm11, %v12220_v36, -inf  ;;  %v12232_v35 = vpop.xlane.xlu0 %3503 }
 0x4b8   : > { %v3428_v22 = vsub.f32 %v3364_v14, %v3396_v17  ;;  %v12230_v5 = vsub.f32 0.0, %v3459_v9  ;;  %14828 = vst [vmem:[#allocation63_spill] sm:$0xff] %v12232_v35  ;;  %3566 = vmax.xlane.f32.xlu1 %v3565_v21  ;;  %v3365_v17 = vadd.f32 %v12030_v10, %v3029_v46  ;;  %v12241_v14 = vpop.xlane.xlu1 %3500  ;;  %vm3950_vm12 = vcmp.eq.f32.partialorder %v12043_v47, %v12232_v35 }
 0x4b9   : > { %v3427_v33 = vsub.f32 %v3363_v6, %v3395_v54  ;;  %v9621_v43 = vpop.f32.mrb[32].mxu1  ;;  %v12234_v26 = vsub.f32 0.0, %v3458_v12  ;;  %14830 = vst [vmem:[#allocation65_spill] sm:$0xff] %v12241_v14  ;;  %v14831_v54 = vlaneseq  ;;  %v3367_v46 = vadd.f32 %v12030_v10, %v3035_v7 }
 0x4ba   : > { %14827 = vst [vmem:[#allocation62_spill] sm:$0xff] %v12230_v5  ;;  %v3461_v57 = vmul.f32 %v12034_v20, %v3428_v22  ;;  %v3398_v30 = vmul.f32 2.0, %v9621_v43  ;;  %v3311_v44 = vpop.f32.mrb[33].mxu1  ;;  %v3574_v29 = vsel %vm3498_vm11, %v12230_v5, -inf  ;;  %v3368_v43 = vadd.f32 %v12030_v10, %v3038_v55 }
 0x4bb   : > { %14829 = vst [vmem:[#allocation64_spill] sm:$0xff] %v12234_v26  ;;  %v3460_v9 = vmul.f32 %v12034_v20, %v3427_v33  ;;  %v3397_v6 = vmul.f32 2.0, %v3311_v44  ;;  %3575 = vmax.xlane.f32.xlu0 %v3574_v29  ;;  %v3571_v12 = vsel %vm3498_vm11, %v12234_v26, -inf  ;;  %v12247_v28 = vand.u32 127, %v14831_v54 }
 0x4bc   : > { %v3430_v21 = vsub.f32 %v3366_v32, %v3398_v30  ;;  %v12251_v22 = vsub.f32 0.0, %v3461_v57  ;;  %3572 = vmax.xlane.f32.xlu1 %v3571_v12  ;;  %vm3949_vm13 = vcmp.eq.f32.partialorder %v12038_v39, %v12241_v14 }
 0x4bd   : > { %14832 = vst [vmem:[#allocation66_spill] sm:$0xff] %v12247_v28  ;;  %v3429_v59 = vsub.f32 %v3365_v17, %v3397_v6  ;;  %v9624_v33 = vpop.f32.mrb[34].mxu1  ;;  %v12255_v44 = vsub.f32 0.0, %v3460_v9  ;;  %v3982_v55 = vsel %vm3950_vm12, %v12247_v28, 32  ;;  %v3981_v12 = vsel %vm3949_vm13, %v12247_v28, 32 }
 0x4be   : > { %14833 = vst [vmem:[#allocation67_spill] sm:$0xff] %v12251_v22  ;;  %v3463_v29 = vmul.f32 %v12034_v20, %v3430_v21  ;;  %v3400_v54 = vmul.f32 2.0, %v9624_v33  ;;  %v3321_v60 = vpop.f32.mrb[35].mxu1  ;;  %v3580_v57 = vsel %vm3498_vm11, %v12251_v22, -inf  ;;  %v12278_v21 = vsel %vm3498_vm11, %v3982_v55, 2147483647 }
 0x4bf   : > { %14834 = vst [vmem:[#allocation68_spill] sm:$0xff] %v12255_v44  ;;  %v3462_v32 = vmul.f32 %v12034_v20, %v3429_v59  ;;  %v3399_v7 = vmul.f32 2.0, %v3321_v60  ;;  %3581 = vmax.xlane.f32.xlu0 %v3580_v57  ;;  %v3577_v10 = vsel %vm3498_vm11, %v12255_v44, -inf  ;;  %v4030_v57 = vshra.s32 %v12278_v21, 16 }
 0x4c0   : > { %v3432_v30 = vsub.f32 %v3368_v43, %v3400_v54  ;;  %v12269_v17 = vsub.f32 0.0, %v3463_v29  ;;  %3578 = vmax.xlane.f32.xlu1 %v3577_v10  ;;  %v12286_v29 = vsel %vm3498_vm11, %v3981_v12, 2147483647 }
 0x4c1   : > { %v3431_v9 = vsub.f32 %v3367_v46, %v3399_v7  ;;  %v12271_v6 = vsub.f32 0.0, %v3462_v32  ;;  %v4015_v7 = vshra.s32 %v12286_v29, 16  ;;  %v12296_v10 = vcvt.s32.f32 %v4030_v57 }
 0x4c2   : > { %14835 = vst [vmem:[#allocation69_spill] sm:$0xff] %v12269_v17  ;;  %v3465_v59 = vmul.f32 %v12034_v20, %v3432_v30  ;;  %v3586_v60 = vsel %vm3498_vm11, %v12269_v17, -inf }
 0x4c3   : > { %14836 = vst [vmem:[#allocation70_spill] sm:$0xff] %v12271_v6  ;;  %v3464_v33 = vmul.f32 %v12034_v20, %v3431_v9  ;;  %3587 = vmax.xlane.f32.xlu0 %v3586_v60  ;;  %v3583_v43 = vsel %vm3498_vm11, %v12271_v6, -inf  ;;  %v12299_v55 = vcvt.s32.f32 %v4015_v7 }
 0x4c4   : > { %v12283_v46 = vsub.f32 0.0, %v3465_v59  ;;  %3584 = vmax.xlane.f32.xlu1 %v3583_v43 }
 0x4c5   : > { %v12288_v54 = vsub.f32 0.0, %v3464_v33 }
 0x4c6   : > { %14837 = vst [vmem:[#allocation71_spill] sm:$0xff] %v12283_v46  ;;  %v3592_v32 = vsel %vm3498_vm11, %v12283_v46, -inf }
 0x4c7   : > { %14838 = vst [vmem:[#allocation72_spill] sm:$0xff] %v12288_v54  ;;  %3593 = vmax.xlane.f32.xlu0 %v3592_v32  ;;  %v3589_v20 = vsel %vm3498_vm11, %v12288_v54, -inf }
 0x4c8   : > { %3590 = vmax.xlane.f32.xlu1 %v3589_v20 }
 0x4cb   : > { %4033 = vmin.xlane.f32.xlu0 %v12296_v10 }
 0x4cc   : > { %4018 = vmin.xlane.f32.xlu1 %v12299_v55 }
 0x51c   : > { %v12302_v30 = vpop.xlane.xlu0 %3509 }
 0x51d   : > { %14839 = vst [vmem:[#allocation73_spill] sm:$0xff] %v12302_v30  ;;  %vm3952_vm15 = vcmp.eq.f32.partialorder %v12067_v34, %v12302_v30  ;;  %v12306_v9 = vpop.xlane.xlu1 %3506 }
 0x51e   : > { %14840 = vst [vmem:[#allocation74_spill] sm:$0xff] %v12306_v9  ;;  %vm3951_vm0 = vcmp.eq.f32.partialorder %v12071_v27, %v12306_v9  ;;  %v3984_v12 = vsel %vm3952_vm15, %v12247_v28, 32 }
 0x51f   : > { %v12312_v59 = vsel %vm3498_vm11, %v3984_v12, 2147483647  ;;  %v3983_v60 = vsel %vm3951_vm0, %v12247_v28, 32 }
 0x520   : > { %v12315_v33 = vpop.xlane.xlu0 %3515  ;;  %v4060_v43 = vshra.s32 %v12312_v59, 16  ;;  %v12319_v57 = vsel %vm3498_vm11, %v3983_v60, 2147483647 }
 0x521   : > { %14841 = vst [vmem:[#allocation75_spill] sm:$0xff] %v12315_v33  ;;  %vm3954_vm3 = vcmp.eq.f32.partialorder %v12081_v37, %v12315_v33  ;;  %v12323_v32 = vpop.xlane.xlu1 %3512  ;;  %v4045_v12 = vshra.s32 %v12319_v57, 16 }
 0x522   : > { %14842 = vst [vmem:[#allocation76_spill] sm:$0xff] %v12323_v32  ;;  %v3986_v20 = vsel %vm3954_vm3, %v12247_v28, 32  ;;  %vm3953_vm4 = vcmp.eq.f32.partialorder %v12085_v50, %v12323_v32  ;;  %v12328_v7 = vcvt.s32.f32 %v4060_v43 }
 0x523   : > { %v12332_v34 = vsel %vm3498_vm11, %v3986_v20, 2147483647  ;;  %v3985_v37 = vsel %vm3953_vm4, %v12247_v28, 32  ;;  %v12343_v43 = vcvt.s32.f32 %v4045_v12 }
 0x524   : > { %v12334_v30 = vpop.xlane.xlu0 %3521  ;;  %v4090_v60 = vshra.s32 %v12332_v34, 16  ;;  %4063 = vmin.xlane.f32.xlu0 %v12328_v7  ;;  %v12352_v32 = vsel %vm3498_vm11, %v3985_v37, 2147483647 }
 0x525   : > { %14843 = vst [vmem:[#allocation77_spill] sm:$0xff] %v12334_v30  ;;  %vm3956_vm5 = vcmp.eq.f32.partialorder %v12097_v3, %v12334_v30  ;;  %v12341_v33 = vpop.xlane.xlu1 %3518  ;;  %4048 = vmin.xlane.f32.xlu1 %v12343_v43  ;;  %v4075_v12 = vshra.s32 %v12352_v32, 16 }
 0x526   : > { %14844 = vst [vmem:[#allocation78_spill] sm:$0xff] %v12341_v33  ;;  %v3988_v50 = vsel %vm3956_vm5, %v12247_v28, 32  ;;  %vm3955_vm9 = vcmp.eq.f32.partialorder %v12099_v16, %v12341_v33  ;;  %v12349_v20 = vcvt.s32.f32 %v4090_v60 }
 0x527   : > { %v12355_v47 = vsel %vm3498_vm11, %v3988_v50, 2147483647  ;;  %v3987_v60 = vsel %vm3955_vm9, %v12247_v28, 32  ;;  %v12370_v50 = vcvt.s32.f32 %v4075_v12 }
 0x528   : > { %v12357_v3 = vpop.xlane.xlu0 %3527  ;;  %v4120_v30 = vshra.s32 %v12355_v47, 16  ;;  %4093 = vmin.xlane.f32.xlu0 %v12349_v20  ;;  %v12377_v27 = vsel %vm3498_vm11, %v3987_v60, 2147483647 }
 0x529   : > { %14845 = vst [vmem:[#allocation79_spill] sm:$0xff] %v12357_v3  ;;  %vm3958_vm10 = vcmp.eq.f32.partialorder %v12113_v42, %v12357_v3  ;;  %v12364_v16 = vpop.xlane.xlu1 %3524  ;;  %4078 = vmin.xlane.f32.xlu1 %v12370_v50  ;;  %v4105_v60 = vshra.s32 %v12377_v27, 16 }
 0x52a   : > { %14846 = vst [vmem:[#allocation80_spill] sm:$0xff] %v12364_v16  ;;  %v3990_v37 = vsel %vm3958_vm10, %v12247_v28, 32  ;;  %vm3957_vm12 = vcmp.eq.f32.partialorder %v12117_v2, %v12364_v16  ;;  %v12372_v33 = vcvt.s32.f32 %v4120_v30 }
 0x52b   : > { %v12380_v42 = vsel %vm3498_vm11, %v3990_v37, 2147483647  ;;  %v3989_v3 = vsel %vm3957_vm12, %v12247_v28, 32  ;;  %v12400_v39 = vcvt.s32.f32 %v4105_v60 }
 0x52c   : > { %v12374_v35 = vpop.xlane.xlu0 %3533  ;;  %4123 = vmin.xlane.f32.xlu0 %v12372_v33  ;;  %v4150_v37 = vshra.s32 %v12380_v42, 16  ;;  %v12397_v16 = vsel %vm3498_vm11, %v3989_v3, 2147483647 }
 0x52d   : > { %14847 = vst [vmem:[#allocation81_spill] sm:$0xff] %v12374_v35  ;;  %vm3960_vm13 = vcmp.eq.f32.partialorder %v12129_v8, %v12374_v35  ;;  %v12387_v12 = vpop.xlane.xlu1 %3530  ;;  %4108 = vmin.xlane.f32.xlu1 %v12400_v39  ;;  %v4135_v3 = vshra.s32 %v12397_v16, 16 }
 0x52e   : > { %14848 = vst [vmem:[#allocation82_spill] sm:$0xff] %v12387_v12  ;;  %v3992_v30 = vsel %vm3960_vm13, %v12247_v28, 32  ;;  %vm3959_vm15 = vcmp.eq.f32.partialorder %v12133_v0, %v12387_v12  ;;  %v12402_v8 = vcvt.s32.f32 %v4150_v37 }
 0x52f   : > { %v3991_v9 = vsel %vm3959_vm15, %v12247_v28, 32  ;;  %v12407_v14 = vsel %vm3498_vm11, %v3992_v30, 2147483647 }
 0x530   : > { %v12394_v2 = vpop.xlane.xlu0 %3539  ;;  %4153 = vmin.xlane.f32.xlu0 %v12402_v8  ;;  %v4180_v37 = vshra.s32 %v12407_v14, 16  ;;  %v12421_v30 = vsel %vm3498_vm11, %v3991_v9, 2147483647 }
 0x531   : > { %14849 = vst [vmem:[#allocation83_spill] sm:$0xff] %v12394_v2  ;;  %v12404_v35 = vpop.xlane.xlu1 %3536  ;;  %vm3962_vm0 = vcmp.eq.f32.partialorder %v12147_v13, %v12394_v2  ;;  %v12424_v2 = vcvt.s32.f32 %v4135_v3  ;;  %v4165_v12 = vshra.s32 %v12421_v30, 16 }
 0x532   : > { %14850 = vst [vmem:[#allocation84_spill] sm:$0xff] %v12404_v35  ;;  %vm3961_vm3 = vcmp.eq.f32.partialorder %v12149_v63, %v12404_v35  ;;  %v3994_v60 = vsel %vm3962_vm0, %v12247_v28, 32  ;;  %v12430_v35 = vcvt.s32.f32 %v4180_v37 }
 0x533   : > { %v3993_v13 = vsel %vm3961_vm3, %v12247_v28, 32  ;;  %4138 = vmin.xlane.f32.xlu1 %v12424_v2  ;;  %v12437_v9 = vsel %vm3498_vm11, %v3994_v60, 2147483647  ;;  %v12448_v51 = vcvt.s32.f32 %v4165_v12 }
 0x534   : > { %v12418_v0 = vpop.xlane.xlu0 %3545  ;;  %4183 = vmin.xlane.f32.xlu0 %v12430_v35  ;;  %v12445_v37 = vsel %vm3498_vm11, %v3993_v13, 2147483647 }
 0x535   : > { %14851 = vst [vmem:[#allocation85_spill] sm:$0xff] %v12418_v0  ;;  %vm3964_vm4 = vcmp.eq.f32.partialorder %v12163_v53, %v12418_v0  ;;  %v12428_v63 = vpop.xlane.xlu1 %3542  ;;  %v4210_v53 = vshra.s32 %v12437_v9, 16 }
 0x536   : > { %14852 = vst [vmem:[#allocation86_spill] sm:$0xff] %v12428_v63  ;;  %vm3963_vm5 = vcmp.eq.f32.partialorder %v12165_v62, %v12428_v63  ;;  %v3996_v3 = vsel %vm3964_vm4, %v12247_v28, 32  ;;  %v4195_v63 = vshra.s32 %v12445_v37, 16 }
 0x537   : > { %v3995_v52 = vsel %vm3963_vm5, %v12247_v28, 32  ;;  %v12454_v62 = vcvt.s32.f32 %v4210_v53  ;;  %4168 = vmin.xlane.f32.xlu1 %v12448_v51  ;;  %v12461_v13 = vsel %vm3498_vm11, %v3996_v3, 2147483647 }
 0x538   : > { %v12442_v0 = vpop.xlane.xlu0 %3551  ;;  %v12469_v53 = vsel %vm3498_vm11, %v3995_v52, 2147483647  ;;  %v12472_v45 = vcvt.s32.f32 %v4195_v63 }
 0x539   : > { %14853 = vst [vmem:[#allocation87_spill] sm:$0xff] %v12442_v0  ;;  %vm3966_vm9 = vcmp.eq.f32.partialorder %v12177_v56, %v12442_v0  ;;  %v12452_v60 = vpop.xlane.xlu1 %3548  ;;  %4213 = vmin.xlane.f32.xlu0 %v12454_v62  ;;  %v4240_v56 = vshra.s32 %v12461_v13, 16 }
 0x53a   : > { %14854 = vst [vmem:[#allocation88_spill] sm:$0xff] %v12452_v60  ;;  %vm3965_vm10 = vcmp.eq.f32.partialorder %v12179_v15, %v12452_v60  ;;  %v3998_v12 = vsel %vm3966_vm9, %v12247_v28, 32  ;;  %v4225_v60 = vshra.s32 %v12469_v53, 16 }
 0x53b   : > { %v3997_v58 = vsel %vm3965_vm10, %v12247_v28, 32  ;;  %v12478_v15 = vcvt.s32.f32 %v4240_v56  ;;  %4198 = vmin.xlane.f32.xlu1 %v12472_v45  ;;  %v12485_v52 = vsel %vm3498_vm11, %v3998_v12, 2147483647 }
 0x53c   : > { %v12466_v0 = vpop.xlane.xlu0 %3557  ;;  %v12493_v56 = vsel %vm3498_vm11, %v3997_v58, 2147483647  ;;  %v12496_v40 = vcvt.s32.f32 %v4225_v60 }
 0x53d   : > { %14855 = vst [vmem:[#allocation89_spill] sm:$0xff] %v12466_v0  ;;  %vm3968_vm12 = vcmp.eq.f32.partialorder %v12191_v25, %v12466_v0  ;;  %v12476_v3 = vpop.xlane.xlu1 %3554  ;;  %4243 = vmin.xlane.f32.xlu0 %v12478_v15  ;;  %v4270_v25 = vshra.s32 %v12485_v52, 16 }
 0x53e   : > { %14856 = vst [vmem:[#allocation90_spill] sm:$0xff] %v12476_v3  ;;  %vm3967_vm13 = vcmp.eq.f32.partialorder %v12193_v4, %v12476_v3  ;;  %v4000_v63 = vsel %vm3968_vm12, %v12247_v28, 32  ;;  %v4255_v3 = vshra.s32 %v12493_v56, 16 }
 0x53f   : > { %v3999_v41 = vsel %vm3967_vm13, %v12247_v28, 32  ;;  %v12500_v12 = vcvt.s32.f32 %v4270_v25  ;;  %4228 = vmin.xlane.f32.xlu1 %v12496_v40  ;;  %v12510_v58 = vsel %vm3498_vm11, %v4000_v63, 2147483647 }
 0x540   : > { %v12490_v0 = vpop.xlane.xlu0 %3563  ;;  %v12513_v60 = vcvt.s32.f32 %v4255_v3  ;;  %v4300_v25 = vshra.s32 %v12510_v58, 16 }
 0x541   : > { %14857 = vst [vmem:[#allocation91_spill] sm:$0xff] %v12490_v0  ;;  %vm3970_vm15 = vcmp.eq.f32.partialorder %v12205_v48, %v12490_v0  ;;  %v12502_v4 = vpop.xlane.xlu1 %3560  ;;  %4273 = vmin.xlane.f32.xlu0 %v12500_v12  ;;  %v12519_v0 = vsel %vm3498_vm11, %v3999_v41, 2147483647 }
 0x542   : > { %14858 = vst [vmem:[#allocation92_spill] sm:$0xff] %v12502_v4  ;;  %v4002_v31 = vsel %vm3970_vm15, %v12247_v28, 32  ;;  %vm3969_vm0 = vcmp.eq.f32.partialorder %v12207_v1, %v12502_v4  ;;  %v12524_v1 = vcvt.s32.f32 %v4300_v25  ;;  %v4285_v4 = vshra.s32 %v12519_v0, 16 }
 0x543   : > { %v4001_v38 = vsel %vm3969_vm0, %v12247_v28, 32  ;;  %v12530_v3 = vsel %vm3498_vm11, %v4002_v31, 2147483647  ;;  %4258 = vmin.xlane.f32.xlu1 %v12513_v60 }
 0x544   : > { %v12516_v48 = vpop.xlane.xlu0 %3569  ;;  %v12537_v41 = vcvt.s32.f32 %v4285_v4  ;;  %v4330_v25 = vshra.s32 %v12530_v3, 16 }
 0x545   : > { %14859 = vst [vmem:[#allocation93_spill] sm:$0xff] %v12516_v48  ;;  %vm3972_vm3 = vcmp.eq.f32.partialorder %v12218_v61, %v12516_v48  ;;  %v12526_v63 = vpop.xlane.xlu1 %3566  ;;  %4303 = vmin.xlane.f32.xlu0 %v12524_v1  ;;  %v12543_v48 = vsel %vm3498_vm11, %v4001_v38, 2147483647 }
 0x546   : > { %14860 = vst [vmem:[#allocation94_spill] sm:$0xff] %v12526_v63  ;;  %v4004_v24 = vsel %vm3972_vm3, %v12247_v28, 32  ;;  %vm3971_vm4 = vcmp.eq.f32.partialorder %v12220_v36, %v12526_v63  ;;  %v12548_v23 = vcvt.s32.f32 %v4330_v25  ;;  %v4315_v36 = vshra.s32 %v12543_v48, 16 }
 0x547   : > { %v4003_v31 = vsel %vm3971_vm4, %v12247_v28, 32  ;;  %v12554_v4 = vsel %vm3498_vm11, %v4004_v24, 2147483647  ;;  %4288 = vmin.xlane.f32.xlu1 %v12537_v41 }
 0x548   : > { %v12540_v61 = vpop.xlane.xlu0 %3575  ;;  %v12561_v38 = vcvt.s32.f32 %v4315_v36  ;;  %v4360_v25 = vshra.s32 %v12554_v4, 16 }
 0x549   : > { %14861 = vst [vmem:[#allocation95_spill] sm:$0xff] %v12540_v61  ;;  %vm3974_vm5 = vcmp.eq.f32.partialorder %v12230_v5, %v12540_v61  ;;  %v12550_v11 = vpop.xlane.xlu1 %3572  ;;  %4333 = vmin.xlane.f32.xlu0 %v12548_v23  ;;  %v12567_v61 = vsel %vm3498_vm11, %v4003_v31, 2147483647 }
 0x54a   : > { %14862 = vst [vmem:[#allocation96_spill] sm:$0xff] %v12550_v11  ;;  %v4006_v63 = vsel %vm3974_vm5, %v12247_v28, 32  ;;  %vm3973_vm9 = vcmp.eq.f32.partialorder %v12234_v26, %v12550_v11  ;;  %14863 = vst [vmem:[#allocation97_spill] sm:$0xff] %v12561_v38  ;;  %v12572_v18 = vcvt.s32.f32 %v4360_v25  ;;  %v4345_v26 = vshra.s32 %v12567_v61, 16 }
 0x54b   : > { %v4005_v24 = vsel %vm3973_vm9, %v12247_v28, 32  ;;  %v12578_v36 = vsel %vm3498_vm11, %v4006_v63, 2147483647  ;;  %4318 = vmin.xlane.f32.xlu1 %v12561_v38 }
 0x54c   : > { %v12564_v5 = vpop.xlane.xlu0 %3581  ;;  %v12585_v31 = vcvt.s32.f32 %v4345_v26  ;;  %v4390_v25 = vshra.s32 %v12578_v36, 16 }
 0x54d   : > { %14864 = vst [vmem:[#allocation98_spill] sm:$0xff] %v12564_v5  ;;  %vm3976_vm10 = vcmp.eq.f32.partialorder %v12251_v22, %v12564_v5  ;;  %v12574_v49 = vpop.xlane.xlu1 %3578  ;;  %4363 = vmin.xlane.f32.xlu0 %v12572_v18  ;;  %v12591_v5 = vsel %vm3498_vm11, %v4005_v24, 2147483647 }
 0x54e   : > { %14865 = vst [vmem:[#allocation99_spill] sm:$0xff] %v12574_v49  ;;  %v4008_v11 = vsel %vm3976_vm10, %v12247_v28, 32  ;;  %vm3975_vm12 = vcmp.eq.f32.partialorder %v12255_v44, %v12574_v49  ;;  %14866 = vst [vmem:[#allocation100_spill] sm:$0xff] %v12585_v31  ;;  %v12596_v19 = vcvt.s32.f32 %v4390_v25  ;;  %v4375_v44 = vshra.s32 %v12591_v5, 16 }
 0x54f   : > { %v4007_v63 = vsel %vm3975_vm12, %v12247_v28, 32  ;;  %v12602_v26 = vsel %vm3498_vm11, %v4008_v11, 2147483647  ;;  %4348 = vmin.xlane.f32.xlu1 %v12585_v31 }
 0x550   : > { %v12588_v22 = vpop.xlane.xlu0 %3587  ;;  %14868 = vst [vmem:[#allocation102_spill] sm:$0xff] %v12596_v19  ;;  %v12609_v24 = vcvt.s32.f32 %v4375_v44  ;;  %v4420_v25 = vshra.s32 %v12602_v26, 16 }
 0x551   : > { %14867 = vst [vmem:[#allocation101_spill] sm:$0xff] %v12588_v22  ;;  %vm3978_vm13 = vcmp.eq.f32.partialorder %v12269_v17, %v12588_v22  ;;  %v12598_v38 = vpop.xlane.xlu1 %3584  ;;  %4393 = vmin.xlane.f32.xlu0 %v12596_v19  ;;  %v12615_v22 = vsel %vm3498_vm11, %v4007_v63, 2147483647 }
 0x552   : > { %14869 = vst [vmem:[#allocation103_spill] sm:$0xff] %v12598_v38  ;;  %v4010_v49 = vsel %vm3978_vm13, %v12247_v28, 32  ;;  %vm3977_vm15 = vcmp.eq.f32.partialorder %v12271_v6, %v12598_v38  ;;  %14870 = vst [vmem:[#allocation104_spill] sm:$0xff] %v12609_v24  ;;  %v12620_v31 = vcvt.s32.f32 %v4420_v25  ;;  %v4405_v6 = vshra.s32 %v12615_v22, 16 }
 0x553   : > { %14872 = vst [vmem:[#allocation106_spill] sm:$0xff] %v12615_v22  ;;  %v4009_v11 = vsel %vm3977_vm15, %v12247_v28, 32  ;;  %v12626_v44 = vsel %vm3498_vm11, %v4010_v49, 2147483647  ;;  %4378 = vmin.xlane.f32.xlu1 %v12609_v24 }
 0x554   : > { %v12612_v17 = vpop.xlane.xlu0 %3593  ;;  %v12633_v63 = vcvt.s32.f32 %v4405_v6 }
 0x555   : > { %14871 = vst [vmem:[#allocation105_spill] sm:$0xff] %v12612_v17  ;;  %vm3980_vm0 = vcmp.eq.f32.partialorder %v12283_v46, %v12612_v17  ;;  %v12623_v38 = vpop.xlane.xlu1 %3590  ;;  %4423 = vmin.xlane.f32.xlu0 %v12620_v31  ;;  %v4450_v46 = vshra.s32 %v12626_v44, 16  ;;  %v12638_v17 = vsel %vm3498_vm11, %v4009_v11, 2147483647 }
 0x556   : > { %14873 = vst [vmem:[#allocation107_spill] sm:$0xff] %v12623_v38  ;;  %v4012_v19 = vsel %vm3980_vm0, %v12247_v28, 32  ;;  %vm3979_vm3 = vcmp.eq.f32.partialorder %v12288_v54, %v12623_v38  ;;  %14874 = vst [vmem:[#allocation108_spill] sm:$0xff] %v12638_v17  ;;  %v4435_v49 = vshra.s32 %v12638_v17, 16 }
 0x557   : > { %v4011_v25 = vsel %vm3979_vm3, %v12247_v28, 32  ;;  %v12641_v22 = vcvt.s32.f32 %v4450_v46  ;;  %v12644_v24 = vsel %vm3498_vm11, %v4012_v19, 2147483647  ;;  %4408 = vmin.xlane.f32.xlu1 %v12633_v63  ;;  %v4029_v28 = vand.u32 65535, %v12278_v21 }
 0x558   : > { %v12647_v54 = vsel %vm3498_vm11, %v4011_v25, 2147483647  ;;  %v12650_v6 = vcvt.s32.f32 %v4435_v49  ;;  %v4480_v38 = vshra.s32 %v12644_v24, 16  ;;  %v12656_v46 = vpop.xlane.xlu0 %4033  ;;  %v4014_v25 = vand.u32 65535, %v12286_v29  ;;  %v4589_v29 = vld [vmem:[%s14575_s7] sm:$0xff] }
 0x559   : > { %14875 = vst [vmem:[#allocation109_spill] sm:$0xff] %v12647_v54  ;;  %4453 = vmin.xlane.f32.xlu0 %v12641_v22  ;;  %v4465_v11 = vshra.s32 %v12647_v54, 16  ;;  %v12664_v49 = vpop.xlane.xlu1 %4018  ;;  %vm4035_vm4 = vcmp.eq.f32.partialorder %v12296_v10, %v12656_v46  ;;  %v4031_v54 = vcvt.s32.f32 %v4029_v28  ;;  %v4591_v28 = vld [vmem:[%s14575_s7 + $0x10] sm:$0xff]  ;;  %v4592_v10 = vld [vmem:[%s14575_s7 + $0x18] sm:$0xff] }
 0x55a   : > { %v12658_v17 = vcvt.s32.f32 %v4480_v38  ;;  %vm4020_vm5 = vcmp.eq.f32.partialorder %v12299_v55, %v12664_v49  ;;  %v4016_v38 = vcvt.s32.f32 %v4014_v25  ;;  %v9689_v55 = vpack.c.bf16 %v4592_v10, %v4591_v28 }
 0x55b   : > { %4438 = vmin.xlane.f32.xlu1 %v12650_v6  ;;  %v12661_v19 = vcvt.s32.f32 %v4465_v11  ;;  %v4036_v21 = vsel %vm4035_vm4, %v4031_v54, inf  ;;  %v4059_v25 = vand.u32 65535, %v12312_v59  ;;  %v4074_v59 = vand.u32 65535, %v12352_v32 }
 0x55c   : > { %14876 = vst [vmem:[#allocation110_spill] sm:$0xff] %v12658_v17  ;;  %v4021_v11 = vsel %vm4020_vm5, %v4016_v38, inf }
 0x55d   : > { %14877 = vst [vmem:[#allocation111_spill] sm:$0xff] %v12661_v19  ;;  %4483 = vmin.xlane.f32.xlu0 %v12658_v17  ;;  %v4590_v17 = vld [vmem:[%s14575_s7 + $0x8] sm:$0xff] }
 0x55e   : > { %v9685_v54 = vpack.c.bf16 %v4590_v17, %v4589_v29 }
 0x55f   : > { %4468 = vmin.xlane.f32.xlu1 %v12661_v19  ;;  %v4089_v19 = vand.u32 65535, %v12332_v34 }
 0x560   : > { %9686 = vmatprep.subr.bf16.mxu1 %v9685_v54 }
 0x561   : > { %4037 = vmin.xlane.f32.xlu0 %v4036_v21  ;;  %9688 = vmatpush3.bf16.msra.mxu1 %v9685_v54  ;;  %v4044_v21 = vand.u32 65535, %v12319_v57  ;;  %v4091_v10 = vcvt.s32.f32 %v4089_v19 }
 0x562   : > { %9690 = vmatprep.subr.bf16.mxu1 %v9689_v55 }
 0x563   : > { %4022 = vmin.xlane.f32.xlu1 %v4021_v11  ;;  %v4061_v11 = vcvt.s32.f32 %v4059_v25  ;;  %v4046_v28 = vcvt.s32.f32 %v4044_v21  ;;  %v4076_v25 = vcvt.s32.f32 %v4074_v59 }
 0x565   : > { %9692 = vmatpush3.bf16.msra.mxu1 %v9689_v55  ;;  %v4119_v55 = vand.u32 65535, %v12355_v47  ;;  %v4104_v47 = vand.u32 65535, %v12377_v27  ;;  %v4179_v27 = vand.u32 65535, %v12407_v14 }
 0x5b1   : > { %v12686_v38 = vpop.xlane.xlu0 %4063 }
 0x5b2   : > { %vm4065_vm9 = vcmp.eq.f32.partialorder %v12328_v7, %v12686_v38  ;;  %v12691_v17 = vpop.xlane.xlu1 %4048 }
 0x5b3   : > { %v4066_v29 = vsel %vm4065_vm9, %v4061_v11, inf  ;;  %vm4050_vm10 = vcmp.eq.f32.partialorder %v12343_v43, %v12691_v17  ;;  %v4121_v43 = vcvt.s32.f32 %v4119_v55  ;;  %v4164_v55 = vand.u32 65535, %v12421_v30 }
 0x5b4   : > { %4067 = vmin.xlane.f32.xlu0 %v4066_v29  ;;  %v4051_v54 = vsel %vm4050_vm10, %v4046_v28, inf  ;;  %v4106_v29 = vcvt.s32.f32 %v4104_v47  ;;  %v4194_v30 = vand.u32 65535, %v12445_v37  ;;  %v4224_v37 = vand.u32 65535, %v12469_v53 }
 0x5b5   : > { %v12696_v57 = vpop.xlane.xlu0 %4093  ;;  %4052 = vmin.xlane.f32.xlu1 %v4051_v54  ;;  %v4134_v54 = vand.u32 65535, %v12397_v16  ;;  %v4254_v53 = vand.u32 65535, %v12493_v56  ;;  %v4284_v56 = vand.u32 65535, %v12519_v0  ;;  %v4314_v0 = vand.u32 65535, %v12543_v48 }
 0x5b6   : > { %vm4095_vm12 = vcmp.eq.f32.partialorder %v12349_v20, %v12696_v57  ;;  %v12701_v7 = vpop.xlane.xlu1 %4078  ;;  %v4149_v20 = vand.u32 65535, %v12380_v42  ;;  %v4344_v48 = vand.u32 65535, %v12567_v61  ;;  %v4374_v61 = vand.u32 65535, %v12591_v5 }
 0x5b7   : > { %v4096_v34 = vsel %vm4095_vm12, %v4091_v10, inf  ;;  %vm4080_vm13 = vcmp.eq.f32.partialorder %v12370_v50, %v12701_v7  ;;  %v4136_v10 = vcvt.s32.f32 %v4134_v54 }
 0x5b8   : > { %4097 = vmin.xlane.f32.xlu0 %v4096_v34  ;;  %v4081_v32 = vsel %vm4080_vm13, %v4076_v25, inf  ;;  %v4151_v59 = vcvt.s32.f32 %v4149_v20  ;;  %v4209_v34 = vand.u32 65535, %v12437_v9  ;;  %v4239_v9 = vand.u32 65535, %v12461_v13 }
 0x5b9   : > { %v12703_v21 = vpop.xlane.xlu0 %4123  ;;  %4082 = vmin.xlane.f32.xlu1 %v4081_v32  ;;  %v4196_v20 = vcvt.s32.f32 %v4194_v30  ;;  %v4269_v13 = vand.u32 65535, %v12485_v52  ;;  %v4299_v52 = vand.u32 65535, %v12510_v58  ;;  %v4329_v58 = vand.u32 65535, %v12530_v3 }
 0x5ba   : > { %vm4125_vm15 = vcmp.eq.f32.partialorder %v12372_v33, %v12703_v21  ;;  %v12711_v11 = vpop.xlane.xlu1 %4108  ;;  %v4211_v47 = vcvt.s32.f32 %v4209_v34  ;;  %v4359_v3 = vand.u32 65535, %v12554_v4  ;;  %v4389_v4 = vand.u32 65535, %v12578_v36 }
 0x5bb   : > { %v4126_v19 = vsel %vm4125_vm15, %v4121_v43, inf  ;;  %vm4110_vm0 = vcmp.eq.f32.partialorder %v12400_v39, %v12711_v11  ;;  %v4181_v39 = vcvt.s32.f32 %v4179_v27  ;;  %v4166_v43 = vcvt.s32.f32 %v4164_v55 }
 0x5bc   : > { %4127 = vmin.xlane.f32.xlu0 %v4126_v19  ;;  %v4111_v33 = vsel %vm4110_vm0, %v4106_v29, inf  ;;  %v4241_v29 = vcvt.s32.f32 %v4239_v9  ;;  %v4226_v27 = vcvt.s32.f32 %v4224_v37  ;;  %v4256_v55 = vcvt.s32.f32 %v4254_v53  ;;  %v14880_v53 = vld [vmem:[#allocation102_spill] sm:$0xff] }
 0x5bd   : > { %v12713_v28 = vpop.xlane.xlu0 %4153  ;;  %4112 = vmin.xlane.f32.xlu1 %v4111_v33  ;;  %v4271_v33 = vcvt.s32.f32 %v4269_v13  ;;  %v4316_v9 = vcvt.s32.f32 %v4314_v0  ;;  %v14879_v13 = vld [vmem:[#allocation100_spill] sm:$0xff]  ;;  %v4419_v36 = vand.u32 65535, %v12602_v26  ;;  %v4449_v26 = vand.u32 65535, %v12626_v44 }
 0x5be   : > { %vm4155_vm3 = vcmp.eq.f32.partialorder %v12402_v8, %v12713_v28  ;;  %v4479_v44 = vand.u32 65535, %v12644_v24  ;;  %v4040_v24 = vcvt.f32.s32 %v12656_v46 }
 0x5bf   : > { %v4156_v42 = vsel %vm4155_vm3, %v4151_v59, inf }
 0x5c0   : > { %4157 = vmin.xlane.f32.xlu0 %v4156_v42  ;;  %v12721_v50 = vpop.xlane.xlu1 %4138 }
 0x5c1   : > { %vm4140_vm4 = vcmp.eq.f32.partialorder %v12424_v2, %v12721_v50  ;;  %v12726_v16 = vpop.xlane.xlu0 %4183 }
 0x5c2   : > { %v4141_v8 = vsel %vm4140_vm4, %v4136_v10, inf  ;;  %vm4185_vm5 = vcmp.eq.f32.partialorder %v12430_v35, %v12726_v16 }
 0x5c3   : > { %4142 = vmin.xlane.f32.xlu1 %v4141_v8  ;;  %v4186_v14 = vsel %vm4185_vm5, %v4181_v39, inf  ;;  %v4301_v39 = vcvt.s32.f32 %v4299_v52  ;;  %v4376_v52 = vcvt.s32.f32 %v4374_v61  ;;  %v4025_v61 = vcvt.f32.s32 %v12664_v49 }
 0x5c4   : > { %v12731_v25 = vpop.xlane.xlu1 %4168  ;;  %4187 = vmin.xlane.f32.xlu0 %v4186_v14  ;;  %v4286_v14 = vcvt.s32.f32 %v4284_v56  ;;  %v4421_v56 = vcvt.s32.f32 %v4419_v36 }
 0x5c5   : > { %vm4170_vm9 = vcmp.eq.f32.partialorder %v12448_v51, %v12731_v25 }
 0x5c6   : > { %v12736_v2 = vpop.xlane.xlu0 %4213  ;;  %v4171_v32 = vsel %vm4170_vm9, %v4166_v43, inf  ;;  %v4331_v43 = vcvt.s32.f32 %v4329_v58 }
 0x5c7   : > { %vm4215_vm10 = vcmp.eq.f32.partialorder %v12454_v62, %v12736_v2  ;;  %4172 = vmin.xlane.f32.xlu1 %v4171_v32  ;;  %v14878_v32 = vld [vmem:[#allocation97_spill] sm:$0xff] }
 0x5c8   : > { %v4216_v35 = vsel %vm4215_vm10, %v4211_v47, inf  ;;  %v12741_v19 = vpop.xlane.xlu1 %4198 }
 0x5c9   : > { %4217 = vmin.xlane.f32.xlu0 %v4216_v35  ;;  %vm4200_vm12 = vcmp.eq.f32.partialorder %v12472_v45, %v12741_v19  ;;  %v4361_v35 = vcvt.s32.f32 %v4359_v3  ;;  %v4451_v3 = vcvt.s32.f32 %v4449_v26 }
 0x5ca   : > { %v12746_v51 = vpop.xlane.xlu0 %4243  ;;  %v4201_v59 = vsel %vm4200_vm12, %v4196_v20, inf }
 0x5cb   : > { %vm4245_vm13 = vcmp.eq.f32.partialorder %v12478_v15, %v12746_v51  ;;  %4202 = vmin.xlane.f32.xlu1 %v4201_v59 }
 0x5cc   : > { %v4246_v62 = vsel %vm4245_vm13, %v4241_v29, inf  ;;  %v12751_v54 = vpop.xlane.xlu1 %4228  ;;  %v4346_v29 = vcvt.s32.f32 %v4344_v48  ;;  %v14884_v48 = vld [vmem:[#allocation109_spill] sm:$0xff] }
 0x5cd   : > { %4247 = vmin.xlane.f32.xlu0 %v4246_v62  ;;  %vm4230_vm15 = vcmp.eq.f32.partialorder %v12496_v40, %v12751_v54  ;;  %v4391_v62 = vcvt.s32.f32 %v4389_v4 }
 0x5ce   : > { %v12756_v45 = vpop.xlane.xlu0 %4273  ;;  %v4231_v42 = vsel %vm4230_vm15, %v4226_v27, inf }
 0x5cf   : > { %vm4275_vm0 = vcmp.eq.f32.partialorder %v12500_v12, %v12756_v45  ;;  %4232 = vmin.xlane.f32.xlu1 %v4231_v42  ;;  %v14881_v42 = vld [vmem:[#allocation106_spill] sm:$0xff] }
 0x5d0   : > { %v4276_v15 = vsel %vm4275_vm0, %v4271_v33, inf  ;;  %v12761_v10 = vpop.xlane.xlu1 %4258  ;;  %v4404_v5 = vand.u32 65535, %v14881_v42  ;;  %v14887_v42 = vld [vmem:[#allocation66_spill] sm:$0xff] }
 0x5d1   : > { %4277 = vmin.xlane.f32.xlu0 %v4276_v15  ;;  %vm4260_vm3 = vcmp.eq.f32.partialorder %v12513_v60, %v12761_v10  ;;  %v14882_v15 = vld [vmem:[#allocation104_spill] sm:$0xff] }
 0x5d2   : > { %v12766_v40 = vpop.xlane.xlu0 %4303  ;;  %v4261_v34 = vsel %vm4260_vm3, %v4256_v55, inf }
 0x5d3   : > { %vm4305_vm4 = vcmp.eq.f32.partialorder %v12524_v1, %v12766_v40  ;;  %4262 = vmin.xlane.f32.xlu1 %v4261_v34 }
 0x5d4   : > { %v4306_v12 = vsel %vm4305_vm4, %v4301_v39, inf  ;;  %v12771_v8 = vpop.xlane.xlu1 %4288 }
 0x5d5   : > { %4307 = vmin.xlane.f32.xlu0 %v4306_v12  ;;  %vm4290_vm5 = vcmp.eq.f32.partialorder %v12537_v41, %v12771_v8  ;;  %v4406_v12 = vcvt.s32.f32 %v4404_v5  ;;  %v10739_v5 = vmov 0.0  }
 0x5d6   : > { %v12776_v60 = vpop.xlane.xlu0 %4333  ;;  %v4291_v30 = vsel %vm4290_vm5, %v4286_v14, inf  ;;  %v14883_v14 = vld [vmem:[#allocation108_spill] sm:$0xff] }
 0x5d7   : > { %vm4335_vm9 = vcmp.eq.f32.partialorder %v12548_v23, %v12776_v60  ;;  %4292 = vmin.xlane.f32.xlu1 %v4291_v30  ;;  %v4434_v0 = vand.u32 65535, %v14883_v14  ;;  %v4055_v14 = vcvt.f32.s32 %v12691_v17 }
 0x5d8   : > { %v4336_v1 = vsel %vm4335_vm9, %v4331_v43, inf  ;;  %v12781_v47 = vpop.xlane.xlu1 %4318 }
 0x5d9   : > { %4337 = vmin.xlane.f32.xlu0 %v4336_v1  ;;  %vm4320_vm10 = vcmp.eq.f32.partialorder %v14878_v32, %v12781_v47  ;;  %v4464_v32 = vand.u32 65535, %v14884_v48 }
 0x5da   : > { %v12786_v41 = vpop.xlane.xlu0 %4363  ;;  %v4321_v20 = vsel %vm4320_vm10, %v4316_v9, inf  ;;  %v4436_v9 = vcvt.s32.f32 %v4434_v0  ;;  %v4100_v0 = vcvt.f32.s32 %v12696_v57 }
 0x5db   : > { %vm4365_vm12 = vcmp.eq.f32.partialorder %v12572_v18, %v12786_v41  ;;  %4322 = vmin.xlane.f32.xlu1 %v4321_v20  ;;  %v14885_v20 = vld [vmem:[#allocation110_spill] sm:$0xff] }
 0x5dc   : > { %v4366_v23 = vsel %vm4365_vm12, %v4361_v35, inf  ;;  %v12791_v37 = vpop.xlane.xlu1 %4348  ;;  %v4481_v35 = vcvt.s32.f32 %v4479_v44 }
 0x5dd   : > { %4367 = vmin.xlane.f32.xlu0 %v4366_v23  ;;  %vm4350_vm13 = vcmp.eq.f32.partialorder %v14879_v13, %v12791_v37  ;;  %v14886_v13 = vld [vmem:[#allocation111_spill] sm:$0xff] }
 0x5de   : > { %v12796_v59 = vpop.xlane.xlu0 %4393  ;;  %v4351_v27 = vsel %vm4350_vm13, %v4346_v29, inf  ;;  %v4466_v29 = vcvt.s32.f32 %v4464_v32 }
 0x5df   : > { %vm4395_vm15 = vcmp.eq.f32.partialorder %v14880_v53, %v12796_v59  ;;  %4352 = vmin.xlane.f32.xlu1 %v4351_v27 }
 0x5e0   : > { %v4396_v18 = vsel %vm4395_vm15, %v4391_v62, inf  ;;  %v12801_v33 = vpop.xlane.xlu1 %4378  ;;  %v4041_v62 = vshll.u32 %v4040_v24, 16 }
 0x5e1   : > { %4397 = vmin.xlane.f32.xlu0 %v4396_v18  ;;  %vm4380_vm0 = vcmp.eq.f32.partialorder %v14882_v15, %v12801_v33  ;;  %v4026_v18 = vshll.u32 %v4025_v61, 16 }
 0x5e2   : > { %v12806_v55 = vpop.xlane.xlu0 %4423  ;;  %v4381_v39 = vsel %vm4380_vm0, %v4376_v52, inf }
 0x5e3   : > { %vm4425_vm3 = vcmp.eq.f32.partialorder %v12620_v31, %v12806_v55  ;;  %4382 = vmin.xlane.f32.xlu1 %v4381_v39 }
 0x5e4   : > { %v4426_v58 = vsel %vm4425_vm3, %v4421_v56, inf  ;;  %v12811_v34 = vpop.xlane.xlu1 %4408 }
 0x5e5   : > { %4427 = vmin.xlane.f32.xlu0 %v4426_v58  ;;  %vm4410_vm4 = vcmp.eq.f32.partialorder %v12633_v63, %v12811_v34 }
 0x5e6   : > { %v12816_v43 = vpop.xlane.xlu0 %4453  ;;  %v4411_v30 = vsel %vm4410_vm4, %v4406_v12, inf  ;;  %v4070_v12 = vcvt.f32.s32 %v12686_v38  ;;  %v4130_v38 = vcvt.f32.s32 %v12703_v21  ;;  %v4160_v21 = vcvt.f32.s32 %v12713_v28 }
 0x5e7   : > { %vm4455_vm5 = vcmp.eq.f32.partialorder %v12641_v22, %v12816_v43  ;;  %4412 = vmin.xlane.f32.xlu1 %v4411_v30 }
 0x5e8   : > { %v4456_v31 = vsel %vm4455_vm5, %v4451_v3, inf  ;;  %v12821_v1 = vpop.xlane.xlu1 %4438  ;;  %v4071_v44 = vshll.u32 %v4070_v12, 16 }
 0x5e9   : > { %4457 = vmin.xlane.f32.xlu0 %v4456_v31  ;;  %vm4440_vm9 = vcmp.eq.f32.partialorder %v12650_v6, %v12821_v1 }
 0x5ea   : > { %v12826_v63 = vpop.xlane.xlu0 %4483  ;;  %v4441_v4 = vsel %vm4440_vm9, %v4436_v9, inf  ;;  %v4056_v9 = vshll.u32 %v4055_v14, 16 }
 0x5eb   : > { %vm4485_vm10 = vcmp.eq.f32.partialorder %v14885_v20, %v12826_v63  ;;  %4442 = vmin.xlane.f32.xlu1 %v4441_v4  ;;  %v4085_v4 = vcvt.f32.s32 %v12701_v7 }
 0x5ec   : > { %v4486_v22 = vsel %vm4485_vm10, %v4481_v35, inf  ;;  %v12831_v23 = vpop.xlane.xlu1 %4468  ;;  %v4101_v35 = vshll.u32 %v4100_v0, 16 }
 0x5ed   : > { %4487 = vmin.xlane.f32.xlu0 %v4486_v22  ;;  %vm4470_vm12 = vcmp.eq.f32.partialorder %v14886_v13, %v12831_v23 }
 0x5ee   : > { %v4038_v6 = vpop.xlane.xlu0 %4037  ;;  %v4471_v36 = vsel %vm4470_vm12, %v4466_v29, inf }
 0x5ef   : > { %v4039_v27 = vcvt.f32.s32 %v4038_v6  ;;  %4472 = vmin.xlane.f32.xlu1 %v4471_v36  ;;  %v4086_v6 = vshll.u32 %v4085_v4, 16  ;;  %v4220_v4 = vcvt.f32.s32 %v12736_v2  ;;  %v4205_v2 = vcvt.f32.s32 %v12741_v19 }
 0x5f0   : > { %v4023_v53 = vpop.xlane.xlu1 %4022 }
 0x5f1   : > { %v4042_v46 = vadd.s32 %v4041_v62, %v4039_v27  ;;  %v4024_v52 = vcvt.f32.s32 %v4023_v53  ;;  %v4115_v27 = vcvt.f32.s32 %v12711_v11  ;;  %v4131_v53 = vshll.u32 %v4130_v38, 16 }
 0x5f3   : > { %vm4494_vm13 = vcmp.eq.s32.totalorder %v14887_v42, %v4042_v46  ;;  %v4027_v56 = vadd.s32 %v4026_v18, %v4024_v52 }
 0x5f4   : > { %v8721_v15 = vsel %vm4494_vm13, 1.0, %v10739_v5 }
 0x5f5   : > { %vm4493_vm15 = vcmp.eq.s32.totalorder %v14887_v42, %v4027_v56  ;;  %v4915_v49 = vsel %vm3498_vm11, %v8721_v15, 0.0 }
 0x5f6   : > { %v8720_v26 = vsel %vm4493_vm15, 1.0, %v10739_v5 }
 0x5f7   : > { %9633 = vmatprep.mubr.msk.f32.mxu1 %vm3498_vm11, %v8720_v26  ;;  %v4914_v39 = vsel %vm3498_vm11, %v8720_v26, 0.0  ;;  %v4161_v26 = vshll.u32 %v4160_v21, 16 }
 0x5f8   : > { %v4916_v58 = vadd.f32 %v4915_v49, %v4914_v39  ;;  %9634 = vmatmul.mubr.msk.f32.vlgmr.msra.gmra.mrb[36].mxu1 %vm3498_vm11, %v8721_v15  ;;  %v4116_v49 = vshll.u32 %v4115_v27, 16 }
 0x641   : > { %v4068_v3 = vpop.xlane.xlu0 %4067 }
 0x642   : > { %v4069_v30 = vcvt.f32.s32 %v4068_v3  ;;  %v4053_v31 = vpop.xlane.xlu1 %4052 }
 0x643   : > { %v4054_v32 = vcvt.f32.s32 %v4053_v31 }
 0x644   : > { %v4072_v48 = vadd.s32 %v4071_v44, %v4069_v30  ;;  %v4190_v44 = vcvt.f32.s32 %v12726_v16  ;;  %v4175_v30 = vcvt.f32.s32 %v12731_v25 }
 0x645   : > { %v4098_v24 = vpop.xlane.xlu0 %4097  ;;  %v4057_v20 = vadd.s32 %v4056_v9, %v4054_v32 }
 0x646   : > { %v4099_v22 = vcvt.f32.s32 %v4098_v24  ;;  %vm4496_vm0 = vcmp.eq.s32.totalorder %v14887_v42, %v4072_v48  ;;  %v4083_v57 = vpop.xlane.xlu1 %4082 }
 0x647   : > { %vm4495_vm3 = vcmp.eq.s32.totalorder %v14887_v42, %v4057_v20  ;;  %v8723_v13 = vsel %vm4496_vm0, 1.0, %v10739_v5  ;;  %v4084_v62 = vcvt.f32.s32 %v4083_v57  ;;  %v4176_v57 = vshll.u32 %v4175_v30, 16 }
 0x648   : > { %v4102_v17 = vadd.s32 %v4101_v35, %v4099_v22  ;;  %v8722_v29 = vsel %vm4495_vm3, 1.0, %v10739_v5  ;;  %v4919_v52 = vsel %vm3498_vm11, %v8723_v13, 0.0  ;;  %v4191_v22 = vshll.u32 %v4190_v44, 16 }
 0x649   : > { %v4128_v61 = vpop.xlane.xlu0 %4127  ;;  %9636 = vmatprep.mubr.msk.f32.mxu1 %vm3498_vm11, %v8722_v29  ;;  %v4917_v7 = vsel %vm3498_vm11, %v8722_v29, 0.0  ;;  %v4087_v18 = vadd.s32 %v4086_v6, %v4084_v62 }
 0x64a   : > { %v4129_v36 = vcvt.f32.s32 %v4128_v61  ;;  %v4918_v46 = vadd.f32 %v4917_v7, %v4916_v58  ;;  %9637 = vmatmul.mubr.msk.f32.gmra.mrb[38].mxu1 %vm3498_vm11, %v8723_v13  ;;  %vm4498_vm4 = vcmp.eq.s32.totalorder %v14887_v42, %v4102_v17  ;;  %v4113_v39 = vpop.xlane.xlu1 %4112  ;;  %v4145_v58 = vcvt.f32.s32 %v12721_v50 }
 0x64b   : > { %vm4497_vm5 = vcmp.eq.s32.totalorder %v14887_v42, %v4087_v18  ;;  %v8725_v28 = vsel %vm4498_vm4, 1.0, %v10739_v5  ;;  %v4114_v14 = vcvt.f32.s32 %v4113_v39  ;;  %v4250_v13 = vcvt.f32.s32 %v12746_v51 }
 0x64c   : > { %v4920_v15 = vadd.f32 %v4919_v52, %v4918_v46  ;;  %v4132_v56 = vadd.s32 %v4131_v53, %v4129_v36  ;;  %v8724_v11 = vsel %vm4497_vm5, 1.0, %v10739_v5  ;;  %v4923_v32 = vsel %vm3498_vm11, %v8725_v28, 0.0 }
 0x64d   : > { %v4158_v12 = vpop.xlane.xlu0 %4157  ;;  %9639 = vmatprep.mubr.msk.f32.mxu1 %vm3498_vm11, %v8724_v11  ;;  %v4921_v0 = vsel %vm3498_vm11, %v8724_v11, 0.0  ;;  %v4117_v9 = vadd.s32 %v4116_v49, %v4114_v14  ;;  %v4146_v24 = vshll.u32 %v4145_v58, 16  ;;  %v4221_v36 = vshll.u32 %v4220_v4, 16 }
 0x64e   : > { %v4159_v3 = vcvt.f32.s32 %v4158_v12  ;;  %v4922_v31 = vadd.f32 %v4921_v0, %v4920_v15  ;;  %9640 = vmatmul.mubr.msk.f32.gmra.mrb[40].mxu1 %vm3498_vm11, %v8725_v28  ;;  %vm4500_vm9 = vcmp.eq.s32.totalorder %v14887_v42, %v4132_v56  ;;  %v4235_v51 = vcvt.f32.s32 %v12751_v54 }
 0x64f   : > { %vm4499_vm10 = vcmp.eq.s32.totalorder %v14887_v42, %v4117_v9  ;;  %v8727_v17 = vsel %vm4500_vm9, 1.0, %v10739_v5  ;;  %v4206_v49 = vshll.u32 %v4205_v2, 16  ;;  %v4280_v28 = vcvt.f32.s32 %v12756_v45 }
 0x650   : > { %v4162_v48 = vadd.s32 %v4161_v26, %v4159_v3  ;;  %v4143_v50 = vpop.xlane.xlu1 %4142  ;;  %v4924_v35 = vadd.f32 %v4923_v32, %v4922_v31  ;;  %v8726_v25 = vsel %vm4499_vm10, 1.0, %v10739_v5  ;;  %v4927_v21 = vsel %vm3498_vm11, %v8727_v17, 0.0 }
 0x651   : > { %v4144_v20 = vcvt.f32.s32 %v4143_v50  ;;  %v4188_v16 = vpop.xlane.xlu0 %4187  ;;  %9642 = vmatprep.mubr.msk.f32.mxu1 %vm3498_vm11, %v8726_v25  ;;  %v4925_v61 = vsel %vm3498_vm11, %v8726_v25, 0.0  ;;  %v4251_v26 = vshll.u32 %v4250_v13, 16  ;;  %v4236_v31 = vshll.u32 %v4235_v51, 16 }
 0x652   : > { %v4189_v38 = vcvt.f32.s32 %v4188_v16  ;;  %vm4502_vm12 = vcmp.eq.s32.totalorder %v14887_v42, %v4162_v48  ;;  %v4926_v6 = vadd.f32 %v4925_v61, %v4924_v35  ;;  %9643 = vmatmul.mubr.msk.f32.gmra.mrb[42].mxu1 %vm3498_vm11, %v8727_v17  ;;  %v4265_v45 = vcvt.f32.s32 %v12761_v10 }
 0x653   : > { %v4147_v29 = vadd.s32 %v4146_v24, %v4144_v20  ;;  %v8729_v19 = vsel %vm4502_vm12, 1.0, %v10739_v5  ;;  %v4310_v32 = vcvt.f32.s32 %v12766_v40  ;;  %v4281_v4 = vshll.u32 %v4280_v28, 16 }
 0x654   : > { %v4192_v62 = vadd.s32 %v4191_v22, %v4189_v38  ;;  %v4173_v7 = vpop.xlane.xlu1 %4172  ;;  %v4928_v53 = vadd.f32 %v4927_v21, %v4926_v6  ;;  %v4931_v14 = vsel %vm3498_vm11, %v8729_v19, 0.0  ;;  %v4295_v40 = vcvt.f32.s32 %v12771_v8 }
 0x655   : > { %v4174_v27 = vcvt.f32.s32 %v4173_v7  ;;  %vm4501_vm13 = vcmp.eq.s32.totalorder %v14887_v42, %v4147_v29  ;;  %v4266_v61 = vshll.u32 %v4265_v45, 16  ;;  %v4311_v2 = vshll.u32 %v4310_v32, 16 }
 0x656   : > { %v4218_v46 = vpop.xlane.xlu0 %4217  ;;  %v8728_v18 = vsel %vm4501_vm13, 1.0, %v10739_v5  ;;  %vm4504_vm15 = vcmp.eq.s32.totalorder %v14887_v42, %v4192_v62  ;;  %v4340_v7 = vcvt.f32.s32 %v12776_v60  ;;  %v4325_v60 = vcvt.f32.s32 %v12781_v47 }
 0x657   : > { %v4219_v52 = vcvt.f32.s32 %v4218_v46  ;;  %v4177_v15 = vadd.s32 %v4176_v57, %v4174_v27  ;;  %9645 = vmatprep.mubr.msk.f32.mxu1 %vm3498_vm11, %v8728_v18  ;;  %v4929_v56 = vsel %vm3498_vm11, %v8728_v18, 0.0  ;;  %v8731_v30 = vsel %vm4504_vm15, 1.0, %v10739_v5 }
 0x658   : > { %v4930_v39 = vadd.f32 %v4929_v56, %v4928_v53  ;;  %v4203_v12 = vpop.xlane.xlu1 %4202  ;;  %9646 = vmatmul.mubr.msk.f32.gmra.mrb[44].mxu1 %vm3498_vm11, %v8729_v19  ;;  %v4935_v16 = vsel %vm3498_vm11, %v8731_v30, 0.0  ;;  %v4400_v45 = vcvt.f32.s32 %v12796_v59  ;;  %v4385_v59 = vcvt.f32.s32 %v12801_v33 }
 0x659   : > { %v4222_v11 = vadd.s32 %v4221_v36, %v4219_v52  ;;  %v4204_v58 = vcvt.f32.s32 %v4203_v12  ;;  %vm4503_vm0 = vcmp.eq.s32.totalorder %v14887_v42, %v4177_v15  ;;  %v4296_v52 = vshll.u32 %v4295_v40, 16 }
 0x65a   : > { %v4248_v54 = vpop.xlane.xlu0 %4247  ;;  %v4932_v0 = vadd.f32 %v4931_v14, %v4930_v39  ;;  %v8730_v3 = vsel %vm4503_vm0, 1.0, %v10739_v5  ;;  %v4370_v15 = vcvt.f32.s32 %v12786_v41  ;;  %v4341_v39 = vshll.u32 %v4340_v7, 16 }
 0x65b   : > { %v4249_v44 = vcvt.f32.s32 %v4248_v54  ;;  %v4207_v9 = vadd.s32 %v4206_v49, %v4204_v58  ;;  %9648 = vmatprep.mubr.msk.f32.mxu1 %vm3498_vm11, %v8730_v3  ;;  %v4933_v48 = vsel %vm3498_vm11, %v8730_v3, 0.0  ;;  %vm4506_vm3 = vcmp.eq.s32.totalorder %v14887_v42, %v4222_v11 }
 0x65c   : > { %v4934_v50 = vadd.f32 %v4933_v48, %v4932_v0  ;;  %v4233_v24 = vpop.xlane.xlu1 %4232  ;;  %9649 = vmatmul.mubr.msk.f32.gmra.mrb[46].mxu1 %vm3498_vm11, %v8731_v30  ;;  %v8733_v10 = vsel %vm4506_vm3, 1.0, %v10739_v5  ;;  %v4355_v41 = vcvt.f32.s32 %v12791_v37  ;;  %v4371_v30 = vshll.u32 %v4370_v15, 16 }
 0x65d   : > { %v4252_v35 = vadd.s32 %v4251_v26, %v4249_v44  ;;  %v4234_v20 = vcvt.f32.s32 %v4233_v24  ;;  %vm4505_vm4 = vcmp.eq.s32.totalorder %v14887_v42, %v4207_v9  ;;  %v4939_v27 = vsel %vm3498_vm11, %v8733_v10, 0.0 }
 0x65e   : > { %v4278_v22 = vpop.xlane.xlu0 %4277  ;;  %v4936_v25 = vadd.f32 %v4935_v16, %v4934_v50  ;;  %v8732_v38 = vsel %vm4505_vm4, 1.0, %v10739_v5  ;;  %v4326_v44 = vshll.u32 %v4325_v60, 16  ;;  %v4356_v16 = vshll.u32 %v4355_v41, 16 }
 0x65f   : > { %v4279_v17 = vcvt.f32.s32 %v4278_v22  ;;  %v4237_v57 = vadd.s32 %v4236_v31, %v4234_v20  ;;  %9651 = vmatprep.mubr.msk.f32.mxu1 %vm3498_vm11, %v8732_v38  ;;  %v4937_v29 = vsel %vm3498_vm11, %v8732_v38, 0.0  ;;  %vm4508_vm5 = vcmp.eq.s32.totalorder %v14887_v42, %v4252_v35 }
 0x660   : > { %v4938_v13 = vadd.f32 %v4937_v29, %v4936_v25  ;;  %v4263_v62 = vpop.xlane.xlu1 %4262  ;;  %9652 = vmatmul.mubr.msk.f32.gmra.mrb[48].mxu1 %vm3498_vm11, %v8733_v10  ;;  %v8735_v18 = vsel %vm4508_vm5, 1.0, %v10739_v5  ;;  %v4430_v38 = vcvt.f32.s32 %v12806_v55  ;;  %v4415_v55 = vcvt.f32.s32 %v12811_v34 }
 0x661   : > { %v4282_v6 = vadd.s32 %v4281_v4, %v4279_v17  ;;  %v4264_v36 = vcvt.f32.s32 %v4263_v62  ;;  %vm4507_vm9 = vcmp.eq.s32.totalorder %v14887_v42, %v4237_v57  ;;  %v4943_v12 = vsel %vm3498_vm11, %v8735_v18, 0.0 }
 0x662   : > { %v4308_v8 = vpop.xlane.xlu0 %4307  ;;  %v4940_v21 = vadd.f32 %v4939_v27, %v4938_v13  ;;  %v8734_v46 = vsel %vm4507_vm9, 1.0, %v10739_v5  ;;  %v4401_v57 = vshll.u32 %v4400_v45, 16  ;;  %v4386_v27 = vshll.u32 %v4385_v59, 16 }
 0x663   : > { %v4309_v53 = vcvt.f32.s32 %v4308_v8  ;;  %v4267_v19 = vadd.s32 %v4266_v61, %v4264_v36  ;;  %9654 = vmatprep.mubr.msk.f32.mxu1 %vm3498_vm11, %v8734_v46  ;;  %v4941_v51 = vsel %vm3498_vm11, %v8734_v46, 0.0  ;;  %vm4510_vm10 = vcmp.eq.s32.totalorder %v14887_v42, %v4282_v6 }
 0x664   : > { %v4942_v56 = vadd.f32 %v4941_v51, %v4940_v21  ;;  %v4293_v26 = vpop.xlane.xlu1 %4292  ;;  %9655 = vmatmul.mubr.msk.f32.gmra.mrb[50].mxu1 %vm3498_vm11, %v8735_v18  ;;  %v8737_v47 = vsel %vm4510_vm10, 1.0, %v10739_v5  ;;  %v4431_v8 = vshll.u32 %v4430_v38, 16  ;;  %v4460_v18 = vcvt.f32.s32 %v12816_v43 }
 0x665   : > { %v4312_v49 = vadd.s32 %v4311_v2, %v4309_v53  ;;  %v4294_v11 = vcvt.f32.s32 %v4293_v26  ;;  %vm4509_vm12 = vcmp.eq.s32.totalorder %v14887_v42, %v4267_v19  ;;  %v4947_v50 = vsel %vm3498_vm11, %v8737_v47, 0.0 }
 0x666   : > { %v4338_v28 = vpop.xlane.xlu0 %4337  ;;  %v4944_v58 = vadd.f32 %v4943_v12, %v4942_v56  ;;  %v8736_v14 = vsel %vm4509_vm12, 1.0, %v10739_v5  ;;  %v4445_v43 = vcvt.f32.s32 %v12821_v1 }
 0x667   : > { %v4339_v54 = vcvt.f32.s32 %v4338_v28  ;;  %v4297_v0 = vadd.s32 %v4296_v52, %v4294_v11  ;;  %9657 = vmatprep.mubr.msk.f32.mxu1 %vm3498_vm11, %v8736_v14  ;;  %v4945_v3 = vsel %vm3498_vm11, %v8736_v14, 0.0  ;;  %vm4512_vm13 = vcmp.eq.s32.totalorder %v14887_v42, %v4312_v49 }
 0x668   : > { %v4946_v31 = vadd.f32 %v4945_v3, %v4944_v58  ;;  %v4323_v48 = vpop.xlane.xlu1 %4322  ;;  %9658 = vmatmul.mubr.msk.f32.gmra.mrb[52].mxu1 %vm3498_vm11, %v8737_v47  ;;  %v8739_v20 = vsel %vm4512_vm13, 1.0, %v10739_v5  ;;  %v4416_v49 = vshll.u32 %v4415_v55, 16  ;;  %v4490_v11 = vcvt.f32.s32 %v12826_v63 }
 0x669   : > { %v4342_v9 = vadd.s32 %v4341_v39, %v4339_v54  ;;  %v4324_v32 = vcvt.f32.s32 %v4323_v48  ;;  %vm4511_vm15 = vcmp.eq.s32.totalorder %v14887_v42, %v4297_v0  ;;  %v4951_v61 = vsel %vm3498_vm11, %v8739_v20, 0.0 }
 0x66a   : > { %v4368_v37 = vpop.xlane.xlu0 %4367  ;;  %v4948_v35 = vadd.f32 %v4947_v50, %v4946_v31  ;;  %v8738_v24 = vsel %vm4511_vm15, 1.0, %v10739_v5  ;;  %v4461_v14 = vshll.u32 %v4460_v18, 16  ;;  %v4446_v31 = vshll.u32 %v4445_v43, 16  ;;  %v10717_v18 = vld [vmem:[%s11761_s20 + $0x10] sm:$0xff] }
 0x66b   : > { %v4369_v4 = vcvt.f32.s32 %v4368_v37  ;;  %v4327_v22 = vadd.s32 %v4326_v44, %v4324_v32  ;;  %9660 = vmatprep.mubr.msk.f32.mxu1 %vm3498_vm11, %v8738_v24  ;;  %v4949_v25 = vsel %vm3498_vm11, %v8738_v24, 0.0  ;;  %vm4514_vm0 = vcmp.eq.s32.totalorder %v14887_v42, %v4342_v9  ;;  %v10140_v43 = vld [vmem:[%s14577_s9 + $0x224] ss:$16 sps:$4 sm:$0xff]  }
 0x66c   : > { %v4950_v17 = vadd.f32 %v4949_v25, %v4948_v35  ;;  %v4353_v40 = vpop.xlane.xlu1 %4352  ;;  %9661 = vmatmul.mubr.msk.f32.gmra.mrb[54].mxu1 %vm3498_vm11, %v8739_v20  ;;  %v8741_v33 = vsel %vm4514_vm0, 1.0, %v10739_v5  ;;  %v4491_v9 = vshll.u32 %v4490_v11, 16  ;;  %v4475_v50 = vcvt.f32.s32 %v12831_v23  ;;  %v10141_v11 = vld [vmem:[%s14577_s9 + $0x240] ss:$16 sps:$4 sm:$0xff]  }
 0x66d   : > { %v4372_v10 = vadd.s32 %v4371_v30, %v4369_v4  ;;  %v4354_v29 = vcvt.f32.s32 %v4353_v40  ;;  %vm4513_vm3 = vcmp.eq.s32.totalorder %v14887_v42, %v4327_v22  ;;  %v4955_v19 = vsel %vm3498_vm11, %v8741_v33, 0.0 }
 0x66e   : > { %v4398_v2 = vpop.xlane.xlu0 %4397  ;;  %v4952_v13 = vadd.f32 %v4951_v61, %v4950_v17  ;;  %v8740_v6 = vsel %vm4513_vm3, 1.0, %v10739_v5 }
 0x66f   : > { %v4399_v62 = vcvt.f32.s32 %v4398_v2  ;;  %v4357_v7 = vadd.s32 %v4356_v16, %v4354_v29  ;;  %9663 = vmatprep.mubr.msk.f32.mxu1 %vm3498_vm11, %v8740_v6  ;;  %v4953_v36 = vsel %vm3498_vm11, %v8740_v6, 0.0  ;;  %vm4516_vm4 = vcmp.eq.s32.totalorder %v14887_v42, %v4372_v10 }
 0x670   : > { %v4954_v21 = vadd.f32 %v4953_v36, %v4952_v13  ;;  %v4383_v53 = vpop.xlane.xlu1 %4382  ;;  %9664 = vmatmul.mubr.msk.f32.gmra.mrb[56].mxu1 %vm3498_vm11, %v8741_v33  ;;  %v8743_v56 = vsel %vm4516_vm4, 1.0, %v10739_v5  ;;  %v4476_v10 = vshll.u32 %v4475_v50, 16 }
 0x671   : > { %v4402_v46 = vadd.s32 %v4401_v57, %v4399_v62  ;;  %v4384_v52 = vcvt.f32.s32 %v4383_v53  ;;  %vm4515_vm5 = vcmp.eq.s32.totalorder %v14887_v42, %v4357_v7  ;;  %v4959_v47 = vsel %vm3498_vm11, %v8743_v56, 0.0 }
 0x672   : > { %v4428_v34 = vpop.xlane.xlu0 %4427  ;;  %v4956_v51 = vadd.f32 %v4955_v19, %v4954_v21  ;;  %v8742_v60 = vsel %vm4515_vm5, 1.0, %v10739_v5  ;;  %v10718_v19 = vld [vmem:[%s11761_s20] sm:$0xff]  ;;  %vm5340_vm5 = vcmask 392192  }
 0x673   : > { %v4429_v15 = vcvt.f32.s32 %v4428_v34  ;;  %v4387_v26 = vadd.s32 %v4386_v27, %v4384_v52  ;;  %9666 = vmatprep.mubr.msk.f32.mxu1 %vm3498_vm11, %v8742_v60  ;;  %v4957_v39 = vsel %vm3498_vm11, %v8742_v60, 0.0  ;;  %vm4518_vm9 = vcmp.eq.s32.totalorder %v14887_v42, %v4402_v46 }
 0x674   : > { %v4958_v12 = vadd.f32 %v4957_v39, %v4956_v51  ;;  %v4413_v58 = vpop.xlane.xlu1 %4412  ;;  %9667 = vmatmul.mubr.msk.f32.gmra.mrb[58].mxu1 %vm3498_vm11, %v8743_v56  ;;  %v8745_v1 = vsel %vm4518_vm9, 1.0, %v10739_v5  ;;  %v10138_v39 = vld [vmem:[%s14577_s9 + $0x220] ss:$16 sps:$4 sm:$0xff]   ;;  %vm5345_vm9 = vcmask 654336  }
 0x675   : > { %v4432_v28 = vadd.s32 %v4431_v8, %v4429_v15  ;;  %v4414_v54 = vcvt.f32.s32 %v4413_v58  ;;  %vm4517_vm10 = vcmp.eq.s32.totalorder %v14887_v42, %v4387_v26  ;;  %v4963_v35 = vsel %vm3498_vm11, %v8745_v1, 0.0  ;;  %v10137_v26 = vld [vmem:[%s14577_s9 + $0x204] ss:$16 sps:$4 sm:$0xff]   ;;  %v14889_v58 = vld [vmem:[#allocation13_spill] sm:$0xff] }
 0x676   : > { %v4458_v41 = vpop.xlane.xlu0 %4457  ;;  %v4960_v0 = vadd.f32 %v4959_v47, %v4958_v12  ;;  %v8744_v3 = vsel %vm4517_vm10, 1.0, %v10739_v5  ;;  %5858 = vmatprep.subr.bf16.mxu1 %v10137_v26  ;;  %v10143_v12 = vld [vmem:[%s14577_s9 + $0x244] ss:$16 sps:$4 sm:$0xff]   ;;  %v14891_v47 = vld [vmem:[#allocation11_spill] sm:$0xff]  ;;  %vm5351_vm10 = vcmask 916480  }
 0x677   : > { %v4459_v44 = vcvt.f32.s32 %v4458_v41  ;;  %v4417_v30 = vadd.s32 %v4416_v49, %v4414_v54  ;;  %9669 = vmatprep.mubr.msk.f32.mxu1 %vm3498_vm11, %v8744_v3  ;;  %v4961_v63 = vsel %vm3498_vm11, %v8744_v3, 0.0  ;;  %vm4520_vm12 = vcmp.eq.s32.totalorder %v14887_v42, %v4432_v28  ;;  %v10135_v49 = vld [vmem:[%s14577_s9 + $0x200] ss:$16 sps:$4 sm:$0xff]   ;;  %v10146_v3 = vld [vmem:[%s14577_s9 + $0x264] ss:$16 sps:$4 sm:$0xff]  }
 0x678   : > { %v4962_v48 = vadd.f32 %v4961_v63, %v4960_v0  ;;  %v4443_v32 = vpop.xlane.xlu1 %4442  ;;  %9670 = vmatmul.mubr.msk.f32.gmra.mrb[60].mxu1 %vm3498_vm11, %v8745_v1  ;;  %v8747_v22 = vsel %vm4520_vm12, 1.0, %v10739_v5  ;;  %v10144_v0 = vld [vmem:[%s14577_s9 + $0x260] ss:$16 sps:$4 sm:$0xff]   ;;  %vm5348_vm12 = vcmask 785408  }
 0x679   : > { %v4462_v45 = vadd.s32 %v4461_v14, %v4459_v44  ;;  %v4444_v37 = vcvt.f32.s32 %v4443_v32  ;;  %vm4519_vm13 = vcmp.eq.s32.totalorder %v14887_v42, %v4417_v30  ;;  %v4967_v57 = vsel %vm3498_vm11, %v8747_v22, 0.0  ;;  %5859 = vmatpush1.bf16.msra.mxu1 %v10135_v49  ;;  %v14901_v49 = vld [vmem:[#allocation18_spill] sm:$0xff] }
 0x67a   : > { %v4488_v24 = vpop.xlane.xlu0 %4487  ;;  %v4964_v4 = vadd.f32 %v4963_v35, %v4962_v48  ;;  %v8746_v20 = vsel %vm4519_vm13, 1.0, %v10739_v5  ;;  %5860 = vmatprep.subr.bf16.mxu1 %v10140_v43  ;;  %v14893_v35 = vld [vmem:[#allocation10_spill] sm:$0xff] }
 0x67b   : > { %v4489_v16 = vcvt.f32.s32 %v4488_v24  ;;  %v4447_v25 = vadd.s32 %v4446_v31, %v4444_v37  ;;  %9672 = vmatprep.mubr.msk.f32.mxu1 %vm3498_vm11, %v8746_v20  ;;  %v4965_v59 = vsel %vm3498_vm11, %v8746_v20, 0.0  ;;  %vm4522_vm15 = vcmp.eq.s32.totalorder %v14887_v42, %v4462_v45  ;;  %v10147_v31 = vld [vmem:[%s14577_s9 + $0x280] ss:$16 sps:$4 sm:$0xff]  }
 0x67c   : > { %v4966_v23 = vadd.f32 %v4965_v59, %v4964_v4  ;;  %v4473_v17 = vpop.xlane.xlu1 %4472  ;;  %9673 = vmatmul.mubr.msk.f32.gmra.mrb[62].mxu1 %vm3498_vm11, %v8747_v22  ;;  %v8749_v2 = vsel %vm4522_vm15, 1.0, %v10739_v5  ;;  %v14892_v45 = vld [vmem:[#allocation12_spill] sm:$0xff] }
 0x67d   : > { %v4492_v38 = vadd.s32 %v4491_v9, %v4489_v16  ;;  %v4474_v40 = vcvt.f32.s32 %v4473_v17  ;;  %vm4521_vm0 = vcmp.eq.s32.totalorder %v14887_v42, %v4447_v25  ;;  %v4971_v33 = vsel %vm3498_vm11, %v8749_v2, 0.0  ;;  %5861 = vmatpush1.bf16.msra.mxu1 %v10138_v39  ;;  %v10149_v9 = vld [vmem:[%s14577_s9 + $0x284] ss:$16 sps:$4 sm:$0xff]   ;;  %v10150_v22 = vld [vmem:[%s14577_s9 + $0x2a0] ss:$16 sps:$4 sm:$0xff]  }
 0x67e   : > { %v4968_v29 = vadd.f32 %v4967_v57, %v4966_v23  ;;  %v8748_v61 = vsel %vm4521_vm0, 1.0, %v10739_v5  ;;  %5862 = vmatprep.subr.bf16.mxu1 %v10143_v12  ;;  %v10152_v25 = vld [vmem:[%s14577_s9 + $0x2a4] ss:$16 sps:$4 sm:$0xff]  }
 0x67f   : > { %v4477_v13 = vadd.s32 %v4476_v10, %v4474_v40  ;;  %9675 = vmatprep.mubr.msk.f32.mxu1 %vm3498_vm11, %v8748_v61  ;;  %v4969_v6 = vsel %vm3498_vm11, %v8748_v61, 0.0  ;;  %vm4524_vm3 = vcmp.eq.s32.totalorder %v14887_v42, %v4492_v38  ;;  %v14895_v17 = vld [vmem:[#allocation14_spill] sm:$0xff] }
 0x680   : > { %v4970_v62 = vadd.f32 %v4969_v6, %v4968_v29  ;;  %9676 = vmatmul.mubr.msk.f32.gmra.mrb[64].mxu1 %vm3498_vm11, %v8749_v2  ;;  %v8751_v36 = vsel %vm4524_vm3, 1.0, %v10739_v5  ;;  %v14897_v29 = vld [vmem:[#allocation15_spill] sm:$0xff]  ;;  %v10153_v2 = vld [vmem:[%s14577_s9 + $0x2c0] ss:$16 sps:$4 sm:$0xff]  }
 0x681   : > { %vm4523_vm4 = vcmp.eq.s32.totalorder %v14887_v42, %v4477_v13  ;;  %v4975_v21 = vsel %vm3498_vm11, %v8751_v36, 0.0  ;;  %5863 = vmatpush1.bf16.msra.mxu1 %v10141_v11  ;;  %v10155_v13 = vld [vmem:[%s14577_s9 + $0x2c4] ss:$16 sps:$4 sm:$0xff]   ;;  %v14903_v11 = vld [vmem:[#allocation19_spill] sm:$0xff] }
 0x682   : > { %v4972_v55 = vadd.f32 %v4971_v33, %v4970_v62  ;;  %v8750_v7 = vsel %vm4523_vm4, 1.0, %v10739_v5  ;;  %5864 = vmatprep.subr.bf16.mxu1 %v10146_v3 }
 0x683   : > { %9678 = vmatprep.mubr.msk.f32.mxu1 %vm3498_vm11, %v8750_v7  ;;  %v4973_v27 = vsel %vm3498_vm11, %v8750_v7, 0.0  ;;  %v14898_v7 = vld [vmem:[#allocation16_spill] sm:$0xff] }
 0x684   : > { %v4974_v8 = vadd.f32 %v4973_v27, %v4972_v55  ;;  %9679 = vmatmul.mubr.msk.f32.gmra.mrb[66].mxu1 %vm3498_vm11, %v8751_v36 }
 0x685   : > { %5865 = vmatpush1.bf16.msra.mxu1 %v10144_v0 }
 0x686   : > { %v12994_v46 = vadd.f32 %v4975_v21, %v4974_v8  ;;  %5866 = vmatprep.subr.bf16.mxu1 %v10149_v9  ;;  %v14900_v21 = vld [vmem:[#allocation17_spill] sm:$0xff] }
 0x688   : > { %14888 = vst [vmem:[#allocation97_spill] sm:$0xff] %v12994_v46 }
 0x689   : > { %5867 = vmatpush1.bf16.msra.mxu1 %v10147_v31  ;;  %v14906_v31 = vld [vmem:[#allocation21_spill] sm:$0xff] }
 0x68a   : > { %5868 = vmatprep.subr.bf16.mxu1 %v10152_v25 }
 0x68d   : > { %5869 = vmatpush1.bf16.msra.mxu1 %v10150_v22 }
 0x68e   : > { %5870 = vmatprep.subr.bf16.mxu1 %v10155_v13  ;;  %v10719_v13 = vld [vmem:[%s11761_s20 + $0x18] sm:$0xff] }
 0x691   : > { %5871 = vmatpush1.bf16.msra.mxu1 %v10153_v2 }
 0x6cb   : > { %v12996_v53 = vpop.f32.mrb[36].mxu1 }
 0x6cc   : > { %v5088_v42 = vsub.f32 %v10717_v18, %v12996_v53  ;;  %v13000_v52 = vpop.f32.mrb[37].mxu1 }
 0x6cd   : > { %v5087_v5 = vsub.f32 %v10718_v19, %v13000_v52  ;;  %v10158_v19 = vld [vmem:[%s14577_s9 + $0x2e4] ss:$16 sps:$4 sm:$0xff]  }
 0x6ce   : > { %v5120_v34 = vmul.f32 %v5088_v42, %v5088_v42  ;;  %v10156_v42 = vld [vmem:[%s14577_s9 + $0x2e0] ss:$16 sps:$4 sm:$0xff]   ;;  %5872 = vmatprep.subr.bf16.mxu1 %v10158_v19 }
 0x6cf   : > { %v5119_v51 = vmul.f32 %v5087_v5, %v5087_v5  ;;  %5873 = vmatpush1.bf16.msra.mxu1 %v10156_v42 }
 0x6d0   : > { %v5152_v60 = vsel %vm2942_vm8, %v5120_v34, 0.0 }
 0x6d1   : > { %v5151_v15 = vsel %vm2942_vm8, %v5119_v51, 0.0 }
 0x6d2   : > { %v5153_v56 = vadd.f32 %v5152_v60, %v5151_v15 }
 0x71d   : > { %v9638_v28 = vpop.f32.mrb[38].mxu1 }
 0x71e   : > { %v5090_v14 = vsub.f32 %v14889_v58, %v9638_v28  ;;  %5228 = vrot.lane.b32.xlu1 %v9638_v28, %s14890_s23  ;;  %v4765_v54 = vpop.f32.mrb[39].mxu1  ;;  %v10159_v28 = vld [vmem:[%s14577_s9 + $0x300] ss:$16 sps:$4 sm:$0xff]   ;;  %v10161_v58 = vld [vmem:[%s14577_s9 + $0x304] ss:$16 sps:$4 sm:$0xff]  }
 0x71f   : > { %v5089_v41 = vsub.f32 %v14891_v47, %v4765_v54  ;;  %5874 = vmatprep.subr.bf16.mxu1 %v10161_v58 }
 0x720   : > { %v5122_v44 = vmul.f32 %v5090_v14, %v5090_v14  ;;  %5875 = vmatpush1.bf16.msra.mxu1 %v10159_v28 }
 0x721   : > { %v5121_v1 = vmul.f32 %v5089_v41, %v5089_v41  ;;  %v9641_v63 = vpop.f32.mrb[40].mxu1 }
 0x722   : > { %5226 = vrot.lane.b32.xlu1 %v4765_v54, %s14890_s23  ;;  %v5092_v32 = vsub.f32 %v14892_v45, %v9641_v63  ;;  %v4775_v50 = vpop.f32.mrb[41].mxu1  ;;  %v5156_v37 = vsel %vm2942_vm8, %v5122_v44, 0.0  ;;  %v14904_v44 = vld [vmem:[#allocation20_spill] sm:$0xff] }
 0x723   : > { %v5154_v30 = vsel %vm2942_vm8, %v5121_v1, 0.0  ;;  %v5091_v24 = vsub.f32 %v14893_v35, %v4775_v50  ;;  %5234 = vrot.lane.b32.xlu0 %v4775_v50, %s14894_s22  ;;  %v10164_v45 = vld [vmem:[%s14577_s9 + $0x324] ss:$16 sps:$4 sm:$0xff]  }
 0x724   : > { %v5155_v48 = vadd.f32 %v5154_v30, %v5153_v56  ;;  %v5124_v20 = vmul.f32 %v5092_v32, %v5092_v32  ;;  %5876 = vmatprep.subr.bf16.mxu1 %v10164_v45 }
 0x725   : > { %v5123_v16 = vmul.f32 %v5091_v24, %v5091_v24  ;;  %v9644_v23 = vpop.f32.mrb[42].mxu1 }
 0x726   : > { %v5157_v4 = vadd.f32 %v5156_v37, %v5155_v48  ;;  %5236 = vrot.lane.b32.xlu1 %v9641_v63, %s14894_s22  ;;  %v5094_v10 = vsub.f32 %v14895_v17, %v9644_v23  ;;  %v4785_v40 = vpop.f32.mrb[43].mxu1  ;;  %v5160_v57 = vsel %vm2942_vm8, %v5124_v20, 0.0  ;;  %v10162_v48 = vld [vmem:[%s14577_s9 + $0x320] ss:$16 sps:$4 sm:$0xff]   ;;  %v10167_v17 = vld [vmem:[%s14577_s9 + $0x344] ss:$16 sps:$4 sm:$0xff]  }
 0x727   : > { %v5158_v59 = vsel %vm2942_vm8, %v5123_v16, 0.0  ;;  %v5093_v61 = vsub.f32 %v14897_v29, %v4785_v40  ;;  %5242 = vrot.lane.b32.xlu0 %v4785_v40, %s14896_s29  ;;  %v14907_v20 = vld [vmem:[#allocation22_spill] sm:$0xff]  ;;  %5877 = vmatpush1.bf16.msra.mxu1 %v10162_v48 }
 0x728   : > { %v5159_v38 = vadd.f32 %v5158_v59, %v5157_v4  ;;  %v5126_v62 = vmul.f32 %v5094_v10, %v5094_v10  ;;  %v14908_v59 = vld [vmem:[#allocation23_spill] sm:$0xff]  ;;  %5878 = vmatprep.subr.bf16.mxu1 %v10167_v17 }
 0x729   : > { %v5125_v33 = vmul.f32 %v5093_v61, %v5093_v61 }
 0x72a   : > { %5244 = vrot.lane.b32.xlu1 %v9644_v23, %s14896_s29  ;;  %v5161_v6 = vadd.f32 %v5160_v57, %v5159_v38  ;;  %v5164_v34 = vsel %vm2942_vm8, %v5126_v62, 0.0  ;;  %v10165_v38 = vld [vmem:[%s14577_s9 + $0x340] ss:$16 sps:$4 sm:$0xff]  }
 0x72b   : > { %v9647_v55 = vpop.f32.mrb[44].mxu1  ;;  %v5162_v8 = vsel %vm2942_vm8, %v5125_v33, 0.0  ;;  %5879 = vmatpush1.bf16.msra.mxu1 %v10165_v38  ;;  %v10168_v33 = vld [vmem:[%s14577_s9 + $0x360] ss:$16 sps:$4 sm:$0xff]  }
 0x72c   : > { %v5096_v36 = vsub.f32 %v14898_v7, %v9647_v55  ;;  %v4795_v27 = vpop.f32.mrb[45].mxu1  ;;  %v5163_v5 = vadd.f32 %v5162_v8, %v5161_v6 }
 0x72d   : > { %v5095_v18 = vsub.f32 %v14900_v21, %v4795_v27  ;;  %5250 = vrot.lane.b32.xlu0 %v4795_v27, %s14899_s28 }
 0x72e   : > { %5252 = vrot.lane.b32.xlu1 %v9647_v55, %s14899_s28  ;;  %v5128_v51 = vmul.f32 %v5096_v36, %v5096_v36  ;;  %v5165_v56 = vadd.f32 %v5164_v34, %v5163_v5  ;;  %v10170_v55 = vld [vmem:[%s14577_s9 + $0x364] ss:$16 sps:$4 sm:$0xff]   ;;  %v10720_v36 = vld [vmem:[%s11761_s20 + $0x8] sm:$0xff]  ;;  %v14909_v34 = vld [vmem:[#allocation25_spill] sm:$0xff] }
 0x72f   : > { %v5127_v60 = vmul.f32 %v5095_v18, %v5095_v18  ;;  %v9650_v15 = vpop.f32.mrb[46].mxu1  ;;  %5880 = vmatprep.subr.bf16.mxu1 %v10170_v55 }
 0x730   : > { %v5098_v26 = vsub.f32 %v14901_v49, %v9650_v15  ;;  %v4805_v39 = vpop.f32.mrb[47].mxu1  ;;  %v5168_v54 = vsel %vm2942_vm8, %v5128_v51, 0.0  ;;  %5881 = vmatpush1.bf16.msra.mxu1 %v10168_v33  ;;  %v14916_v33 = vld [vmem:[#allocation30_spill] sm:$0xff] }
 0x731   : > { %v5166_v43 = vsel %vm2942_vm8, %v5127_v60, 0.0  ;;  %v5097_v12 = vsub.f32 %v14903_v11, %v4805_v39  ;;  %5258 = vrot.lane.b32.xlu0 %v4805_v39, %s14902_s17 }
 0x732   : > { %5260 = vrot.lane.b32.xlu1 %v9650_v15, %s14902_s17  ;;  %v5167_v14 = vadd.f32 %v5166_v43, %v5165_v56  ;;  %v5130_v47 = vmul.f32 %v5098_v26, %v5098_v26  ;;  %v10171_v15 = vld [vmem:[%s14577_s9 + $0x380] ss:$16 sps:$4 sm:$0xff]   ;;  %v10173_v56 = vld [vmem:[%s14577_s9 + $0x384] ss:$16 sps:$4 sm:$0xff]  }
 0x733   : > { %v5129_v41 = vmul.f32 %v5097_v12, %v5097_v12  ;;  %v9653_v0 = vpop.f32.mrb[48].mxu1  ;;  %v14910_v26 = vld [vmem:[#allocation24_spill] sm:$0xff]  ;;  %5882 = vmatprep.subr.bf16.mxu1 %v10173_v56 }
 0x734   : > { %v5169_v3 = vadd.f32 %v5168_v54, %v5167_v14  ;;  %v5100_v1 = vsub.f32 %v14904_v44, %v9653_v0  ;;  %v4815_v30 = vpop.f32.mrb[49].mxu1  ;;  %v5172_v50 = vsel %vm2942_vm8, %v5130_v47, 0.0  ;;  %v14911_v54 = vld [vmem:[#allocation27_spill] sm:$0xff]  ;;  %5883 = vmatpush1.bf16.msra.mxu1 %v10171_v15  ;;  %v14918_v15 = vld [vmem:[#allocation32_spill] sm:$0xff] }
 0x735   : > { %v5170_v63 = vsel %vm2942_vm8, %v5129_v41, 0.0  ;;  %v5099_v9 = vsub.f32 %v14906_v31, %v4815_v30  ;;  %5266 = vrot.lane.b32.xlu0 %v4815_v30, %s14905_s19 }
 0x736   : > { %5268 = vrot.lane.b32.xlu1 %v9653_v0, %s14905_s19  ;;  %v5171_v32 = vadd.f32 %v5170_v63, %v5169_v3  ;;  %v5132_v37 = vmul.f32 %v5100_v1, %v5100_v1  ;;  %v10174_v0 = vld [vmem:[%s14577_s9 + $0x3a0] ss:$16 sps:$4 sm:$0xff]   ;;  %v10176_v3 = vld [vmem:[%s14577_s9 + $0x3a4] ss:$16 sps:$4 sm:$0xff]  }
 0x737   : > { %v5131_v35 = vmul.f32 %v5099_v9, %v5099_v9  ;;  %v13100_v24 = vpop.f32.mrb[50].mxu1  ;;  %v14912_v1 = vld [vmem:[#allocation26_spill] sm:$0xff]  ;;  %5884 = vmatprep.subr.bf16.mxu1 %v10176_v3 }
 0x738   : > { %v5173_v4 = vadd.f32 %v5172_v50, %v5171_v32  ;;  %v5102_v16 = vsub.f32 %v14907_v20, %v13100_v24  ;;  %v13104_v22 = vpop.f32.mrb[51].mxu1  ;;  %v5176_v40 = vsel %vm2942_vm8, %v5132_v37, 0.0  ;;  %v14913_v50 = vld [vmem:[#allocation29_spill] sm:$0xff]  ;;  %5885 = vmatpush1.bf16.msra.mxu1 %v10174_v0  ;;  %v10179_v20 = vld [vmem:[%s14577_s9 + $0x3c4] ss:$16 sps:$4 sm:$0xff]  }
 0x739   : > { %v5174_v25 = vsel %vm2942_vm8, %v5131_v35, 0.0  ;;  %v5101_v23 = vsub.f32 %v14908_v59, %v13104_v22  ;;  %5886 = vmatprep.subr.bf16.mxu1 %v10179_v20 }
 0x73a   : > { %v5175_v10 = vadd.f32 %v5174_v25, %v5173_v4  ;;  %v5134_v57 = vmul.f32 %v5102_v16, %v5102_v16  ;;  %v10177_v4 = vld [vmem:[%s14577_s9 + $0x3c0] ss:$16 sps:$4 sm:$0xff]  }
 0x73b   : > { %v5133_v29 = vmul.f32 %v5101_v23, %v5101_v23  ;;  %v13116_v61 = vpop.f32.mrb[52].mxu1  ;;  %v14914_v25 = vld [vmem:[#allocation28_spill] sm:$0xff] }
 0x73c   : > { %v5177_v2 = vadd.f32 %v5176_v40, %v5175_v10  ;;  %v5104_v6 = vsub.f32 %v10719_v13, %v13116_v61  ;;  %v13120_v62 = vpop.f32.mrb[53].mxu1  ;;  %v5180_v21 = vsel %vm2942_vm8, %v5134_v57, 0.0  ;;  %5887 = vmatpush1.bf16.msra.mxu1 %v10177_v4 }
 0x73d   : > { %v5178_v7 = vsel %vm2942_vm8, %v5133_v29, 0.0  ;;  %v5103_v27 = vsub.f32 %v10720_v36, %v13120_v62  ;;  %v14915_v29 = vld [vmem:[#allocation31_spill] sm:$0xff]  ;;  %v10182_v36 = vld [vmem:[%s14577_s9 + $0x3e4] ss:$16 sps:$4 sm:$0xff]  }
 0x73e   : > { %v5179_v8 = vadd.f32 %v5178_v7, %v5177_v2  ;;  %v5136_v18 = vmul.f32 %v5104_v6, %v5104_v6  ;;  %v10180_v7 = vld [vmem:[%s14577_s9 + $0x3e0] ss:$16 sps:$4 sm:$0xff]   ;;  %5888 = vmatprep.subr.bf16.mxu1 %v10182_v36 }
 0x73f   : > { %v5135_v42 = vmul.f32 %v5103_v27, %v5103_v27  ;;  %v9662_v19 = vpop.f32.mrb[54].mxu1 }
 0x740   : > { %v5181_v5 = vadd.f32 %v5180_v21, %v5179_v8  ;;  %v5106_v51 = vsub.f32 %v14909_v34, %v9662_v19  ;;  %5284 = vrot.lane.b32.xlu0 %v9662_v19, %s14890_s23  ;;  %v4845_v60 = vpop.f32.mrb[55].mxu1  ;;  %v5184_v11 = vsel %vm2942_vm8, %v5136_v18, 0.0  ;;  %5889 = vmatpush1.bf16.msra.mxu1 %v10180_v7  ;;  %v14931_v7 = vld [vmem:[#allocation40_spill] sm:$0xff] }
 0x741   : > { %v5182_v49 = vsel %vm2942_vm8, %v5135_v42, 0.0  ;;  %v5105_v39 = vsub.f32 %v14910_v26, %v4845_v60  ;;  %5282 = vrot.lane.b32.xlu1 %v4845_v60, %s14890_s23  ;;  %s555_s23 = scalar_lea.vmem %s14584_s16, %s15070_s25 }
 0x742   : > { %v5183_v43 = vadd.f32 %v5182_v49, %v5181_v5  ;;  %v5138_v12 = vmul.f32 %v5106_v51, %v5106_v51  ;;  %v14917_v5 = vld [vmem:[#allocation33_spill] sm:$0xff] }
 0x743   : > { %v5137_v28 = vmul.f32 %v5105_v39, %v5105_v39  ;;  %v9665_v58 = vpop.f32.mrb[56].mxu1 }
 0x744   : > { %v5185_v14 = vadd.f32 %v5184_v11, %v5183_v43  ;;  %v5108_v47 = vsub.f32 %v14911_v54, %v9665_v58  ;;  %v4855_v41 = vpop.f32.mrb[57].mxu1  ;;  %v5188_v31 = vsel %vm2942_vm8, %v5138_v12, 0.0 }
 0x745   : > { %v5186_v44 = vsel %vm2942_vm8, %v5137_v28, 0.0  ;;  %v5107_v30 = vsub.f32 %v14912_v1, %v4855_v41  ;;  %5292 = vrot.lane.b32.xlu1 %v9665_v58, %s14894_s22  ;;  %5290 = vrot.lane.b32.xlu0 %v4855_v41, %s14894_s22  ;;  %v14919_v28 = vld [vmem:[#allocation35_spill] sm:$0xff] }
 0x746   : > { %v5187_v63 = vadd.f32 %v5186_v44, %v5185_v14  ;;  %v5140_v9 = vmul.f32 %v5108_v47, %v5108_v47  ;;  %v14920_v47 = vld [vmem:[#allocation34_spill] sm:$0xff] }
 0x747   : > { %v5139_v48 = vmul.f32 %v5107_v30, %v5107_v30  ;;  %v9668_v45 = vpop.f32.mrb[58].mxu1 }
 0x748   : > { %v5189_v32 = vadd.f32 %v5188_v31, %v5187_v63  ;;  %v5110_v37 = vsub.f32 %v14913_v50, %v9668_v45  ;;  %v4865_v35 = vpop.f32.mrb[59].mxu1  ;;  %v5192_v38 = vsel %vm2942_vm8, %v5140_v9, 0.0  ;;  %v14921_v31 = vld [vmem:[#allocation37_spill] sm:$0xff] }
 0x749   : > { %v5190_v16 = vsel %vm2942_vm8, %v5139_v48, 0.0  ;;  %v5109_v59 = vsub.f32 %v14914_v25, %v4865_v35  ;;  %5300 = vrot.lane.b32.xlu1 %v9668_v45, %s14896_s29  ;;  %5298 = vrot.lane.b32.xlu0 %v4865_v35, %s14896_s29  ;;  %v10185_v35 = vld [vmem:[%s14577_s9 + $0x20c] ss:$16 sps:$4 sm:$0xff]   ;;  %s547_s29 = scalar_lea.vmem %s14582_s14, %s15023_s0 }
 0x74a   : > { %v5191_v23 = vadd.f32 %v5190_v16, %v5189_v32  ;;  %v5142_v17 = vmul.f32 %v5110_v37, %v5110_v37  ;;  %v14922_v32 = vld [vmem:[#allocation36_spill] sm:$0xff]  ;;  %5901 = vmatprep.subr.bf16.mxu1 %v10185_v35 }
 0x74b   : > { %v5141_v10 = vmul.f32 %v5109_v59, %v5109_v59  ;;  %v9671_v40 = vpop.f32.mrb[60].mxu1 }
 0x74c   : > { %v5193_v57 = vadd.f32 %v5192_v38, %v5191_v23  ;;  %v5112_v2 = vsub.f32 %v14915_v29, %v9671_v40  ;;  %v4875_v13 = vpop.f32.mrb[61].mxu1  ;;  %v5196_v8 = vsel %vm2942_vm8, %v5142_v17, 0.0 }
 0x74d   : > { %v5194_v6 = vsel %vm2942_vm8, %v5141_v10, 0.0  ;;  %v5111_v55 = vsub.f32 %v14916_v33, %v4875_v13  ;;  %5308 = vrot.lane.b32.xlu1 %v9671_v40, %s14899_s28  ;;  %5306 = vrot.lane.b32.xlu0 %v4875_v13, %s14899_s28  ;;  %s14923_s28 = smov 112   ;;  %v14924_v10 = vld [vmem:[#allocation65_spill] sm:$0xff]  ;;  %v14925_v40 = vld [vmem:[#allocation38_spill] sm:$0xff]  ;;  %v14928_v33 = vld [vmem:[#allocation63_spill] sm:$0xff] }
 0x74e   : > { %v5195_v27 = vadd.f32 %v5194_v6, %v5193_v57  ;;  %v5144_v21 = vmul.f32 %v5112_v2, %v5112_v2  ;;  %v13211_v57 = vsub.f32 %v14925_v40, %v14924_v10  ;;  %v14926_v2 = vld [vmem:[#allocation74_spill] sm:$0xff]  ;;  %v14927_v13 = vld [vmem:[#allocation41_spill] sm:$0xff]  ;;  %v14950_v40 = vld [vmem:[#allocation83_spill] sm:$0xff] }
 0x74f   : > { %v5143_v18 = vmul.f32 %v5111_v55, %v5111_v55  ;;  %v9674_v42 = vpop.f32.mrb[62].mxu1  ;;  %v13216_v6 = vsub.f32 %v14927_v13, %v14926_v2 }
 0x750   : > { %v5197_v19 = vadd.f32 %v5196_v8, %v5195_v27  ;;  %v5114_v34 = vsub.f32 %v14917_v5, %v9674_v42  ;;  %v4885_v51 = vpop.f32.mrb[63].mxu1  ;;  %v5200_v26 = vsel %vm2942_vm8, %v5144_v21, 0.0  ;;  %v3627_v29 = vmul.f32 1.442695, %v13211_v57  ;;  %v14932_v21 = vld [vmem:[#allocation76_spill] sm:$0xff]  ;;  %v14934_v5 = vld [vmem:[#allocation75_spill] sm:$0xff] }
 0x751   : > { %v5198_v60 = vsel %vm2942_vm8, %v5143_v18, 0.0  ;;  %v5113_v56 = vsub.f32 %v14918_v15, %v4885_v51  ;;  %5316 = vrot.lane.b32.xlu1 %v9674_v42, %s14902_s17  ;;  %5314 = vrot.lane.b32.xlu0 %v4885_v51, %s14902_s17  ;;  %v3631_v27 = vmul.f32 1.442695, %v13216_v6  ;;  %v14933_v18 = vld [vmem:[#allocation43_spill] sm:$0xff]  ;;  %v14936_v15 = vld [vmem:[#allocation78_spill] sm:$0xff]  ;;  %s15067_s17 = sshll.u32 %s15070_s25, 4 }
 0x752   : > { %v5199_v49 = vadd.f32 %v5198_v60, %v5197_v19  ;;  %v5146_v39 = vmul.f32 %v5114_v34, %v5114_v34  ;;  %10525 = vpow2.f32 %v3627_v29  ;;  %v13230_v42 = vsub.f32 %v14933_v18, %v14932_v21  ;;  %v14935_v34 = vld [vmem:[#allocation42_spill] sm:$0xff]  ;;  %s552_s21 = scalar_lea.vmem %s14583_s15, %s15067_s17 }
 0x753   : > { %v5145_v43 = vmul.f32 %v5113_v56, %v5113_v56  ;;  %v9677_v11 = vpop.f32.mrb[64].mxu1  ;;  %10527 = vpow2.f32 %v3631_v27  ;;  %v13235_v51 = vsub.f32 %v14935_v34, %v14934_v5  ;;  %v14937_v56 = vld [vmem:[#allocation45_spill] sm:$0xff]  ;;  %v14951_v29 = vld [vmem:[#allocation50_spill] sm:$0xff]  ;;  %v14956_v5 = vld [vmem:[#allocation52_spill] sm:$0xff] }
 0x754   : > { %v5201_v12 = vadd.f32 %v5200_v26, %v5199_v49  ;;  %v5116_v58 = vsub.f32 %v14919_v28, %v9677_v11  ;;  %v4895_v14 = vpop.f32.mrb[65].mxu1  ;;  %v5204_v3 = vsel %vm2942_vm8, %v5146_v39, 0.0  ;;  %v3635_v60 = vmul.f32 1.442695, %v13230_v42  ;;  %v14938_v39 = vld [vmem:[#allocation77_spill] sm:$0xff]  ;;  %v14940_v28 = vld [vmem:[#allocation80_spill] sm:$0xff] }
 0x755   : > { %v5202_v54 = vsel %vm2942_vm8, %v5145_v43, 0.0  ;;  %v5115_v41 = vsub.f32 %v14920_v47, %v4895_v14  ;;  %5324 = vrot.lane.b32.xlu1 %v9677_v11, %s14905_s19  ;;  %5322 = vrot.lane.b32.xlu0 %v4895_v14, %s14905_s19  ;;  %v13240_v49 = vsub.f32 %v14937_v56, %v14936_v15  ;;  %v3637_v26 = vmul.f32 1.442695, %v13235_v51  ;;  %v14939_v43 = vld [vmem:[#allocation44_spill] sm:$0xff]  ;;  %v14959_v56 = vld [vmem:[#allocation55_spill] sm:$0xff] }
 0x756   : > { %v5203_v0 = vadd.f32 %v5202_v54, %v5201_v12  ;;  %v5148_v44 = vmul.f32 %v5116_v58, %v5116_v58  ;;  %v13245_v11 = vsub.f32 %v14939_v43, %v14938_v39  ;;  %v14941_v58 = vld [vmem:[#allocation47_spill] sm:$0xff]  ;;  %v13291_v2 = vsub.f32 %v14951_v29, %v14950_v40  ;;  %v14958_v15 = vld [vmem:[#allocation88_spill] sm:$0xff] }
 0x757   : > { %v5147_v1 = vmul.f32 %v5115_v41, %v5115_v41  ;;  %v9680_v30 = vpop.f32.mrb[66].mxu1  ;;  %v3639_v12 = vmul.f32 1.442695, %v13240_v49  ;;  %v13250_v14 = vsub.f32 %v14941_v58, %v14940_v28  ;;  %v14942_v41 = vld [vmem:[#allocation79_spill] sm:$0xff]  ;;  %v14970_v29 = vld [vmem:[#allocation92_spill] sm:$0xff] }
 0x758   : > { %v5205_v63 = vadd.f32 %v5204_v3, %v5203_v0  ;;  %v5118_v9 = vsub.f32 %v14921_v31, %v9680_v30  ;;  %v4905_v48 = vpop.f32.mrb[67].mxu1  ;;  %v5208_v4 = vsel %vm2942_vm8, %v5148_v44, 0.0  ;;  %v3641_v47 = vmul.f32 1.442695, %v13245_v11  ;;  %v14943_v0 = vld [vmem:[#allocation46_spill] sm:$0xff] }
 0x759   : > { %v5206_v45 = vsel %vm2942_vm8, %v5147_v1, 0.0  ;;  %v5117_v50 = vsub.f32 %v14922_v32, %v4905_v48  ;;  %5332 = vrot.lane.b32.xlu1 %v9680_v30, %s14923_s28  ;;  %5330 = vrot.lane.b32.xlu0 %v4905_v48, %s14923_s28  ;;  %v13257_v3 = vsub.f32 %v14943_v0, %v14942_v41  ;;  %v3643_v44 = vmul.f32 1.442695, %v13250_v14  ;;  %v14944_v1 = vld [vmem:[#allocation82_spill] sm:$0xff]  ;;  %v14945_v30 = vld [vmem:[#allocation49_spill] sm:$0xff] }
 0x75a   : > { %v5207_v37 = vadd.f32 %v5206_v45, %v5205_v63  ;;  %v5150_v20 = vmul.f32 %v5118_v9, %v5118_v9  ;;  %v13262_v63 = vsub.f32 %v14945_v30, %v14944_v1  ;;  %v14946_v32 = vld [vmem:[#allocation81_spill] sm:$0xff]  ;;  %v3653_v18 = vmul.f32 1.442695, %v13291_v2  ;;  %v14962_v41 = vld [vmem:[#allocation54_spill] sm:$0xff] }
 0x75b   : > { %v5149_v16 = vmul.f32 %v5117_v50, %v5117_v50  ;;  %v3645_v45 = vmul.f32 1.442695, %v13257_v3  ;;  %v14947_v50 = vld [vmem:[#allocation48_spill] sm:$0xff]  ;;  %v14964_v1 = vld [vmem:[#allocation90_spill] sm:$0xff]  ;;  %v14965_v30 = vld [vmem:[#allocation57_spill] sm:$0xff] }
 0x75c   : > { %v5209_v25 = vadd.f32 %v5208_v4, %v5207_v37  ;;  %v5212_v38 = vsel %vm2942_vm8, %v5150_v20, 0.0  ;;  %v13252_v54 = vpop.eup %10525  ;;  %v13273_v37 = vsub.f32 %v14947_v50, %v14946_v32  ;;  %v3647_v35 = vmul.f32 1.442695, %v13262_v63  ;;  %v14948_v4 = vld [vmem:[#allocation84_spill] sm:$0xff]  ;;  %v14949_v20 = vld [vmem:[#allocation51_spill] sm:$0xff] }
 0x75d   : > { %v5210_v59 = vsel %vm2942_vm8, %v5149_v16, 0.0  ;;  %5276 = vrot.lane.b32.xlu1 %v13100_v24, %s14923_s28  ;;  %5274 = vrot.lane.b32.xlu0 %v13104_v22, %s14923_s28  ;;  %v14929_v24 = vld [vmem:[#allocation39_spill] sm:$0xff]  ;;  %v14930_v22 = vld [vmem:[#allocation73_spill] sm:$0xff]  ;;  %v3691_v31 = vsel %vm3498_vm11, %v13252_v54, 0.0  ;;  %v13266_v9 = vpop.eup %10527  ;;  %v13278_v16 = vsub.f32 %v14949_v20, %v14948_v4 }
 0x75e   : > { %v5211_v23 = vadd.f32 %v5210_v59, %v5209_v25  ;;  %v13220_v55 = vsub.f32 %v14929_v24, %v14928_v33  ;;  %v13224_v36 = vsub.f32 %v14931_v7, %v14930_v22  ;;  %v3697_v25 = vsel %vm3498_vm11, %v13266_v9, 0.0  ;;  %v14952_v33 = vld [vmem:[#allocation86_spill] sm:$0xff]  ;;  %v14953_v24 = vld [vmem:[#allocation53_spill] sm:$0xff] }
 0x75f   : > { %v3649_v10 = vmul.f32 1.442695, %v13273_v37  ;;  %v3651_v13 = vmul.f32 1.442695, %v13278_v16  ;;  %v13296_v22 = vsub.f32 %v14953_v24, %v14952_v33  ;;  %v14967_v20 = vld [vmem:[#allocation89_spill] sm:$0xff] }
 0x760   : > { %v13207_v17 = vadd.f32 %v5212_v38, %v5211_v23  ;;  %v3629_v8 = vmul.f32 1.442695, %v13220_v55  ;;  %v3633_v19 = vmul.f32 1.442695, %v13224_v36 }
 0x761   : > { %14954 = vst [vmem:[#allocation100_spill] sm:$0xff] %v13296_v22 }
 0x762   : > { %10529 = vpow2.f32 %v3629_v8 }
 0x763   : > { %10531 = vpow2.f32 %v3633_v19  ;;  %v14955_v19 = vld [vmem:[#allocation85_spill] sm:$0xff] }
 0x764   : > { %10533 = vpow2.f32 %v3635_v60  ;;  %v13309_v34 = vsub.f32 %v14956_v5, %v14955_v19  ;;  %v3655_v60 = vmul.f32 1.442695, %v13296_v22  ;;  %v14973_v5 = vld [vmem:[#allocation91_spill] sm:$0xff] }
 0x765   : > { %10535 = vpow2.f32 %v3637_v26  ;;  %v13314_v26 = vsub.f32 %v14959_v56, %v14958_v15 }
 0x766   : > { %10537 = vpow2.f32 %v3639_v12  ;;  %14957 = vst [vmem:[#allocation102_spill] sm:$0xff] %v13309_v34  ;;  %v3657_v58 = vmul.f32 1.442695, %v13309_v34 }
 0x767   : > { %10539 = vpow2.f32 %v3641_v47  ;;  %14960 = vst [vmem:[#allocation106_spill] sm:$0xff] %v13314_v26  ;;  %v14961_v47 = vld [vmem:[#allocation87_spill] sm:$0xff] }
 0x768   : > { %10541 = vpow2.f32 %v3643_v44  ;;  %v13327_v0 = vsub.f32 %v14962_v41, %v14961_v47  ;;  %v3659_v44 = vmul.f32 1.442695, %v13314_v26 }
 0x769   : > { %10543 = vpow2.f32 %v3645_v45 }
 0x76a   : > { %10545 = vpow2.f32 %v3647_v35  ;;  %14963 = vst [vmem:[#allocation104_spill] sm:$0xff] %v13327_v0  ;;  %v3661_v4 = vmul.f32 1.442695, %v13327_v0 }
 0x76b   : > { %10547 = vpow2.f32 %v3649_v10 }
 0x76c   : > { %v13268_v48 = vpop.eup %10529  ;;  %10549 = vpow2.f32 %v3651_v13  ;;  %v14971_v13 = vld [vmem:[#allocation59_spill] sm:$0xff] }
 0x76d   : > { %v13282_v59 = vpop.eup %10531  ;;  %v3694_v23 = vsel %vm3498_vm11, %v13268_v48, 0.0  ;;  %10551 = vpow2.f32 %v3653_v18  ;;  %v13352_v33 = vsub.f32 %v14971_v13, %v14970_v29  ;;  %v14982_v29 = vld [vmem:[#allocation96_spill] sm:$0xff] }
 0x76e   : > { %v13286_v38 = vpop.eup %10533  ;;  %v3700_v7 = vsel %vm3498_vm11, %v13282_v59, 0.0  ;;  %10553 = vpow2.f32 %v3655_v60  ;;  %v14974_v60 = vld [vmem:[#allocation58_spill] sm:$0xff]  ;;  %v14983_v13 = vld [vmem:[#allocation64_spill] sm:$0xff] }
 0x76f   : > { %v13300_v27 = vpop.eup %10535  ;;  %v3703_v8 = vsel %vm3498_vm11, %v13286_v38, 0.0  ;;  %10555 = vpow2.f32 %v3657_v58  ;;  %14972 = vst [vmem:[#allocation110_spill] sm:$0xff] %v13352_v33  ;;  %v13365_v15 = vsub.f32 %v14974_v60, %v14973_v5  ;;  %v14977_v58 = vld [vmem:[#allocation61_spill] sm:$0xff] }
 0x770   : > { %v13304_v21 = vpop.eup %10537  ;;  %v3706_v39 = vsel %vm3498_vm11, %v13300_v27, 0.0  ;;  %10557 = vpow2.f32 %v3659_v44 }
 0x771   : > { %v13318_v43 = vpop.eup %10539  ;;  %v3709_v12 = vsel %vm3498_vm11, %v13304_v21, 0.0  ;;  %10559 = vpow2.f32 %v3661_v4  ;;  %14975 = vst [vmem:[#allocation111_spill] sm:$0xff] %v13365_v15  ;;  %v14980_v4 = vld [vmem:[#allocation60_spill] sm:$0xff] }
 0x772   : > { %v13322_v28 = vpop.eup %10541  ;;  %v3712_v45 = vsel %vm3498_vm11, %v13318_v43, 0.0 }
 0x773   : > { %v13336_v32 = vpop.eup %10543  ;;  %v3715_v50 = vsel %vm3498_vm11, %v13322_v28, 0.0 }
 0x774   : > { %v13340_v35 = vpop.eup %10545  ;;  %v3718_v24 = vsel %vm3498_vm11, %v13336_v32, 0.0 }
 0x77c   : > { %3692 = vadd.xlane.f32.xlu0 %v3691_v31  ;;  %v13332_v31 = vsub.f32 %v14965_v30, %v14964_v1 }
 0x77e   : > { %14966 = vst [vmem:[#allocation108_spill] sm:$0xff] %v13332_v31  ;;  %v3663_v40 = vmul.f32 1.442695, %v13332_v31 }
 0x780   : > { %3698 = vadd.xlane.f32.xlu0 %v3697_v25  ;;  %v14968_v25 = vld [vmem:[#allocation56_spill] sm:$0xff]  ;;  %10561 = vpow2.f32 %v3663_v40 }
 0x781   : > { %3695 = vadd.xlane.f32.xlu1 %v3694_v23  ;;  %v13345_v23 = vsub.f32 %v14968_v25, %v14967_v20 }
 0x783   : > { %14969 = vst [vmem:[#allocation109_spill] sm:$0xff] %v13345_v23  ;;  %v3665_v19 = vmul.f32 1.442695, %v13345_v23  ;;  %v15006_v23 = vld [vmem:[#allocation107_spill] sm:$0xff] }
 0x784   : > { %3701 = vadd.xlane.f32.xlu0 %v3700_v7  ;;  %v13356_v7 = vpop.eup %10547 }
 0x785   : > { %3704 = vadd.xlane.f32.xlu1 %v3703_v8  ;;  %v3721_v8 = vsel %vm3498_vm11, %v13340_v35, 0.0  ;;  %v13360_v18 = vpop.eup %10549  ;;  %v3724_v41 = vsel %vm3498_vm11, %v13356_v7, 0.0  ;;  %10563 = vpow2.f32 %v3665_v19 }
 0x786   : > { %v13376_v44 = vpop.eup %10551  ;;  %v3727_v1 = vsel %vm3498_vm11, %v13360_v18, 0.0 }
 0x787   : > { %v13380_v30 = vpop.eup %10553 }
 0x788   : > { %3707 = vadd.xlane.f32.xlu0 %v3706_v39  ;;  %v3667_v39 = vmul.f32 1.442695, %v13352_v33  ;;  %v13398_v19 = vpop.eup %10555  ;;  %v3733_v60 = vsel %vm3498_vm11, %v13380_v30, 0.0 }
 0x789   : > { %3710 = vadd.xlane.f32.xlu1 %v3709_v12  ;;  %v14976_v12 = vld [vmem:[#allocation94_spill] sm:$0xff]  ;;  %14985 = vst [vmem:[#allocation12_spill] sm:$0xff] %v13398_v19 }
 0x78a   : > { %v13372_v47 = vsub.f32 %v14977_v58, %v14976_v12  ;;  %10565 = vpow2.f32 %v3667_v39  ;;  %v13402_v12 = vpop.eup %10557  ;;  %v14987_v58 = vld [vmem:[#allocation95_spill] sm:$0xff] }
 0x78b   : > { %14986 = vst [vmem:[#allocation10_spill] sm:$0xff] %v13402_v12  ;;  %v13416_v46 = vpop.eup %10559 }
 0x78c   : > { %3713 = vadd.xlane.f32.xlu0 %v3712_v45  ;;  %14978 = vst [vmem:[#allocation66_spill] sm:$0xff] %v13372_v47  ;;  %v3669_v45 = vmul.f32 1.442695, %v13365_v15  ;;  %v3671_v40 = vmul.f32 1.442695, %v13372_v47  ;;  %14993 = vst [vmem:[#allocation16_spill] sm:$0xff] %v13416_v46 }
 0x78d   : > { %3716 = vadd.xlane.f32.xlu1 %v3715_v50  ;;  %v14979_v50 = vld [vmem:[#allocation93_spill] sm:$0xff]  ;;  %v14998_v47 = vld [vmem:[#allocation103_spill] sm:$0xff]  ;;  %v3742_v33 = vsel %vm3498_vm11, %v13416_v46, 0.0 }
 0x78e   : > { %v13385_v20 = vsub.f32 %v14980_v4, %v14979_v50  ;;  %10567 = vpow2.f32 %v3669_v45  ;;  %v14990_v4 = vld [vmem:[#allocation99_spill] sm:$0xff]  ;;  %v3739_v45 = vsel %vm3498_vm11, %v13402_v12, 0.0 }
 0x78f   : > { %10569 = vpow2.f32 %v3671_v40 }
 0x790   : > { %v13347_v10 = vpop.permute.xlu1 %5228  ;;  %3719 = vadd.xlane.f32.xlu0 %v3718_v24  ;;  %14981 = vst [vmem:[#allocation13_spill] sm:$0xff] %v13385_v20  ;;  %v13392_v24 = vsub.f32 %v14983_v13, %v14982_v29  ;;  %v3673_v39 = vmul.f32 1.442695, %v13385_v20  ;;  %v14991_v29 = vld [vmem:[#allocation68_spill] sm:$0xff] }
 0x791   : > { %3722 = vadd.xlane.f32.xlu1 %v3721_v8  ;;  %v3730_v8 = vsel %vm3498_vm11, %v13376_v44, 0.0  ;;  %v13412_v13 = vsub.f32 %v14991_v29, %v14990_v4  ;;  %v14995_v4 = vld [vmem:[#allocation98_spill] sm:$0xff]  ;;  %v14996_v29 = vld [vmem:[#allocation67_spill] sm:$0xff] }
 0x792   : > { %14984 = vst [vmem:[#allocation11_spill] sm:$0xff] %v13392_v24  ;;  %v3675_v50 = vmul.f32 1.442695, %v13392_v24  ;;  %10571 = vpow2.f32 %v3673_v39  ;;  %v13429_v24 = vsub.f32 %v14996_v29, %v14995_v4  ;;  %v15003_v4 = vld [vmem:[#allocation101_spill] sm:$0xff] }
 0x793   : > { %14992 = vst [vmem:[#allocation15_spill] sm:$0xff] %v13412_v13  ;;  %v3679_v20 = vmul.f32 1.442695, %v13412_v13  ;;  %v15004_v29 = vld [vmem:[#allocation69_spill] sm:$0xff] }
 0x794   : > { %v13367_v56 = vpop.permute.xlu1 %5226  ;;  %3725 = vadd.xlane.f32.xlu0 %v3724_v41  ;;  %v14988_v41 = vld [vmem:[#allocation62_spill] sm:$0xff]  ;;  %14997 = vst [vmem:[#allocation18_spill] sm:$0xff] %v13429_v24  ;;  %10573 = vpow2.f32 %v3675_v50  ;;  %v3681_v50 = vmul.f32 1.442695, %v13429_v24  ;;  %v13447_v13 = vsub.f32 %v15004_v29, %v15003_v4 }
 0x795   : > { %3728 = vadd.xlane.f32.xlu1 %v3727_v1  ;;  %v13387_v25 = vpop.permute.xlu0 %5234  ;;  %v13407_v1 = vsub.f32 %v14988_v41, %v14987_v58  ;;  %v13422_v58 = vpop.eup %10561 }
 0x796   : > { %14994 = vst [vmem:[#allocation17_spill] sm:$0xff] %v13422_v58  ;;  %v3745_v39 = vsel %vm3498_vm11, %v13422_v58, 0.0  ;;  %15005 = vst [vmem:[#allocation22_spill] sm:$0xff] %v13447_v13 }
 0x797   : > { %14989 = vst [vmem:[#allocation14_spill] sm:$0xff] %v13407_v1  ;;  %v3677_v41 = vmul.f32 1.442695, %v13407_v1 }
 0x798   : > { %v13396_v5 = vpop.permute.xlu1 %5236  ;;  %3731 = vadd.xlane.f32.xlu0 %v3730_v8  ;;  %v3736_v8 = vsel %vm3498_vm11, %v13398_v19, 0.0 }
 0x799   : > { %3734 = vadd.xlane.f32.xlu1 %v3733_v60  ;;  %v13418_v60 = vpop.permute.xlu0 %5242  ;;  %10575 = vpow2.f32 %v3677_v41 }
 0x79a   : > { %10577 = vpow2.f32 %v3679_v20  ;;  %v3685_v20 = vmul.f32 1.442695, %v13447_v13 }
 0x79b   : > { %10579 = vpow2.f32 %v3681_v50 }
 0x79c   : > { %3737 = vadd.xlane.f32.xlu0 %v3736_v8  ;;  %v13424_v40 = vpop.permute.xlu1 %5244  ;;  %v14999_v8 = vld [vmem:[#allocation70_spill] sm:$0xff] }
 0x79d   : > { %3740 = vadd.xlane.f32.xlu1 %v3739_v45  ;;  %v13434_v15 = vsub.f32 %v14999_v8, %v14998_v47  ;;  %v13438_v45 = vpop.eup %10563 }
 0x79e   : > { %15001 = vst [vmem:[#allocation20_spill] sm:$0xff] %v13438_v45  ;;  %v13442_v1 = vpop.eup %10565  ;;  %v3748_v41 = vsel %vm3498_vm11, %v13438_v45, 0.0 }
 0x79f   : > { %15000 = vst [vmem:[#allocation19_spill] sm:$0xff] %v13434_v15  ;;  %15002 = vst [vmem:[#allocation21_spill] sm:$0xff] %v13442_v1  ;;  %v13449_v47 = vpop.permute.xlu0 %5250  ;;  %v3683_v8 = vmul.f32 1.442695, %v13434_v15  ;;  %v3751_v4 = vsel %vm3498_vm11, %v13442_v1, 0.0  ;;  %v15011_v15 = vld [vmem:[#allocation105_spill] sm:$0xff] }
 0x7a0   : > { %3743 = vadd.xlane.f32.xlu0 %v3742_v33  ;;  %v15007_v33 = vld [vmem:[#allocation72_spill] sm:$0xff]  ;;  %v13456_v58 = vpop.permute.xlu1 %5252 }
 0x7a1   : > { %3746 = vadd.xlane.f32.xlu1 %v3745_v39  ;;  %v13454_v31 = vsub.f32 %v15007_v33, %v15006_v23  ;;  %v13460_v39 = vpop.eup %10567  ;;  %v15012_v23 = vld [vmem:[#allocation71_spill] sm:$0xff]  ;;  %10581 = vpow2.f32 %v3683_v8 }
 0x7a2   : > { %15009 = vst [vmem:[#allocation25_spill] sm:$0xff] %v13460_v39  ;;  %v13464_v29 = vpop.eup %10569  ;;  %v13469_v33 = vsub.f32 %v15012_v23, %v15011_v15  ;;  %v3754_v45 = vsel %vm3498_vm11, %v13460_v39, 0.0  ;;  %10583 = vpow2.f32 %v3685_v20 }
 0x7a3   : > { %15008 = vst [vmem:[#allocation23_spill] sm:$0xff] %v13454_v31  ;;  %15010 = vst [vmem:[#allocation24_spill] sm:$0xff] %v13464_v29  ;;  %v3687_v24 = vmul.f32 1.442695, %v13454_v31  ;;  %v13476_v0 = vpop.permute.xlu0 %5258  ;;  %v3757_v50 = vsel %vm3498_vm11, %v13464_v29, 0.0 }
 0x7a4   : > { %3749 = vadd.xlane.f32.xlu0 %v3748_v41  ;;  %15013 = vst [vmem:[#allocation27_spill] sm:$0xff] %v13469_v33  ;;  %v13474_v41 = vpop.eup %10571  ;;  %v13482_v13 = vpop.permute.xlu1 %5260  ;;  %v3689_v15 = vmul.f32 1.442695, %v13469_v33 }
 0x7a5   : > { %3752 = vadd.xlane.f32.xlu1 %v3751_v4  ;;  %15014 = vst [vmem:[#allocation26_spill] sm:$0xff] %v13474_v41  ;;  %v13480_v4 = vpop.eup %10573  ;;  %10585 = vpow2.f32 %v3687_v24  ;;  %v3760_v8 = vsel %vm3498_vm11, %v13474_v41, 0.0 }
 0x7a6   : > { %15015 = vst [vmem:[#allocation29_spill] sm:$0xff] %v13480_v4  ;;  %v13487_v23 = vpop.eup %10575  ;;  %10587 = vpow2.f32 %v3689_v15 }
 0x7a7   : > { %15016 = vst [vmem:[#allocation28_spill] sm:$0xff] %v13487_v23  ;;  %v13491_v31 = vpop.eup %10577  ;;  %v13493_v29 = vpop.permute.xlu0 %5266  ;;  %v3766_v24 = vsel %vm3498_vm11, %v13487_v23, 0.0 }
 0x7a8   : > { %3755 = vadd.xlane.f32.xlu0 %v3754_v45  ;;  %v3763_v45 = vsel %vm3498_vm11, %v13480_v4, 0.0  ;;  %15017 = vst [vmem:[#allocation31_spill] sm:$0xff] %v13491_v31  ;;  %v13499_v20 = vpop.eup %10579 }
 0x7a9   : > { %3758 = vadd.xlane.f32.xlu1 %v3757_v50  ;;  %v13495_v50 = vpop.permute.xlu1 %5268  ;;  %15018 = vst [vmem:[#allocation30_spill] sm:$0xff] %v13499_v20  ;;  %v3772_v15 = vsel %vm3498_vm11, %v13499_v20, 0.0 }
 0x7ab   : > { %v13503_v33 = vpop.eup %10581 }
 0x7ac   : > { %3761 = vadd.xlane.f32.xlu0 %v3760_v8  ;;  %v3769_v8 = vsel %vm3498_vm11, %v13491_v31, 0.0  ;;  %15019 = vst [vmem:[#allocation33_spill] sm:$0xff] %v13503_v33  ;;  %v3775_v23 = vsel %vm3498_vm11, %v13503_v33, 0.0 }
 0x7ad   : > { %3764 = vadd.xlane.f32.xlu1 %v3763_v45  ;;  %v13507_v45 = vpop.eup %10583 }
 0x7ae   : > { %15020 = vst [vmem:[#allocation32_spill] sm:$0xff] %v13507_v45  ;;  %v3778_v31 = vsel %vm3498_vm11, %v13507_v45, 0.0 }
 0x7af   : > { %v13511_v39 = vpop.eup %10585 }
 0x7b0   : > { %3767 = vadd.xlane.f32.xlu0 %v3766_v24  ;;  %15021 = vst [vmem:[#allocation35_spill] sm:$0xff] %v13511_v39  ;;  %v3781_v20 = vsel %vm3498_vm11, %v13511_v39, 0.0 }
 0x7b1   : > { %3770 = vadd.xlane.f32.xlu1 %v3769_v8  ;;  %v13515_v8 = vpop.eup %10587 }
 0x7b2   : > { %v5285_v4 = vpop.permute.xlu0 %5284  ;;  %15022 = vst [vmem:[#allocation34_spill] sm:$0xff] %v13515_v8  ;;  %v3784_v33 = vsel %vm3498_vm11, %v13515_v8, 0.0 }
 0x7b3   : > { %v5283_v41 = vpop.permute.xlu1 %5282  ;;  %v5355_v45 = vsel %vm2942_vm8, %v13116_v61, %v5285_v4 }
 0x7b4   : > { %3773 = vadd.xlane.f32.xlu0 %v3772_v15 }
 0x7b5   : > { %3776 = vadd.xlane.f32.xlu1 %v3775_v23 }
 0x7b7   : > { %v5293_v24 = vpop.permute.xlu1 %5292  ;;  %v5291_v1 = vpop.permute.xlu0 %5290 }
 0x7b8   : > { %3779 = vadd.xlane.f32.xlu0 %v3778_v31  ;;  %v5354_v31 = vsel %vm2942_vm8, %v13120_v62, %v5283_v41 }
 0x7b9   : > { %3782 = vadd.xlane.f32.xlu1 %v3781_v20  ;;  %v5357_v20 = vsel %vm3498_vm11, %v5355_v45, %v5293_v24  ;;  %v5356_v39 = vsel %vm3498_vm11, %v5354_v31, %v5291_v1  ;;  %v5337_v1 = vsel %vm2942_vm8, %v12996_v53, %v13347_v10 }
 0x7bb   : > { %v5301_v46 = vpop.permute.xlu1 %5300  ;;  %v5299_v15 = vpop.permute.xlu0 %5298 }
 0x7bc   : > { %3785 = vadd.xlane.f32.xlu0 %v3784_v33  ;;  %v5359_v19 = vsel %vm5340_vm5, %v5357_v20, %v5301_v46  ;;  %v5358_v22 = vsel %vm5340_vm5, %v5356_v39, %v5299_v15 }
 0x7bf   : > { %v5309_v26 = vpop.permute.xlu1 %5308  ;;  %v5307_v23 = vpop.permute.xlu0 %5306 }
 0x7c0   : > { %5214 = vadd.xlane.f32.xlu0 %v13207_v17  ;;  %v5336_v17 = vsel %vm2942_vm8, %v13000_v52, %v13367_v56  ;;  %v5361_v61 = vsel %vm740_vm1, %v5359_v19, %v5309_v26  ;;  %v5360_v62 = vsel %vm740_vm1, %v5358_v22, %v5307_v23  ;;  %v5339_v52 = vsel %vm3498_vm11, %v5337_v1, %v13396_v5 }
 0x7c1   : > { %v5338_v46 = vsel %vm3498_vm11, %v5336_v17, %v13387_v25  ;;  %v5342_v56 = vsel %vm5340_vm5, %v5339_v52, %v13424_v40 }
 0x7c2   : > { %v5344_v5 = vsel %vm740_vm1, %v5342_v56, %v13456_v58 }
 0x7c3   : > { %v5317_v12 = vpop.permute.xlu1 %5316  ;;  %v5315_v34 = vpop.permute.xlu0 %5314 }
 0x7c4   : > { %v5363_v41 = vsel %vm5345_vm9, %v5361_v61, %v5317_v12  ;;  %v5362_v4 = vsel %vm5345_vm9, %v5360_v62, %v5315_v34  ;;  %v5341_v34 = vsel %vm5340_vm5, %v5338_v46, %v13418_v60  ;;  %v5347_v60 = vsel %vm5345_vm9, %v5344_v5, %v13482_v13 }
 0x7c5   : > { %v5343_v25 = vsel %vm740_vm1, %v5341_v34, %v13449_v47  ;;  %v5350_v24 = vsel %vm5348_vm12, %v5347_v60, %v13495_v50  ;;  %v10484_v34 = vld [vmem:[%s14579_s11 + $0x280] sm:$0xff]  }
 0x7c6   : > { %v5346_v45 = vsel %vm5345_vm9, %v5343_v25, %v13476_v0  ;;  %v10183_v0 = vld [vmem:[%s14577_s9 + $0x208] ss:$16 sps:$4 sm:$0xff]  }
 0x7c7   : > { %v5325_v8 = vpop.permute.xlu1 %5324  ;;  %v5323_v33 = vpop.permute.xlu0 %5322  ;;  %v5349_v40 = vsel %vm5348_vm12, %v5346_v45, %v13493_v29  ;;  %v10188_v29 = vld [vmem:[%s14577_s9 + $0x22c] ss:$16 sps:$4 sm:$0xff]  }
 0x7c8   : > { %v5365_v22 = vsel %vm5348_vm12, %v5363_v41, %v5325_v8  ;;  %v5364_v53 = vsel %vm5348_vm12, %v5362_v4, %v5323_v33  ;;  %v10186_v33 = vld [vmem:[%s14577_s9 + $0x228] ss:$16 sps:$4 sm:$0xff]   ;;  %v10191_v41 = vld [vmem:[%s14577_s9 + $0x24c] ss:$16 sps:$4 sm:$0xff]  }
 0x7c9   : > { %v10477_v25 = vld [vmem:[%s14579_s11 + $0x58] sm:$0xff]  }
 0x7cb   : > { %v5333_v26 = vpop.permute.xlu1 %5332  ;;  %v5331_v10 = vpop.permute.xlu0 %5330 }
 0x7cc   : > { %v5367_v19 = vsel %vm5351_vm10, %v5365_v22, %v5333_v26  ;;  %v5366_v12 = vsel %vm5351_vm10, %v5364_v53, %v5331_v10  ;;  %v5402_v53 = vld [vmem:[#allocation2 + $0x20] sm:$0x11]  ;;  %v10189_v10 = vld [vmem:[%s14577_s9 + $0x248] ss:$16 sps:$4 sm:$0xff]  }
 0x7cd   : > { %8083 = vst [vmem:[%s547_s29 + $0x18] sm:$0xff] %v5367_v19  ;;  %8081 = vst [vmem:[%s547_s29 + $0x8] sm:$0xff] %v5366_v12  ;;  %v5369_v39 = vpack.c.bf16 %v5367_v19, %v5366_v12  ;;  %v5398_v26 = vld [vmem:[#allocation2] sm:$0xff] }
 0x7cf   : > { %v5277_v8 = vpop.permute.xlu1 %5276  ;;  %5890 = vmatprep.mubr.bf16.mxu1 %v5369_v39  ;;  %v5275_v47 = vpop.permute.xlu0 %5274 }
 0x7d0   : > { %v5353_v58 = vsel %vm5351_vm10, %v5350_v24, %v5277_v8  ;;  %v5352_v15 = vsel %vm5351_vm10, %v5349_v40, %v5275_v47  ;;  %v10192_v40 = vld [vmem:[%s14577_s9 + $0x268] ss:$16 sps:$4 sm:$0xff]   ;;  %v10197_v24 = vld [vmem:[%s14577_s9 + $0x28c] ss:$16 sps:$4 sm:$0xff]  }
 0x7d1   : > { %v9366_v23 = vpack.c.bf16 %v5367_v19, %v5353_v58  ;;  %8082 = vst [vmem:[%s547_s29 + $0x10] sm:$0xff] %v5353_v58  ;;  %v13574_v13 = vpack.c.bf16 %v5353_v58, %v5352_v15  ;;  %v9365_v31 = vpack.c.bf16 %v5366_v12, %v5352_v15  ;;  %8080 = vst [vmem:[%s547_s29] sm:$0xff] %v5352_v15  ;;  %v10195_v8 = vld [vmem:[%s14577_s9 + $0x288] ss:$16 sps:$4 sm:$0xff]   ;;  %v10200_v47 = vld [vmem:[%s14577_s9 + $0x2ac] ss:$16 sps:$4 sm:$0xff]  }
 0x7d2   : > { %v10198_v58 = vld [vmem:[%s14577_s9 + $0x2a8] ss:$16 sps:$4 sm:$0xff]   ;;  %v10203_v15 = vld [vmem:[%s14577_s9 + $0x2cc] ss:$16 sps:$4 sm:$0xff]  }
 0x7d3   : > { %v5387_v50 = vshrl.u32 %v9366_v23, 16  ;;  %v5379_v20 = vshrl.u32 %v9365_v31, 16  ;;  %5891 = vmatmul.mubr.bf16.vlgmr.msra.gmra.mrb[68].mxu1 %v13574_v13  ;;  %v5390_v61 = vshll.u32 %v9366_v23, 16  ;;  %v5382_v1 = vshll.u32 %v9365_v31, 16  ;;  %v10206_v23 = vld [vmem:[%s14577_s9 + $0x2ec] ss:$16 sps:$4 sm:$0xff]  }
 0x7d4   : > { %5902 = vmatpush1.bf16.msra.mxu1 %v10183_v0  ;;  %5933 = vmatprep.mubr.bf16.mxu1 %v5369_v39  ;;  %v10194_v39 = vld [vmem:[%s14577_s9 + $0x26c] ss:$16 sps:$4 sm:$0xff]   ;;  %v10201_v0 = vld [vmem:[%s14577_s9 + $0x2c8] ss:$16 sps:$4 sm:$0xff]  }
 0x7d5   : > { %v5389_v17 = vrot.slane %v5387_v50, 7  ;;  %v5381_v62 = vrot.slane %v5379_v20, 7  ;;  %5903 = vmatprep.subr.bf16.mxu1 %v10188_v29  ;;  %v10204_v31 = vld [vmem:[%s14577_s9 + $0x2e8] ss:$16 sps:$4 sm:$0xff]   ;;  %v10209_v29 = vld [vmem:[%s14577_s9 + $0x30c] ss:$16 sps:$4 sm:$0xff]  }
 0x7d6   : > { %v10207_v50 = vld [vmem:[%s14577_s9 + $0x308] ss:$16 sps:$4 sm:$0xff]   ;;  %v10212_v20 = vld [vmem:[%s14577_s9 + $0x32c] ss:$16 sps:$4 sm:$0xff]  }
 0x7d7   : > { %v5392_v4 = vor.u32 %v5390_v61, %v5389_v17  ;;  %v5394_v46 = vrot.slane %v5389_v17, 4  ;;  %v5384_v52 = vor.u32 %v5382_v1, %v5381_v62  ;;  %v5385_v22 = vrot.slane %v5381_v62, 4  ;;  %v10215_v17 = vld [vmem:[%s14577_s9 + $0x34c] ss:$16 sps:$4 sm:$0xff]   ;;  %v10213_v61 = vld [vmem:[%s14577_s9 + $0x348] ss:$16 sps:$4 sm:$0xff]  }
 0x7d8   : > { %5904 = vmatpush1.bf16.msra.mxu1 %v10186_v33  ;;  %v10210_v33 = vld [vmem:[%s14577_s9 + $0x328] ss:$16 sps:$4 sm:$0xff]   ;;  %v10218_v62 = vld [vmem:[%s14577_s9 + $0x36c] ss:$16 sps:$4 sm:$0xff]  }
 0x7d9   : > { %v5403_v56 = vsel %vm10872_vm7, %v5394_v46, %v5402_v53  ;;  %v13593_v12 = vsel %vm10913_vm14, %v5385_v22, %v5392_v4  ;;  %v5399_v5 = vsel %vm11192_vm6, %v5384_v52, %v5398_v26  ;;  %5905 = vmatprep.subr.bf16.mxu1 %v10191_v41  ;;  %v10216_v1 = vld [vmem:[%s14577_s9 + $0x368] ss:$16 sps:$4 sm:$0xff]   ;;  %v10221_v41 = vld [vmem:[%s14577_s9 + $0x38c] ss:$16 sps:$4 sm:$0xff]  }
 0x7da   : > { %5404 = vst [vmem:[#allocation2 + $0x20] sm:$0x11] %v5403_v56  ;;  %5400 = vst [vmem:[#allocation2] sm:$0xff] %v5399_v5  ;;  %v13601_v45 = vcombine.high %v5399_v5, %v13593_v12  ;;  %v13604_v60 = vcombine.low %v5399_v5, %v13593_v12  ;;  %v10219_v4 = vld [vmem:[%s14577_s9 + $0x388] ss:$16 sps:$4 sm:$0xff]  }
 0x7db   : > { %v10224_v46 = vld [vmem:[%s14577_s9 + $0x3ac] ss:$16 sps:$4 sm:$0xff]   ;;  %v10222_v52 = vld [vmem:[%s14577_s9 + $0x3a8] ss:$16 sps:$4 sm:$0xff]  }
 0x7dc   : > { %5906 = vmatpush1.bf16.msra.mxu1 %v10189_v10  ;;  %v10227_v22 = vld [vmem:[%s14577_s9 + $0x3cc] ss:$16 sps:$4 sm:$0xff]   ;;  %v10225_v53 = vld [vmem:[%s14577_s9 + $0x3c8] ss:$16 sps:$4 sm:$0xff]  }
 0x7dd   : > { %5907 = vmatprep.subr.bf16.mxu1 %v10194_v39  ;;  %v10230_v10 = vld [vmem:[%s14577_s9 + $0x3ec] ss:$16 sps:$4 sm:$0xff]   ;;  %v10228_v56 = vld [vmem:[%s14577_s9 + $0x3e8] ss:$16 sps:$4 sm:$0xff]   ;;  %v10233_v39 = vld [vmem:[%s14577_s9 + $0x4] ss:$16 sps:$4 sm:$0xff]  }
 0x7e0   : > { %5908 = vmatpush1.bf16.msra.mxu1 %v10192_v40 }
 0x7e1   : > { %5909 = vmatprep.subr.bf16.mxu1 %v10197_v24  ;;  %v10231_v24 = vld [vmem:[%s14577_s9] ss:$16 sps:$4 sm:$0xff]  }
 0x7e4   : > { %5910 = vmatpush1.bf16.msra.mxu1 %v10195_v8 }
 0x7e5   : > { %5911 = vmatprep.subr.bf16.mxu1 %v10200_v47  ;;  %v10236_v47 = vld [vmem:[%s14577_s9 + $0x24] ss:$16 sps:$4 sm:$0xff]  }
 0x7e8   : > { %5912 = vmatpush1.bf16.msra.mxu1 %v10198_v58 }
 0x7e9   : > { %5913 = vmatprep.subr.bf16.mxu1 %v10203_v15  ;;  %v10234_v15 = vld [vmem:[%s14577_s9 + $0x20] ss:$16 sps:$4 sm:$0xff]  }
 0x7ec   : > { %5914 = vmatpush1.bf16.msra.mxu1 %v10201_v0 }
 0x7ed   : > { %5915 = vmatprep.subr.bf16.mxu1 %v10206_v23 }
 0x7f0   : > { %5916 = vmatpush1.bf16.msra.mxu1 %v10204_v31  ;;  %v10239_v31 = vld [vmem:[%s14577_s9 + $0x44] ss:$16 sps:$4 sm:$0xff]  }
 0x7f1   : > { %5917 = vmatprep.subr.bf16.mxu1 %v10209_v29 }
 0x7f4   : > { %5918 = vmatpush1.bf16.msra.mxu1 %v10207_v50 }
 0x7f5   : > { %5919 = vmatprep.subr.bf16.mxu1 %v10212_v20 }
 0x7f8   : > { %5920 = vmatpush1.bf16.msra.mxu1 %v10210_v33  ;;  %v10237_v33 = vld [vmem:[%s14577_s9 + $0x40] ss:$16 sps:$4 sm:$0xff]  }
 0x7f9   : > { %5921 = vmatprep.subr.bf16.mxu1 %v10215_v17 }
 0x7fc   : > { %5922 = vmatpush1.bf16.msra.mxu1 %v10213_v61 }
 0x7fd   : > { %5923 = vmatprep.subr.bf16.mxu1 %v10218_v62 }
 0x800   : > { %5924 = vmatpush1.bf16.msra.mxu1 %v10216_v1  ;;  %v10242_v1 = vld [vmem:[%s14577_s9 + $0x64] ss:$16 sps:$4 sm:$0xff]  }
 0x801   : > { %5925 = vmatprep.subr.bf16.mxu1 %v10221_v41 }
 0x804   : > { %5926 = vmatpush1.bf16.msra.mxu1 %v10219_v4 }
 0x805   : > { %5927 = vmatprep.subr.bf16.mxu1 %v10224_v46 }
 0x808   : > { %5928 = vmatpush1.bf16.msra.mxu1 %v10222_v52 }
 0x809   : > { %v3693_v26 = vpop.xlane.xlu0 %3692  ;;  %5929 = vmatprep.subr.bf16.mxu1 %v10227_v22 }
 0x80a   : > { %10589 = vlog2.f32 %v3693_v26 }
 0x80b   : > { %10591 = vrcp.f32 %v3693_v26 }
 0x80c   : > { %5930 = vmatpush1.bf16.msra.mxu1 %v10225_v53 }
 0x80d   : > { %v3699_v5 = vpop.xlane.xlu0 %3698  ;;  %5931 = vmatprep.subr.bf16.mxu1 %v10230_v10 }
 0x80e   : > { %10593 = vrcp.f32 %v3699_v5  ;;  %v3696_v40 = vpop.xlane.xlu1 %3695 }
 0x80f   : > { %10595 = vlog2.f32 %v3699_v5 }
 0x810   : > { %10597 = vrcp.f32 %v3696_v40  ;;  %5932 = vmatpush1.bf16.msra.mxu1 %v10228_v56 }
 0x811   : > { %10599 = vlog2.f32 %v3696_v40  ;;  %v3702_v8 = vpop.xlane.xlu0 %3701  ;;  %6274 = vmatprep.subr.bf16.mxu1 %v10233_v39 }
 0x812   : > { %10601 = vrcp.f32 %v3702_v8  ;;  %v3705_v58 = vpop.xlane.xlu1 %3704 }
 0x813   : > { %10603 = vlog2.f32 %v3702_v8  ;;  %5934 = vmatmul.mubr.bf16.vlgmr.msra.gmra.mrb[72].mxu1 %v13574_v13 }
 0x814   : > { %10605 = vrcp.f32 %v3705_v58  ;;  %6275 = vmatpush1.bf16.msra.mxu1 %v10231_v24  ;;  %6306 = vmatprep.mubr.bf16.mxu1 %v13601_v45  ;;  %v10590_v0 = vpop.eup %10589 }
 0x815   : > { %10607 = vlog2.f32 %v3705_v58  ;;  %v3708_v23 = vpop.xlane.xlu0 %3707  ;;  %6276 = vmatprep.subr.bf16.mxu1 %v10236_v47  ;;  %v3852_v29 = vmul.f32 0.6931472, %v10590_v0  ;;  %v10592_v13 = vpop.eup %10591 }
 0x816   : > { %10609 = vrcp.f32 %v3708_v23  ;;  %v3711_v50 = vpop.xlane.xlu1 %3710  ;;  %v3819_v22 = vmul.f32 %v10592_v13, %v13252_v54  ;;  %v10245_v54 = vld [vmem:[%s14577_s9 + $0x84] ss:$16 sps:$4 sm:$0xff]  }
 0x817   : > { %10611 = vlog2.f32 %v3708_v23  ;;  %v3915_v61 = vsub.f32 %v13211_v57, %v3852_v29  ;;  %v10240_v57 = vld [vmem:[%s14577_s9 + $0x60] ss:$16 sps:$4 sm:$0xff]  }
 0x818   : > { %v10594_v20 = vpop.eup %10593  ;;  %10613 = vrcp.f32 %v3711_v50  ;;  %6277 = vmatpush1.bf16.msra.mxu1 %v10234_v15 }
 0x819   : > { %v10596_v17 = vpop.eup %10595  ;;  %10615 = vlog2.f32 %v3711_v50  ;;  %v3714_v62 = vpop.xlane.xlu0 %3713  ;;  %6278 = vmatprep.subr.bf16.mxu1 %v10239_v31  ;;  %v4983_v5 = vmul.f32 %v3915_v61, %v3819_v22  ;;  %v3821_v39 = vmul.f32 %v10594_v20, %v13266_v9 }
 0x81a   : > { %v10598_v41 = vpop.eup %10597  ;;  %v3856_v4 = vmul.f32 0.6931472, %v10596_v17  ;;  %10617 = vrcp.f32 %v3714_v62  ;;  %v3717_v46 = vpop.xlane.xlu1 %3716 }
 0x81b   : > { %v10600_v52 = vpop.eup %10599  ;;  %10619 = vlog2.f32 %v3714_v62 }
 0x81c   : > { %v10602_v53 = vpop.eup %10601  ;;  %v3917_v26 = vsub.f32 %v13216_v6, %v3856_v4  ;;  %v3854_v10 = vmul.f32 0.6931472, %v10600_v52  ;;  %10621 = vrcp.f32 %v3717_v46  ;;  %6279 = vmatpush1.bf16.msra.mxu1 %v10237_v33  ;;  %v3820_v6 = vmul.f32 %v10598_v41, %v13268_v48  ;;  %v10243_v48 = vld [vmem:[%s14577_s9 + $0x80] ss:$16 sps:$4 sm:$0xff]  }
 0x81d   : > { %v10604_v56 = vpop.eup %10603  ;;  %10623 = vlog2.f32 %v3717_v46  ;;  %v3720_v40 = vpop.xlane.xlu0 %3719  ;;  %6280 = vmatprep.subr.bf16.mxu1 %v10242_v1  ;;  %v3822_v31 = vmul.f32 %v10602_v53, %v13282_v59  ;;  %v10248_v59 = vld [vmem:[%s14577_s9 + $0xa4] ss:$16 sps:$4 sm:$0xff]  }
 0x81e   : > { %v10606_v24 = vpop.eup %10605  ;;  %v3916_v8 = vsub.f32 %v13220_v55, %v3854_v10  ;;  %v3858_v47 = vmul.f32 0.6931472, %v10604_v56  ;;  %10625 = vrcp.f32 %v3720_v40  ;;  %v3723_v58 = vpop.xlane.xlu1 %3722  ;;  %v4985_v0 = vmul.f32 %v3917_v26, %v3821_v39 }
 0x81f   : > { %v10608_v15 = vpop.eup %10607  ;;  %10627 = vlog2.f32 %v3720_v40  ;;  %v5015_v55 = vsel %vm3498_vm11, %v4983_v5, 0.0  ;;  %v3823_v20 = vmul.f32 %v10606_v24, %v13286_v38 }
 0x820   : > { %v10610_v23 = vpop.eup %10609  ;;  %v4984_v9 = vmul.f32 %v3916_v8, %v3820_v6  ;;  %v3918_v29 = vsub.f32 %v13224_v36, %v3858_v47  ;;  %v3860_v50 = vmul.f32 0.6931472, %v10608_v15  ;;  %6281 = vmatpush1.bf16.msra.mxu1 %v10240_v57  ;;  %10629 = vrcp.f32 %v3723_v58 }
 0x821   : > { %v10612_v13 = vpop.eup %10611  ;;  %v3726_v33 = vpop.xlane.xlu0 %3725  ;;  %6282 = vmatprep.subr.bf16.mxu1 %v10245_v54  ;;  %v5018_v46 = vsel %vm3498_vm11, %v4985_v0, 0.0  ;;  %v3824_v38 = vmul.f32 %v10610_v23, %v13300_v27  ;;  %10631 = vlog2.f32 %v3723_v58  ;;  %v10251_v27 = vld [vmem:[%s14577_s9 + $0xc4] ss:$16 sps:$4 sm:$0xff]  }
 0x822   : > { %v10614_v17 = vpop.eup %10613  ;;  %v5016_v36 = vsel %vm3498_vm11, %v4984_v9, 0.0  ;;  %v4986_v61 = vmul.f32 %v3918_v29, %v3822_v31  ;;  %v3919_v62 = vsub.f32 %v13230_v42, %v3860_v50  ;;  %v3862_v1 = vmul.f32 0.6931472, %v10612_v13  ;;  %v3729_v41 = vpop.xlane.xlu1 %3728  ;;  %v10246_v42 = vld [vmem:[%s14577_s9 + $0xa0] ss:$16 sps:$4 sm:$0xff]  }
 0x823   : > { %v10616_v4 = vpop.eup %10615  ;;  %v5017_v52 = vadd.f32 %v5016_v36, %v5015_v55  ;;  %v3825_v39 = vmul.f32 %v10614_v17, %v13304_v21  ;;  %10633 = vrcp.f32 %v3726_v33 }
 0x824   : > { %v10618_v22 = vpop.eup %10617  ;;  %v5020_v53 = vsel %vm3498_vm11, %v4986_v61, 0.0  ;;  %v4987_v26 = vmul.f32 %v3919_v62, %v3823_v20  ;;  %v3920_v10 = vsub.f32 %v13235_v51, %v3862_v1  ;;  %v3864_v57 = vmul.f32 0.6931472, %v10616_v4  ;;  %6283 = vmatpush1.bf16.msra.mxu1 %v10243_v48 }
 0x825   : > { %v10620_v56 = vpop.eup %10619  ;;  %v5019_v5 = vadd.f32 %v5018_v46, %v5017_v52  ;;  %v3732_v40 = vpop.xlane.xlu0 %3731  ;;  %6284 = vmatprep.subr.bf16.mxu1 %v10248_v59  ;;  %v3826_v0 = vmul.f32 %v10618_v22, %v13318_v43  ;;  %10635 = vlog2.f32 %v3726_v33  ;;  %v10254_v43 = vld [vmem:[%s14577_s9 + $0xe4] ss:$16 sps:$4 sm:$0xff]  }
 0x826   : > { %v10622_v54 = vpop.eup %10621  ;;  %v4988_v24 = vmul.f32 %v3920_v10, %v3824_v38  ;;  %v3921_v51 = vsub.f32 %v13240_v49, %v3864_v57  ;;  %v3866_v6 = vmul.f32 0.6931472, %v10620_v56  ;;  %v3735_v8 = vpop.xlane.xlu1 %3734  ;;  %v5022_v15 = vsel %vm3498_vm11, %v4987_v26, 0.0  ;;  %v10249_v49 = vld [vmem:[%s14577_s9 + $0xc0] ss:$16 sps:$4 sm:$0xff]  }
 0x827   : > { %v10624_v47 = vpop.eup %10623  ;;  %v5021_v58 = vadd.f32 %v5020_v53, %v5019_v5  ;;  %v3827_v13 = vmul.f32 %v10622_v54, %v13322_v28  ;;  %10637 = vrcp.f32 %v3729_v41  ;;  %v10255_v5 = vld [vmem:[%s14577_s9 + $0x100] ss:$16 sps:$4 sm:$0xff]  }
 0x828   : > { %v10626_v21 = vpop.eup %10625  ;;  %v5024_v23 = vsel %vm3498_vm11, %v4988_v24, 0.0  ;;  %v4989_v9 = vmul.f32 %v3921_v51, %v3825_v39  ;;  %v3922_v31 = vsub.f32 %v13245_v11, %v3866_v6  ;;  %v3868_v29 = vmul.f32 0.6931472, %v10624_v47  ;;  %6285 = vmatpush1.bf16.msra.mxu1 %v10246_v42 }
 0x829   : > { %v10628_v50 = vpop.eup %10627  ;;  %v5023_v48 = vadd.f32 %v5022_v15, %v5021_v58  ;;  %v3738_v55 = vpop.xlane.xlu0 %3737  ;;  %6286 = vmatprep.subr.bf16.mxu1 %v10251_v27  ;;  %v3828_v61 = vmul.f32 %v10626_v21, %v13336_v32  ;;  %10639 = vlog2.f32 %v3729_v41  ;;  %v10257_v32 = vld [vmem:[%s14577_s9 + $0x104] ss:$16 sps:$4 sm:$0xff]   ;;  %v10258_v58 = vld [vmem:[%s14577_s9 + $0x120] ss:$16 sps:$4 sm:$0xff]  }
 0x82a   : > { %v4990_v20 = vmul.f32 %v3922_v31, %v3826_v0  ;;  %v3923_v33 = vsub.f32 %v13250_v14, %v3868_v29  ;;  %v3870_v11 = vmul.f32 0.6931472, %v10628_v50  ;;  %v3741_v59 = vpop.xlane.xlu1 %3740  ;;  %v10630_v17 = vpop.eup %10629  ;;  %v5026_v62 = vsel %vm3498_vm11, %v4989_v9, 0.0  ;;  %v10252_v14 = vld [vmem:[%s14577_s9 + $0xe0] ss:$16 sps:$4 sm:$0xff]  }
 0x82b   : > { %v5025_v36 = vadd.f32 %v5024_v23, %v5023_v48  ;;  %v10632_v46 = vpop.eup %10631  ;;  %10641 = vrcp.f32 %v3732_v40  ;;  %v10263_v23 = vld [vmem:[%s14577_s9 + $0x144] ss:$16 sps:$4 sm:$0xff]  }
 0x82c   : > { %v5028_v28 = vsel %vm3498_vm11, %v4990_v20, 0.0  ;;  %v4991_v1 = vmul.f32 %v3923_v33, %v3827_v13  ;;  %v3924_v4 = vsub.f32 %v13257_v3, %v3870_v11  ;;  %6287 = vmatpush1.bf16.msra.mxu1 %v10249_v49  ;;  %v3872_v22 = vmul.f32 0.6931472, %v10632_v46  ;;  %v10261_v13 = vld [vmem:[%s14577_s9 + $0x140] ss:$16 sps:$4 sm:$0xff]  }
 0x82d   : > { %v5027_v52 = vadd.f32 %v5026_v62, %v5025_v36  ;;  %v3744_v38 = vpop.xlane.xlu0 %3743  ;;  %6288 = vmatprep.subr.bf16.mxu1 %v10254_v43  ;;  %10643 = vlog2.f32 %v3732_v40  ;;  %v3829_v3 = vmul.f32 %v10630_v17, %v13340_v35  ;;  %v10634_v10 = vpop.eup %10633  ;;  %v10260_v35 = vld [vmem:[%s14577_s9 + $0x124] ss:$16 sps:$4 sm:$0xff]  }
 0x82e   : > { %v4992_v41 = vmul.f32 %v3924_v4, %v3828_v61  ;;  %10645 = vrcp.f32 %v3735_v8  ;;  %v3747_v26 = vpop.xlane.xlu1 %3746  ;;  %v5030_v57 = vsel %vm3498_vm11, %v4991_v1, 0.0  ;;  %v3925_v56 = vsub.f32 %v13262_v63, %v3872_v22  ;;  %v10266_v33 = vld [vmem:[%s14577_s9 + $0x164] ss:$16 sps:$4 sm:$0xff]   ;;  %v10264_v4 = vld [vmem:[%s14577_s9 + $0x160] ss:$16 sps:$4 sm:$0xff]  }
 0x82f   : > { %v5029_v53 = vadd.f32 %v5028_v28, %v5027_v52  ;;  %10647 = vlog2.f32 %v3735_v8  ;;  %v10636_v39 = vpop.eup %10635  ;;  %v3830_v8 = vmul.f32 %v10634_v10, %v13356_v7 }
 0x830   : > { %v5032_v42 = vsel %vm3498_vm11, %v4992_v41, 0.0  ;;  %6289 = vmatpush1.bf16.msra.mxu1 %v10252_v14  ;;  %10649 = vrcp.f32 %v3738_v55  ;;  %v4993_v54 = vmul.f32 %v3925_v56, %v3829_v3  ;;  %v3874_v24 = vmul.f32 0.6931472, %v10636_v39  ;;  %v10269_v41 = vld [vmem:[%s14577_s9 + $0x184] ss:$16 sps:$4 sm:$0xff]  }
 0x831   : > { %v5031_v40 = vadd.f32 %v5030_v57, %v5029_v53  ;;  %v3750_v27 = vpop.xlane.xlu0 %3749  ;;  %6290 = vmatprep.subr.bf16.mxu1 %v10257_v32  ;;  %10651 = vlog2.f32 %v3738_v55  ;;  %v10638_v63 = vpop.eup %10637  ;;  %v15029_v57 = vld [vmem:[#allocation102_spill] sm:$0xff] }
 0x832   : > { %10653 = vrcp.f32 %v3741_v59  ;;  %v5034_v6 = vsel %vm3498_vm11, %v4993_v54, 0.0  ;;  %v3926_v47 = vsub.f32 %v13273_v37, %v3874_v24  ;;  %v3753_v21 = vpop.xlane.xlu1 %3752  ;;  %v3831_v50 = vmul.f32 %v10638_v63, %v13360_v18  ;;  %v15031_v63 = vld [vmem:[#allocation106_spill] sm:$0xff] }
 0x833   : > { %v5033_v51 = vadd.f32 %v5032_v42, %v5031_v40  ;;  %10655 = vlog2.f32 %v3741_v59  ;;  %v10640_v15 = vpop.eup %10639  ;;  %v15030_v40 = vld [vmem:[#allocation10_spill] sm:$0xff] }
 0x834   : > { %6291 = vmatpush1.bf16.msra.mxu1 %v10255_v5  ;;  %10657 = vrcp.f32 %v3744_v38  ;;  %v4994_v9 = vmul.f32 %v3926_v47, %v3830_v8  ;;  %v3876_v31 = vmul.f32 0.6931472, %v10640_v15 }
 0x835   : > { %v5035_v0 = vadd.f32 %v5034_v6, %v5033_v51  ;;  %6292 = vmatprep.subr.bf16.mxu1 %v10260_v35  ;;  %10659 = vlog2.f32 %v3744_v38  ;;  %v10642_v7 = vpop.eup %10641  ;;  %v3756_v37 = vpop.xlane.xlu0 %3755  ;;  %v10267_v35 = vld [vmem:[%s14577_s9 + $0x180] ss:$16 sps:$4 sm:$0xff]  }
 0x836   : > { %10661 = vrcp.f32 %v3747_v26  ;;  %v5036_v49 = vsel %vm3498_vm11, %v4994_v9, 0.0  ;;  %v3927_v48 = vsub.f32 %v13278_v16, %v3876_v31  ;;  %v3832_v16 = vmul.f32 %v10642_v7, %v13376_v44  ;;  %v3759_v61 = vpop.xlane.xlu1 %3758  ;;  %v15027_v44 = vld [vmem:[#allocation100_spill] sm:$0xff] }
 0x837   : > { %v10644_v29 = vpop.eup %10643  ;;  %10663 = vlog2.f32 %v3747_v26  ;;  %v5037_v43 = vadd.f32 %v5036_v49, %v5035_v0 }
 0x838   : > { %6293 = vmatpush1.bf16.msra.mxu1 %v10258_v58  ;;  %v10646_v55 = vpop.eup %10645  ;;  %v3878_v20 = vmul.f32 0.6931472, %v10644_v29  ;;  %10665 = vrcp.f32 %v3750_v27  ;;  %v4995_v59 = vmul.f32 %v3927_v48, %v3831_v50  ;;  %v10272_v58 = vld [vmem:[%s14577_s9 + $0x1a4] ss:$16 sps:$4 sm:$0xff]  }
 0x839   : > { %6294 = vmatprep.subr.bf16.mxu1 %v10263_v23  ;;  %v10648_v11 = vpop.eup %10647  ;;  %10667 = vlog2.f32 %v3750_v27  ;;  %v3833_v1 = vmul.f32 %v10646_v55, %v13380_v30  ;;  %v3762_v32 = vpop.xlane.xlu0 %3761  ;;  %v15028_v30 = vld [vmem:[#allocation12_spill] sm:$0xff]  ;;  %v15034_v55 = vld [vmem:[#allocation17_spill] sm:$0xff] }
 0x83a   : > { %v10650_v18 = vpop.eup %10649  ;;  %v3928_v17 = vsub.f32 %v13291_v2, %v3878_v20  ;;  %v3880_v36 = vmul.f32 0.6931472, %v10648_v11  ;;  %10669 = vrcp.f32 %v3753_v21  ;;  %v5038_v28 = vsel %vm3498_vm11, %v4995_v59, 0.0  ;;  %v3765_v47 = vpop.xlane.xlu1 %3764  ;;  %v10270_v20 = vld [vmem:[%s14577_s9 + $0x1a0] ss:$16 sps:$4 sm:$0xff]  }
 0x83b   : > { %v10652_v62 = vpop.eup %10651  ;;  %10671 = vlog2.f32 %v3753_v21  ;;  %v5039_v46 = vadd.f32 %v5038_v28, %v5037_v43  ;;  %v3834_v53 = vmul.f32 %v10650_v18, %v15028_v30  ;;  %v15032_v21 = vld [vmem:[#allocation16_spill] sm:$0xff] }
 0x83c   : > { %6295 = vmatpush1.bf16.msra.mxu1 %v10261_v13  ;;  %v10654_v14 = vpop.eup %10653  ;;  %v4996_v52 = vmul.f32 %v3928_v17, %v3832_v16  ;;  %v3929_v38 = vsub.f32 %v15027_v44, %v3880_v36  ;;  %v3882_v2 = vmul.f32 0.6931472, %v10652_v62  ;;  %10673 = vrcp.f32 %v3756_v37  ;;  %v15035_v18 = vld [vmem:[#allocation108_spill] sm:$0xff] }
 0x83d   : > { %6296 = vmatprep.subr.bf16.mxu1 %v10266_v33  ;;  %v10656_v22 = vpop.eup %10655  ;;  %v3835_v27 = vmul.f32 %v10654_v14, %v15030_v40  ;;  %10675 = vlog2.f32 %v3756_v37  ;;  %v15033_v37 = vld [vmem:[#allocation104_spill] sm:$0xff]  ;;  %v3768_v50 = vpop.xlane.xlu0 %3767 }
 0x83e   : > { %v10658_v3 = vpop.eup %10657  ;;  %v5040_v26 = vsel %vm3498_vm11, %v4996_v52, 0.0  ;;  %v4997_v10 = vmul.f32 %v3929_v38, %v3833_v1  ;;  %v3930_v42 = vsub.f32 %v15029_v57, %v3882_v2  ;;  %v3884_v56 = vmul.f32 0.6931472, %v10656_v22  ;;  %v10275_v36 = vld [vmem:[%s14577_s9 + $0x1c4] ss:$16 sps:$4 sm:$0xff]   ;;  %v3771_v38 = vpop.xlane.xlu1 %3770 }
 0x83f   : > { %v10660_v5 = vpop.eup %10659  ;;  %v5041_v39 = vadd.f32 %v5040_v26, %v5039_v46  ;;  %v3836_v23 = vmul.f32 %v10658_v3, %v15032_v21  ;;  %10677 = vrcp.f32 %v3759_v61  ;;  %v15037_v46 = vld [vmem:[#allocation109_spill] sm:$0xff]  ;;  %v10273_v22 = vld [vmem:[%s14577_s9 + $0x1c0] ss:$16 sps:$4 sm:$0xff]  }
 0x840   : > { %6297 = vmatpush1.bf16.msra.mxu1 %v10264_v4  ;;  %v10662_v54 = vpop.eup %10661  ;;  %v5042_v24 = vsel %vm3498_vm11, %v4997_v10, 0.0  ;;  %v4998_v51 = vmul.f32 %v3930_v42, %v3834_v53  ;;  %v3931_v6 = vsub.f32 %v15031_v63, %v3884_v56  ;;  %v3886_v8 = vmul.f32 0.6931472, %v10660_v5  ;;  %v15038_v3 = vld [vmem:[#allocation21_spill] sm:$0xff]  ;;  %v15039_v10 = vld [vmem:[#allocation110_spill] sm:$0xff] }
 0x841   : > { %6298 = vmatprep.subr.bf16.mxu1 %v10269_v41  ;;  %v10664_v15 = vpop.eup %10663  ;;  %v5043_v0 = vadd.f32 %v5042_v24, %v5041_v39  ;;  %v3837_v43 = vmul.f32 %v10662_v54, %v15034_v55  ;;  %10679 = vlog2.f32 %v3759_v61  ;;  %v15036_v61 = vld [vmem:[#allocation20_spill] sm:$0xff]  ;;  %v3774_v42 = vpop.xlane.xlu0 %3773  ;;  %v15040_v63 = vld [vmem:[#allocation25_spill] sm:$0xff] }
 0x842   : > { %v10666_v9 = vpop.eup %10665  ;;  %v5044_v31 = vsel %vm3498_vm11, %v4998_v51, 0.0  ;;  %v4999_v7 = vmul.f32 %v3931_v6, %v3835_v27  ;;  %v3932_v29 = vsub.f32 %v15033_v37, %v3886_v8  ;;  %v3888_v49 = vmul.f32 0.6931472, %v10664_v15  ;;  %v10278_v56 = vld [vmem:[%s14577_s9 + $0x1e4] ss:$16 sps:$4 sm:$0xff]   ;;  %v15041_v8 = vld [vmem:[#allocation111_spill] sm:$0xff]  ;;  %v3777_v15 = vpop.xlane.xlu1 %3776 }
 0x843   : > { %v10668_v48 = vpop.eup %10667  ;;  %v5045_v13 = vadd.f32 %v5044_v31, %v5043_v0  ;;  %v3838_v1 = vmul.f32 %v10666_v9, %v15036_v61  ;;  %10681 = vrcp.f32 %v3762_v32  ;;  %v10276_v24 = vld [vmem:[%s14577_s9 + $0x1e0] ss:$16 sps:$4 sm:$0xff]   ;;  %v10279_v37 = vld [vmem:[%s14577_s9 + $0x8] ss:$16 sps:$4 sm:$0xff]   ;;  %v10284_v55 = vld [vmem:[%s14577_s9 + $0x2c] ss:$16 sps:$4 sm:$0xff]  }
 0x844   : > { %6299 = vmatpush1.bf16.msra.mxu1 %v10267_v35  ;;  %v10670_v33 = vpop.eup %10669  ;;  %v5046_v11 = vsel %vm3498_vm11, %v4999_v7, 0.0  ;;  %v5000_v59 = vmul.f32 %v3932_v29, %v3836_v23  ;;  %v3933_v16 = vsub.f32 %v15035_v18, %v3888_v49  ;;  %v3890_v17 = vmul.f32 0.6931472, %v10668_v48  ;;  %v15042_v49 = vld [vmem:[#allocation24_spill] sm:$0xff]  ;;  %v15043_v48 = vld [vmem:[#allocation66_spill] sm:$0xff]  ;;  %v15045_v61 = vld [vmem:[#allocation13_spill] sm:$0xff] }
 0x845   : > { %6300 = vmatprep.subr.bf16.mxu1 %v10272_v58  ;;  %v10672_v62 = vpop.eup %10671  ;;  %v5047_v28 = vadd.f32 %v5046_v11, %v5045_v13  ;;  %10683 = vlog2.f32 %v3762_v32  ;;  %v3839_v26 = vmul.f32 %v10670_v33, %v15038_v3  ;;  %v3780_v31 = vpop.xlane.xlu0 %3779 }
 0x846   : > { %v5048_v4 = vsel %vm3498_vm11, %v5000_v59, 0.0  ;;  %v5001_v14 = vmul.f32 %v3933_v16, %v3837_v43  ;;  %v3934_v52 = vsub.f32 %v15037_v46, %v3890_v17  ;;  %v3892_v44 = vmul.f32 0.6931472, %v10672_v62  ;;  %v10674_v2 = vpop.eup %10673  ;;  %v3783_v59 = vpop.xlane.xlu1 %3782  ;;  %v10282_v16 = vld [vmem:[%s14577_s9 + $0x28] ss:$16 sps:$4 sm:$0xff]   ;;  %v15044_v62 = vld [vmem:[#allocation26_spill] sm:$0xff] }
 0x847   : > { %v5049_v41 = vadd.f32 %v5048_v4, %v5047_v28  ;;  %v10676_v5 = vpop.eup %10675  ;;  %10685 = vrcp.f32 %v3765_v47  ;;  %v3840_v6 = vmul.f32 %v10674_v2, %v15040_v63 }
 0x848   : > { %6301 = vmatpush1.bf16.msra.mxu1 %v10270_v20  ;;  %v5050_v30 = vsel %vm3498_vm11, %v5001_v14, 0.0  ;;  %v5002_v53 = vmul.f32 %v3934_v52, %v3838_v1  ;;  %v3935_v57 = vsub.f32 %v15039_v10, %v3892_v44  ;;  %v3894_v27 = vmul.f32 0.6931472, %v10676_v5  ;;  %v10287_v14 = vld [vmem:[%s14577_s9 + $0x4c] ss:$16 sps:$4 sm:$0xff]  }
 0x849   : > { %6302 = vmatprep.subr.bf16.mxu1 %v10275_v36  ;;  %v5051_v32 = vadd.f32 %v5050_v30, %v5049_v41  ;;  %10687 = vlog2.f32 %v3765_v47  ;;  %v10678_v35 = vpop.eup %10677  ;;  %v10281_v47 = vld [vmem:[%s14577_s9 + $0xc] ss:$16 sps:$4 sm:$0xff]   ;;  %v3786_v4 = vpop.xlane.xlu0 %3785 }
 0x84a   : > { %v5052_v39 = vsel %vm3498_vm11, %v5002_v53, 0.0  ;;  %v5003_v40 = vmul.f32 %v3935_v57, %v3839_v26  ;;  %10689 = vrcp.f32 %v3768_v50  ;;  %v3936_v58 = vsub.f32 %v15041_v8, %v3894_v27  ;;  %v15046_v41 = vld [vmem:[#allocation29_spill] sm:$0xff]  ;;  %v15047_v30 = vld [vmem:[#allocation11_spill] sm:$0xff]  ;;  %v15049_v27 = vld [vmem:[#allocation14_spill] sm:$0xff] }
 0x84b   : > { %v5053_v54 = vadd.f32 %v5052_v39, %v5051_v32  ;;  %10691 = vlog2.f32 %v3768_v50  ;;  %v10680_v0 = vpop.eup %10679  ;;  %v3841_v50 = vmul.f32 %v10678_v35, %v15042_v49  ;;  %v10285_v26 = vld [vmem:[%s14577_s9 + $0x48] ss:$16 sps:$4 sm:$0xff]   ;;  %v10290_v5 = vld [vmem:[%s14577_s9 + $0x6c] ss:$16 sps:$4 sm:$0xff]  }
 0x84c   : > { %6303 = vmatpush1.bf16.msra.mxu1 %v10273_v22  ;;  %v5054_v51 = vsel %vm3498_vm11, %v5003_v40, 0.0  ;;  %10693 = vrcp.f32 %v3771_v38  ;;  %v5004_v23 = vmul.f32 %v3936_v58, %v3840_v6  ;;  %v3896_v9 = vmul.f32 0.6931472, %v10680_v0 }
 0x84d   : > { %6304 = vmatprep.subr.bf16.mxu1 %v10278_v56  ;;  %v5055_v21 = vadd.f32 %v5054_v51, %v5053_v54  ;;  %10695 = vlog2.f32 %v3771_v38  ;;  %v10682_v7 = vpop.eup %10681  ;;  %v15050_v51 = vld [vmem:[#allocation31_spill] sm:$0xff] }
 0x84e   : > { %10697 = vrcp.f32 %v3774_v42  ;;  %v5056_v29 = vsel %vm3498_vm11, %v5004_v23, 0.0  ;;  %v3937_v13 = vsub.f32 %v15043_v48, %v3896_v9  ;;  %v3842_v28 = vmul.f32 %v10682_v7, %v15044_v62  ;;  %v15053_v48 = vld [vmem:[#allocation18_spill] sm:$0xff] }
 0x84f   : > { %10699 = vlog2.f32 %v3774_v42  ;;  %v10684_v43 = vpop.eup %10683  ;;  %v5057_v20 = vadd.f32 %v5056_v29, %v5055_v21  ;;  %v15048_v42 = vld [vmem:[#allocation28_spill] sm:$0xff]  ;;  %v10288_v21 = vld [vmem:[%s14577_s9 + $0x68] ss:$16 sps:$4 sm:$0xff]  }
 0x850   : > { %6305 = vmatpush1.bf16.msra.mxu1 %v10276_v24  ;;  %10701 = vrcp.f32 %v3777_v15  ;;  %v5005_v33 = vmul.f32 %v3937_v13, %v3841_v50  ;;  %v3898_v11 = vmul.f32 0.6931472, %v10684_v43 }
 0x851   : > { %6317 = vmatprep.subr.bf16.mxu1 %v10281_v47  ;;  %10703 = vlog2.f32 %v3777_v15  ;;  %v10686_v18 = vpop.eup %10685  ;;  %v15051_v15 = vld [vmem:[#allocation15_spill] sm:$0xff] }
 0x852   : > { %10705 = vrcp.f32 %v3780_v31  ;;  %v5058_v36 = vsel %vm3498_vm11, %v5005_v33, 0.0  ;;  %v3938_v1 = vsub.f32 %v15045_v61, %v3898_v11  ;;  %v3843_v22 = vmul.f32 %v10686_v18, %v15046_v41  ;;  %v15054_v33 = vld [vmem:[#allocation33_spill] sm:$0xff] }
 0x853   : > { %6307 = vmatmul.mubr.bf16.vlgmr.msra.gmra.mrb[68].mxu1 %v13604_v60  ;;  %v10688_v17 = vpop.eup %10687  ;;  %10707 = vlog2.f32 %v3780_v31  ;;  %v15052_v31 = vld [vmem:[#allocation30_spill] sm:$0xff] }
 0x854   : > { %6318 = vmatpush1.bf16.msra.mxu1 %v10279_v37  ;;  %6349 = vmatprep.mubr.bf16.mxu1 %v13601_v45  ;;  %v10690_v46 = vpop.eup %10689  ;;  %v5059_v45 = vadd.f32 %v5058_v36, %v5057_v20  ;;  %v3900_v52 = vmul.f32 0.6931472, %v10688_v17  ;;  %10709 = vrcp.f32 %v3783_v59  ;;  %v5006_v38 = vmul.f32 %v3938_v1, %v3842_v28  ;;  %v10293_v37 = vld [vmem:[%s14577_s9 + $0x8c] ss:$16 sps:$4 sm:$0xff]   ;;  %v10291_v28 = vld [vmem:[%s14577_s9 + $0x88] ss:$16 sps:$4 sm:$0xff]  }
 0x855   : > { %6319 = vmatprep.subr.bf16.mxu1 %v10284_v55  ;;  %v10692_v44 = vpop.eup %10691  ;;  %10711 = vlog2.f32 %v3783_v59  ;;  %v3844_v56 = vmul.f32 %v10690_v46, %v15048_v42  ;;  %v15055_v17 = vld [vmem:[#allocation19_spill] sm:$0xff] }
 0x856   : > { %v10694_v2 = vpop.eup %10693  ;;  %v3939_v53 = vsub.f32 %v15047_v30, %v3900_v52  ;;  %v3902_v3 = vmul.f32 0.6931472, %v10692_v44  ;;  %10713 = vrcp.f32 %v3786_v4  ;;  %v5060_v57 = vsel %vm3498_vm11, %v5006_v38, 0.0  ;;  %v10296_v46 = vld [vmem:[%s14577_s9 + $0xac] ss:$16 sps:$4 sm:$0xff]   ;;  %v15057_v38 = vld [vmem:[#allocation22_spill] sm:$0xff] }
 0x857   : > { %v10696_v10 = vpop.eup %10695  ;;  %10715 = vlog2.f32 %v3786_v4  ;;  %v5061_v39 = vadd.f32 %v5060_v57, %v5059_v45  ;;  %v3845_v63 = vmul.f32 %v10694_v2, %v15050_v51  ;;  %v15056_v4 = vld [vmem:[#allocation32_spill] sm:$0xff]  ;;  %v15059_v57 = vld [vmem:[#allocation23_spill] sm:$0xff] }
 0x858   : > { %6320 = vmatpush1.bf16.msra.mxu1 %v10282_v16  ;;  %v10698_v32 = vpop.eup %10697  ;;  %v5007_v40 = vmul.f32 %v3939_v53, %v3843_v22  ;;  %v3940_v35 = vsub.f32 %v15049_v27, %v3902_v3  ;;  %v3904_v54 = vmul.f32 0.6931472, %v10696_v10  ;;  %v15058_v53 = vld [vmem:[#allocation35_spill] sm:$0xff] }
 0x859   : > { %6321 = vmatprep.subr.bf16.mxu1 %v10287_v14  ;;  %v10700_v24 = vpop.eup %10699  ;;  %v3846_v7 = vmul.f32 %v10698_v32, %v15052_v31  ;;  %v15060_v27 = vld [vmem:[#allocation27_spill] sm:$0xff] }
 0x85a   : > { %v10702_v6 = vpop.eup %10701  ;;  %v5062_v8 = vsel %vm3498_vm11, %v5007_v40, 0.0  ;;  %v5008_v58 = vmul.f32 %v3940_v35, %v3844_v56  ;;  %v3941_v47 = vsub.f32 %v15051_v15, %v3904_v54  ;;  %v3906_v0 = vmul.f32 0.6931472, %v10700_v24  ;;  %v15061_v54 = vld [vmem:[#allocation34_spill] sm:$0xff]  ;;  %v10303_v31 = vld [vmem:[%s14577_s9 + $0x108] ss:$16 sps:$4 sm:$0xff]  }
 0x85b   : > { %v10704_v23 = vpop.eup %10703  ;;  %v5063_v9 = vadd.f32 %v5062_v8, %v5061_v39  ;;  %v3847_v11 = vmul.f32 %v10702_v6, %v15054_v33  ;;  %v10299_v39 = vld [vmem:[%s14577_s9 + $0xcc] ss:$16 sps:$4 sm:$0xff]  }
 0x85c   : > { %6322 = vmatpush1.bf16.msra.mxu1 %v10285_v26  ;;  %v10706_v29 = vpop.eup %10705  ;;  %v5064_v49 = vsel %vm3498_vm11, %v5008_v58, 0.0  ;;  %v5009_v50 = vmul.f32 %v3941_v47, %v3845_v63  ;;  %v3942_v13 = vsub.f32 %v15053_v48, %v3906_v0  ;;  %v3908_v55 = vmul.f32 0.6931472, %v10704_v23  ;;  %v10297_v58 = vld [vmem:[%s14577_s9 + $0xc8] ss:$16 sps:$4 sm:$0xff]  }
 0x85d   : > { %6323 = vmatprep.subr.bf16.mxu1 %v10290_v5  ;;  %v10708_v43 = vpop.eup %10707  ;;  %v5065_v20 = vadd.f32 %v5064_v49, %v5063_v9  ;;  %v3848_v14 = vmul.f32 %v10706_v29, %v15056_v4  ;;  %v10294_v5 = vld [vmem:[%s14577_s9 + $0xa8] ss:$16 sps:$4 sm:$0xff]   ;;  %v10302_v47 = vld [vmem:[%s14577_s9 + $0xec] ss:$16 sps:$4 sm:$0xff]   ;;  %v10327_v4 = vld [vmem:[%s14577_s9 + $0x400] ss:$16 sps:$4 sm:$0xff]  }
 0x85e   : > { %v10710_v59 = vpop.eup %10709  ;;  %v5066_v18 = vsel %vm3498_vm11, %v5009_v50, 0.0  ;;  %v5010_v16 = vmul.f32 %v3942_v13, %v3846_v7  ;;  %v3943_v36 = vsub.f32 %v15055_v17, %v3908_v55  ;;  %v3910_v62 = vmul.f32 0.6931472, %v10708_v43  ;;  %v10300_v23 = vld [vmem:[%s14577_s9 + $0xe8] ss:$16 sps:$4 sm:$0xff]  }
 0x85f   : > { %v10712_v61 = vpop.eup %10711  ;;  %v5067_v1 = vadd.f32 %v5066_v18, %v5065_v20  ;;  %v3849_v3 = vmul.f32 %v10710_v59, %v15058_v53  ;;  %v10305_v9 = vld [vmem:[%s14577_s9 + $0x10c] ss:$16 sps:$4 sm:$0xff]   ;;  %v10309_v49 = vld [vmem:[%s14577_s9 + $0x148] ss:$16 sps:$4 sm:$0xff]   ;;  %v13967_v59 = vld [vmem:[#allocation2] sm:$0xee] }
 0x860   : > { %6324 = vmatpush1.bf16.msra.mxu1 %v10288_v21  ;;  %v10714_v45 = vpop.eup %10713  ;;  %v5068_v52 = vsel %vm3498_vm11, %v5010_v16, 0.0  ;;  %v5011_v44 = vmul.f32 %v3943_v36, %v3847_v11  ;;  %v3944_v2 = vsub.f32 %v15057_v38, %v3910_v62  ;;  %v3912_v41 = vmul.f32 0.6931472, %v10712_v61  ;;  %v10308_v7 = vld [vmem:[%s14577_s9 + $0x12c] ss:$16 sps:$4 sm:$0xff]  }
 0x861   : > { %6325 = vmatprep.subr.bf16.mxu1 %v10293_v37  ;;  %v10716_v22 = vpop.eup %10715  ;;  %v5069_v30 = vadd.f32 %v5068_v52, %v5067_v1  ;;  %v3850_v24 = vmul.f32 %v10714_v45, %v15061_v54  ;;  %v10306_v37 = vld [vmem:[%s14577_s9 + $0x128] ss:$16 sps:$4 sm:$0xff]   ;;  %v10311_v29 = vld [vmem:[%s14577_s9 + $0x14c] ss:$16 sps:$4 sm:$0xff]   ;;  %v13969_v18 = vld [vmem:[#allocation2 + $0x20] sm:$0x11]  ;;  %v9045_v17 = vcombine.high %v13967_v59, %v13593_v12 }
 0x862   : > { %v5070_v26 = vsel %vm3498_vm11, %v5011_v44, 0.0  ;;  %v5012_v10 = vmul.f32 %v3944_v2, %v3848_v14  ;;  %v3945_v42 = vsub.f32 %v15059_v57, %v3912_v41  ;;  %v3914_v56 = vmul.f32 0.6931472, %v10716_v22  ;;  %v10314_v50 = vld [vmem:[%s14577_s9 + $0x16c] ss:$16 sps:$4 sm:$0xff]   ;;  %v10426_v54 = vld [vmem:[%s14579_s11 + $0x100] sm:$0xff]  }
 0x863   : > { %v5071_v32 = vadd.f32 %v5070_v26, %v5069_v30  ;;  %v10312_v48 = vld [vmem:[%s14577_s9 + $0x168] ss:$16 sps:$4 sm:$0xff]   ;;  %v10317_v13 = vld [vmem:[%s14577_s9 + $0x18c] ss:$16 sps:$4 sm:$0xff]   ;;  %v9047_v36 = vcombine.high %v13969_v18, %v13969_v18  ;;  %v6438_v61 = vrot.slane %v9045_v17, 1 }
 0x864   : > { %6326 = vmatpush1.bf16.msra.mxu1 %v10291_v28  ;;  %v5013_v40 = vmul.f32 %v3945_v42, %v3849_v3  ;;  %v3946_v35 = vsub.f32 %v15060_v27, %v3914_v56  ;;  %v5072_v51 = vsel %vm3498_vm11, %v5012_v10, 0.0  ;;  %v10315_v55 = vld [vmem:[%s14577_s9 + $0x188] ss:$16 sps:$4 sm:$0xff]   ;;  %v10320_v43 = vld [vmem:[%s14577_s9 + $0x1ac] ss:$16 sps:$4 sm:$0xff]  }
 0x865   : > { %6327 = vmatprep.subr.bf16.mxu1 %v10296_v46  ;;  %v5073_v63 = vadd.f32 %v5072_v51, %v5071_v32  ;;  %v10318_v20 = vld [vmem:[%s14577_s9 + $0x1a8] ss:$16 sps:$4 sm:$0xff]   ;;  %v10323_v33 = vld [vmem:[%s14577_s9 + $0x1cc] ss:$16 sps:$4 sm:$0xff]   ;;  %v10329_v28 = vld [vmem:[%s14577_s9 + $0x404] ss:$16 sps:$4 sm:$0xff]  }
 0x866   : > { %v5014_v6 = vmul.f32 %v3946_v35, %v3850_v24  ;;  %v5074_v8 = vsel %vm3498_vm11, %v5013_v40, 0.0  ;;  %v10321_v11 = vld [vmem:[%s14577_s9 + $0x1c8] ss:$16 sps:$4 sm:$0xff]   ;;  %v10326_v16 = vld [vmem:[%s14577_s9 + $0x1ec] ss:$16 sps:$4 sm:$0xff]   ;;  %v6439_v1 = vrot.slane %v9047_v36, 1 }
 0x867   : > { %v5075_v15 = vadd.f32 %v5074_v8, %v5073_v63  ;;  %v10324_v62 = vld [vmem:[%s14577_s9 + $0x1e8] ss:$16 sps:$4 sm:$0xff]   ;;  %v10333_v14 = vld [vmem:[%s14577_s9 + $0x424] ss:$16 sps:$4 sm:$0xff]   ;;  %v10331_v45 = vld [vmem:[%s14577_s9 + $0x420] ss:$16 sps:$4 sm:$0xff]  }
 0x868   : > { %6328 = vmatpush1.bf16.msra.mxu1 %v10294_v5  ;;  %v5076_v0 = vsel %vm3498_vm11, %v5014_v6, 0.0  ;;  %v13992_v46 = vsel %vm1027_vm2, %v6438_v61, %v6439_v1  ;;  %v10336_v52 = vld [vmem:[%s14577_s9 + $0x444] ss:$16 sps:$4 sm:$0xff]   ;;  %v10337_v38 = vld [vmem:[%s14577_s9 + $0x460] ss:$16 sps:$4 sm:$0xff]   ;;  %v10427_v24 = vld [vmem:[%s14579_s11 + $0x148] sm:$0xff]  }
 0x869   : > { %6329 = vmatprep.subr.bf16.mxu1 %v10299_v39  ;;  %v5077_v21 = vadd.f32 %v5076_v0, %v5075_v15  ;;  %v10339_v44 = vld [vmem:[%s14577_s9 + $0x464] ss:$16 sps:$4 sm:$0xff]   ;;  %v10340_v41 = vld [vmem:[%s14577_s9 + $0x480] ss:$16 sps:$4 sm:$0xff]   ;;  %v10428_v63 = vld [vmem:[%s14579_s11 + $0x108] sm:$0xff]  }
 0x86a   : > { %v10342_v2 = vld [vmem:[%s14577_s9 + $0x484] ss:$16 sps:$4 sm:$0xff]   ;;  %v10343_v30 = vld [vmem:[%s14577_s9 + $0x4a0] ss:$16 sps:$4 sm:$0xff]   ;;  %v10431_v0 = vld [vmem:[%s14579_s11 + $0x158] sm:$0xff]  }
 0x86b   : > { %5078 = vadd.xlane.f32.xlu1 %v5077_v21  ;;  %v10345_v22 = vld [vmem:[%s14577_s9 + $0x4a4] ss:$16 sps:$4 sm:$0xff]   ;;  %v10346_v3 = vld [vmem:[%s14577_s9 + $0x4c0] ss:$16 sps:$4 sm:$0xff]   ;;  %v10386_v17 = vld [vmem:[%s14577_s9 + $0x468] ss:$16 sps:$4 sm:$0xff]  }
 0x86c   : > { %6330 = vmatpush1.bf16.msra.mxu1 %v10297_v58  ;;  %v10348_v53 = vld [vmem:[%s14577_s9 + $0x4c4] ss:$16 sps:$4 sm:$0xff]   ;;  %v10349_v10 = vld [vmem:[%s14577_s9 + $0x4e0] ss:$16 sps:$4 sm:$0xff]   ;;  %v10391_v36 = vld [vmem:[%s14577_s9 + $0x48c] ss:$16 sps:$4 sm:$0xff]  }
 0x86d   : > { %6331 = vmatprep.subr.bf16.mxu1 %v10302_v47  ;;  %v10351_v26 = vld [vmem:[%s14577_s9 + $0x4e4] ss:$16 sps:$4 sm:$0xff]   ;;  %v10352_v42 = vld [vmem:[%s14577_s9 + $0x500] ss:$16 sps:$4 sm:$0xff]   ;;  %v10392_v61 = vld [vmem:[%s14577_s9 + $0x4a8] ss:$16 sps:$4 sm:$0xff]  }
 0x86e   : > { %v10354_v57 = vld [vmem:[%s14577_s9 + $0x504] ss:$16 sps:$4 sm:$0xff]   ;;  %v10355_v5 = vld [vmem:[%s14577_s9 + $0x520] ss:$16 sps:$4 sm:$0xff]   ;;  %v10397_v1 = vld [vmem:[%s14577_s9 + $0x4cc] ss:$16 sps:$4 sm:$0xff]  }
 0x86f   : > { %v10357_v56 = vld [vmem:[%s14577_s9 + $0x524] ss:$16 sps:$4 sm:$0xff]   ;;  %v10358_v39 = vld [vmem:[%s14577_s9 + $0x540] ss:$16 sps:$4 sm:$0xff]  }
 0x870   : > { %6332 = vmatpush1.bf16.msra.mxu1 %v10300_v23  ;;  %v10360_v32 = vld [vmem:[%s14577_s9 + $0x544] ss:$16 sps:$4 sm:$0xff]   ;;  %v10361_v27 = vld [vmem:[%s14577_s9 + $0x560] ss:$16 sps:$4 sm:$0xff]   ;;  %v10432_v23 = vld [vmem:[%s14579_s11 + $0x118] sm:$0xff]  }
 0x871   : > { %6333 = vmatprep.subr.bf16.mxu1 %v10305_v9  ;;  %v10363_v40 = vld [vmem:[%s14577_s9 + $0x564] ss:$16 sps:$4 sm:$0xff]   ;;  %v10364_v6 = vld [vmem:[%s14577_s9 + $0x580] ss:$16 sps:$4 sm:$0xff]  }
 0x872   : > { %v10425_v35 = vld [vmem:[%s14579_s11 + $0x140] sm:$0xff]   ;;  %v10429_v8 = vld [vmem:[%s14579_s11 + $0x150] sm:$0xff]  }
 0x873   : > { %v10366_v51 = vld [vmem:[%s14577_s9 + $0x584] ss:$16 sps:$4 sm:$0xff]   ;;  %9441 = vmatprep.subr.bf16.mxu0 %v10425_v35  ;;  %v10367_v47 = vld [vmem:[%s14577_s9 + $0x5a0] ss:$16 sps:$4 sm:$0xff]  }
 0x874   : > { %6334 = vmatpush1.bf16.msra.mxu1 %v10303_v31  ;;  %9442 = vmatpush3.bf16.msra.mxu0 %v10426_v54  ;;  %v10369_v58 = vld [vmem:[%s14577_s9 + $0x5a4] ss:$16 sps:$4 sm:$0xff]   ;;  %v10370_v9 = vld [vmem:[%s14577_s9 + $0x5c0] ss:$16 sps:$4 sm:$0xff]  }
 0x875   : > { %6335 = vmatprep.subr.bf16.mxu1 %v10308_v7  ;;  %9443 = vmatprep.subr.bf16.mxu0 %v10427_v24  ;;  %v10430_v15 = vld [vmem:[%s14579_s11 + $0x110] sm:$0xff]   ;;  %v10433_v31 = vld [vmem:[%s14579_s11 + $0x160] sm:$0xff]   ;;  %v10416_v24 = vld [vmem:[%s14577_s9 + $0x5a8] ss:$16 sps:$4 sm:$0xff]  }
 0x876   : > { %v10372_v21 = vld [vmem:[%s14577_s9 + $0x5c4] ss:$16 sps:$4 sm:$0xff]  }
 0x877   : > { %v10375_v7 = vld [vmem:[%s14577_s9 + $0x5e4] ss:$16 sps:$4 sm:$0xff]  }
 0x878   : > { %6336 = vmatpush1.bf16.msra.mxu1 %v10306_v37  ;;  %9444 = vmatpush3.bf16.msra.mxu0 %v10428_v63  ;;  %v9044_v37 = vcombine.low %v13967_v59, %v13593_v12  ;;  %v10379_v12 = vld [vmem:[%s14577_s9 + $0x40c] ss:$16 sps:$4 sm:$0xff]  }
 0x879   : > { %6337 = vmatprep.subr.bf16.mxu1 %v10311_v29  ;;  %9445 = vmatprep.subr.bf16.mxu0 %v10429_v8  ;;  %v9046_v29 = vcombine.low %v13969_v18, %v13969_v18  ;;  %v10385_v59 = vld [vmem:[%s14577_s9 + $0x44c] ss:$16 sps:$4 sm:$0xff]   ;;  %v10383_v18 = vld [vmem:[%s14577_s9 + $0x448] ss:$16 sps:$4 sm:$0xff]  }
 0x87a   : > { %v10421_v63 = vld [vmem:[%s14577_s9 + $0x5cc] ss:$16 sps:$4 sm:$0xff]   ;;  %v10419_v8 = vld [vmem:[%s14577_s9 + $0x5c8] ss:$16 sps:$4 sm:$0xff]  }
 0x87c   : > { %6338 = vmatpush1.bf16.msra.mxu1 %v10309_v49  ;;  %9446 = vmatpush3.bf16.msra.mxu0 %v10430_v15  ;;  %v10434_v49 = vld [vmem:[%s14579_s11 + $0x120] sm:$0xff]   ;;  %v10422_v15 = vld [vmem:[%s14577_s9 + $0x5e8] ss:$16 sps:$4 sm:$0xff]  }
 0x87d   : > { %6339 = vmatprep.subr.bf16.mxu1 %v10314_v50  ;;  %9447 = vmatprep.subr.bf16.mxu0 %v10431_v0  ;;  %v10373_v50 = vld [vmem:[%s14577_s9 + $0x5e0] ss:$16 sps:$4 sm:$0xff]  }
 0x87e   : > { %v10437_v0 = vld [vmem:[%s14579_s11 + $0x170] sm:$0xff]  }
 0x880   : > { %6340 = vmatpush1.bf16.msra.mxu1 %v10312_v48  ;;  %9448 = vmatpush3.bf16.msra.mxu0 %v10432_v23  ;;  %v10435_v48 = vld [vmem:[%s14579_s11 + $0x168] sm:$0xff]   ;;  %v10439_v23 = vld [vmem:[%s14579_s11 + $0x178] sm:$0xff]  }
 0x881   : > { %6341 = vmatprep.subr.bf16.mxu1 %v10317_v13  ;;  %9449 = vmatprep.subr.bf16.mxu0 %v10433_v31  ;;  %v6435_v13 = vrot.slane %v9044_v37, 1  ;;  %v10441_v31 = vld [vmem:[%s14579_s11 + $0x1c0] sm:$0xff]  }
 0x882   : > { %v10452_v37 = vld [vmem:[%s14579_s11 + $0x80] sm:$0xff]  }
 0x884   : > { %6342 = vmatpush1.bf16.msra.mxu1 %v10315_v55  ;;  %v6436_v55 = vrot.slane %v9046_v29, 1  ;;  %9450 = vmatpush3.bf16.msra.mxu0 %v10434_v49  ;;  %v10455_v29 = vld [vmem:[%s14579_s11 + $0xc8] sm:$0xff]  }
 0x885   : > { %6343 = vmatprep.subr.bf16.mxu1 %v10320_v43  ;;  %v10377_v43 = vld [vmem:[%s14577_s9 + $0x408] ss:$16 sps:$4 sm:$0xff]   ;;  %9451 = vmatprep.subr.bf16.mxu0 %v10435_v48  ;;  %v10460_v48 = vld [vmem:[%s14579_s11 + $0x90] sm:$0xff]  }
 0x886   : > { %v10456_v49 = vld [vmem:[%s14579_s11 + $0x88] sm:$0xff]  }
 0x888   : > { %6344 = vmatpush1.bf16.msra.mxu1 %v10318_v20  ;;  %v10382_v20 = vld [vmem:[%s14577_s9 + $0x42c] ss:$16 sps:$4 sm:$0xff]  }
 0x889   : > { %6345 = vmatprep.subr.bf16.mxu1 %v10323_v33  ;;  %v14129_v33 = vsel %vm1027_vm2, %v6435_v13, %v6436_v55  ;;  %v10464_v13 = vld [vmem:[%s14579_s11 + $0x98] sm:$0xff]   ;;  %v10467_v55 = vld [vmem:[%s14579_s11 + $0xe0] sm:$0xff]  }
 0x88c   : > { %6346 = vmatpush1.bf16.msra.mxu1 %v10321_v11  ;;  %v10380_v11 = vld [vmem:[%s14577_s9 + $0x428] ss:$16 sps:$4 sm:$0xff]  }
 0x88d   : > { %6347 = vmatprep.subr.bf16.mxu1 %v10326_v16  ;;  %v10388_v16 = vld [vmem:[%s14577_s9 + $0x46c] ss:$16 sps:$4 sm:$0xff]  }
 0x890   : > { %6348 = vmatpush1.bf16.msra.mxu1 %v10324_v62  ;;  %v10389_v62 = vld [vmem:[%s14577_s9 + $0x488] ss:$16 sps:$4 sm:$0xff]  }
 0x891   : > { %6763 = vmatprep.subr.bf16.mxu1 %v10329_v28  ;;  %v10394_v28 = vld [vmem:[%s14577_s9 + $0x4ac] ss:$16 sps:$4 sm:$0xff]  }
 0x893   : > { %6350 = vmatmul.mubr.bf16.vlgmr.msra.gmra.mrb[72].mxu1 %v13604_v60  ;;  %v10334_v60 = vld [vmem:[%s14577_s9 + $0x440] ss:$16 sps:$4 sm:$0xff]  }
 0x894   : > { %6764 = vmatpush1.bf16.msra.mxu1 %v10327_v4  ;;  %6795 = vmatprep.mubr.bf16.mxu1 %v13992_v46  ;;  %v10395_v4 = vld [vmem:[%s14577_s9 + $0x4c8] ss:$16 sps:$4 sm:$0xff]  }
 0x895   : > { %6765 = vmatprep.subr.bf16.mxu1 %v10333_v14  ;;  %v10400_v14 = vld [vmem:[%s14577_s9 + $0x4ec] ss:$16 sps:$4 sm:$0xff]  }
 0x898   : > { %6766 = vmatpush1.bf16.msra.mxu1 %v10331_v45  ;;  %v10403_v45 = vld [vmem:[%s14577_s9 + $0x50c] ss:$16 sps:$4 sm:$0xff]  }
 0x899   : > { %6767 = vmatprep.subr.bf16.mxu1 %v10336_v52  ;;  %v5215_v52 = vpop.xlane.xlu0 %5214 }
 0x89c   : > { %6768 = vmatpush1.bf16.msra.mxu1 %v10334_v60  ;;  %v10401_v60 = vld [vmem:[%s14577_s9 + $0x508] ss:$16 sps:$4 sm:$0xff]  }
 0x89d   : > { %6769 = vmatprep.subr.bf16.mxu1 %v10339_v44  ;;  %v10406_v44 = vld [vmem:[%s14577_s9 + $0x52c] ss:$16 sps:$4 sm:$0xff]  }
 0x8a0   : > { %6770 = vmatpush1.bf16.msra.mxu1 %v10337_v38  ;;  %v5216_v38 = vrot.slane %v5215_v52, 4 }
 0x8a1   : > { %6771 = vmatprep.subr.bf16.mxu1 %v10342_v2  ;;  %v10404_v2 = vld [vmem:[%s14577_s9 + $0x528] ss:$16 sps:$4 sm:$0xff]  }
 0x8a4   : > { %6772 = vmatpush1.bf16.msra.mxu1 %v10340_v41  ;;  %v10409_v41 = vld [vmem:[%s14577_s9 + $0x54c] ss:$16 sps:$4 sm:$0xff]  }
 0x8a5   : > { %6773 = vmatprep.subr.bf16.mxu1 %v10345_v22  ;;  %v5217_v22 = vadd.f32 %v5216_v38, %v5215_v52 }
 0x8a8   : > { %6774 = vmatpush1.bf16.msra.mxu1 %v10343_v30  ;;  %v10407_v30 = vld [vmem:[%s14577_s9 + $0x548] ss:$16 sps:$4 sm:$0xff]  }
 0x8a9   : > { %6775 = vmatprep.subr.bf16.mxu1 %v10348_v53  ;;  %v10412_v53 = vld [vmem:[%s14577_s9 + $0x56c] ss:$16 sps:$4 sm:$0xff]  }
 0x8ac   : > { %6776 = vmatpush1.bf16.msra.mxu1 %v10346_v3  ;;  %v5218_v3 = vrot.slane %v5217_v22, 2 }
 0x8ad   : > { %6777 = vmatprep.subr.bf16.mxu1 %v10351_v26 }
 0x8b0   : > { %6778 = vmatpush1.bf16.msra.mxu1 %v10349_v10 }
 0x8b1   : > { %6779 = vmatprep.subr.bf16.mxu1 %v10354_v57  ;;  %v10410_v57 = vld [vmem:[%s14577_s9 + $0x568] ss:$16 sps:$4 sm:$0xff]  }
 0x8b4   : > { %6780 = vmatpush1.bf16.msra.mxu1 %v10352_v42 }
 0x8b5   : > { %6781 = vmatprep.subr.bf16.mxu1 %v10357_v56  ;;  %v10415_v56 = vld [vmem:[%s14577_s9 + $0x58c] ss:$16 sps:$4 sm:$0xff]  }
 0x8b8   : > { %6782 = vmatpush1.bf16.msra.mxu1 %v10355_v5  ;;  %v5219_v5 = vadd.f32 %v5218_v3, %v5217_v22 }
 0x8b9   : > { %6783 = vmatprep.subr.bf16.mxu1 %v10360_v32 }
 0x8ba   : > { %v5220_v35 = vrot.slane %v5219_v5, 1 }
 0x8bc   : > { %6784 = vmatpush1.bf16.msra.mxu1 %v10358_v39  ;;  %v10413_v39 = vld [vmem:[%s14577_s9 + $0x588] ss:$16 sps:$4 sm:$0xff]  }
 0x8bd   : > { %6785 = vmatprep.subr.bf16.mxu1 %v10363_v40 }
 0x8c0   : > { %6786 = vmatpush1.bf16.msra.mxu1 %v10361_v27  ;;  %v10418_v27 = vld [vmem:[%s14577_s9 + $0x5ac] ss:$16 sps:$4 sm:$0xff]  }
 0x8c1   : > { %6787 = vmatprep.subr.bf16.mxu1 %v10366_v51 }
 0x8c4   : > { %6788 = vmatpush1.bf16.msra.mxu1 %v10364_v6  ;;  %v5221_v6 = vadd.f32 %v5220_v35, %v5219_v5 }
 0x8c5   : > { %6789 = vmatprep.subr.bf16.mxu1 %v10369_v58  ;;  %v10424_v58 = vld [vmem:[%s14577_s9 + $0x5ec] ss:$16 sps:$4 sm:$0xff]  }
 0x8c8   : > { %6790 = vmatpush1.bf16.msra.mxu1 %v10367_v47  ;;  %v10436_v47 = vld [vmem:[%s14579_s11 + $0x128] sm:$0xff]  }
 0x8c9   : > { %6791 = vmatprep.subr.bf16.mxu1 %v10372_v21  ;;  %9452 = vmatpush3.bf16.msra.mxu0 %v10436_v47  ;;  %v10438_v21 = vld [vmem:[%s14579_s11 + $0x130] sm:$0xff]  }
 0x8ca   : > { %9453 = vmatprep.subr.bf16.mxu0 %v10437_v0 }
 0x8cc   : > { %6792 = vmatpush1.bf16.msra.mxu1 %v10370_v9  ;;  %v10440_v9 = vld [vmem:[%s14579_s11 + $0x138] sm:$0xff]  }
 0x8cd   : > { %6793 = vmatprep.subr.bf16.mxu1 %v10375_v7  ;;  %9454 = vmatpush3.bf16.msra.mxu0 %v10438_v21  ;;  %v10451_v7 = vld [vmem:[%s14579_s11 + $0xc0] sm:$0xff]   ;;  %v10446_v21 = vld [vmem:[%s14579_s11 + $0x190] sm:$0xff]  }
 0x8ce   : > { %9455 = vmatprep.subr.bf16.mxu0 %v10439_v23  ;;  %v10447_v23 = vld [vmem:[%s14579_s11 + $0x1d8] sm:$0xff]  }
 0x8d0   : > { %6794 = vmatpush1.bf16.msra.mxu1 %v10373_v50  ;;  %v10459_v50 = vld [vmem:[%s14579_s11 + $0xd0] sm:$0xff]  }
 0x8d1   : > { %6806 = vmatprep.subr.bf16.mxu1 %v10379_v12  ;;  %9456 = vmatpush3.bf16.msra.mxu0 %v10440_v9  ;;  %v10463_v12 = vld [vmem:[%s14579_s11 + $0xd8] sm:$0xff]  }
 0x8d2   : > { %9463 = vmatprep.subr.bf16.mxu0 %v10441_v31 }
 0x8d3   : > { %6796 = vmatmul.mubr.bf16.vlgmr.msra.gmra.mrb[68].mxu1 %v14129_v33 }
 0x8d4   : > { %6807 = vmatpush1.bf16.msra.mxu1 %v10377_v43  ;;  %6838 = vmatprep.mubr.bf16.mxu1 %v13992_v46  ;;  %v10398_v46 = vld [vmem:[%s14577_s9 + $0x4e8] ss:$16 sps:$4 sm:$0xff]   ;;  %v10468_v43 = vld [vmem:[%s14579_s11 + $0xa0] sm:$0xff]  }
 0x8d5   : > { %6808 = vmatprep.subr.bf16.mxu1 %v10382_v20  ;;  %v10471_v20 = vld [vmem:[%s14579_s11 + $0xe8] sm:$0xff]  }
 0x8d8   : > { %6809 = vmatpush1.bf16.msra.mxu1 %v10380_v11  ;;  %v10475_v11 = vld [vmem:[%s14579_s11 + $0xf0] sm:$0xff]  }
 0x8d9   : > { %6810 = vmatprep.subr.bf16.mxu1 %v10385_v59  ;;  %v10476_v59 = vld [vmem:[%s14579_s11 + $0xb0] sm:$0xff]  }
 0x8dc   : > { %6811 = vmatpush1.bf16.msra.mxu1 %v10383_v18  ;;  %v10479_v18 = vld [vmem:[%s14579_s11 + $0xf8] sm:$0xff]  }
 0x8dd   : > { %6812 = vmatprep.subr.bf16.mxu1 %v10388_v16  ;;  %v10480_v16 = vld [vmem:[%s14579_s11 + $0xb8] sm:$0xff]  }
 0x8e0   : > { %6813 = vmatpush1.bf16.msra.mxu1 %v10386_v17  ;;  %v10483_v17 = vld [vmem:[%s14579_s11 + $0x2c0] sm:$0xff]  }
 0x8e1   : > { %6814 = vmatprep.subr.bf16.mxu1 %v10391_v36  ;;  %v14293_v36 = vld [vmem:[%s14578_s10] sm:$0xf] }
 0x8e4   : > { %6815 = vmatpush1.bf16.msra.mxu1 %v10389_v62  ;;  %v15062_v62 = vld [vmem:[#allocation7_spill] sm:$0xff] }
 0x8e5   : > { %6816 = vmatprep.subr.bf16.mxu1 %v10394_v28  ;;  %v6862_v28 = vrot.slane %v14293_v36, %v15062_v62 }
 0x8e8   : > { %6817 = vmatpush1.bf16.msra.mxu1 %v10392_v61  ;;  %v15063_v61 = vld [vmem:[#allocation8_spill] sm:$0xff] }
 0x8e9   : > { %6818 = vmatprep.subr.bf16.mxu1 %v10397_v1  ;;  %v6866_v1 = vrot.slane %v14293_v36, %v15063_v61 }
 0x8ec   : > { %6819 = vmatpush1.bf16.msra.mxu1 %v10395_v4 }
 0x8ed   : > { %6820 = vmatprep.subr.bf16.mxu1 %v10400_v14 }
 0x8f0   : > { %6821 = vmatpush1.bf16.msra.mxu1 %v10398_v46 }
 0x8f1   : > { %6822 = vmatprep.subr.bf16.mxu1 %v10403_v45 }
 0x8f4   : > { %6823 = vmatpush1.bf16.msra.mxu1 %v10401_v60 }
 0x8f5   : > { %6824 = vmatprep.subr.bf16.mxu1 %v10406_v44 }
 0x8f8   : > { %6825 = vmatpush1.bf16.msra.mxu1 %v10404_v2  ;;  %v5079_v26 = vpop.xlane.xlu1 %5078 }
 0x8f9   : > { %6826 = vmatprep.subr.bf16.mxu1 %v10409_v41  ;;  %v5080_v10 = vrot.slane %v5079_v26, 4 }
 0x8fb   : > { %v5081_v42 = vadd.f32 %v5080_v10, %v5079_v26 }
 0x8fc   : > { %6827 = vmatpush1.bf16.msra.mxu1 %v10407_v30 }
 0x8fd   : > { %6828 = vmatprep.subr.bf16.mxu1 %v10412_v53  ;;  %v5082_v32 = vrot.slane %v5081_v42, 2 }
 0x8ff   : > { %v5083_v40 = vadd.f32 %v5082_v32, %v5081_v42  ;;  %v10442_v42 = vld [vmem:[%s14579_s11 + $0x180] sm:$0xff]  }
 0x900   : > { %6829 = vmatpush1.bf16.msra.mxu1 %v10410_v57 }
 0x901   : > { %6830 = vmatprep.subr.bf16.mxu1 %v10415_v56  ;;  %v5084_v54 = vrot.slane %v5083_v40, 1  ;;  %v10443_v56 = vld [vmem:[%s14579_s11 + $0x1c8] sm:$0xff]  }
 0x903   : > { %v5085_v51 = vadd.f32 %v5084_v54, %v5083_v40  ;;  %v10444_v54 = vld [vmem:[%s14579_s11 + $0x188] sm:$0xff]  }
 0x904   : > { %6831 = vmatpush1.bf16.msra.mxu1 %v10413_v39 }
 0x905   : > { %6832 = vmatprep.subr.bf16.mxu1 %v10418_v27  ;;  %9745 = vpush %v5085_v51  ;;  %v10445_v51 = vld [vmem:[%s14579_s11 + $0x1d0] sm:$0xff]  }
 0x906   : > { %9747 = vpush %v5221_v6 }
 0x908   : > { %6833 = vmatpush1.bf16.msra.mxu1 %v10416_v24  ;;  %v6955_v24 = vld [vmem:[#allocation2] sm:$0xff] }
 0x909   : > { %6834 = vmatprep.subr.bf16.mxu1 %v10421_v63 }
 0x90c   : > { %6835 = vmatpush1.bf16.msra.mxu1 %v10419_v8 }
 0x90d   : > { %6836 = vmatprep.subr.bf16.mxu1 %v10424_v58 }
 0x910   : > { %6837 = vmatpush1.bf16.msra.mxu1 %v10422_v15  ;;  %v6963_v15 = vld [vmem:[#allocation2 + $0x20] sm:$0x11] }
 0x911   : > { %9507 = vmatprep.subr.bf16.mxu1 %v10451_v7  ;;  %v10448_v7 = vld [vmem:[%s14579_s11 + $0x198] sm:$0xff]  }
 0x913   : > { %6839 = vmatmul.mubr.bf16.vlgmr.msra.gmra.mrb[72].mxu1 %v14129_v33  ;;  %v10472_v33 = vld [vmem:[%s14579_s11 + $0xa8] sm:$0xff]  }
 0x914   : > { %9508 = vmatpush3.bf16.msra.mxu1 %v10452_v37  ;;  %v10449_v37 = vld [vmem:[%s14579_s11 + $0x1e0] sm:$0xff]  }
 0x915   : > { %9509 = vmatprep.subr.bf16.mxu1 %v10455_v29  ;;  %v10450_v29 = vld [vmem:[%s14579_s11 + $0x1a0] sm:$0xff]  }
 0x918   : > { %9510 = vmatpush3.bf16.msra.mxu1 %v10456_v49  ;;  %v10453_v49 = vld [vmem:[%s14579_s11 + $0x1e8] sm:$0xff]  }
 0x919   : > { %9511 = vmatprep.subr.bf16.mxu1 %v10459_v50  ;;  %v10454_v50 = vld [vmem:[%s14579_s11 + $0x1a8] sm:$0xff]  }
 0x91c   : > { %9512 = vmatpush3.bf16.msra.mxu1 %v10460_v48  ;;  %v10457_v48 = vld [vmem:[%s14579_s11 + $0x1f0] sm:$0xff]  }
 0x91d   : > { %9513 = vmatprep.subr.bf16.mxu1 %v10463_v12  ;;  %v10458_v12 = vld [vmem:[%s14579_s11 + $0x1b0] sm:$0xff]  }
 0x920   : > { %9514 = vmatpush3.bf16.msra.mxu1 %v10464_v13  ;;  %v10461_v13 = vld [vmem:[%s14579_s11 + $0x1f8] sm:$0xff]  }
 0x921   : > { %9515 = vmatprep.subr.bf16.mxu1 %v10467_v55  ;;  %v10462_v55 = vld [vmem:[%s14579_s11 + $0x1b8] sm:$0xff]  }
 0x924   : > { %9516 = vmatpush3.bf16.msra.mxu1 %v10468_v43  ;;  %v10465_v43 = vld [vmem:[%s14579_s11 + $0x40] sm:$0xff]  }
 0x925   : > { %9517 = vmatprep.subr.bf16.mxu1 %v10471_v20  ;;  %v15064_v20 = vld [vmem:[#allocation6_spill] sm:$0xff] }
 0x928   : > { %9518 = vmatpush3.bf16.msra.mxu1 %v10472_v33  ;;  %v15065_v33 = vsub.s32 2, %v15064_v20 }
 0x929   : > { %9519 = vmatprep.subr.bf16.mxu1 %v10475_v11 }
 0x92a   : > { %v6870_v11 = vrot.slane %v14293_v36, %v15065_v33  ;;  %v10490_v33 = vld [vmem:[%s14579_s11 + $0x70] sm:$0xff]  }
 0x92c   : > { %9520 = vmatpush3.bf16.msra.mxu1 %v10476_v59  ;;  %v15066_v59 = vsub.s32 3, %v15064_v20 }
 0x92d   : > { %9521 = vmatprep.subr.bf16.mxu1 %v10479_v18 }
 0x92e   : > { %v6874_v18 = vrot.slane %v14293_v36, %v15066_v59  ;;  %v10466_v36 = vld [vmem:[%s14579_s11] sm:$0xff]  }
 0x92f   : > { %v10501_v59 = vld [vmem:[%s14579_s11 + $0x2e0] sm:$0xff]  }
 0x930   : > { %9522 = vmatpush3.bf16.msra.mxu1 %v10480_v16 }
 0x931   : > { %9551 = vmatprep.subr.bf16.mxu1 %v10483_v17 }
 0x936   : > { %s9746_s27 = spop %9745 }
 0x9a6   : > { %v6797_v4 = vpop.f32.mrb[68].mxu1 }
 0x9a7   : > { %v6879_v14 = vadd.f32 %v6862_v28, %v6797_v4  ;;  %v6799_v46 = vpop.f32.mrb[69].mxu1 }
 0x9a8   : > { %v6880_v45 = vadd.f32 %v6866_v1, %v6799_v46  ;;  %v6801_v52 = vpop.f32.mrb[70].mxu1 }
 0x9a9   : > { %v6887_v60 = vmax.f32 %v6879_v14, 0.0  ;;  %v6883_v44 = vadd.f32 %v6862_v28, %v6801_v52  ;;  %v6803_v38 = vpop.f32.mrb[71].mxu1 }
 0x9aa   : > { %v6888_v2 = vmax.f32 %v6880_v45, 0.0  ;;  %v6884_v41 = vadd.f32 %v6866_v1, %v6803_v38 }
 0x9ab   : > { %v6891_v22 = vmax.f32 %v6883_v44, 0.0 }
 0x9ac   : > { %v9367_v30 = vpack.c.bf16 %v6888_v2, %v6887_v60  ;;  %v6892_v53 = vmax.f32 %v6884_v41, 0.0 }
 0x9ad   : > { %v6895_v3 = vpack.c.bf16 %v6891_v22, %v6887_v60 }
 0x9ae   : > { %v6916_v26 = vshrl.u32 %v9367_v30, 16  ;;  %v6896_v10 = vpack.c.bf16 %v6892_v53, %v6888_v2  ;;  %v9369_v57 = vpack.c.bf16 %v6892_v53, %v6891_v22  ;;  %v6919_v32 = vshll.u32 %v9367_v30, 16  ;;  %v10469_v30 = vld [vmem:[%s14579_s11 + $0x48] sm:$0xff]  }
 0x9b0   : > { %v6918_v5 = vrot.slane %v6916_v26, 7  ;;  %v6931_v39 = vshrl.u32 %v9369_v57, 16  ;;  %7330 = vmatprep.mubr.bf16.mxu0 %v6896_v10  ;;  %v6934_v35 = vshll.u32 %v9369_v57, 16 }
 0x9b1   : > { %7331 = vmatmul.mubr.bf16.vlgmr.msra.gmra.mrb[8].mxu0 %v6895_v3 }
 0x9b2   : > { %v6921_v40 = vor.u32 %v6919_v32, %v6918_v5  ;;  %v6933_v27 = vrot.slane %v6931_v39, 7  ;;  %9464 = vmatpush3.bf16.msra.mxu0 %v10442_v42  ;;  %v6929_v63 = vrot.slane %v6918_v5, 4  ;;  %v6958_v5 = vld [vmem:[#allocation2 + $0x8] sm:$0xff]  ;;  %v10473_v32 = vld [vmem:[%s14579_s11 + $0x50] sm:$0xff]  }
 0x9b3   : > { %9465 = vmatprep.subr.bf16.mxu0 %v10443_v56  ;;  %v10470_v56 = vld [vmem:[%s14579_s11 + $0x8] sm:$0xff]  }
 0x9b4   : > { %v14313_v6 = vsel %vm11192_vm6, %v6921_v40, %v6955_v24  ;;  %v6936_v8 = vor.u32 %v6934_v35, %v6933_v27  ;;  %v6947_v58 = vrot.slane %v6933_v27, 4 }
 0x9b5   : > { %6957 = vst [vmem:[#allocation2] sm:$0xff] %v14313_v6 }
 0x9b6   : > { %v14318_v47 = vsel %vm10913_vm14, %v6929_v63, %v6936_v8  ;;  %v6964_v0 = vsel %vm10872_vm7, %v6947_v58, %v6963_v15  ;;  %9466 = vmatpush3.bf16.msra.mxu0 %v10444_v54  ;;  %v6966_v54 = vld [vmem:[#allocation2 + $0x28] sm:$0x11]  ;;  %v10474_v63 = vld [vmem:[%s14579_s11 + $0x10] sm:$0xff]   ;;  %v10478_v15 = vld [vmem:[%s14579_s11 + $0x18] sm:$0xff]  }
 0x9b7   : > { %6961 = vst [vmem:[#allocation2 + $0x10] sm:$0xff] %v14318_v47  ;;  %6965 = vst [vmem:[#allocation2 + $0x20] sm:$0x11] %v6964_v0  ;;  %9467 = vmatprep.subr.bf16.mxu0 %v10445_v51  ;;  %v9212_v9 = vcombine.low %v14313_v6, %v14318_v47  ;;  %v9213_v31 = vcombine.high %v14313_v6, %v14318_v47  ;;  %v10488_v58 = vld [vmem:[%s14579_s11 + $0x2c8] sm:$0xff]   ;;  %v10481_v0 = vld [vmem:[%s14579_s11 + $0x60] sm:$0xff]  }
 0x9b8   : > { %v10514_v6 = vld [vmem:[%s14579_s11 + $0x2b8] sm:$0xff]  }
 0x9ba   : > { %9468 = vmatpush3.bf16.msra.mxu0 %v10446_v21  ;;  %v10489_v21 = vld [vmem:[%s14579_s11 + $0x288] sm:$0xff]  }
 0x9bb   : > { %9469 = vmatprep.subr.bf16.mxu0 %v10447_v23 }
 0x9be   : > { %9470 = vmatpush3.bf16.msra.mxu0 %v10448_v7 }
 0x9bf   : > { %9471 = vmatprep.subr.bf16.mxu0 %v10449_v37  ;;  %v10482_v37 = vld [vmem:[%s14579_s11 + $0x20] sm:$0xff]  }
 0x9c2   : > { %9472 = vmatpush3.bf16.msra.mxu0 %v10450_v29 }
 0x9c3   : > { %9473 = vmatprep.subr.bf16.mxu0 %v10453_v49  ;;  %v10485_v49 = vld [vmem:[%s14579_s11 + $0x68] sm:$0xff]  }
 0x9c6   : > { %9474 = vmatpush3.bf16.msra.mxu0 %v10454_v50 }
 0x9c7   : > { %9475 = vmatprep.subr.bf16.mxu0 %v10457_v48  ;;  %v10493_v48 = vld [vmem:[%s14579_s11 + $0x290] sm:$0xff]  }
 0x9ca   : > { %9476 = vmatpush3.bf16.msra.mxu0 %v10458_v12  ;;  %v10496_v12 = vld [vmem:[%s14579_s11 + $0x2d8] sm:$0xff]  }
 0x9cb   : > { %9477 = vmatprep.subr.bf16.mxu0 %v10461_v13 }
 0x9ce   : > { %9478 = vmatpush3.bf16.msra.mxu0 %v10462_v55 }
 0x9cf   : > { %9485 = vmatprep.subr.bf16.mxu0 %v10465_v43  ;;  %v10487_v43 = vld [vmem:[%s14579_s11 + $0x28] sm:$0xff]  }
 0x9e6   : > { %v6840_v16 = vpop.f32.mrb[72].mxu1 }
 0x9e7   : > { %v6881_v17 = vadd.f32 %v6870_v11, %v6840_v16  ;;  %v6842_v62 = vpop.f32.mrb[73].mxu1  ;;  %v14447_v16 = vld [vmem:[#allocation2 + $0x20] sm:$0x11] }
 0x9e8   : > { %v6882_v28 = vadd.f32 %v6874_v18, %v6842_v62  ;;  %v6844_v61 = vpop.f32.mrb[74].mxu1  ;;  %v10502_v62 = vld [vmem:[%s14579_s11 + $0x2a0] sm:$0xff]  }
 0x9e9   : > { %v6889_v1 = vmax.f32 %v6881_v17, 0.0  ;;  %v6885_v4 = vadd.f32 %v6870_v11, %v6844_v61  ;;  %v6846_v14 = vpop.f32.mrb[75].mxu1  ;;  %v10497_v11 = vld [vmem:[%s14579_s11 + $0x298] sm:$0xff]   ;;  %v10505_v61 = vld [vmem:[%s14579_s11 + $0x2e8] sm:$0xff]  }
 0x9ea   : > { %v6890_v46 = vmax.f32 %v6882_v28, 0.0  ;;  %v6886_v45 = vadd.f32 %v6874_v18, %v6846_v14  ;;  %v10491_v18 = vld [vmem:[%s14579_s11 + $0x30] sm:$0xff]   ;;  %v10494_v17 = vld [vmem:[%s14579_s11 + $0x78] sm:$0xff]   ;;  %v14455_v28 = vld [vmem:[#allocation2] sm:$0xee] }
 0x9eb   : > { %v6893_v52 = vmax.f32 %v6885_v4, 0.0  ;;  %v10495_v4 = vld [vmem:[%s14579_s11 + $0x38] sm:$0xff]   ;;  %v10498_v14 = vld [vmem:[%s14579_s11 + $0x240] sm:$0xff]  }
 0x9ec   : > { %v9368_v60 = vpack.c.bf16 %v6890_v46, %v6889_v1  ;;  %v6894_v44 = vmax.f32 %v6886_v45, 0.0  ;;  %v10506_v45 = vld [vmem:[%s14579_s11 + $0x2a8] sm:$0xff]  }
 0x9ed   : > { %v6897_v38 = vpack.c.bf16 %v6893_v52, %v6889_v1  ;;  %v9317_v1 = vcombine.high %v14447_v16, %v14447_v16 }
 0x9ee   : > { %v6923_v2 = vshrl.u32 %v9368_v60, 16  ;;  %v6898_v41 = vpack.c.bf16 %v6894_v44, %v6890_v46  ;;  %v9370_v22 = vpack.c.bf16 %v6894_v44, %v6893_v52  ;;  %v6926_v3 = vshll.u32 %v9368_v60, 16  ;;  %v10509_v52 = vld [vmem:[%s14579_s11 + $0x2f0] sm:$0xff]   ;;  %v10499_v44 = vld [vmem:[%s14579_s11 + $0x200] sm:$0xff]  }
 0x9ef   : > { %v9313_v46 = vcombine.high %v14455_v28, %v14318_v47  ;;  %v7763_v60 = vrot.slane %v9317_v1, 1 }
 0x9f0   : > { %v6925_v53 = vrot.slane %v6923_v2, 7  ;;  %v6940_v26 = vshrl.u32 %v9370_v22, 16  ;;  %7371 = vmatprep.mubr.bf16.mxu0 %v6898_v41  ;;  %v6943_v42 = vshll.u32 %v9370_v22, 16  ;;  %v10503_v2 = vld [vmem:[%s14579_s11 + $0x248] sm:$0xff]   ;;  %v10510_v41 = vld [vmem:[%s14579_s11 + $0x2b0] sm:$0xff]   ;;  %v10513_v22 = vld [vmem:[%s14579_s11 + $0x2f8] sm:$0xff]  }
 0x9f1   : > { %7372 = vmatmul.mubr.bf16.vlgmr.msra.gmra.mrb[12].mxu0 %v6897_v38  ;;  %v7762_v38 = vrot.slane %v9313_v46, 1 }
 0x9f2   : > { %v6928_v10 = vor.u32 %v6926_v3, %v6925_v53  ;;  %v6942_v57 = vrot.slane %v6940_v26, 7  ;;  %9486 = vmatpush3.bf16.msra.mxu0 %v10466_v36  ;;  %7624 = vmatprep.mubr.bf16.mxu0 %v9213_v31  ;;  %v6938_v39 = vrot.slane %v6925_v53, 4  ;;  %v10492_v31 = vld [vmem:[%s14579_s11 + $0x2d0] sm:$0xff]   ;;  %v10504_v53 = vld [vmem:[%s14579_s11 + $0x208] sm:$0xff]  }
 0x9f3   : > { %9487 = vmatprep.subr.bf16.mxu0 %v10469_v30  ;;  %v7764_v36 = vsel %vm1027_vm2, %v7762_v38, %v7763_v60  ;;  %v10507_v3 = vld [vmem:[%s14579_s11 + $0x250] sm:$0xff]  }
 0x9f4   : > { %v6959_v40 = vsel %vm11192_vm6, %v6928_v10, %v6958_v5  ;;  %v6945_v27 = vor.u32 %v6943_v42, %v6942_v57  ;;  %v6948_v35 = vrot.slane %v6942_v57, 4  ;;  %v10508_v10 = vld [vmem:[%s14579_s11 + $0x210] sm:$0xff]   ;;  %v10511_v57 = vld [vmem:[%s14579_s11 + $0x258] sm:$0xff]  }
 0x9f5   : > { %6960 = vst [vmem:[#allocation2 + $0x8] sm:$0xff] %v6959_v40  ;;  %v10512_v5 = vld [vmem:[%s14579_s11 + $0x218] sm:$0xff]  }
 0x9f6   : > { %v14385_v24 = vsel %vm10913_vm14, %v6938_v39, %v6945_v27  ;;  %v6967_v51 = vsel %vm10872_vm7, %v6948_v35, %v6966_v54  ;;  %9488 = vmatpush3.bf16.msra.mxu0 %v10470_v56  ;;  %v10516_v39 = vld [vmem:[%s14579_s11 + $0x220] sm:$0xff]   ;;  %v10519_v27 = vld [vmem:[%s14579_s11 + $0x228] sm:$0xff]   ;;  %v10520_v35 = vld [vmem:[%s14579_s11 + $0x270] sm:$0xff]   ;;  %vm8089_vm7 = vcmask 7168   ;;  %vm8091_vm14 = vcmask 15360  }
 0x9f7   : > { %6968 = vst [vmem:[#allocation2 + $0x28] sm:$0x11] %v6967_v51  ;;  %9489 = vmatprep.subr.bf16.mxu0 %v10473_v32  ;;  %v9214_v8 = vcombine.low %v6959_v40, %v14385_v24  ;;  %v9215_v19 = vcombine.high %v6959_v40, %v14385_v24  ;;  %v10515_v32 = vld [vmem:[%s14579_s11 + $0x260] sm:$0xff]   ;;  %v10518_v40 = vld [vmem:[%s14579_s11 + $0x268] sm:$0xff]   ;;  %v10521_v54 = vld [vmem:[%s14579_s11 + $0x230] sm:$0xff]   ;;  %v9316_v51 = vcombine.low %v14447_v16, %v14447_v16 }
 0x9f9   : > { %7665 = vmatprep.mubr.bf16.mxu1 %v9215_v19 }
 0x9fa   : > { %9490 = vmatpush3.bf16.msra.mxu0 %v10474_v63  ;;  %7666 = vmatmul.mubr.bf16.vlgmr.msra.gmra.mrb[76].mxu1 %v9214_v8  ;;  %v10523_v63 = vld [vmem:[%s14579_s11 + $0x238] sm:$0xff]   ;;  %v7760_v8 = vrot.slane %v9316_v51, 1 }
 0x9fb   : > { %9491 = vmatprep.subr.bf16.mxu0 %v10477_v25  ;;  %9552 = vmatpush3.bf16.msra.mxu1 %v10484_v34  ;;  %v9312_v25 = vcombine.low %v14455_v28, %v14318_v47 }
 0x9fc   : > { %v14412_v23 = vld [vmem:[#allocation2 + $0x8] sm:$0xee]  ;;  %9553 = vmatprep.subr.bf16.mxu1 %v10488_v58 }
 0x9fd   : > { %v9315_v7 = vcombine.high %v14412_v23, %v14385_v24  ;;  %v7759_v19 = vrot.slane %v9312_v25, 1 }
 0x9fe   : > { %9492 = vmatpush3.bf16.msra.mxu0 %v10478_v15  ;;  %v6976_v29 = vld [vmem:[#allocation2 + $0x28] sm:$0x11] }
 0x9ff   : > { %9493 = vmatprep.subr.bf16.mxu0 %v10481_v0  ;;  %v9319_v50 = vcombine.high %v6976_v29, %v6976_v29  ;;  %9554 = vmatpush3.bf16.msra.mxu1 %v10489_v21  ;;  %v7768_v13 = vrot.slane %v9315_v7, 1  ;;  %v9318_v30 = vcombine.low %v6976_v29, %v6976_v29  ;;  %v7761_v34 = vsel %vm1027_vm2, %v7759_v19, %v7760_v8 }
 0xa00   : > { %9555 = vmatprep.subr.bf16.mxu1 %v10492_v31 }
 0xa01   : > { %v7769_v55 = vrot.slane %v9319_v50, 1  ;;  %v7766_v26 = vrot.slane %v9318_v30, 1 }
 0xa02   : > { %9494 = vmatpush3.bf16.msra.mxu0 %v10482_v37 }
 0xa03   : > { %9495 = vmatprep.subr.bf16.mxu0 %v10485_v49  ;;  %v7770_v20 = vsel %vm1027_vm2, %v7768_v13, %v7769_v55  ;;  %9556 = vmatpush3.bf16.msra.mxu1 %v10493_v48 }
 0xa04   : > { %8040 = vmatprep.mubr.bf16.mxu1 %v7770_v20  ;;  %9557 = vmatprep.subr.bf16.mxu1 %v10496_v12 }
 0xa06   : > { %9496 = vmatpush3.bf16.msra.mxu0 %v10487_v43 }
 0xa07   : > { %9497 = vmatprep.subr.bf16.mxu0 %v10490_v33  ;;  %9558 = vmatpush3.bf16.msra.mxu1 %v10497_v11 }
 0xa08   : > { %9559 = vmatprep.subr.bf16.mxu1 %v10501_v59 }
 0xa0a   : > { %9498 = vmatpush3.bf16.msra.mxu0 %v10491_v18 }
 0xa0b   : > { %9499 = vmatprep.subr.bf16.mxu0 %v10494_v17  ;;  %9560 = vmatpush3.bf16.msra.mxu1 %v10502_v62 }
 0xa0c   : > { %9561 = vmatprep.subr.bf16.mxu1 %v10505_v61 }
 0xa0e   : > { %9500 = vmatpush3.bf16.msra.mxu0 %v10495_v4 }
 0xa0f   : > { %9529 = vmatprep.subr.bf16.mxu0 %v10498_v14  ;;  %9562 = vmatpush3.bf16.msra.mxu1 %v10506_v45 }
 0xa10   : > { %9563 = vmatprep.subr.bf16.mxu1 %v10509_v52 }
 0xa11   : > { %7625 = vmatmul.mubr.bf16.vlgmr.msra.gmra.mrb[16].mxu0 %v9212_v9  ;;  %v9314_v9 = vcombine.low %v14412_v23, %v14385_v24  ;;  %v10522_v24 = vld [vmem:[%s14579_s11 + $0x278] sm:$0xff]  }
 0xa12   : > { %9530 = vmatpush3.bf16.msra.mxu0 %v10499_v44  ;;  %7999 = vmatprep.mubr.bf16.mxu0 %v7764_v36 }
 0xa13   : > { %9531 = vmatprep.subr.bf16.mxu0 %v10503_v2  ;;  %9564 = vmatpush3.bf16.msra.mxu1 %v10510_v41  ;;  %v7765_v42 = vrot.slane %v9314_v9, 1 }
 0xa14   : > { %9565 = vmatprep.subr.bf16.mxu1 %v10513_v22 }
 0xa15   : > { %v7767_v56 = vsel %vm1027_vm2, %v7765_v42, %v7766_v26 }
 0xa16   : > { %9532 = vmatpush3.bf16.msra.mxu0 %v10504_v53 }
 0xa17   : > { %9533 = vmatprep.subr.bf16.mxu0 %v10507_v3  ;;  %9566 = vmatpush3.bf16.msra.mxu1 %v10514_v6  ;;  %v9352_v6 = vld [vmem:[%s14580_s12] ss:$0 sm:$0xff] }
 0xa1a   : > { %9534 = vmatpush3.bf16.msra.mxu0 %v10508_v10  ;;  %8041 = vmatmul.mubr.bf16.vlgmr.msra.gmra.mrb[80].mxu1 %v7767_v56  ;;  %v10721_v56 = vld [vmem:[%s10861_s26] sm:$0xff] }
 0xa1b   : > { %9535 = vmatprep.subr.bf16.mxu0 %v10511_v57 }
 0xa1e   : > { %9536 = vmatpush3.bf16.msra.mxu0 %v10512_v5 }
 0xa1f   : > { %9537 = vmatprep.subr.bf16.mxu0 %v10515_v32  ;;  %v10722_v32 = vld [vmem:[%s10861_s26 + $0x8] sm:$0xff]  ;;  %s9748_s26 = spop %9747 }
 0xa20   : > { %s5223_s29 = smul.f32 %s9748_s26, %s12025_s18 }
 0xa22   : > { %9538 = vmatpush3.bf16.msra.mxu0 %v10516_v39 }
 0xa23   : > { %9539 = vmatprep.subr.bf16.mxu0 %v10518_v40 }
 0xa26   : > { %9540 = vmatpush3.bf16.msra.mxu0 %v10519_v27 }
 0xa27   : > { %9541 = vmatprep.subr.bf16.mxu0 %v10520_v35 }
 0xa2a   : > { %9542 = vmatpush3.bf16.msra.mxu0 %v10521_v54 }
 0xa2b   : > { %9543 = vmatprep.subr.bf16.mxu0 %v10522_v24 }
 0xa2e   : > { %9544 = vmatpush3.bf16.msra.mxu0 %v10523_v63 }
 0xa31   : > { %8000 = vmatmul.mubr.bf16.vlgmr.msra.gmra.mrb[20].mxu0 %v7761_v34 }
 0xa84   : > { %v9457_v58 = vpop.f32.mrb[8].mxu0 }
 0xa85   : > { %v9458_v15 = vpop.f32.mrb[9].mxu0 }
 0xa86   : > { %v9459_v0 = vadd.f32 %v9458_v15, %v9457_v58  ;;  %v9460_v21 = vpop.f32.mrb[10].mxu0  ;;  %v8087_v15 = vstv %s9746_s27 }
 0xa87   : > { %v9461_v23 = vpop.f32.mrb[11].mxu0 }
 0xa88   : > { %v9462_v31 = vadd.f32 %v9461_v23, %v9460_v21  ;;  %v8088_v21 = vstv %s5223_s29 }
 0xac4   : > { %v9479_v7 = vpop.f32.mrb[12].mxu0 }
 0xac5   : > { %v9480_v37 = vpop.f32.mrb[13].mxu0 }
 0xac6   : > { %v9481_v29 = vadd.f32 %v9480_v37, %v9479_v7  ;;  %v9482_v49 = vpop.f32.mrb[14].mxu0  ;;  %v15068_v7 = vld [vmem:[#allocation97_spill] sm:$0xff] }
 0xac7   : > { %v9483_v50 = vpop.f32.mrb[15].mxu0  ;;  %v4977_v37 = vrot.slane %v15068_v7, 4 }
 0xac8   : > { %v7374_v48 = vadd.f32 %v9481_v29, %v9459_v0  ;;  %v9484_v47 = vadd.f32 %v9483_v50, %v9482_v49 }
 0xac9   : > { %v4978_v29 = vadd.f32 %v4977_v37, %v15068_v7 }
 0xaca   : > { %v7377_v12 = vadd.f32 %v9484_v47, %v9462_v31 }
 0xacb   : > { %v4979_v49 = vrot.slane %v4978_v29, 2 }
 0xacd   : > { %v9523_v13 = vpop.f32.mrb[76].mxu1  ;;  %v4980_v50 = vadd.f32 %v4979_v49, %v4978_v29 }
 0xace   : > { %v9524_v55 = vpop.f32.mrb[77].mxu1 }
 0xacf   : > { %v9525_v43 = vadd.f32 %v9524_v55, %v9523_v13  ;;  %v9526_v20 = vpop.f32.mrb[78].mxu1 }
 0xad0   : > { %v9527_v33 = vpop.f32.mrb[79].mxu1 }
 0xad1   : > { %v9528_v11 = vadd.f32 %v9527_v33, %v9526_v20 }
 0xae4   : > { %v9501_v59 = vpop.f32.mrb[16].mxu0 }
 0xae5   : > { %v9502_v18 = vpop.f32.mrb[17].mxu0 }
 0xae6   : > { %v9503_v16 = vadd.f32 %v9502_v18, %v9501_v59  ;;  %v9504_v17 = vpop.f32.mrb[18].mxu0 }
 0xae7   : > { %v9505_v62 = vpop.f32.mrb[19].mxu0 }
 0xae8   : > { %v7627_v28 = vadd.f32 %v9503_v16, %v7374_v48  ;;  %v9506_v61 = vadd.f32 %v9505_v62, %v9504_v17  ;;  %v4981_v48 = vrot.slane %v4980_v50, 1 }
 0xaea   : > { %v7668_v1 = vadd.f32 %v9525_v43, %v7627_v28  ;;  %v7630_v4 = vadd.f32 %v9506_v61, %v7377_v12  ;;  %v4982_v47 = vadd.f32 %v4981_v48, %v4980_v50 }
 0xaec   : > { %v7671_v14 = vadd.f32 %v9528_v11, %v7630_v4 }
 0xaed   : > { %v9567_v46 = vpop.f32.mrb[80].mxu1 }
 0xaee   : > { %v9568_v45 = vpop.f32.mrb[81].mxu1 }
 0xaef   : > { %v9569_v52 = vadd.f32 %v9568_v45, %v9567_v46  ;;  %v9570_v60 = vpop.f32.mrb[82].mxu1 }
 0xaf0   : > { %v9571_v44 = vpop.f32.mrb[83].mxu1 }
 0xaf1   : > { %v9572_v38 = vadd.f32 %v9571_v44, %v9570_v60 }
 0xb04   : > { %v9545_v2 = vpop.f32.mrb[20].mxu0 }
 0xb05   : > { %v9546_v41 = vpop.f32.mrb[21].mxu0 }
 0xb06   : > { %v9547_v22 = vadd.f32 %v9546_v41, %v9545_v2  ;;  %v9548_v36 = vpop.f32.mrb[22].mxu0 }
 0xb07   : > { %v9549_v30 = vpop.f32.mrb[23].mxu0 }
 0xb08   : > { %v8043_v53 = vadd.f32 %v9569_v52, %v9547_v22  ;;  %v9550_v3 = vadd.f32 %v9549_v30, %v9548_v36 }
 0xb0a   : > { %v8049_v9 = vadd.f32 %v8043_v53, %v7668_v1  ;;  %v8046_v26 = vadd.f32 %v9572_v38, %v9550_v3 }
 0xb0c   : > { %v8058_v10 = vadd.f32 %v9352_v6, %v8049_v9  ;;  %v8050_v57 = vadd.f32 %v8046_v26, %v7671_v14 }
 0xb0e   : > { %8084 = vst.msk [vmem:[%s552_s21] sm:$0xff] %vm740_vm1, %v8058_v10  ;;  %v8059_v42 = vadd.f32 %v9352_v6, %v8050_v57  ;;  %v8060_v5 = vsub.f32 %v8058_v10, %v10721_v56 }
 0xb10   : > { %8085 = vst.msk [vmem:[%s552_s21 + $0x8] sm:$0xff] %vm740_vm1, %v8059_v42  ;;  %v8061_v39 = vsub.f32 %v8059_v42, %v10722_v32  ;;  %v8062_v40 = vmul.f32 %v8060_v5, %v8060_v5 }
 0xb12   : > { %v8063_v27 = vmul.f32 %v8061_v39, %v8061_v39  ;;  %v8064_v35 = vsel %vm740_vm1, %v8062_v40, 0.0 }
 0xb14   : > { %v8065_v54 = vsel %vm740_vm1, %v8063_v27, 0.0  ;;  %vm8098_vm1 = vcmask 285696  }
 0xb15   : > { %v8066_v24 = vadd.f32 %v8065_v54, %v8064_v35 }
 0xb17   : > { %8067 = vadd.xlane.f32.xlu1 %v8066_v24 }
 0xba4   : > { %v8068_v51 = vpop.xlane.xlu1 %8067 }
 0xba5   : > { %v8069_v63 = vrot.slane %v8068_v51, 4 }
 0xba7   : > { %v8070_v25 = vadd.f32 %v8069_v63, %v8068_v51 }
 0xba9   : > { %v8071_v8 = vrot.slane %v8070_v25, 2 }
 0xbab   : > { %v8072_v19 = vadd.f32 %v8071_v8, %v8070_v25 }
 0xbad   : > { %v8073_v34 = vrot.slane %v8072_v19, 1 }
 0xbaf   : > { %v8074_v58 = vadd.f32 %v8073_v34, %v8072_v19 }
 0xbb1   : > { %9749 = vpush %v8074_v58 }
 0xbe2   : > { %s9750_s30 = spop %9749 }
 0xbe3   : > { %v8086_v0 = vstv %s9750_s30 }
 0xbe4   : > { %v8090_v23 = vsel %vm8089_vm7, %v8086_v0, %v8087_v15 }
 0xbe5   : > { %v8092_v31 = vsel %vm8091_vm14, %v8090_v23, %v8088_v21 }
 0xbe6   : > { %8094 = vrot.lane.b32.xlu0 %v8092_v31, %s14894_s22 }
 0xc58   : > { %v8095_v12 = vpop.permute.xlu0 %8094 }
 0xc59   : > { %v8097_v13 = vsel %vm3498_vm11, %v4982_v47, %v8095_v12 }
 0xc5a   : > { %v8099_v55 = vsel %vm8098_vm1, %v8097_v13, 0.0 }
 0xc5b   : > { %8100 = vst [vmem:[%s555_s23] sm:$0x1] %v8099_v55 }
 0xc5c PF: > { %s28_s24 = sadd.s32 1, %s10729_s24  }
 0xc5d   : > { %p25_p4 = scmp.ge.s32.totalorder %s28_s24, 4  }
 0xc5f   :  { %27 = sbr.rel (!%p25_p4) target bundleno = 9 (0x9), region = 146 }

</bundles_post_ra>
